<compile_context>
chip_gen: v7x
topology: tpu7x:2x2x1
jax: 0.10.0
libtpu: 0.0.40
codegen_flags: <defaults>
</compile_context>

<pallas_src>
import math

import jax
import jax.numpy as jnp
from jax.experimental import pallas as pl
from jax.experimental.pallas import tpu as pltpu


# ----------------------------- Pallas kernel --------------------------------
def make_bilstm_kernel(num_layers, T, B, H):
    """Build a fused BiLSTM-stack kernel for static (num_layers, T, B, H)."""
    G4 = 4 * H

    def kernel(x_ref, *rest):
        # rest = 4*num_layers weight refs, then out_ref, then seq scratch.
        w_refs = rest[:4 * num_layers]
        out_ref = rest[4 * num_layers]           # (B, 2H)   f32
        seq_ref = rest[4 * num_layers + 1]       # (T*B, 2H) bf16 scratch

        def cell(h_prev, c_prev, gx_t, whh):
            # h_prev/c_prev: (B,H) f32; gx_t: (B,4H) f32; whh: (H,4H) bf16
            gates = jnp.dot(h_prev.astype(jnp.bfloat16), whh,
                            preferred_element_type=jnp.float32) + gx_t
            sig = jax.nn.sigmoid(gates[:, :3 * H])        # (i, f, o) at once
            i_g = sig[:, 0 * H:1 * H]
            f_g = sig[:, 1 * H:2 * H]
            o_g = sig[:, 2 * H:3 * H]
            g_g = jnp.tanh(gates[:, 3 * H:4 * H])
            c_new = f_g * c_prev + i_g * g_g
            h_new = o_g * jnp.tanh(c_new)
            return h_new, c_new

        # Time-major rows: row t*B + b holds timestep t, batch b.  bf16 in.
        layer_in = x_ref[...]                             # (T*B, D_in) bf16

        for l in range(num_layers):
            wih, bias, whh_f, whh_b = (r[...] for r in w_refs[4 * l:4 * l + 4])

            # Fused input projection for BOTH directions: one MXU matmul.
            gx = jnp.dot(layer_in, wih,
                         preferred_element_type=jnp.float32) + bias  # (T*B,8H)
            gx_f = gx[:, :G4]
            gx_b = gx[:, G4:]

            h_f = jnp.zeros((B, H), jnp.float32)
            c_f = jnp.zeros((B, H), jnp.float32)
            h_b = jnp.zeros((B, H), jnp.float32)
            c_b = jnp.zeros((B, H), jnp.float32)

            if l == num_layers - 1:
                # Only out[:, -1, :] is needed:
                #   fwd half = forward hidden after the full T-step chain,
                #   bwd half = backward hidden after just ONE step (t = T-1,
                #              which is the first step of the reversed chain
                #              starting from zero state).
                h_b, c_b = cell(h_b, c_b, gx_b[(T - 1) * B:T * B, :], whh_b)
                for t in range(T):
                    h_f, c_f = cell(h_f, c_f, gx_f[t * B:(t + 1) * B, :],
                                    whh_f)
                out_ref[:, 0:H] = h_f
                out_ref[:, H:2 * H] = h_b
            else:
                for t in range(T):
                    # forward direction, time t
                    h_f, c_f = cell(h_f, c_f, gx_f[t * B:(t + 1) * B, :],
                                    whh_f)
                    seq_ref[t * B:(t + 1) * B, 0:H] = h_f.astype(jnp.bfloat16)
                    # backward direction, time tb = T-1-t
                    tb = T - 1 - t
                    h_b, c_b = cell(h_b, c_b, gx_b[tb * B:(tb + 1) * B, :],
                                    whh_b)
                    seq_ref[tb * B:(tb + 1) * B, H:2 * H] = \
                        h_b.astype(jnp.bfloat16)
                layer_in = seq_ref[...]                  # (T*B, 2H) bf16

    return kernel


def bilstm_forward(x, params):
    """Forward pass matching BiLSTMModel.forward.

    x: (B, 1, T, D) -> squeeze(axis=1) -> (B, T, D); returns out[:, -1, :]
    of shape (B, 2H).
    params: per-layer tuples (wih, b, whh_f, whh_b) with
            wih: (D_in, 8H) bf16 (fwd gates | bwd gates, each (i,f,o,g)),
            b:   (1, 8H) f32 (b_ih + b_hh, both directions),
            whh: (H, 4H) bf16 per direction.
    """
    x = jnp.squeeze(x, axis=1)                    # (B, T, D); axis=1 only!
    B, T, D = x.shape
    num_layers = len(params)
    H = params[0][2].shape[0]

    # Time-major 2-D slab: row t*B + b holds x[b, t, :]. (Tiny XLA transpose.)
    x_tb = jnp.transpose(x, (1, 0, 2)).reshape(T * B, D).astype(jnp.bfloat16)

    flat_w = [w for layer in params for w in layer]
    kernel = make_bilstm_kernel(num_layers, T, B, H)

    return pl.pallas_call(
        kernel,
        out_shape=jax.ShapeDtypeStruct((B, 2 * H), jnp.float32),
        in_specs=[pl.BlockSpec(memory_space=pltpu.MemorySpace.VMEM)]
        * (1 + len(flat_w)),
        out_specs=pl.BlockSpec(memory_space=pltpu.MemorySpace.VMEM),
        scratch_shapes=[pltpu.VMEM((T * B, 2 * H), jnp.bfloat16)],
    )(x_tb, *flat_w)


# ------------------------------ Params ---------------------------------------
def init_params(key, input_size, hidden_size, num_layers):
    """PyTorch-style init U(-1/sqrt(H), 1/sqrt(H)).

    Gate columns are laid out (i, f, o, g) per direction (a permutation of
    nn.LSTM's (i, f, g, o)); since weights are randomly initialized this is
    equivalent, and it lets the kernel run one sigmoid over a contiguous
    (B, 3H) block.  Input weights/biases of the two directions are
    concatenated along the gate axis so the kernel does ONE input projection
    per layer.  Weights are stored transposed (for x @ W) and cast to bf16;
    biases combined (b_ih + b_hh) and kept f32.
    """
    k = 1.0 / math.sqrt(hidden_size)
    H = hidden_size
    G = 4 * H
    params = []
    for layer in range(num_layers):
        d_in = input_size if layer == 0 else 2 * H
        wih_cols, b_cols, whhs = [], [], []
        for _direction in range(2):
            key, k1, k2, k3, k4 = jax.random.split(key, 5)
            w_ih = jax.random.uniform(k1, (G, d_in), jnp.float32, -k, k)
            w_hh = jax.random.uniform(k2, (G, H), jnp.float32, -k, k)
            b_ih = jax.random.uniform(k3, (G,), jnp.float32, -k, k)
            b_hh = jax.random.uniform(k4, (G,), jnp.float32, -k, k)
            wih_cols.append(w_ih.T)                               # (d_in, 4H)
            b_cols.append(b_ih + b_hh)                            # (4H,)
            whhs.append(jnp.asarray(w_hh.T, jnp.bfloat16))        # (H, 4H)
        wih = jnp.concatenate(wih_cols, axis=1).astype(jnp.bfloat16)  # (d_in,8H)
        b = jnp.concatenate(b_cols)[None, :].astype(jnp.float32)      # (1, 8H)
        params.append((wih, b, whhs[0], whhs[1]))
    return params


# --------------------------- Pure-JAX reference ------------------------------
def _ref_layer_dir(x_2d, w_ih, w_hh, b, T, B, H, reverse):
    """Same math/precision as the kernel: bf16 matmul operands, f32 accum."""
    gx = jnp.dot(x_2d.astype(jnp.bfloat16), w_ih,
                 preferred_element_type=jnp.float32) + b          # (T*B, 4H)
    gx = gx.reshape(T, B, 4 * H)
    if reverse:
        gx = gx[::-1]

    def step(carry, gx_t):
        h, c = carry
        gates = jnp.dot(h.astype(jnp.bfloat16), w_hh,
                        preferred_element_type=jnp.float32) + gx_t
        i = jax.nn.sigmoid(gates[:, 0 * H:1 * H])
        f = jax.nn.sigmoid(gates[:, 1 * H:2 * H])
        o = jax.nn.sigmoid(gates[:, 2 * H:3 * H])
        g = jnp.tanh(gates[:, 3 * H:4 * H])
        c = f * c + i * g
        h = o * jnp.tanh(c)
        return (h, c), h

    init = (jnp.zeros((B, H), jnp.float32), jnp.zeros((B, H), jnp.float32))
    _, hs = jax.lax.scan(step, init, gx)
    if reverse:
        hs = hs[::-1]
    return hs                                                     # (T, B, H)


def ref_forward(x, params, hidden_size):
    x = jnp.squeeze(x, axis=1)
    B, T, D = x.shape
    H = hidden_size
    G4 = 4 * H
    x_tb = jnp.transpose(x, (1, 0, 2)).reshape(T * B, D)
    seq = None
    for (wih, b, whh_f, whh_b) in params:
        h_f = _ref_layer_dir(x_tb, wih[:, :G4], whh_f, b[:, :G4],
                             T, B, H, reverse=False)
        h_b = _ref_layer_dir(x_tb, wih[:, G4:], whh_b, b[:, G4:],
                             T, B, H, reverse=True)
        seq = jnp.concatenate([h_f, h_b], axis=-1)                # (T, B, 2H)
        # Inter-layer activations travel as bf16 in the kernel.
        x_tb = seq.reshape(T * B, 2 * H).astype(jnp.bfloat16)
    return seq[-1]                                                # (B, 2H)


# --------------------------------- Main ---------------------------------------
if __name__ == "__main__":
    B, T = 8, 8
    INPUT_SIZE, HIDDEN_SIZE, NUM_LAYERS = 128, 128, 2   # small, module-consistent

    key = jax.random.PRNGKey(0)
    key, xk, pk = jax.random.split(key, 3)
    x = jax.random.normal(xk, (B, 1, T, INPUT_SIZE), jnp.float32)
    params = init_params(pk, INPUT_SIZE, HIDDEN_SIZE, NUM_LAYERS)

    fwd = jax.jit(bilstm_forward)
    out = jax.block_until_ready(fwd(x, params))
    ref = jax.block_until_ready(ref_forward(x, params, HIDDEN_SIZE))

    assert out.shape == (B, 2 * HIDDEN_SIZE), out.shape
    max_err = float(jnp.max(jnp.abs(out - ref)))
    assert jnp.allclose(out, ref, atol=2e-3, rtol=2e-3), max_err

    print("KERNEL_OK")
</pallas_src>

<mosaic_0001>
module attributes {stable_mosaic.version = 11 : i64} {
  func.func @kernel(%arg0: memref<64x128xbf16, #tpu.memory_space<vmem>>, %arg1: memref<128x1024xbf16, #tpu.memory_space<vmem>>, %arg2: memref<1x1024xf32, #tpu.memory_space<vmem>>, %arg3: memref<128x512xbf16, #tpu.memory_space<vmem>>, %arg4: memref<128x512xbf16, #tpu.memory_space<vmem>>, %arg5: memref<256x1024xbf16, #tpu.memory_space<vmem>>, %arg6: memref<1x1024xf32, #tpu.memory_space<vmem>>, %arg7: memref<128x512xbf16, #tpu.memory_space<vmem>>, %arg8: memref<128x512xbf16, #tpu.memory_space<vmem>>, %arg9: memref<8x256xf32, #tpu.memory_space<vmem>>, %arg10: memref<64x256xbf16, #tpu.memory_space<vmem>>) attributes {dimension_semantics = [], scalar_prefetch = 0 : i64, scratch_operands = 1 : i64, tpu.core_type = #tpu.core_type<tc>} {
    %c0 = arith.constant 0 : index
    %c0_0 = arith.constant 0 : index
    %0 = vector.load %arg0[%c0, %c0_0] : memref<64x128xbf16, #tpu.memory_space<vmem>>, vector<64x128xbf16>
    %c0_1 = arith.constant 0 : index
    %c0_2 = arith.constant 0 : index
    %1 = vector.load %arg1[%c0_1, %c0_2] : memref<128x1024xbf16, #tpu.memory_space<vmem>>, vector<128x1024xbf16>
    %c0_3 = arith.constant 0 : index
    %c0_4 = arith.constant 0 : index
    %2 = vector.load %arg2[%c0_3, %c0_4] : memref<1x1024xf32, #tpu.memory_space<vmem>>, vector<1x1024xf32>
    %c0_5 = arith.constant 0 : index
    %c0_6 = arith.constant 0 : index
    %3 = vector.load %arg3[%c0_5, %c0_6] : memref<128x512xbf16, #tpu.memory_space<vmem>>, vector<128x512xbf16>
    %c0_7 = arith.constant 0 : index
    %c0_8 = arith.constant 0 : index
    %4 = vector.load %arg4[%c0_7, %c0_8] : memref<128x512xbf16, #tpu.memory_space<vmem>>, vector<128x512xbf16>
    %cst = arith.constant dense<0.000000e+00> : vector<64x1024xf32>
    %5 = tpu.matmul %0, %1, %cst {dimension_numbers = #tpu.dot_dimension_numbers<[1], [0], [0], [1], [0, 0, 1, 1], [], []>} : vector<64x128xbf16>, vector<128x1024xbf16>, vector<64x1024xf32> -> vector<64x1024xf32>
    %6 = vector.broadcast %2 : vector<1x1024xf32> to vector<64x1024xf32>
    %7 = arith.addf %5, %6 : vector<64x1024xf32>
    %8 = vector.extract_strided_slice %7 {offsets = [0, 0], sizes = [64, 512], strides = [1, 1]} : vector<64x1024xf32> to vector<64x512xf32>
    %9 = vector.extract_strided_slice %7 {offsets = [0, 512], sizes = [64, 512], strides = [1, 1]} : vector<64x1024xf32> to vector<64x512xf32>
    %cst_9 = arith.constant 0.000000e+00 : f32
    %10 = vector.broadcast %cst_9 : f32 to vector<8x128xf32>
    %cst_10 = arith.constant 0.000000e+00 : f32
    %11 = vector.broadcast %cst_10 : f32 to vector<8x128xf32>
    %cst_11 = arith.constant 0.000000e+00 : f32
    %12 = vector.broadcast %cst_11 : f32 to vector<8x128xf32>
    %cst_12 = arith.constant 0.000000e+00 : f32
    %13 = vector.broadcast %cst_12 : f32 to vector<8x128xf32>
    %14 = vector.extract_strided_slice %8 {offsets = [0, 0], sizes = [8, 512], strides = [1, 1]} : vector<64x512xf32> to vector<8x512xf32>
    %15 = arith.truncf %10 : vector<8x128xf32> to vector<8x128xbf16>
    %cst_13 = arith.constant dense<0.000000e+00> : vector<8x512xf32>
    %16 = tpu.matmul %15, %3, %cst_13 {dimension_numbers = #tpu.dot_dimension_numbers<[1], [0], [0], [1], [0, 0, 1, 1], [], []>} : vector<8x128xbf16>, vector<128x512xbf16>, vector<8x512xf32> -> vector<8x512xf32>
    %17 = arith.addf %16, %14 : vector<8x512xf32>
    %18 = vector.extract_strided_slice %17 {offsets = [0, 0], sizes = [8, 384], strides = [1, 1]} : vector<8x512xf32> to vector<8x384xf32>
    %19 = arith.negf %18 : vector<8x384xf32>
    %20 = math.exp %19 : vector<8x384xf32>
    %cst_14 = arith.constant 1.000000e+00 : f32
    %21 = vector.broadcast %cst_14 : f32 to vector<8x384xf32>
    %22 = arith.addf %21, %20 : vector<8x384xf32>
    %23 = arith.divf %21, %22 : vector<8x384xf32>
    %24 = vector.extract_strided_slice %23 {offsets = [0, 0], sizes = [8, 128], strides = [1, 1]} : vector<8x384xf32> to vector<8x128xf32>
    %25 = vector.extract_strided_slice %23 {offsets = [0, 128], sizes = [8, 128], strides = [1, 1]} : vector<8x384xf32> to vector<8x128xf32>
    %26 = vector.extract_strided_slice %23 {offsets = [0, 256], sizes = [8, 128], strides = [1, 1]} : vector<8x384xf32> to vector<8x128xf32>
    %27 = vector.extract_strided_slice %17 {offsets = [0, 384], sizes = [8, 128], strides = [1, 1]} : vector<8x512xf32> to vector<8x128xf32>
    %28 = math.tanh %27 : vector<8x128xf32>
    %29 = arith.mulf %25, %11 : vector<8x128xf32>
    %30 = arith.mulf %24, %28 : vector<8x128xf32>
    %31 = arith.addf %29, %30 : vector<8x128xf32>
    %32 = math.tanh %31 : vector<8x128xf32>
    %33 = arith.mulf %26, %32 : vector<8x128xf32>
    %34 = arith.truncf %33 : vector<8x128xf32> to vector<8x128xbf16>
    %c0_15 = arith.constant 0 : index
    %c0_16 = arith.constant 0 : index
    %35 = vector.load %arg10[%c0_15, %c0_16] : memref<64x256xbf16, #tpu.memory_space<vmem>>, vector<8x128xbf16>
    tpu.vector_store %arg10[%c0_15, %c0_16], %34 {strides = array<i32>} : memref<64x256xbf16, #tpu.memory_space<vmem>>, vector<8x128xbf16>,
    %36 = vector.extract_strided_slice %9 {offsets = [56, 0], sizes = [8, 512], strides = [1, 1]} : vector<64x512xf32> to vector<8x512xf32>
    %37 = arith.truncf %12 : vector<8x128xf32> to vector<8x128xbf16>
    %cst_17 = arith.constant dense<0.000000e+00> : vector<8x512xf32>
    %38 = tpu.matmul %37, %4, %cst_17 {dimension_numbers = #tpu.dot_dimension_numbers<[1], [0], [0], [1], [0, 0, 1, 1], [], []>} : vector<8x128xbf16>, vector<128x512xbf16>, vector<8x512xf32> -> vector<8x512xf32>
    %39 = arith.addf %38, %36 : vector<8x512xf32>
    %40 = vector.extract_strided_slice %39 {offsets = [0, 0], sizes = [8, 384], strides = [1, 1]} : vector<8x512xf32> to vector<8x384xf32>
    %41 = arith.negf %40 : vector<8x384xf32>
    %42 = math.exp %41 : vector<8x384xf32>
    %cst_18 = arith.constant 1.000000e+00 : f32
    %43 = vector.broadcast %cst_18 : f32 to vector<8x384xf32>
    %44 = arith.addf %43, %42 : vector<8x384xf32>
    %45 = arith.divf %43, %44 : vector<8x384xf32>
    %46 = vector.extract_strided_slice %45 {offsets = [0, 0], sizes = [8, 128], strides = [1, 1]} : vector<8x384xf32> to vector<8x128xf32>
    %47 = vector.extract_strided_slice %45 {offsets = [0, 128], sizes = [8, 128], strides = [1, 1]} : vector<8x384xf32> to vector<8x128xf32>
    %48 = vector.extract_strided_slice %45 {offsets = [0, 256], sizes = [8, 128], strides = [1, 1]} : vector<8x384xf32> to vector<8x128xf32>
    %49 = vector.extract_strided_slice %39 {offsets = [0, 384], sizes = [8, 128], strides = [1, 1]} : vector<8x512xf32> to vector<8x128xf32>
    %50 = math.tanh %49 : vector<8x128xf32>
    %51 = arith.mulf %47, %13 : vector<8x128xf32>
    %52 = arith.mulf %46, %50 : vector<8x128xf32>
    %53 = arith.addf %51, %52 : vector<8x128xf32>
    %54 = math.tanh %53 : vector<8x128xf32>
    %55 = arith.mulf %48, %54 : vector<8x128xf32>
    %56 = arith.truncf %55 : vector<8x128xf32> to vector<8x128xbf16>
    %c56 = arith.constant 56 : index
    %c128 = arith.constant 128 : index
    %57 = vector.load %arg10[%c56, %c128] : memref<64x256xbf16, #tpu.memory_space<vmem>>, vector<8x128xbf16>
    tpu.vector_store %arg10[%c56, %c128], %56 {strides = array<i32>} : memref<64x256xbf16, #tpu.memory_space<vmem>>, vector<8x128xbf16>,
    %58 = vector.extract_strided_slice %8 {offsets = [8, 0], sizes = [8, 512], strides = [1, 1]} : vector<64x512xf32> to vector<8x512xf32>
    %59 = arith.truncf %33 : vector<8x128xf32> to vector<8x128xbf16>
    %cst_19 = arith.constant dense<0.000000e+00> : vector<8x512xf32>
    %60 = tpu.matmul %59, %3, %cst_19 {dimension_numbers = #tpu.dot_dimension_numbers<[1], [0], [0], [1], [0, 0, 1, 1], [], []>} : vector<8x128xbf16>, vector<128x512xbf16>, vector<8x512xf32> -> vector<8x512xf32>
    %61 = arith.addf %60, %58 : vector<8x512xf32>
    %62 = vector.extract_strided_slice %61 {offsets = [0, 0], sizes = [8, 384], strides = [1, 1]} : vector<8x512xf32> to vector<8x384xf32>
    %63 = arith.negf %62 : vector<8x384xf32>
    %64 = math.exp %63 : vector<8x384xf32>
    %cst_20 = arith.constant 1.000000e+00 : f32
    %65 = vector.broadcast %cst_20 : f32 to vector<8x384xf32>
    %66 = arith.addf %65, %64 : vector<8x384xf32>
    %67 = arith.divf %65, %66 : vector<8x384xf32>
    %68 = vector.extract_strided_slice %67 {offsets = [0, 0], sizes = [8, 128], strides = [1, 1]} : vector<8x384xf32> to vector<8x128xf32>
    %69 = vector.extract_strided_slice %67 {offsets = [0, 128], sizes = [8, 128], strides = [1, 1]} : vector<8x384xf32> to vector<8x128xf32>
    %70 = vector.extract_strided_slice %67 {offsets = [0, 256], sizes = [8, 128], strides = [1, 1]} : vector<8x384xf32> to vector<8x128xf32>
    %71 = vector.extract_strided_slice %61 {offsets = [0, 384], sizes = [8, 128], strides = [1, 1]} : vector<8x512xf32> to vector<8x128xf32>
    %72 = math.tanh %71 : vector<8x128xf32>
    %73 = arith.mulf %69, %31 : vector<8x128xf32>
    %74 = arith.mulf %68, %72 : vector<8x128xf32>
    %75 = arith.addf %73, %74 : vector<8x128xf32>
    %76 = math.tanh %75 : vector<8x128xf32>
    %77 = arith.mulf %70, %76 : vector<8x128xf32>
    %78 = arith.truncf %77 : vector<8x128xf32> to vector<8x128xbf16>
    %c8 = arith.constant 8 : index
    %c0_21 = arith.constant 0 : index
    %79 = vector.load %arg10[%c8, %c0_21] : memref<64x256xbf16, #tpu.memory_space<vmem>>, vector<8x128xbf16>
    tpu.vector_store %arg10[%c8, %c0_21], %78 {strides = array<i32>} : memref<64x256xbf16, #tpu.memory_space<vmem>>, vector<8x128xbf16>,
    %80 = vector.extract_strided_slice %9 {offsets = [48, 0], sizes = [8, 512], strides = [1, 1]} : vector<64x512xf32> to vector<8x512xf32>
    %81 = arith.truncf %55 : vector<8x128xf32> to vector<8x128xbf16>
    %cst_22 = arith.constant dense<0.000000e+00> : vector<8x512xf32>
    %82 = tpu.matmul %81, %4, %cst_22 {dimension_numbers = #tpu.dot_dimension_numbers<[1], [0], [0], [1], [0, 0, 1, 1], [], []>} : vector<8x128xbf16>, vector<128x512xbf16>, vector<8x512xf32> -> vector<8x512xf32>
    %83 = arith.addf %82, %80 : vector<8x512xf32>
    %84 = vector.extract_strided_slice %83 {offsets = [0, 0], sizes = [8, 384], strides = [1, 1]} : vector<8x512xf32> to vector<8x384xf32>
    %85 = arith.negf %84 : vector<8x384xf32>
    %86 = math.exp %85 : vector<8x384xf32>
    %cst_23 = arith.constant 1.000000e+00 : f32
    %87 = vector.broadcast %cst_23 : f32 to vector<8x384xf32>
    %88 = arith.addf %87, %86 : vector<8x384xf32>
    %89 = arith.divf %87, %88 : vector<8x384xf32>
    %90 = vector.extract_strided_slice %89 {offsets = [0, 0], sizes = [8, 128], strides = [1, 1]} : vector<8x384xf32> to vector<8x128xf32>
    %91 = vector.extract_strided_slice %89 {offsets = [0, 128], sizes = [8, 128], strides = [1, 1]} : vector<8x384xf32> to vector<8x128xf32>
    %92 = vector.extract_strided_slice %89 {offsets = [0, 256], sizes = [8, 128], strides = [1, 1]} : vector<8x384xf32> to vector<8x128xf32>
    %93 = vector.extract_strided_slice %83 {offsets = [0, 384], sizes = [8, 128], strides = [1, 1]} : vector<8x512xf32> to vector<8x128xf32>
    %94 = math.tanh %93 : vector<8x128xf32>
    %95 = arith.mulf %91, %53 : vector<8x128xf32>
    %96 = arith.mulf %90, %94 : vector<8x128xf32>
    %97 = arith.addf %95, %96 : vector<8x128xf32>
    %98 = math.tanh %97 : vector<8x128xf32>
    %99 = arith.mulf %92, %98 : vector<8x128xf32>
    %100 = arith.truncf %99 : vector<8x128xf32> to vector<8x128xbf16>
    %c48 = arith.constant 48 : index
    %c128_24 = arith.constant 128 : index
    %101 = vector.load %arg10[%c48, %c128_24] : memref<64x256xbf16, #tpu.memory_space<vmem>>, vector<8x128xbf16>
    tpu.vector_store %arg10[%c48, %c128_24], %100 {strides = array<i32>} : memref<64x256xbf16, #tpu.memory_space<vmem>>, vector<8x128xbf16>,
    %102 = vector.extract_strided_slice %8 {offsets = [16, 0], sizes = [8, 512], strides = [1, 1]} : vector<64x512xf32> to vector<8x512xf32>
    %103 = arith.truncf %77 : vector<8x128xf32> to vector<8x128xbf16>
    %cst_25 = arith.constant dense<0.000000e+00> : vector<8x512xf32>
    %104 = tpu.matmul %103, %3, %cst_25 {dimension_numbers = #tpu.dot_dimension_numbers<[1], [0], [0], [1], [0, 0, 1, 1], [], []>} : vector<8x128xbf16>, vector<128x512xbf16>, vector<8x512xf32> -> vector<8x512xf32>
    %105 = arith.addf %104, %102 : vector<8x512xf32>
    %106 = vector.extract_strided_slice %105 {offsets = [0, 0], sizes = [8, 384], strides = [1, 1]} : vector<8x512xf32> to vector<8x384xf32>
    %107 = arith.negf %106 : vector<8x384xf32>
    %108 = math.exp %107 : vector<8x384xf32>
    %cst_26 = arith.constant 1.000000e+00 : f32
    %109 = vector.broadcast %cst_26 : f32 to vector<8x384xf32>
    %110 = arith.addf %109, %108 : vector<8x384xf32>
    %111 = arith.divf %109, %110 : vector<8x384xf32>
    %112 = vector.extract_strided_slice %111 {offsets = [0, 0], sizes = [8, 128], strides = [1, 1]} : vector<8x384xf32> to vector<8x128xf32>
    %113 = vector.extract_strided_slice %111 {offsets = [0, 128], sizes = [8, 128], strides = [1, 1]} : vector<8x384xf32> to vector<8x128xf32>
    %114 = vector.extract_strided_slice %111 {offsets = [0, 256], sizes = [8, 128], strides = [1, 1]} : vector<8x384xf32> to vector<8x128xf32>
    %115 = vector.extract_strided_slice %105 {offsets = [0, 384], sizes = [8, 128], strides = [1, 1]} : vector<8x512xf32> to vector<8x128xf32>
    %116 = math.tanh %115 : vector<8x128xf32>
    %117 = arith.mulf %113, %75 : vector<8x128xf32>
    %118 = arith.mulf %112, %116 : vector<8x128xf32>
    %119 = arith.addf %117, %118 : vector<8x128xf32>
    %120 = math.tanh %119 : vector<8x128xf32>
    %121 = arith.mulf %114, %120 : vector<8x128xf32>
    %122 = arith.truncf %121 : vector<8x128xf32> to vector<8x128xbf16>
    %c16 = arith.constant 16 : index
    %c0_27 = arith.constant 0 : index
    %123 = vector.load %arg10[%c16, %c0_27] : memref<64x256xbf16, #tpu.memory_space<vmem>>, vector<8x128xbf16>
    tpu.vector_store %arg10[%c16, %c0_27], %122 {strides = array<i32>} : memref<64x256xbf16, #tpu.memory_space<vmem>>, vector<8x128xbf16>,
    %124 = vector.extract_strided_slice %9 {offsets = [40, 0], sizes = [8, 512], strides = [1, 1]} : vector<64x512xf32> to vector<8x512xf32>
    %125 = arith.truncf %99 : vector<8x128xf32> to vector<8x128xbf16>
    %cst_28 = arith.constant dense<0.000000e+00> : vector<8x512xf32>
    %126 = tpu.matmul %125, %4, %cst_28 {dimension_numbers = #tpu.dot_dimension_numbers<[1], [0], [0], [1], [0, 0, 1, 1], [], []>} : vector<8x128xbf16>, vector<128x512xbf16>, vector<8x512xf32> -> vector<8x512xf32>
    %127 = arith.addf %126, %124 : vector<8x512xf32>
    %128 = vector.extract_strided_slice %127 {offsets = [0, 0], sizes = [8, 384], strides = [1, 1]} : vector<8x512xf32> to vector<8x384xf32>
    %129 = arith.negf %128 : vector<8x384xf32>
    %130 = math.exp %129 : vector<8x384xf32>
    %cst_29 = arith.constant 1.000000e+00 : f32
    %131 = vector.broadcast %cst_29 : f32 to vector<8x384xf32>
    %132 = arith.addf %131, %130 : vector<8x384xf32>
    %133 = arith.divf %131, %132 : vector<8x384xf32>
    %134 = vector.extract_strided_slice %133 {offsets = [0, 0], sizes = [8, 128], strides = [1, 1]} : vector<8x384xf32> to vector<8x128xf32>
    %135 = vector.extract_strided_slice %133 {offsets = [0, 128], sizes = [8, 128], strides = [1, 1]} : vector<8x384xf32> to vector<8x128xf32>
    %136 = vector.extract_strided_slice %133 {offsets = [0, 256], sizes = [8, 128], strides = [1, 1]} : vector<8x384xf32> to vector<8x128xf32>
    %137 = vector.extract_strided_slice %127 {offsets = [0, 384], sizes = [8, 128], strides = [1, 1]} : vector<8x512xf32> to vector<8x128xf32>
    %138 = math.tanh %137 : vector<8x128xf32>
    %139 = arith.mulf %135, %97 : vector<8x128xf32>
    %140 = arith.mulf %134, %138 : vector<8x128xf32>
    %141 = arith.addf %139, %140 : vector<8x128xf32>
    %142 = math.tanh %141 : vector<8x128xf32>
    %143 = arith.mulf %136, %142 : vector<8x128xf32>
    %144 = arith.truncf %143 : vector<8x128xf32> to vector<8x128xbf16>
    %c40 = arith.constant 40 : index
    %c128_30 = arith.constant 128 : index
    %145 = vector.load %arg10[%c40, %c128_30] : memref<64x256xbf16, #tpu.memory_space<vmem>>, vector<8x128xbf16>
    tpu.vector_store %arg10[%c40, %c128_30], %144 {strides = array<i32>} : memref<64x256xbf16, #tpu.memory_space<vmem>>, vector<8x128xbf16>,
    %146 = vector.extract_strided_slice %8 {offsets = [24, 0], sizes = [8, 512], strides = [1, 1]} : vector<64x512xf32> to vector<8x512xf32>
    %147 = arith.truncf %121 : vector<8x128xf32> to vector<8x128xbf16>
    %cst_31 = arith.constant dense<0.000000e+00> : vector<8x512xf32>
    %148 = tpu.matmul %147, %3, %cst_31 {dimension_numbers = #tpu.dot_dimension_numbers<[1], [0], [0], [1], [0, 0, 1, 1], [], []>} : vector<8x128xbf16>, vector<128x512xbf16>, vector<8x512xf32> -> vector<8x512xf32>
    %149 = arith.addf %148, %146 : vector<8x512xf32>
    %150 = vector.extract_strided_slice %149 {offsets = [0, 0], sizes = [8, 384], strides = [1, 1]} : vector<8x512xf32> to vector<8x384xf32>
    %151 = arith.negf %150 : vector<8x384xf32>
    %152 = math.exp %151 : vector<8x384xf32>
    %cst_32 = arith.constant 1.000000e+00 : f32
    %153 = vector.broadcast %cst_32 : f32 to vector<8x384xf32>
    %154 = arith.addf %153, %152 : vector<8x384xf32>
    %155 = arith.divf %153, %154 : vector<8x384xf32>
    %156 = vector.extract_strided_slice %155 {offsets = [0, 0], sizes = [8, 128], strides = [1, 1]} : vector<8x384xf32> to vector<8x128xf32>
    %157 = vector.extract_strided_slice %155 {offsets = [0, 128], sizes = [8, 128], strides = [1, 1]} : vector<8x384xf32> to vector<8x128xf32>
    %158 = vector.extract_strided_slice %155 {offsets = [0, 256], sizes = [8, 128], strides = [1, 1]} : vector<8x384xf32> to vector<8x128xf32>
    %159 = vector.extract_strided_slice %149 {offsets = [0, 384], sizes = [8, 128], strides = [1, 1]} : vector<8x512xf32> to vector<8x128xf32>
    %160 = math.tanh %159 : vector<8x128xf32>
    %161 = arith.mulf %157, %119 : vector<8x128xf32>
    %162 = arith.mulf %156, %160 : vector<8x128xf32>
    %163 = arith.addf %161, %162 : vector<8x128xf32>
    %164 = math.tanh %163 : vector<8x128xf32>
    %165 = arith.mulf %158, %164 : vector<8x128xf32>
    %166 = arith.truncf %165 : vector<8x128xf32> to vector<8x128xbf16>
    %c24 = arith.constant 24 : index
    %c0_33 = arith.constant 0 : index
    %167 = vector.load %arg10[%c24, %c0_33] : memref<64x256xbf16, #tpu.memory_space<vmem>>, vector<8x128xbf16>
    tpu.vector_store %arg10[%c24, %c0_33], %166 {strides = array<i32>} : memref<64x256xbf16, #tpu.memory_space<vmem>>, vector<8x128xbf16>,
    %168 = vector.extract_strided_slice %9 {offsets = [32, 0], sizes = [8, 512], strides = [1, 1]} : vector<64x512xf32> to vector<8x512xf32>
    %169 = arith.truncf %143 : vector<8x128xf32> to vector<8x128xbf16>
    %cst_34 = arith.constant dense<0.000000e+00> : vector<8x512xf32>
    %170 = tpu.matmul %169, %4, %cst_34 {dimension_numbers = #tpu.dot_dimension_numbers<[1], [0], [0], [1], [0, 0, 1, 1], [], []>} : vector<8x128xbf16>, vector<128x512xbf16>, vector<8x512xf32> -> vector<8x512xf32>
    %171 = arith.addf %170, %168 : vector<8x512xf32>
    %172 = vector.extract_strided_slice %171 {offsets = [0, 0], sizes = [8, 384], strides = [1, 1]} : vector<8x512xf32> to vector<8x384xf32>
    %173 = arith.negf %172 : vector<8x384xf32>
    %174 = math.exp %173 : vector<8x384xf32>
    %cst_35 = arith.constant 1.000000e+00 : f32
    %175 = vector.broadcast %cst_35 : f32 to vector<8x384xf32>
    %176 = arith.addf %175, %174 : vector<8x384xf32>
    %177 = arith.divf %175, %176 : vector<8x384xf32>
    %178 = vector.extract_strided_slice %177 {offsets = [0, 0], sizes = [8, 128], strides = [1, 1]} : vector<8x384xf32> to vector<8x128xf32>
    %179 = vector.extract_strided_slice %177 {offsets = [0, 128], sizes = [8, 128], strides = [1, 1]} : vector<8x384xf32> to vector<8x128xf32>
    %180 = vector.extract_strided_slice %177 {offsets = [0, 256], sizes = [8, 128], strides = [1, 1]} : vector<8x384xf32> to vector<8x128xf32>
    %181 = vector.extract_strided_slice %171 {offsets = [0, 384], sizes = [8, 128], strides = [1, 1]} : vector<8x512xf32> to vector<8x128xf32>
    %182 = math.tanh %181 : vector<8x128xf32>
    %183 = arith.mulf %179, %141 : vector<8x128xf32>
    %184 = arith.mulf %178, %182 : vector<8x128xf32>
    %185 = arith.addf %183, %184 : vector<8x128xf32>
    %186 = math.tanh %185 : vector<8x128xf32>
    %187 = arith.mulf %180, %186 : vector<8x128xf32>
    %188 = arith.truncf %187 : vector<8x128xf32> to vector<8x128xbf16>
    %c32 = arith.constant 32 : index
    %c128_36 = arith.constant 128 : index
    %189 = vector.load %arg10[%c32, %c128_36] : memref<64x256xbf16, #tpu.memory_space<vmem>>, vector<8x128xbf16>
    tpu.vector_store %arg10[%c32, %c128_36], %188 {strides = array<i32>} : memref<64x256xbf16, #tpu.memory_space<vmem>>, vector<8x128xbf16>,
    %190 = vector.extract_strided_slice %8 {offsets = [32, 0], sizes = [8, 512], strides = [1, 1]} : vector<64x512xf32> to vector<8x512xf32>
    %191 = arith.truncf %165 : vector<8x128xf32> to vector<8x128xbf16>
    %cst_37 = arith.constant dense<0.000000e+00> : vector<8x512xf32>
    %192 = tpu.matmul %191, %3, %cst_37 {dimension_numbers = #tpu.dot_dimension_numbers<[1], [0], [0], [1], [0, 0, 1, 1], [], []>} : vector<8x128xbf16>, vector<128x512xbf16>, vector<8x512xf32> -> vector<8x512xf32>
    %193 = arith.addf %192, %190 : vector<8x512xf32>
    %194 = vector.extract_strided_slice %193 {offsets = [0, 0], sizes = [8, 384], strides = [1, 1]} : vector<8x512xf32> to vector<8x384xf32>
    %195 = arith.negf %194 : vector<8x384xf32>
    %196 = math.exp %195 : vector<8x384xf32>
    %cst_38 = arith.constant 1.000000e+00 : f32
    %197 = vector.broadcast %cst_38 : f32 to vector<8x384xf32>
    %198 = arith.addf %197, %196 : vector<8x384xf32>
    %199 = arith.divf %197, %198 : vector<8x384xf32>
    %200 = vector.extract_strided_slice %199 {offsets = [0, 0], sizes = [8, 128], strides = [1, 1]} : vector<8x384xf32> to vector<8x128xf32>
    %201 = vector.extract_strided_slice %199 {offsets = [0, 128], sizes = [8, 128], strides = [1, 1]} : vector<8x384xf32> to vector<8x128xf32>
    %202 = vector.extract_strided_slice %199 {offsets = [0, 256], sizes = [8, 128], strides = [1, 1]} : vector<8x384xf32> to vector<8x128xf32>
    %203 = vector.extract_strided_slice %193 {offsets = [0, 384], sizes = [8, 128], strides = [1, 1]} : vector<8x512xf32> to vector<8x128xf32>
    %204 = math.tanh %203 : vector<8x128xf32>
    %205 = arith.mulf %201, %163 : vector<8x128xf32>
    %206 = arith.mulf %200, %204 : vector<8x128xf32>
    %207 = arith.addf %205, %206 : vector<8x128xf32>
    %208 = math.tanh %207 : vector<8x128xf32>
    %209 = arith.mulf %202, %208 : vector<8x128xf32>
    %210 = arith.truncf %209 : vector<8x128xf32> to vector<8x128xbf16>
    %c32_39 = arith.constant 32 : index
    %c0_40 = arith.constant 0 : index
    %211 = vector.load %arg10[%c32_39, %c0_40] : memref<64x256xbf16, #tpu.memory_space<vmem>>, vector<8x128xbf16>
    tpu.vector_store %arg10[%c32_39, %c0_40], %210 {strides = array<i32>} : memref<64x256xbf16, #tpu.memory_space<vmem>>, vector<8x128xbf16>,
    %212 = vector.extract_strided_slice %9 {offsets = [24, 0], sizes = [8, 512], strides = [1, 1]} : vector<64x512xf32> to vector<8x512xf32>
    %213 = arith.truncf %187 : vector<8x128xf32> to vector<8x128xbf16>
    %cst_41 = arith.constant dense<0.000000e+00> : vector<8x512xf32>
    %214 = tpu.matmul %213, %4, %cst_41 {dimension_numbers = #tpu.dot_dimension_numbers<[1], [0], [0], [1], [0, 0, 1, 1], [], []>} : vector<8x128xbf16>, vector<128x512xbf16>, vector<8x512xf32> -> vector<8x512xf32>
    %215 = arith.addf %214, %212 : vector<8x512xf32>
    %216 = vector.extract_strided_slice %215 {offsets = [0, 0], sizes = [8, 384], strides = [1, 1]} : vector<8x512xf32> to vector<8x384xf32>
    %217 = arith.negf %216 : vector<8x384xf32>
    %218 = math.exp %217 : vector<8x384xf32>
    %cst_42 = arith.constant 1.000000e+00 : f32
    %219 = vector.broadcast %cst_42 : f32 to vector<8x384xf32>
    %220 = arith.addf %219, %218 : vector<8x384xf32>
    %221 = arith.divf %219, %220 : vector<8x384xf32>
    %222 = vector.extract_strided_slice %221 {offsets = [0, 0], sizes = [8, 128], strides = [1, 1]} : vector<8x384xf32> to vector<8x128xf32>
    %223 = vector.extract_strided_slice %221 {offsets = [0, 128], sizes = [8, 128], strides = [1, 1]} : vector<8x384xf32> to vector<8x128xf32>
    %224 = vector.extract_strided_slice %221 {offsets = [0, 256], sizes = [8, 128], strides = [1, 1]} : vector<8x384xf32> to vector<8x128xf32>
    %225 = vector.extract_strided_slice %215 {offsets = [0, 384], sizes = [8, 128], strides = [1, 1]} : vector<8x512xf32> to vector<8x128xf32>
    %226 = math.tanh %225 : vector<8x128xf32>
    %227 = arith.mulf %223, %185 : vector<8x128xf32>
    %228 = arith.mulf %222, %226 : vector<8x128xf32>
    %229 = arith.addf %227, %228 : vector<8x128xf32>
    %230 = math.tanh %229 : vector<8x128xf32>
    %231 = arith.mulf %224, %230 : vector<8x128xf32>
    %232 = arith.truncf %231 : vector<8x128xf32> to vector<8x128xbf16>
    %c24_43 = arith.constant 24 : index
    %c128_44 = arith.constant 128 : index
    %233 = vector.load %arg10[%c24_43, %c128_44] : memref<64x256xbf16, #tpu.memory_space<vmem>>, vector<8x128xbf16>
    tpu.vector_store %arg10[%c24_43, %c128_44], %232 {strides = array<i32>} : memref<64x256xbf16, #tpu.memory_space<vmem>>, vector<8x128xbf16>,
    %234 = vector.extract_strided_slice %8 {offsets = [40, 0], sizes = [8, 512], strides = [1, 1]} : vector<64x512xf32> to vector<8x512xf32>
    %235 = arith.truncf %209 : vector<8x128xf32> to vector<8x128xbf16>
    %cst_45 = arith.constant dense<0.000000e+00> : vector<8x512xf32>
    %236 = tpu.matmul %235, %3, %cst_45 {dimension_numbers = #tpu.dot_dimension_numbers<[1], [0], [0], [1], [0, 0, 1, 1], [], []>} : vector<8x128xbf16>, vector<128x512xbf16>, vector<8x512xf32> -> vector<8x512xf32>
    %237 = arith.addf %236, %234 : vector<8x512xf32>
    %238 = vector.extract_strided_slice %237 {offsets = [0, 0], sizes = [8, 384], strides = [1, 1]} : vector<8x512xf32> to vector<8x384xf32>
    %239 = arith.negf %238 : vector<8x384xf32>
    %240 = math.exp %239 : vector<8x384xf32>
    %cst_46 = arith.constant 1.000000e+00 : f32
    %241 = vector.broadcast %cst_46 : f32 to vector<8x384xf32>
    %242 = arith.addf %241, %240 : vector<8x384xf32>
    %243 = arith.divf %241, %242 : vector<8x384xf32>
    %244 = vector.extract_strided_slice %243 {offsets = [0, 0], sizes = [8, 128], strides = [1, 1]} : vector<8x384xf32> to vector<8x128xf32>
    %245 = vector.extract_strided_slice %243 {offsets = [0, 128], sizes = [8, 128], strides = [1, 1]} : vector<8x384xf32> to vector<8x128xf32>
    %246 = vector.extract_strided_slice %243 {offsets = [0, 256], sizes = [8, 128], strides = [1, 1]} : vector<8x384xf32> to vector<8x128xf32>
    %247 = vector.extract_strided_slice %237 {offsets = [0, 384], sizes = [8, 128], strides = [1, 1]} : vector<8x512xf32> to vector<8x128xf32>
    %248 = math.tanh %247 : vector<8x128xf32>
    %249 = arith.mulf %245, %207 : vector<8x128xf32>
    %250 = arith.mulf %244, %248 : vector<8x128xf32>
    %251 = arith.addf %249, %250 : vector<8x128xf32>
    %252 = math.tanh %251 : vector<8x128xf32>
    %253 = arith.mulf %246, %252 : vector<8x128xf32>
    %254 = arith.truncf %253 : vector<8x128xf32> to vector<8x128xbf16>
    %c40_47 = arith.constant 40 : index
    %c0_48 = arith.constant 0 : index
    %255 = vector.load %arg10[%c40_47, %c0_48] : memref<64x256xbf16, #tpu.memory_space<vmem>>, vector<8x128xbf16>
    tpu.vector_store %arg10[%c40_47, %c0_48], %254 {strides = array<i32>} : memref<64x256xbf16, #tpu.memory_space<vmem>>, vector<8x128xbf16>,
    %256 = vector.extract_strided_slice %9 {offsets = [16, 0], sizes = [8, 512], strides = [1, 1]} : vector<64x512xf32> to vector<8x512xf32>
    %257 = arith.truncf %231 : vector<8x128xf32> to vector<8x128xbf16>
    %cst_49 = arith.constant dense<0.000000e+00> : vector<8x512xf32>
    %258 = tpu.matmul %257, %4, %cst_49 {dimension_numbers = #tpu.dot_dimension_numbers<[1], [0], [0], [1], [0, 0, 1, 1], [], []>} : vector<8x128xbf16>, vector<128x512xbf16>, vector<8x512xf32> -> vector<8x512xf32>
    %259 = arith.addf %258, %256 : vector<8x512xf32>
    %260 = vector.extract_strided_slice %259 {offsets = [0, 0], sizes = [8, 384], strides = [1, 1]} : vector<8x512xf32> to vector<8x384xf32>
    %261 = arith.negf %260 : vector<8x384xf32>
    %262 = math.exp %261 : vector<8x384xf32>
    %cst_50 = arith.constant 1.000000e+00 : f32
    %263 = vector.broadcast %cst_50 : f32 to vector<8x384xf32>
    %264 = arith.addf %263, %262 : vector<8x384xf32>
    %265 = arith.divf %263, %264 : vector<8x384xf32>
    %266 = vector.extract_strided_slice %265 {offsets = [0, 0], sizes = [8, 128], strides = [1, 1]} : vector<8x384xf32> to vector<8x128xf32>
    %267 = vector.extract_strided_slice %265 {offsets = [0, 128], sizes = [8, 128], strides = [1, 1]} : vector<8x384xf32> to vector<8x128xf32>
    %268 = vector.extract_strided_slice %265 {offsets = [0, 256], sizes = [8, 128], strides = [1, 1]} : vector<8x384xf32> to vector<8x128xf32>
    %269 = vector.extract_strided_slice %259 {offsets = [0, 384], sizes = [8, 128], strides = [1, 1]} : vector<8x512xf32> to vector<8x128xf32>
    %270 = math.tanh %269 : vector<8x128xf32>
    %271 = arith.mulf %267, %229 : vector<8x128xf32>
    %272 = arith.mulf %266, %270 : vector<8x128xf32>
    %273 = arith.addf %271, %272 : vector<8x128xf32>
    %274 = math.tanh %273 : vector<8x128xf32>
    %275 = arith.mulf %268, %274 : vector<8x128xf32>
    %276 = arith.truncf %275 : vector<8x128xf32> to vector<8x128xbf16>
    %c16_51 = arith.constant 16 : index
    %c128_52 = arith.constant 128 : index
    %277 = vector.load %arg10[%c16_51, %c128_52] : memref<64x256xbf16, #tpu.memory_space<vmem>>, vector<8x128xbf16>
    tpu.vector_store %arg10[%c16_51, %c128_52], %276 {strides = array<i32>} : memref<64x256xbf16, #tpu.memory_space<vmem>>, vector<8x128xbf16>,
    %278 = vector.extract_strided_slice %8 {offsets = [48, 0], sizes = [8, 512], strides = [1, 1]} : vector<64x512xf32> to vector<8x512xf32>
    %279 = arith.truncf %253 : vector<8x128xf32> to vector<8x128xbf16>
    %cst_53 = arith.constant dense<0.000000e+00> : vector<8x512xf32>
    %280 = tpu.matmul %279, %3, %cst_53 {dimension_numbers = #tpu.dot_dimension_numbers<[1], [0], [0], [1], [0, 0, 1, 1], [], []>} : vector<8x128xbf16>, vector<128x512xbf16>, vector<8x512xf32> -> vector<8x512xf32>
    %281 = arith.addf %280, %278 : vector<8x512xf32>
    %282 = vector.extract_strided_slice %281 {offsets = [0, 0], sizes = [8, 384], strides = [1, 1]} : vector<8x512xf32> to vector<8x384xf32>
    %283 = arith.negf %282 : vector<8x384xf32>
    %284 = math.exp %283 : vector<8x384xf32>
    %cst_54 = arith.constant 1.000000e+00 : f32
    %285 = vector.broadcast %cst_54 : f32 to vector<8x384xf32>
    %286 = arith.addf %285, %284 : vector<8x384xf32>
    %287 = arith.divf %285, %286 : vector<8x384xf32>
    %288 = vector.extract_strided_slice %287 {offsets = [0, 0], sizes = [8, 128], strides = [1, 1]} : vector<8x384xf32> to vector<8x128xf32>
    %289 = vector.extract_strided_slice %287 {offsets = [0, 128], sizes = [8, 128], strides = [1, 1]} : vector<8x384xf32> to vector<8x128xf32>
    %290 = vector.extract_strided_slice %287 {offsets = [0, 256], sizes = [8, 128], strides = [1, 1]} : vector<8x384xf32> to vector<8x128xf32>
    %291 = vector.extract_strided_slice %281 {offsets = [0, 384], sizes = [8, 128], strides = [1, 1]} : vector<8x512xf32> to vector<8x128xf32>
    %292 = math.tanh %291 : vector<8x128xf32>
    %293 = arith.mulf %289, %251 : vector<8x128xf32>
    %294 = arith.mulf %288, %292 : vector<8x128xf32>
    %295 = arith.addf %293, %294 : vector<8x128xf32>
    %296 = math.tanh %295 : vector<8x128xf32>
    %297 = arith.mulf %290, %296 : vector<8x128xf32>
    %298 = arith.truncf %297 : vector<8x128xf32> to vector<8x128xbf16>
    %c48_55 = arith.constant 48 : index
    %c0_56 = arith.constant 0 : index
    %299 = vector.load %arg10[%c48_55, %c0_56] : memref<64x256xbf16, #tpu.memory_space<vmem>>, vector<8x128xbf16>
    tpu.vector_store %arg10[%c48_55, %c0_56], %298 {strides = array<i32>} : memref<64x256xbf16, #tpu.memory_space<vmem>>, vector<8x128xbf16>,
    %300 = vector.extract_strided_slice %9 {offsets = [8, 0], sizes = [8, 512], strides = [1, 1]} : vector<64x512xf32> to vector<8x512xf32>
    %301 = arith.truncf %275 : vector<8x128xf32> to vector<8x128xbf16>
    %cst_57 = arith.constant dense<0.000000e+00> : vector<8x512xf32>
    %302 = tpu.matmul %301, %4, %cst_57 {dimension_numbers = #tpu.dot_dimension_numbers<[1], [0], [0], [1], [0, 0, 1, 1], [], []>} : vector<8x128xbf16>, vector<128x512xbf16>, vector<8x512xf32> -> vector<8x512xf32>
    %303 = arith.addf %302, %300 : vector<8x512xf32>
    %304 = vector.extract_strided_slice %303 {offsets = [0, 0], sizes = [8, 384], strides = [1, 1]} : vector<8x512xf32> to vector<8x384xf32>
    %305 = arith.negf %304 : vector<8x384xf32>
    %306 = math.exp %305 : vector<8x384xf32>
    %cst_58 = arith.constant 1.000000e+00 : f32
    %307 = vector.broadcast %cst_58 : f32 to vector<8x384xf32>
    %308 = arith.addf %307, %306 : vector<8x384xf32>
    %309 = arith.divf %307, %308 : vector<8x384xf32>
    %310 = vector.extract_strided_slice %309 {offsets = [0, 0], sizes = [8, 128], strides = [1, 1]} : vector<8x384xf32> to vector<8x128xf32>
    %311 = vector.extract_strided_slice %309 {offsets = [0, 128], sizes = [8, 128], strides = [1, 1]} : vector<8x384xf32> to vector<8x128xf32>
    %312 = vector.extract_strided_slice %309 {offsets = [0, 256], sizes = [8, 128], strides = [1, 1]} : vector<8x384xf32> to vector<8x128xf32>
    %313 = vector.extract_strided_slice %303 {offsets = [0, 384], sizes = [8, 128], strides = [1, 1]} : vector<8x512xf32> to vector<8x128xf32>
    %314 = math.tanh %313 : vector<8x128xf32>
    %315 = arith.mulf %311, %273 : vector<8x128xf32>
    %316 = arith.mulf %310, %314 : vector<8x128xf32>
    %317 = arith.addf %315, %316 : vector<8x128xf32>
    %318 = math.tanh %317 : vector<8x128xf32>
    %319 = arith.mulf %312, %318 : vector<8x128xf32>
    %320 = arith.truncf %319 : vector<8x128xf32> to vector<8x128xbf16>
    %c8_59 = arith.constant 8 : index
    %c128_60 = arith.constant 128 : index
    %321 = vector.load %arg10[%c8_59, %c128_60] : memref<64x256xbf16, #tpu.memory_space<vmem>>, vector<8x128xbf16>
    tpu.vector_store %arg10[%c8_59, %c128_60], %320 {strides = array<i32>} : memref<64x256xbf16, #tpu.memory_space<vmem>>, vector<8x128xbf16>,
    %322 = vector.extract_strided_slice %8 {offsets = [56, 0], sizes = [8, 512], strides = [1, 1]} : vector<64x512xf32> to vector<8x512xf32>
    %323 = arith.truncf %297 : vector<8x128xf32> to vector<8x128xbf16>
    %cst_61 = arith.constant dense<0.000000e+00> : vector<8x512xf32>
    %324 = tpu.matmul %323, %3, %cst_61 {dimension_numbers = #tpu.dot_dimension_numbers<[1], [0], [0], [1], [0, 0, 1, 1], [], []>} : vector<8x128xbf16>, vector<128x512xbf16>, vector<8x512xf32> -> vector<8x512xf32>
    %325 = arith.addf %324, %322 : vector<8x512xf32>
    %326 = vector.extract_strided_slice %325 {offsets = [0, 0], sizes = [8, 384], strides = [1, 1]} : vector<8x512xf32> to vector<8x384xf32>
    %327 = arith.negf %326 : vector<8x384xf32>
    %328 = math.exp %327 : vector<8x384xf32>
    %cst_62 = arith.constant 1.000000e+00 : f32
    %329 = vector.broadcast %cst_62 : f32 to vector<8x384xf32>
    %330 = arith.addf %329, %328 : vector<8x384xf32>
    %331 = arith.divf %329, %330 : vector<8x384xf32>
    %332 = vector.extract_strided_slice %331 {offsets = [0, 0], sizes = [8, 128], strides = [1, 1]} : vector<8x384xf32> to vector<8x128xf32>
    %333 = vector.extract_strided_slice %331 {offsets = [0, 128], sizes = [8, 128], strides = [1, 1]} : vector<8x384xf32> to vector<8x128xf32>
    %334 = vector.extract_strided_slice %331 {offsets = [0, 256], sizes = [8, 128], strides = [1, 1]} : vector<8x384xf32> to vector<8x128xf32>
    %335 = vector.extract_strided_slice %325 {offsets = [0, 384], sizes = [8, 128], strides = [1, 1]} : vector<8x512xf32> to vector<8x128xf32>
    %336 = math.tanh %335 : vector<8x128xf32>
    %337 = arith.mulf %333, %295 : vector<8x128xf32>
    %338 = arith.mulf %332, %336 : vector<8x128xf32>
    %339 = arith.addf %337, %338 : vector<8x128xf32>
    %340 = math.tanh %339 : vector<8x128xf32>
    %341 = arith.mulf %334, %340 : vector<8x128xf32>
    %342 = arith.truncf %341 : vector<8x128xf32> to vector<8x128xbf16>
    %c56_63 = arith.constant 56 : index
    %c0_64 = arith.constant 0 : index
    %343 = vector.load %arg10[%c56_63, %c0_64] : memref<64x256xbf16, #tpu.memory_space<vmem>>, vector<8x128xbf16>
    tpu.vector_store %arg10[%c56_63, %c0_64], %342 {strides = array<i32>} : memref<64x256xbf16, #tpu.memory_space<vmem>>, vector<8x128xbf16>,
    %344 = vector.extract_strided_slice %9 {offsets = [0, 0], sizes = [8, 512], strides = [1, 1]} : vector<64x512xf32> to vector<8x512xf32>
    %345 = arith.truncf %319 : vector<8x128xf32> to vector<8x128xbf16>
    %cst_65 = arith.constant dense<0.000000e+00> : vector<8x512xf32>
    %346 = tpu.matmul %345, %4, %cst_65 {dimension_numbers = #tpu.dot_dimension_numbers<[1], [0], [0], [1], [0, 0, 1, 1], [], []>} : vector<8x128xbf16>, vector<128x512xbf16>, vector<8x512xf32> -> vector<8x512xf32>
    %347 = arith.addf %346, %344 : vector<8x512xf32>
    %348 = vector.extract_strided_slice %347 {offsets = [0, 0], sizes = [8, 384], strides = [1, 1]} : vector<8x512xf32> to vector<8x384xf32>
    %349 = arith.negf %348 : vector<8x384xf32>
    %350 = math.exp %349 : vector<8x384xf32>
    %cst_66 = arith.constant 1.000000e+00 : f32
    %351 = vector.broadcast %cst_66 : f32 to vector<8x384xf32>
    %352 = arith.addf %351, %350 : vector<8x384xf32>
    %353 = arith.divf %351, %352 : vector<8x384xf32>
    %354 = vector.extract_strided_slice %353 {offsets = [0, 0], sizes = [8, 128], strides = [1, 1]} : vector<8x384xf32> to vector<8x128xf32>
    %355 = vector.extract_strided_slice %353 {offsets = [0, 128], sizes = [8, 128], strides = [1, 1]} : vector<8x384xf32> to vector<8x128xf32>
    %356 = vector.extract_strided_slice %353 {offsets = [0, 256], sizes = [8, 128], strides = [1, 1]} : vector<8x384xf32> to vector<8x128xf32>
    %357 = vector.extract_strided_slice %347 {offsets = [0, 384], sizes = [8, 128], strides = [1, 1]} : vector<8x512xf32> to vector<8x128xf32>
    %358 = math.tanh %357 : vector<8x128xf32>
    %359 = arith.mulf %355, %317 : vector<8x128xf32>
    %360 = arith.mulf %354, %358 : vector<8x128xf32>
    %361 = arith.addf %359, %360 : vector<8x128xf32>
    %362 = math.tanh %361 : vector<8x128xf32>
    %363 = arith.mulf %356, %362 : vector<8x128xf32>
    %364 = arith.truncf %363 : vector<8x128xf32> to vector<8x128xbf16>
    %c0_67 = arith.constant 0 : index
    %c128_68 = arith.constant 128 : index
    %365 = vector.load %arg10[%c0_67, %c128_68] : memref<64x256xbf16, #tpu.memory_space<vmem>>, vector<8x128xbf16>
    tpu.vector_store %arg10[%c0_67, %c128_68], %364 {strides = array<i32>} : memref<64x256xbf16, #tpu.memory_space<vmem>>, vector<8x128xbf16>,
    %c0_69 = arith.constant 0 : index
    %c0_70 = arith.constant 0 : index
    %366 = vector.load %arg10[%c0_69, %c0_70] : memref<64x256xbf16, #tpu.memory_space<vmem>>, vector<64x256xbf16>
    %c0_71 = arith.constant 0 : index
    %c0_72 = arith.constant 0 : index
    %367 = vector.load %arg5[%c0_71, %c0_72] : memref<256x1024xbf16, #tpu.memory_space<vmem>>, vector<256x1024xbf16>
    %c0_73 = arith.constant 0 : index
    %c0_74 = arith.constant 0 : index
    %368 = vector.load %arg6[%c0_73, %c0_74] : memref<1x1024xf32, #tpu.memory_space<vmem>>, vector<1x1024xf32>
    %c0_75 = arith.constant 0 : index
    %c0_76 = arith.constant 0 : index
    %369 = vector.load %arg7[%c0_75, %c0_76] : memref<128x512xbf16, #tpu.memory_space<vmem>>, vector<128x512xbf16>
    %c0_77 = arith.constant 0 : index
    %c0_78 = arith.constant 0 : index
    %370 = vector.load %arg8[%c0_77, %c0_78] : memref<128x512xbf16, #tpu.memory_space<vmem>>, vector<128x512xbf16>
    %cst_79 = arith.constant dense<0.000000e+00> : vector<64x1024xf32>
    %371 = tpu.matmul %366, %367, %cst_79 {dimension_numbers = #tpu.dot_dimension_numbers<[1], [0], [0], [1], [0, 0, 1, 1], [], []>} : vector<64x256xbf16>, vector<256x1024xbf16>, vector<64x1024xf32> -> vector<64x1024xf32>
    %372 = vector.broadcast %368 : vector<1x1024xf32> to vector<64x1024xf32>
    %373 = arith.addf %371, %372 : vector<64x1024xf32>
    %374 = vector.extract_strided_slice %373 {offsets = [0, 0], sizes = [64, 512], strides = [1, 1]} : vector<64x1024xf32> to vector<64x512xf32>
    %375 = vector.extract_strided_slice %373 {offsets = [0, 512], sizes = [64, 512], strides = [1, 1]} : vector<64x1024xf32> to vector<64x512xf32>
    %cst_80 = arith.constant 0.000000e+00 : f32
    %376 = vector.broadcast %cst_80 : f32 to vector<8x128xf32>
    %cst_81 = arith.constant 0.000000e+00 : f32
    %377 = vector.broadcast %cst_81 : f32 to vector<8x128xf32>
    %cst_82 = arith.constant 0.000000e+00 : f32
    %378 = vector.broadcast %cst_82 : f32 to vector<8x128xf32>
    %cst_83 = arith.constant 0.000000e+00 : f32
    %379 = vector.broadcast %cst_83 : f32 to vector<8x128xf32>
    %380 = vector.extract_strided_slice %375 {offsets = [56, 0], sizes = [8, 512], strides = [1, 1]} : vector<64x512xf32> to vector<8x512xf32>
    %381 = arith.truncf %378 : vector<8x128xf32> to vector<8x128xbf16>
    %cst_84 = arith.constant dense<0.000000e+00> : vector<8x512xf32>
    %382 = tpu.matmul %381, %370, %cst_84 {dimension_numbers = #tpu.dot_dimension_numbers<[1], [0], [0], [1], [0, 0, 1, 1], [], []>} : vector<8x128xbf16>, vector<128x512xbf16>, vector<8x512xf32> -> vector<8x512xf32>
    %383 = arith.addf %382, %380 : vector<8x512xf32>
    %384 = vector.extract_strided_slice %383 {offsets = [0, 0], sizes = [8, 384], strides = [1, 1]} : vector<8x512xf32> to vector<8x384xf32>
    %385 = arith.negf %384 : vector<8x384xf32>
    %386 = math.exp %385 : vector<8x384xf32>
    %cst_85 = arith.constant 1.000000e+00 : f32
    %387 = vector.broadcast %cst_85 : f32 to vector<8x384xf32>
    %388 = arith.addf %387, %386 : vector<8x384xf32>
    %389 = arith.divf %387, %388 : vector<8x384xf32>
    %390 = vector.extract_strided_slice %389 {offsets = [0, 0], sizes = [8, 128], strides = [1, 1]} : vector<8x384xf32> to vector<8x128xf32>
    %391 = vector.extract_strided_slice %389 {offsets = [0, 128], sizes = [8, 128], strides = [1, 1]} : vector<8x384xf32> to vector<8x128xf32>
    %392 = vector.extract_strided_slice %389 {offsets = [0, 256], sizes = [8, 128], strides = [1, 1]} : vector<8x384xf32> to vector<8x128xf32>
    %393 = vector.extract_strided_slice %383 {offsets = [0, 384], sizes = [8, 128], strides = [1, 1]} : vector<8x512xf32> to vector<8x128xf32>
    %394 = math.tanh %393 : vector<8x128xf32>
    %395 = arith.mulf %391, %379 : vector<8x128xf32>
    %396 = arith.mulf %390, %394 : vector<8x128xf32>
    %397 = arith.addf %395, %396 : vector<8x128xf32>
    %398 = math.tanh %397 : vector<8x128xf32>
    %399 = arith.mulf %392, %398 : vector<8x128xf32>
    %400 = vector.extract_strided_slice %374 {offsets = [0, 0], sizes = [8, 512], strides = [1, 1]} : vector<64x512xf32> to vector<8x512xf32>
    %401 = arith.truncf %376 : vector<8x128xf32> to vector<8x128xbf16>
    %cst_86 = arith.constant dense<0.000000e+00> : vector<8x512xf32>
    %402 = tpu.matmul %401, %369, %cst_86 {dimension_numbers = #tpu.dot_dimension_numbers<[1], [0], [0], [1], [0, 0, 1, 1], [], []>} : vector<8x128xbf16>, vector<128x512xbf16>, vector<8x512xf32> -> vector<8x512xf32>
    %403 = arith.addf %402, %400 : vector<8x512xf32>
    %404 = vector.extract_strided_slice %403 {offsets = [0, 0], sizes = [8, 384], strides = [1, 1]} : vector<8x512xf32> to vector<8x384xf32>
    %405 = arith.negf %404 : vector<8x384xf32>
    %406 = math.exp %405 : vector<8x384xf32>
    %cst_87 = arith.constant 1.000000e+00 : f32
    %407 = vector.broadcast %cst_87 : f32 to vector<8x384xf32>
    %408 = arith.addf %407, %406 : vector<8x384xf32>
    %409 = arith.divf %407, %408 : vector<8x384xf32>
    %410 = vector.extract_strided_slice %409 {offsets = [0, 0], sizes = [8, 128], strides = [1, 1]} : vector<8x384xf32> to vector<8x128xf32>
    %411 = vector.extract_strided_slice %409 {offsets = [0, 128], sizes = [8, 128], strides = [1, 1]} : vector<8x384xf32> to vector<8x128xf32>
    %412 = vector.extract_strided_slice %409 {offsets = [0, 256], sizes = [8, 128], strides = [1, 1]} : vector<8x384xf32> to vector<8x128xf32>
    %413 = vector.extract_strided_slice %403 {offsets = [0, 384], sizes = [8, 128], strides = [1, 1]} : vector<8x512xf32> to vector<8x128xf32>
    %414 = math.tanh %413 : vector<8x128xf32>
    %415 = arith.mulf %411, %377 : vector<8x128xf32>
    %416 = arith.mulf %410, %414 : vector<8x128xf32>
    %417 = arith.addf %415, %416 : vector<8x128xf32>
    %418 = math.tanh %417 : vector<8x128xf32>
    %419 = arith.mulf %412, %418 : vector<8x128xf32>
    %420 = vector.extract_strided_slice %374 {offsets = [8, 0], sizes = [8, 512], strides = [1, 1]} : vector<64x512xf32> to vector<8x512xf32>
    %421 = arith.truncf %419 : vector<8x128xf32> to vector<8x128xbf16>
    %cst_88 = arith.constant dense<0.000000e+00> : vector<8x512xf32>
    %422 = tpu.matmul %421, %369, %cst_88 {dimension_numbers = #tpu.dot_dimension_numbers<[1], [0], [0], [1], [0, 0, 1, 1], [], []>} : vector<8x128xbf16>, vector<128x512xbf16>, vector<8x512xf32> -> vector<8x512xf32>
    %423 = arith.addf %422, %420 : vector<8x512xf32>
    %424 = vector.extract_strided_slice %423 {offsets = [0, 0], sizes = [8, 384], strides = [1, 1]} : vector<8x512xf32> to vector<8x384xf32>
    %425 = arith.negf %424 : vector<8x384xf32>
    %426 = math.exp %425 : vector<8x384xf32>
    %cst_89 = arith.constant 1.000000e+00 : f32
    %427 = vector.broadcast %cst_89 : f32 to vector<8x384xf32>
    %428 = arith.addf %427, %426 : vector<8x384xf32>
    %429 = arith.divf %427, %428 : vector<8x384xf32>
    %430 = vector.extract_strided_slice %429 {offsets = [0, 0], sizes = [8, 128], strides = [1, 1]} : vector<8x384xf32> to vector<8x128xf32>
    %431 = vector.extract_strided_slice %429 {offsets = [0, 128], sizes = [8, 128], strides = [1, 1]} : vector<8x384xf32> to vector<8x128xf32>
    %432 = vector.extract_strided_slice %429 {offsets = [0, 256], sizes = [8, 128], strides = [1, 1]} : vector<8x384xf32> to vector<8x128xf32>
    %433 = vector.extract_strided_slice %423 {offsets = [0, 384], sizes = [8, 128], strides = [1, 1]} : vector<8x512xf32> to vector<8x128xf32>
    %434 = math.tanh %433 : vector<8x128xf32>
    %435 = arith.mulf %431, %417 : vector<8x128xf32>
    %436 = arith.mulf %430, %434 : vector<8x128xf32>
    %437 = arith.addf %435, %436 : vector<8x128xf32>
    %438 = math.tanh %437 : vector<8x128xf32>
    %439 = arith.mulf %432, %438 : vector<8x128xf32>
    %440 = vector.extract_strided_slice %374 {offsets = [16, 0], sizes = [8, 512], strides = [1, 1]} : vector<64x512xf32> to vector<8x512xf32>
    %441 = arith.truncf %439 : vector<8x128xf32> to vector<8x128xbf16>
    %cst_90 = arith.constant dense<0.000000e+00> : vector<8x512xf32>
    %442 = tpu.matmul %441, %369, %cst_90 {dimension_numbers = #tpu.dot_dimension_numbers<[1], [0], [0], [1], [0, 0, 1, 1], [], []>} : vector<8x128xbf16>, vector<128x512xbf16>, vector<8x512xf32> -> vector<8x512xf32>
    %443 = arith.addf %442, %440 : vector<8x512xf32>
    %444 = vector.extract_strided_slice %443 {offsets = [0, 0], sizes = [8, 384], strides = [1, 1]} : vector<8x512xf32> to vector<8x384xf32>
    %445 = arith.negf %444 : vector<8x384xf32>
    %446 = math.exp %445 : vector<8x384xf32>
    %cst_91 = arith.constant 1.000000e+00 : f32
    %447 = vector.broadcast %cst_91 : f32 to vector<8x384xf32>
    %448 = arith.addf %447, %446 : vector<8x384xf32>
    %449 = arith.divf %447, %448 : vector<8x384xf32>
    %450 = vector.extract_strided_slice %449 {offsets = [0, 0], sizes = [8, 128], strides = [1, 1]} : vector<8x384xf32> to vector<8x128xf32>
    %451 = vector.extract_strided_slice %449 {offsets = [0, 128], sizes = [8, 128], strides = [1, 1]} : vector<8x384xf32> to vector<8x128xf32>
    %452 = vector.extract_strided_slice %449 {offsets = [0, 256], sizes = [8, 128], strides = [1, 1]} : vector<8x384xf32> to vector<8x128xf32>
    %453 = vector.extract_strided_slice %443 {offsets = [0, 384], sizes = [8, 128], strides = [1, 1]} : vector<8x512xf32> to vector<8x128xf32>
    %454 = math.tanh %453 : vector<8x128xf32>
    %455 = arith.mulf %451, %437 : vector<8x128xf32>
    %456 = arith.mulf %450, %454 : vector<8x128xf32>
    %457 = arith.addf %455, %456 : vector<8x128xf32>
    %458 = math.tanh %457 : vector<8x128xf32>
    %459 = arith.mulf %452, %458 : vector<8x128xf32>
    %460 = vector.extract_strided_slice %374 {offsets = [24, 0], sizes = [8, 512], strides = [1, 1]} : vector<64x512xf32> to vector<8x512xf32>
    %461 = arith.truncf %459 : vector<8x128xf32> to vector<8x128xbf16>
    %cst_92 = arith.constant dense<0.000000e+00> : vector<8x512xf32>
    %462 = tpu.matmul %461, %369, %cst_92 {dimension_numbers = #tpu.dot_dimension_numbers<[1], [0], [0], [1], [0, 0, 1, 1], [], []>} : vector<8x128xbf16>, vector<128x512xbf16>, vector<8x512xf32> -> vector<8x512xf32>
    %463 = arith.addf %462, %460 : vector<8x512xf32>
    %464 = vector.extract_strided_slice %463 {offsets = [0, 0], sizes = [8, 384], strides = [1, 1]} : vector<8x512xf32> to vector<8x384xf32>
    %465 = arith.negf %464 : vector<8x384xf32>
    %466 = math.exp %465 : vector<8x384xf32>
    %cst_93 = arith.constant 1.000000e+00 : f32
    %467 = vector.broadcast %cst_93 : f32 to vector<8x384xf32>
    %468 = arith.addf %467, %466 : vector<8x384xf32>
    %469 = arith.divf %467, %468 : vector<8x384xf32>
    %470 = vector.extract_strided_slice %469 {offsets = [0, 0], sizes = [8, 128], strides = [1, 1]} : vector<8x384xf32> to vector<8x128xf32>
    %471 = vector.extract_strided_slice %469 {offsets = [0, 128], sizes = [8, 128], strides = [1, 1]} : vector<8x384xf32> to vector<8x128xf32>
    %472 = vector.extract_strided_slice %469 {offsets = [0, 256], sizes = [8, 128], strides = [1, 1]} : vector<8x384xf32> to vector<8x128xf32>
    %473 = vector.extract_strided_slice %463 {offsets = [0, 384], sizes = [8, 128], strides = [1, 1]} : vector<8x512xf32> to vector<8x128xf32>
    %474 = math.tanh %473 : vector<8x128xf32>
    %475 = arith.mulf %471, %457 : vector<8x128xf32>
    %476 = arith.mulf %470, %474 : vector<8x128xf32>
    %477 = arith.addf %475, %476 : vector<8x128xf32>
    %478 = math.tanh %477 : vector<8x128xf32>
    %479 = arith.mulf %472, %478 : vector<8x128xf32>
    %480 = vector.extract_strided_slice %374 {offsets = [32, 0], sizes = [8, 512], strides = [1, 1]} : vector<64x512xf32> to vector<8x512xf32>
    %481 = arith.truncf %479 : vector<8x128xf32> to vector<8x128xbf16>
    %cst_94 = arith.constant dense<0.000000e+00> : vector<8x512xf32>
    %482 = tpu.matmul %481, %369, %cst_94 {dimension_numbers = #tpu.dot_dimension_numbers<[1], [0], [0], [1], [0, 0, 1, 1], [], []>} : vector<8x128xbf16>, vector<128x512xbf16>, vector<8x512xf32> -> vector<8x512xf32>
    %483 = arith.addf %482, %480 : vector<8x512xf32>
    %484 = vector.extract_strided_slice %483 {offsets = [0, 0], sizes = [8, 384], strides = [1, 1]} : vector<8x512xf32> to vector<8x384xf32>
    %485 = arith.negf %484 : vector<8x384xf32>
    %486 = math.exp %485 : vector<8x384xf32>
    %cst_95 = arith.constant 1.000000e+00 : f32
    %487 = vector.broadcast %cst_95 : f32 to vector<8x384xf32>
    %488 = arith.addf %487, %486 : vector<8x384xf32>
    %489 = arith.divf %487, %488 : vector<8x384xf32>
    %490 = vector.extract_strided_slice %489 {offsets = [0, 0], sizes = [8, 128], strides = [1, 1]} : vector<8x384xf32> to vector<8x128xf32>
    %491 = vector.extract_strided_slice %489 {offsets = [0, 128], sizes = [8, 128], strides = [1, 1]} : vector<8x384xf32> to vector<8x128xf32>
    %492 = vector.extract_strided_slice %489 {offsets = [0, 256], sizes = [8, 128], strides = [1, 1]} : vector<8x384xf32> to vector<8x128xf32>
    %493 = vector.extract_strided_slice %483 {offsets = [0, 384], sizes = [8, 128], strides = [1, 1]} : vector<8x512xf32> to vector<8x128xf32>
    %494 = math.tanh %493 : vector<8x128xf32>
    %495 = arith.mulf %491, %477 : vector<8x128xf32>
    %496 = arith.mulf %490, %494 : vector<8x128xf32>
    %497 = arith.addf %495, %496 : vector<8x128xf32>
    %498 = math.tanh %497 : vector<8x128xf32>
    %499 = arith.mulf %492, %498 : vector<8x128xf32>
    %500 = vector.extract_strided_slice %374 {offsets = [40, 0], sizes = [8, 512], strides = [1, 1]} : vector<64x512xf32> to vector<8x512xf32>
    %501 = arith.truncf %499 : vector<8x128xf32> to vector<8x128xbf16>
    %cst_96 = arith.constant dense<0.000000e+00> : vector<8x512xf32>
    %502 = tpu.matmul %501, %369, %cst_96 {dimension_numbers = #tpu.dot_dimension_numbers<[1], [0], [0], [1], [0, 0, 1, 1], [], []>} : vector<8x128xbf16>, vector<128x512xbf16>, vector<8x512xf32> -> vector<8x512xf32>
    %503 = arith.addf %502, %500 : vector<8x512xf32>
    %504 = vector.extract_strided_slice %503 {offsets = [0, 0], sizes = [8, 384], strides = [1, 1]} : vector<8x512xf32> to vector<8x384xf32>
    %505 = arith.negf %504 : vector<8x384xf32>
    %506 = math.exp %505 : vector<8x384xf32>
    %cst_97 = arith.constant 1.000000e+00 : f32
    %507 = vector.broadcast %cst_97 : f32 to vector<8x384xf32>
    %508 = arith.addf %507, %506 : vector<8x384xf32>
    %509 = arith.divf %507, %508 : vector<8x384xf32>
    %510 = vector.extract_strided_slice %509 {offsets = [0, 0], sizes = [8, 128], strides = [1, 1]} : vector<8x384xf32> to vector<8x128xf32>
    %511 = vector.extract_strided_slice %509 {offsets = [0, 128], sizes = [8, 128], strides = [1, 1]} : vector<8x384xf32> to vector<8x128xf32>
    %512 = vector.extract_strided_slice %509 {offsets = [0, 256], sizes = [8, 128], strides = [1, 1]} : vector<8x384xf32> to vector<8x128xf32>
    %513 = vector.extract_strided_slice %503 {offsets = [0, 384], sizes = [8, 128], strides = [1, 1]} : vector<8x512xf32> to vector<8x128xf32>
    %514 = math.tanh %513 : vector<8x128xf32>
    %515 = arith.mulf %511, %497 : vector<8x128xf32>
    %516 = arith.mulf %510, %514 : vector<8x128xf32>
    %517 = arith.addf %515, %516 : vector<8x128xf32>
    %518 = math.tanh %517 : vector<8x128xf32>
    %519 = arith.mulf %512, %518 : vector<8x128xf32>
    %520 = vector.extract_strided_slice %374 {offsets = [48, 0], sizes = [8, 512], strides = [1, 1]} : vector<64x512xf32> to vector<8x512xf32>
    %521 = arith.truncf %519 : vector<8x128xf32> to vector<8x128xbf16>
    %cst_98 = arith.constant dense<0.000000e+00> : vector<8x512xf32>
    %522 = tpu.matmul %521, %369, %cst_98 {dimension_numbers = #tpu.dot_dimension_numbers<[1], [0], [0], [1], [0, 0, 1, 1], [], []>} : vector<8x128xbf16>, vector<128x512xbf16>, vector<8x512xf32> -> vector<8x512xf32>
    %523 = arith.addf %522, %520 : vector<8x512xf32>
    %524 = vector.extract_strided_slice %523 {offsets = [0, 0], sizes = [8, 384], strides = [1, 1]} : vector<8x512xf32> to vector<8x384xf32>
    %525 = arith.negf %524 : vector<8x384xf32>
    %526 = math.exp %525 : vector<8x384xf32>
    %cst_99 = arith.constant 1.000000e+00 : f32
    %527 = vector.broadcast %cst_99 : f32 to vector<8x384xf32>
    %528 = arith.addf %527, %526 : vector<8x384xf32>
    %529 = arith.divf %527, %528 : vector<8x384xf32>
    %530 = vector.extract_strided_slice %529 {offsets = [0, 0], sizes = [8, 128], strides = [1, 1]} : vector<8x384xf32> to vector<8x128xf32>
    %531 = vector.extract_strided_slice %529 {offsets = [0, 128], sizes = [8, 128], strides = [1, 1]} : vector<8x384xf32> to vector<8x128xf32>
    %532 = vector.extract_strided_slice %529 {offsets = [0, 256], sizes = [8, 128], strides = [1, 1]} : vector<8x384xf32> to vector<8x128xf32>
    %533 = vector.extract_strided_slice %523 {offsets = [0, 384], sizes = [8, 128], strides = [1, 1]} : vector<8x512xf32> to vector<8x128xf32>
    %534 = math.tanh %533 : vector<8x128xf32>
    %535 = arith.mulf %531, %517 : vector<8x128xf32>
    %536 = arith.mulf %530, %534 : vector<8x128xf32>
    %537 = arith.addf %535, %536 : vector<8x128xf32>
    %538 = math.tanh %537 : vector<8x128xf32>
    %539 = arith.mulf %532, %538 : vector<8x128xf32>
    %540 = vector.extract_strided_slice %374 {offsets = [56, 0], sizes = [8, 512], strides = [1, 1]} : vector<64x512xf32> to vector<8x512xf32>
    %541 = arith.truncf %539 : vector<8x128xf32> to vector<8x128xbf16>
    %cst_100 = arith.constant dense<0.000000e+00> : vector<8x512xf32>
    %542 = tpu.matmul %541, %369, %cst_100 {dimension_numbers = #tpu.dot_dimension_numbers<[1], [0], [0], [1], [0, 0, 1, 1], [], []>} : vector<8x128xbf16>, vector<128x512xbf16>, vector<8x512xf32> -> vector<8x512xf32>
    %543 = arith.addf %542, %540 : vector<8x512xf32>
    %544 = vector.extract_strided_slice %543 {offsets = [0, 0], sizes = [8, 384], strides = [1, 1]} : vector<8x512xf32> to vector<8x384xf32>
    %545 = arith.negf %544 : vector<8x384xf32>
    %546 = math.exp %545 : vector<8x384xf32>
    %cst_101 = arith.constant 1.000000e+00 : f32
    %547 = vector.broadcast %cst_101 : f32 to vector<8x384xf32>
    %548 = arith.addf %547, %546 : vector<8x384xf32>
    %549 = arith.divf %547, %548 : vector<8x384xf32>
    %550 = vector.extract_strided_slice %549 {offsets = [0, 0], sizes = [8, 128], strides = [1, 1]} : vector<8x384xf32> to vector<8x128xf32>
    %551 = vector.extract_strided_slice %549 {offsets = [0, 128], sizes = [8, 128], strides = [1, 1]} : vector<8x384xf32> to vector<8x128xf32>
    %552 = vector.extract_strided_slice %549 {offsets = [0, 256], sizes = [8, 128], strides = [1, 1]} : vector<8x384xf32> to vector<8x128xf32>
    %553 = vector.extract_strided_slice %543 {offsets = [0, 384], sizes = [8, 128], strides = [1, 1]} : vector<8x512xf32> to vector<8x128xf32>
    %554 = math.tanh %553 : vector<8x128xf32>
    %555 = arith.mulf %551, %537 : vector<8x128xf32>
    %556 = arith.mulf %550, %554 : vector<8x128xf32>
    %557 = arith.addf %555, %556 : vector<8x128xf32>
    %558 = math.tanh %557 : vector<8x128xf32>
    %559 = arith.mulf %552, %558 : vector<8x128xf32>
    %c0_102 = arith.constant 0 : index
    %c0_103 = arith.constant 0 : index
    %560 = vector.load %arg9[%c0_102, %c0_103] : memref<8x256xf32, #tpu.memory_space<vmem>>, vector<8x128xf32>
    tpu.vector_store %arg9[%c0_102, %c0_103], %559 {strides = array<i32>} : memref<8x256xf32, #tpu.memory_space<vmem>>, vector<8x128xf32>,
    %c0_104 = arith.constant 0 : index
    %c128_105 = arith.constant 128 : index
    %561 = vector.load %arg9[%c0_104, %c128_105] : memref<8x256xf32, #tpu.memory_space<vmem>>, vector<8x128xf32>
    tpu.vector_store %arg9[%c0_104, %c128_105], %399 {strides = array<i32>} : memref<8x256xf32, #tpu.memory_space<vmem>>, vector<8x128xf32>,
    return
  }
}

</mosaic_0001>

<bundles_post_ra>
// kernel: bilstm_forward.1
= control target key start
LH: loop header
LB: loop body
LE: loop exit
PB: predicated region body
PF: predicated region fallthrough
CT: control target
= control target key end

     0   :  { %14 = vsyncpa [#allocation4], 0  ;;  %s8777_s0 = inlined_call_operand.vmem [shape: bf16[64,128], index: 0, kind: input, shape index: {}]   ;;  %s8778_s1 = inlined_call_operand.hbm [shape: bf16[128,1024], index: 1, kind: input, shape index: {}]   ;;  %s8779_s2 = inlined_call_operand.vmem [shape: f32[1,1024], index: 2, kind: input, shape index: {}]   ;;  %s8780_s3 = inlined_call_operand.hbm [shape: bf16[128,512], index: 3, kind: input, shape index: {}]   ;;  %s8781_s4 = inlined_call_operand.hbm [shape: bf16[128,512], index: 4, kind: input, shape index: {}]   ;;  %s8782_s5 = inlined_call_operand.hbm [shape: bf16[256,1024], index: 5, kind: input, shape index: {}]   ;;  %s8783_s6 = inlined_call_operand.vmem [shape: f32[1,1024], index: 6, kind: input, shape index: {}]   ;;  %s8784_s7 = inlined_call_operand.hbm [shape: bf16[128,512], index: 7, kind: input, shape index: {}]   ;;  %s8785_s8 = inlined_call_operand.hbm [shape: bf16[128,512], index: 8, kind: input, shape index: {}]   ;;  %s8786_s9 = inlined_call_operand.hbm [shape: f32[8,256], index: 9, kind: output, shape index: {}]  }
   0x1   :  { %15 = vsyncpa [#allocation7], 0 }
   0x2   :  { %16 = vsyncpa [#allocation10], 0 }
   0x3   :  { %17 = vsyncpa [#allocation13], 0 }
   0x4   :  { %18 = vsyncpa [#allocation5], 0  ;;  %s6780_s30 = smov [#allocation6]   ;;  %s6616_s13 = scalar_lea.hbm %s8780_s3, 4096 }
   0x5   :  { %s40_s10 = sshll.u32 %s6780_s30, 4  ;;  %p6617_p0 = scmp.ne.s32.totalorder %s8780_s3, %s6616_s13  ;;  %s41_s10 = int_to_ptr.vmem [resolvable:$true] %s40_s10 }
   0x6   :  { %p6620_p1 = scmp.lt.u32.totalorder %s6616_s13, %s8780_s3 }
   0x8   :  { %p6622_p2 = pnand %p6620_p1, %p6617_p0 }
   0xa   :  { %6625 = shalt.err (!%p6622_p2)
}
   0xb   :  { %s6626_s18 = scalar_lea.vmem %s41_s10, 4096  ;;  %p6631_p4 = scmp.lt.s32.totalorder %s41_s10, %s41_s10 }
   0xc   :  { %p6627_p3 = scmp.ne.s32.totalorder %s41_s10, %s6626_s18  ;;  %p6632_p5 = scmp.lt.s32.totalorder %s6626_s18, %s6626_s18 }
   0xe   :  { %p6633_p6 = por %p6632_p5, %p6631_p4 }
  0x10   :  { %p6634_p7 = pnand %p6633_p6, %p6627_p3 }
  0x12   :  { %6637 = shalt.err (!%p6634_p7)
}
  0x13   :  { %s6781_s19 = smov 256   ;;  %s6782_s20 = smov 16  }
  0x14   :  { %46 = dma.hbm_to_vmem [thread:$0]  %s8780_s3, 4096, %s41_s10, [#allocation7], %s6781_s19, %s6781_s19, %s6782_s20  }
  0x15   :  { %s6783_s23 = smov [#allocation9]   ;;  %s6784_s25 = smov [#allocation3]  }
  0x16   :  { %s64_s24 = sshll.u32 %s6783_s23, 4  ;;  %s26_s26 = sshll.u32 %s6784_s25, 4  ;;  %s65_s24 = int_to_ptr.vmem [resolvable:$true] %s64_s24  ;;  %s27_s26 = int_to_ptr.vmem [resolvable:$true] %s26_s26 }
  0x17   :  { %s6638_s29 = scalar_lea.hbm %s8782_s5, 16384 }
  0x18   :  { %p6639_p8 = scmp.ne.s32.totalorder %s8782_s5, %s6638_s29  ;;  %p6642_p9 = scmp.lt.u32.totalorder %s6638_s29, %s8782_s5 }
  0x1a   :  { %p6644_p10 = pnand %p6642_p9, %p6639_p8 }
  0x1c   :  { %6647 = shalt.err (!%p6644_p10)
}
  0x1d   :  { %s6648_s3 = scalar_lea.vmem %s65_s24, 16384  ;;  %p6653_p12 = scmp.lt.s32.totalorder %s65_s24, %s65_s24 }
  0x1e   :  { %p6649_p11 = scmp.ne.s32.totalorder %s65_s24, %s6648_s3  ;;  %p6654_p13 = scmp.lt.s32.totalorder %s6648_s3, %s6648_s3 }
  0x20   :  { %p6655_p0 = por %p6654_p13, %p6653_p12 }
  0x22   :  { %p6656_p1 = pnand %p6655_p0, %p6649_p11 }
  0x24   :  { %6659 = shalt.err (!%p6656_p1)
}
  0x25   :  { %s6785_s10 = smov 512   ;;  %s6786_s14 = smov 32  }
  0x26   :  { %70 = dma.hbm_to_vmem [thread:$0]  %s8782_s5, 16384, %s65_s24, [#allocation10], %s6785_s10, %s6785_s10, %s6786_s14  }
  0x27   :  { %s6660_s21 = scalar_lea.hbm %s8778_s1, 8192 }
  0x28   :  { %p6661_p2 = scmp.ne.s32.totalorder %s8778_s1, %s6660_s21  ;;  %p6664_p3 = scmp.lt.u32.totalorder %s6660_s21, %s8778_s1 }
  0x2a   :  { %p6666_p4 = pnand %p6664_p3, %p6661_p2 }
  0x2c   :  { %6669 = shalt.err (!%p6666_p4)
}
  0x2d   :  { %s6670_s28 = scalar_lea.vmem %s27_s26, 8192  ;;  %p6675_p6 = scmp.lt.s32.totalorder %s27_s26, %s27_s26 }
  0x2e   :  { %p6671_p5 = scmp.ne.s32.totalorder %s27_s26, %s6670_s28  ;;  %p6676_p7 = scmp.lt.s32.totalorder %s6670_s28, %s6670_s28 }
  0x30   :  { %p6677_p8 = por %p6676_p7, %p6675_p6 }
  0x32   :  { %p6678_p9 = pnand %p6677_p8, %p6671_p5 }
  0x34   :  { %6681 = shalt.err (!%p6678_p9)
}
  0x35   :  { %32 = dma.hbm_to_vmem [thread:$0]  %s8778_s1, 8192, %s27_s26, [#allocation4], %s6785_s10, %s6785_s10, %s6786_s14  }
  0x36   :  { %s6787_s29 = smov [#allocation8]   ;;  %s6788_s11 = smov [#allocation11]  }
  0x37   :  { %s52_s30 = sshll.u32 %s6787_s29, 4  ;;  %s78_s12 = sshll.u32 %s6788_s11, 4  ;;  %s53_s30 = int_to_ptr.vmem [resolvable:$true] %s52_s30  ;;  %s79_s12 = int_to_ptr.vmem [resolvable:$true] %s78_s12 }
  0x38   :  { %s6682_s15 = scalar_lea.hbm %s8781_s4, 4096 }
  0x39   :  { %p6683_p10 = scmp.ne.s32.totalorder %s8781_s4, %s6682_s15  ;;  %p6686_p11 = scmp.lt.u32.totalorder %s6682_s15, %s8781_s4 }
  0x3b   :  { %p6688_p12 = pnand %p6686_p11, %p6683_p10 }
  0x3d   :  { %6691 = shalt.err (!%p6688_p12)
}
  0x3e   :  { %s6692_s1 = scalar_lea.vmem %s53_s30, 4096  ;;  %p6697_p0 = scmp.lt.s32.totalorder %s53_s30, %s53_s30 }
  0x3f   :  { %p6693_p13 = scmp.ne.s32.totalorder %s53_s30, %s6692_s1  ;;  %p6698_p1 = scmp.lt.s32.totalorder %s6692_s1, %s6692_s1 }
  0x41   :  { %p6699_p2 = por %p6698_p1, %p6697_p0 }
  0x43   :  { %p6700_p3 = pnand %p6699_p2, %p6693_p13 }
  0x45   :  { %6703 = shalt.err (!%p6700_p3)
}
  0x46   :  { %58 = dma.hbm_to_vmem [thread:$0]  %s8781_s4, 4096, %s53_s30, [#allocation7], %s6781_s19, %s6781_s19, %s6782_s20  }
  0x47   :  { %s6704_s23 = scalar_lea.hbm %s8784_s7, 4096 }
  0x48   :  { %p6705_p4 = scmp.ne.s32.totalorder %s8784_s7, %s6704_s23  ;;  %p6708_p5 = scmp.lt.u32.totalorder %s6704_s23, %s8784_s7 }
  0x4a   :  { %p6710_p6 = pnand %p6708_p5, %p6705_p4 }
  0x4c   :  { %6713 = shalt.err (!%p6710_p6)
}
  0x4d   :  { %s6714_s24 = scalar_lea.vmem %s79_s12, 4096  ;;  %p6719_p8 = scmp.lt.s32.totalorder %s79_s12, %s79_s12 }
  0x4e   :  { %p6715_p7 = scmp.ne.s32.totalorder %s79_s12, %s6714_s24  ;;  %p6720_p9 = scmp.lt.s32.totalorder %s6714_s24, %s6714_s24 }
  0x50   :  { %p6721_p10 = por %p6720_p9, %p6719_p8 }
  0x52   :  { %p6722_p11 = pnand %p6721_p10, %p6715_p7 }
  0x54   :  { %6725 = shalt.err (!%p6722_p11)
}
  0x55   :  { %84 = dma.hbm_to_vmem [thread:$0]  %s8784_s7, 4096, %s79_s12, [#allocation10], %s6781_s19, %s6781_s19, %s6782_s20  }
  0x56   :  { %s6789_s30 = smov [#allocation12]   ;;  %s6726_s15 = scalar_lea.hbm %s8785_s8, 4096 }
  0x57   :  { %s90_s11 = sshll.u32 %s6789_s30, 4  ;;  %p6727_p12 = scmp.ne.s32.totalorder %s8785_s8, %s6726_s15  ;;  %s91_s11 = int_to_ptr.vmem [resolvable:$true] %s90_s11 }
  0x58   :  { %p6730_p13 = scmp.lt.u32.totalorder %s6726_s15, %s8785_s8 }
  0x5a   :  { %p6732_p0 = pnand %p6730_p13, %p6727_p12 }
  0x5c   :  { %6735 = shalt.err (!%p6732_p0)
}
  0x5d   :  { %s6736_s1 = scalar_lea.vmem %s91_s11, 4096  ;;  %p6741_p2 = scmp.lt.s32.totalorder %s91_s11, %s91_s11 }
  0x5e   :  { %p6737_p1 = scmp.ne.s32.totalorder %s91_s11, %s6736_s1  ;;  %p6742_p3 = scmp.lt.s32.totalorder %s6736_s1, %s6736_s1 }
  0x60   :  { %p6743_p4 = por %p6742_p3, %p6741_p2 }
  0x62   :  { %p6744_p5 = pnand %p6743_p4, %p6737_p1 }
  0x64   :  { %6747 = shalt.err (!%p6744_p5)
}
  0x65   :  { %96 = dma.hbm_to_vmem [thread:$0]  %s8785_s8, 4096, %s91_s11, [#allocation13], %s6781_s19, %s6781_s19, %s6782_s20  }
  0x66   :  { %6770 = dma.done.wait [#allocation4], 8192  }
  0x67   :  { %6771 = vsyncadd [#allocation4], 4294959104 }
  0x68   :  { %6772 = dma.done.wait [#allocation7], 8192  }
  0x69   :  { %6773 = vsyncadd [#allocation7], 4294959104 }
  0x6a   :  { %6774 = dma.done.wait [#allocation10], 20480  }
  0x6b   :  { %6775 = vsyncadd [#allocation10], 4294946816 }
  0x6c   :  { %6776 = dma.done.wait [#allocation13], 4096  }
  0x6d   :  { %6777 = vsyncadd [#allocation13], 4294963200  ;;  %v8787_v0 = vmov 0   ;;  %v124_v1 = vld [vmem:[#allocation3] sm:$0xff]  ;;  %v125_v3 = vld [vmem:[#allocation3 + $0x8] sm:$0xff] }
  0x6e   :  { %670 = vmatprep.mubr.bf16.mxu0 %v8787_v0  ;;  %743 = vmatprep.mubr.bf16.mxu1 %v8787_v0  ;;  %v128_v2 = vld [vmem:[#allocation3 + $0x20] sm:$0xff]  ;;  %v129_v5 = vld [vmem:[#allocation3 + $0x28] sm:$0xff]  ;;  %v126_v62 = vld [vmem:[#allocation3 + $0x10] sm:$0xff] }
  0x6f   :  { %v5454_v4 = vcombine.high %v124_v1, %v128_v2  ;;  %v5453_v6 = vcombine.low %v124_v1, %v128_v2  ;;  %v132_v7 = vld [vmem:[#allocation3 + $0x40] sm:$0xff]  ;;  %v5456_v9 = vcombine.high %v125_v3, %v129_v5  ;;  %v5455_v10 = vcombine.low %v125_v3, %v129_v5  ;;  %v133_v12 = vld [vmem:[#allocation3 + $0x48] sm:$0xff]  ;;  %v130_v1 = vld [vmem:[#allocation3 + $0x30] sm:$0xff] }
  0x70   :  { %v136_v8 = vld [vmem:[#allocation3 + $0x60] sm:$0xff]  ;;  %v137_v13 = vld [vmem:[#allocation3 + $0x68] sm:$0xff]  ;;  %v127_v2 = vld [vmem:[#allocation3 + $0x18] sm:$0xff] }
  0x71   :  { %v5462_v11 = vcombine.high %v132_v7, %v136_v8  ;;  %v140_v14 = vld [vmem:[#allocation3 + $0x80] sm:$0xff]  ;;  %638 = vmatprep.subr.bf16.mxu0 %v5454_v4  ;;  %v5464_v15 = vcombine.high %v133_v12, %v137_v13  ;;  %v141_v17 = vld [vmem:[#allocation3 + $0x88] sm:$0xff]  ;;  %711 = vmatprep.subr.bf16.mxu1 %v5456_v9  ;;  %v5461_v19 = vcombine.low %v132_v7, %v136_v8  ;;  %v131_v3 = vld [vmem:[#allocation3 + $0x38] sm:$0xff] }
  0x72   :  { %v144_v16 = vld [vmem:[#allocation3 + $0xa0] sm:$0xff]  ;;  %v145_v18 = vld [vmem:[#allocation3 + $0xa8] sm:$0xff]  ;;  %639 = vmatpush1.bf16.msra.mxu0 %v5453_v6  ;;  %712 = vmatpush1.bf16.msra.mxu1 %v5455_v10  ;;  %v5463_v20 = vcombine.low %v133_v12, %v137_v13  ;;  %v5458_v7 = vcombine.high %v126_v62, %v130_v1  ;;  %v134_v8 = vld [vmem:[#allocation3 + $0x50] sm:$0xff]  ;;  %v5460_v9 = vcombine.high %v127_v2, %v131_v3 }
  0x73   :  { %640 = vmatprep.subr.bf16.mxu0 %v5462_v11  ;;  %v5470_v21 = vcombine.high %v140_v14, %v144_v16  ;;  %713 = vmatprep.subr.bf16.mxu1 %v5464_v15  ;;  %v5472_v22 = vcombine.high %v141_v17, %v145_v18  ;;  %v148_v23 = vld [vmem:[#allocation3 + $0xc0] sm:$0xff]  ;;  %v149_v25 = vld [vmem:[#allocation3 + $0xc8] sm:$0xff]  ;;  %v5469_v27 = vcombine.low %v140_v14, %v144_v16  ;;  %v138_v10 = vld [vmem:[#allocation3 + $0x70] sm:$0xff] }
  0x74   :  { %v152_v24 = vld [vmem:[#allocation3 + $0xe0] sm:$0xff]  ;;  %v153_v26 = vld [vmem:[#allocation3 + $0xe8] sm:$0xff]  ;;  %v5471_v28 = vcombine.low %v141_v17, %v145_v18  ;;  %v135_v11 = vld [vmem:[#allocation3 + $0x58] sm:$0xff]  ;;  %v5457_v13 = vcombine.low %v126_v62, %v130_v1  ;;  %v5459_v14 = vcombine.low %v127_v2, %v131_v3  ;;  %v5466_v15 = vcombine.high %v134_v8, %v138_v10 }
  0x75   :  { %v5478_v29 = vcombine.high %v148_v23, %v152_v24  ;;  %v5480_v30 = vcombine.high %v149_v25, %v153_v26  ;;  %v156_v31 = vld [vmem:[#allocation3 + $0x100] sm:$0xff]  ;;  %v157_v33 = vld [vmem:[#allocation3 + $0x108] sm:$0xff]  ;;  %v5477_v35 = vcombine.low %v148_v23, %v152_v24  ;;  %v5479_v36 = vcombine.low %v149_v25, %v153_v26  ;;  %v139_v12 = vld [vmem:[#allocation3 + $0x78] sm:$0xff] }
  0x76   :  { %641 = vmatpush1.bf16.msra.mxu0 %v5461_v19  ;;  %714 = vmatpush1.bf16.msra.mxu1 %v5463_v20  ;;  %v160_v32 = vld [vmem:[#allocation3 + $0x120] sm:$0xff]  ;;  %v161_v34 = vld [vmem:[#allocation3 + $0x128] sm:$0xff]  ;;  %v142_v16 = vld [vmem:[#allocation3 + $0x90] sm:$0xff]  ;;  %v5468_v17 = vcombine.high %v135_v11, %v139_v12 }
  0x77   :  { %642 = vmatprep.subr.bf16.mxu0 %v5470_v21  ;;  %715 = vmatprep.subr.bf16.mxu1 %v5472_v22  ;;  %v5486_v37 = vcombine.high %v156_v31, %v160_v32  ;;  %v164_v38 = vld [vmem:[#allocation3 + $0x140] sm:$0xff]  ;;  %v5488_v39 = vcombine.high %v157_v33, %v161_v34  ;;  %v165_v41 = vld [vmem:[#allocation3 + $0x148] sm:$0xff]  ;;  %v5485_v43 = vcombine.low %v156_v31, %v160_v32  ;;  %v146_v18 = vld [vmem:[#allocation3 + $0xb0] sm:$0xff] }
  0x78   :  { %v168_v40 = vld [vmem:[#allocation3 + $0x160] sm:$0xff]  ;;  %v169_v42 = vld [vmem:[#allocation3 + $0x168] sm:$0xff]  ;;  %v5487_v44 = vcombine.low %v157_v33, %v161_v34  ;;  %v143_v19 = vld [vmem:[#allocation3 + $0x98] sm:$0xff]  ;;  %v5465_v21 = vcombine.low %v134_v8, %v138_v10  ;;  %v5467_v22 = vcombine.low %v135_v11, %v139_v12  ;;  %v5474_v24 = vcombine.high %v142_v16, %v146_v18 }
  0x79   :  { %v5494_v45 = vcombine.high %v164_v38, %v168_v40  ;;  %v172_v46 = vld [vmem:[#allocation3 + $0x180] sm:$0xff]  ;;  %v5496_v47 = vcombine.high %v165_v41, %v169_v42  ;;  %v173_v49 = vld [vmem:[#allocation3 + $0x188] sm:$0xff]  ;;  %v5493_v51 = vcombine.low %v164_v38, %v168_v40  ;;  %v5495_v52 = vcombine.low %v165_v41, %v169_v42  ;;  %v147_v20 = vld [vmem:[#allocation3 + $0xb8] sm:$0xff] }
  0x7a   :  { %643 = vmatpush1.bf16.msra.mxu0 %v5469_v27  ;;  %716 = vmatpush1.bf16.msra.mxu1 %v5471_v28  ;;  %v176_v48 = vld [vmem:[#allocation3 + $0x1a0] sm:$0xff]  ;;  %v177_v50 = vld [vmem:[#allocation3 + $0x1a8] sm:$0xff]  ;;  %v150_v25 = vld [vmem:[#allocation3 + $0xd0] sm:$0xff]  ;;  %v5476_v26 = vcombine.high %v143_v19, %v147_v20  ;;  %v5475_v31 = vcombine.low %v143_v19, %v147_v20 }
  0x7b   :  { %644 = vmatprep.subr.bf16.mxu0 %v5478_v29  ;;  %717 = vmatprep.subr.bf16.mxu1 %v5480_v30  ;;  %v5502_v53 = vcombine.high %v172_v46, %v176_v48  ;;  %v5504_v54 = vcombine.high %v173_v49, %v177_v50  ;;  %v180_v55 = vld [vmem:[#allocation3 + $0x1c0] sm:$0xff]  ;;  %v181_v57 = vld [vmem:[#allocation3 + $0x1c8] sm:$0xff]  ;;  %v5501_v59 = vcombine.low %v172_v46, %v176_v48  ;;  %v154_v27 = vld [vmem:[#allocation3 + $0xf0] sm:$0xff] }
  0x7c   :  { %v184_v56 = vld [vmem:[#allocation3 + $0x1e0] sm:$0xff]  ;;  %v185_v58 = vld [vmem:[#allocation3 + $0x1e8] sm:$0xff]  ;;  %v5503_v60 = vcombine.low %v173_v49, %v177_v50  ;;  %v151_v28 = vld [vmem:[#allocation3 + $0xd8] sm:$0xff]  ;;  %v5473_v30 = vcombine.low %v142_v16, %v146_v18  ;;  %v5482_v32 = vcombine.high %v150_v25, %v154_v27  ;;  %v5481_v38 = vcombine.low %v150_v25, %v154_v27 }
  0x7d   :  { %v5510_v61 = vcombine.high %v180_v55, %v184_v56  ;;  %v5512_v63 = vcombine.high %v181_v57, %v185_v58  ;;  %v5509_v4 = vcombine.low %v180_v55, %v184_v56  ;;  %v5511_v5 = vcombine.low %v181_v57, %v185_v58  ;;  %v6931_v6 = vld [vmem:[%s8777_s0] sm:$0xff]   ;;  %v6938_v23 = vld [vmem:[%s8777_s0 + $0x8] sm:$0xff]   ;;  %v155_v29 = vld [vmem:[#allocation3 + $0xf8] sm:$0xff] }
  0x7e   :  { %645 = vmatpush1.bf16.msra.mxu0 %v5477_v35  ;;  %718 = vmatpush1.bf16.msra.mxu1 %v5479_v36  ;;  %v158_v33 = vld [vmem:[#allocation3 + $0x110] sm:$0xff]  ;;  %v5484_v34 = vcombine.high %v151_v28, %v155_v29  ;;  %v159_v36 = vld [vmem:[#allocation3 + $0x118] sm:$0xff] }
  0x7f   :  { %646 = vmatprep.subr.bf16.mxu0 %v5486_v37  ;;  %719 = vmatprep.subr.bf16.mxu1 %v5488_v39  ;;  %v162_v35 = vld [vmem:[#allocation3 + $0x130] sm:$0xff]  ;;  %v163_v37 = vld [vmem:[#allocation3 + $0x138] sm:$0xff]  ;;  %v5483_v39 = vcombine.low %v151_v28, %v155_v29 }
  0x80   :  { %v6947_v40 = vld [vmem:[%s8777_s0 + $0x10] sm:$0xff]   ;;  %v5490_v41 = vcombine.high %v158_v33, %v162_v35  ;;  %v171_v46 = vld [vmem:[#allocation3 + $0x178] sm:$0xff]  ;;  %v5491_v48 = vcombine.low %v159_v36, %v163_v37 }
  0x81   :  { %v166_v42 = vld [vmem:[#allocation3 + $0x150] sm:$0xff]  ;;  %v6956_v57 = vld [vmem:[%s8777_s0 + $0x18] sm:$0xff]  }
  0x82   :  { %647 = vmatpush1.bf16.msra.mxu0 %v5485_v43  ;;  %720 = vmatpush1.bf16.msra.mxu1 %v5487_v44  ;;  %v5492_v43 = vcombine.high %v159_v36, %v163_v37  ;;  %v170_v44 = vld [vmem:[#allocation3 + $0x170] sm:$0xff]  ;;  %v183_v62 = vld [vmem:[#allocation3 + $0x1d8] sm:$0xff] }
  0x83   :  { %648 = vmatprep.subr.bf16.mxu0 %v5494_v45  ;;  %721 = vmatprep.subr.bf16.mxu1 %v5496_v47  ;;  %v167_v45 = vld [vmem:[#allocation3 + $0x158] sm:$0xff]  ;;  %v5489_v47 = vcombine.low %v158_v33, %v162_v35  ;;  %v5498_v49 = vcombine.high %v166_v42, %v170_v44  ;;  %v174_v50 = vld [vmem:[#allocation3 + $0x190] sm:$0xff]  ;;  %v5497_v55 = vcombine.low %v166_v42, %v170_v44 }
  0x84   :  { %v5499_v56 = vcombine.low %v167_v45, %v171_v46  ;;  %v6962_v8 = vld [vmem:[#allocation6 + $0x4] ss:$16 sps:$4 sm:$0xff]   ;;  %v6968_v10 = vld [vmem:[#allocation6] ss:$16 sps:$4 sm:$0xff]   ;;  %v6970_v11 = vld [vmem:[#allocation6 + $0x8] ss:$16 sps:$4 sm:$0xff]  }
  0x85   :  { %v6973_v12 = vld [vmem:[#allocation6 + $0x24] ss:$16 sps:$4 sm:$0xff]   ;;  %v6993_v18 = vld [vmem:[#allocation6 + $0x40] ss:$16 sps:$4 sm:$0xff]   ;;  %v6996_v19 = vld [vmem:[#allocation6 + $0x48] ss:$16 sps:$4 sm:$0xff]  }
  0x86   :  { %649 = vmatpush1.bf16.msra.mxu0 %v5493_v51  ;;  %722 = vmatpush1.bf16.msra.mxu1 %v5495_v52  ;;  %v5500_v51 = vcombine.high %v167_v45, %v171_v46  ;;  %v178_v52 = vld [vmem:[#allocation3 + $0x1b0] sm:$0xff]  ;;  %v7015_v25 = vld [vmem:[#allocation6 + $0x8c] ss:$16 sps:$4 sm:$0xff]   ;;  %v7024_v27 = vld [vmem:[#allocation6 + $0x88] ss:$16 sps:$4 sm:$0xff]  }
  0x87   :  { %650 = vmatprep.subr.bf16.mxu0 %v5502_v53  ;;  %723 = vmatprep.subr.bf16.mxu1 %v5504_v54  ;;  %v175_v53 = vld [vmem:[#allocation3 + $0x198] sm:$0xff]  ;;  %v5506_v58 = vcombine.high %v174_v50, %v178_v52  ;;  %v5505_v1 = vcombine.low %v174_v50, %v178_v52  ;;  %v6983_v16 = vld [vmem:[#allocation6 + $0x44] ss:$16 sps:$4 sm:$0xff]   ;;  %8881 = vst [vmem:[#allocation25_spill] sm:$0xff] %v7015_v25  ;;  %8883 = vst [vmem:[#allocation27_spill] sm:$0xff] %v7024_v27 }
  0x88   :  { %v179_v54 = vld [vmem:[#allocation3 + $0x1b8] sm:$0xff]  ;;  %v6998_v20 = vld [vmem:[#allocation6 + $0x64] ss:$16 sps:$4 sm:$0xff]   ;;  %v7034_v29 = vld [vmem:[#allocation6 + $0xa0] ss:$16 sps:$4 sm:$0xff]  }
  0x89   :  { %v5507_v2 = vcombine.low %v175_v53, %v179_v54  ;;  %8876 = vst [vmem:[#allocation20_spill] sm:$0xff] %v6998_v20  ;;  %v7026_v28 = vld [vmem:[#allocation6 + $0xa4] ss:$16 sps:$4 sm:$0xff]   ;;  %8886 = vst [vmem:[#allocation30_spill] sm:$0xff] %v7034_v29  ;;  %v7049_v33 = vld [vmem:[#allocation6 + $0xc0] ss:$16 sps:$4 sm:$0xff]  }
  0x8a   :  { %651 = vmatpush1.bf16.msra.mxu0 %v5501_v59  ;;  %724 = vmatpush1.bf16.msra.mxu1 %v5503_v60  ;;  %v182_v59 = vld [vmem:[#allocation3 + $0x1d0] sm:$0xff]  ;;  %v5508_v60 = vcombine.high %v175_v53, %v179_v54  ;;  %8884 = vst [vmem:[#allocation28_spill] sm:$0xff] %v7026_v28  ;;  %8890 = vst [vmem:[#allocation34_spill] sm:$0xff] %v7049_v33  ;;  %v7060_v36 = vld [vmem:[#allocation6 + $0xec] ss:$16 sps:$4 sm:$0xff]  }
  0x8b   :  { %652 = vmatprep.subr.bf16.mxu0 %v5510_v61  ;;  %725 = vmatprep.subr.bf16.mxu1 %v5512_v63  ;;  %v186_v61 = vld [vmem:[#allocation3 + $0x1f0] sm:$0xff]  ;;  %v187_v63 = vld [vmem:[#allocation3 + $0x1f8] sm:$0xff]  ;;  %8893 = vst [vmem:[#allocation37_spill] sm:$0xff] %v7060_v36 }
  0x8c   :  { %v5514_v3 = vcombine.high %v182_v59, %v186_v61  ;;  %v7057_v35 = vld [vmem:[#allocation6 + $0xe4] ss:$16 sps:$4 sm:$0xff]   ;;  %v7065_v37 = vld [vmem:[#allocation6 + $0xe0] ss:$16 sps:$4 sm:$0xff]   ;;  %v7083_v42 = vld [vmem:[#allocation8 + $0x8] ss:$16 sps:$4 sm:$0xff]  }
  0x8d   :  { %8892 = vst [vmem:[#allocation36_spill] sm:$0xff] %v7057_v35  ;;  %8894 = vst [vmem:[#allocation38_spill] sm:$0xff] %v7065_v37  ;;  %v7088_v44 = vld [vmem:[#allocation8 + $0x2c] ss:$16 sps:$4 sm:$0xff]   ;;  %v7093_v45 = vld [vmem:[#allocation8 + $0x20] ss:$16 sps:$4 sm:$0xff]  }
  0x8e   :  { %653 = vmatpush1.bf16.msra.mxu0 %v5509_v4  ;;  %726 = vmatpush1.bf16.msra.mxu1 %v5511_v5  ;;  %v5516_v4 = vcombine.high %v183_v62, %v187_v63  ;;  %v5513_v5 = vcombine.low %v182_v59, %v186_v61  ;;  %v7097_v46 = vld [vmem:[#allocation8 + $0x28] ss:$16 sps:$4 sm:$0xff]   ;;  %v7116_v52 = vld [vmem:[#allocation8 + $0x6c] ss:$16 sps:$4 sm:$0xff]   ;;  %v7119_v53 = vld [vmem:[#allocation8 + $0x60] ss:$16 sps:$4 sm:$0xff]  }
  0x8f   :  { %784 = vmatprep.subr.bf16.mxu0 %v5458_v7  ;;  %857 = vmatprep.subr.bf16.mxu1 %v5460_v9  ;;  %v5515_v7 = vcombine.low %v183_v62, %v187_v63  ;;  %v6965_v9 = vld [vmem:[#allocation6 + $0xc] ss:$16 sps:$4 sm:$0xff]   ;;  %v7111_v50 = vld [vmem:[#allocation8 + $0x48] ss:$16 sps:$4 sm:$0xff]   ;;  %v7137_v59 = vld [vmem:[#allocation8 + $0xa4] ss:$16 sps:$4 sm:$0xff]  }
  0x90   :  { %v7123_v54 = vld [vmem:[#allocation8 + $0x68] ss:$16 sps:$4 sm:$0xff]   ;;  %v7143_v61 = vld [vmem:[#allocation8 + $0xa0] ss:$16 sps:$4 sm:$0xff]   ;;  %v7149_v63 = vld [vmem:[#allocation8 + $0xc4] ss:$16 sps:$4 sm:$0xff]  }
  0x91   :  { %671 = vmatmul.mubr.bf16.vlgmr.msra.gmra.mrb[0].mxu0 %v6931_v6  ;;  %744 = vmatmul.mubr.bf16.vlgmr.msra.gmra.mrb[0].mxu1 %v6931_v6  ;;  %v7147_v62 = vld [vmem:[#allocation8 + $0xa8] ss:$16 sps:$4 sm:$0xff]  }
  0x92   :  { %785 = vmatpush1.bf16.msra.mxu0 %v5457_v13  ;;  %858 = vmatpush1.bf16.msra.mxu1 %v5459_v14  ;;  %v6976_v13 = vld [vmem:[#allocation6 + $0x2c] ss:$16 sps:$4 sm:$0xff]   ;;  %v6979_v14 = vld [vmem:[#allocation6 + $0x20] ss:$16 sps:$4 sm:$0xff]  }
  0x93   :  { %786 = vmatprep.subr.bf16.mxu0 %v5466_v15  ;;  %859 = vmatprep.subr.bf16.mxu1 %v5468_v17  ;;  %v6981_v15 = vld [vmem:[#allocation6 + $0x28] ss:$16 sps:$4 sm:$0xff]   ;;  %v6987_v17 = vld [vmem:[#allocation6 + $0x4c] ss:$16 sps:$4 sm:$0xff]  }
  0x94   :  { %680 = vmatprep.mubr.bf16.mxu0 %v8787_v0  ;;  %753 = vmatprep.mubr.bf16.mxu1 %v8787_v0 }
  0x96   :  { %787 = vmatpush1.bf16.msra.mxu0 %v5465_v21  ;;  %860 = vmatpush1.bf16.msra.mxu1 %v5467_v22  ;;  %v7006_v21 = vld [vmem:[#allocation6 + $0x60] ss:$16 sps:$4 sm:$0xff]   ;;  %v7009_v22 = vld [vmem:[#allocation6 + $0x68] ss:$16 sps:$4 sm:$0xff]  }
  0x97   :  { %788 = vmatprep.subr.bf16.mxu0 %v5474_v24  ;;  %861 = vmatprep.subr.bf16.mxu1 %v5476_v26  ;;  %8878 = vst [vmem:[#allocation22_spill] sm:$0xff] %v7006_v21  ;;  %8879 = vst [vmem:[#allocation23_spill] sm:$0xff] %v7009_v22  ;;  %v7011_v24 = vld [vmem:[#allocation6 + $0x84] ss:$16 sps:$4 sm:$0xff]   ;;  %v7021_v26 = vld [vmem:[#allocation6 + $0x80] ss:$16 sps:$4 sm:$0xff]  }
  0x98   :  { %8880 = vst [vmem:[#allocation24_spill] sm:$0xff] %v7011_v24  ;;  %8882 = vst [vmem:[#allocation26_spill] sm:$0xff] %v7021_v26 }
  0x99   :  { %681 = vmatmul.mubr.bf16.gmra.mrb[4].mxu0 %v6938_v23  ;;  %754 = vmatmul.mubr.bf16.gmra.mrb[4].mxu1 %v6938_v23 }
  0x9a   :  { %789 = vmatpush1.bf16.msra.mxu0 %v5473_v30  ;;  %862 = vmatpush1.bf16.msra.mxu1 %v5475_v31  ;;  %v7037_v30 = vld [vmem:[#allocation6 + $0xa8] ss:$16 sps:$4 sm:$0xff]   ;;  %v7039_v31 = vld [vmem:[#allocation6 + $0xc4] ss:$16 sps:$4 sm:$0xff]  }
  0x9b   :  { %790 = vmatprep.subr.bf16.mxu0 %v5482_v32  ;;  %863 = vmatprep.subr.bf16.mxu1 %v5484_v34  ;;  %8887 = vst [vmem:[#allocation31_spill] sm:$0xff] %v7037_v30  ;;  %8888 = vst [vmem:[#allocation32_spill] sm:$0xff] %v7039_v31  ;;  %v7043_v32 = vld [vmem:[#allocation6 + $0xcc] ss:$16 sps:$4 sm:$0xff]   ;;  %v7052_v34 = vld [vmem:[#allocation6 + $0xc8] ss:$16 sps:$4 sm:$0xff]  }
  0x9c   :  { %690 = vmatprep.mubr.bf16.mxu0 %v8787_v0  ;;  %763 = vmatprep.mubr.bf16.mxu1 %v8787_v0  ;;  %8889 = vst [vmem:[#allocation33_spill] sm:$0xff] %v7043_v32  ;;  %8891 = vst [vmem:[#allocation35_spill] sm:$0xff] %v7052_v34 }
  0x9e   :  { %791 = vmatpush1.bf16.msra.mxu0 %v5481_v38  ;;  %864 = vmatpush1.bf16.msra.mxu1 %v5483_v39  ;;  %v7069_v38 = vld [vmem:[#allocation6 + $0xe8] ss:$16 sps:$4 sm:$0xff]   ;;  %v7071_v39 = vld [vmem:[#allocation8 + $0x4] ss:$16 sps:$4 sm:$0xff]  }
  0x9f   :  { %792 = vmatprep.subr.bf16.mxu0 %v5490_v41  ;;  %865 = vmatprep.subr.bf16.mxu1 %v5492_v43  ;;  %8895 = vst [vmem:[#allocation39_spill] sm:$0xff] %v7069_v38  ;;  %8896 = vst [vmem:[#allocation40_spill] sm:$0xff] %v7071_v39  ;;  %v7079_v41 = vld [vmem:[#allocation8] ss:$16 sps:$4 sm:$0xff]   ;;  %v7085_v43 = vld [vmem:[#allocation8 + $0x24] ss:$16 sps:$4 sm:$0xff]  }
  0xa1   :  { %691 = vmatmul.mubr.bf16.gmra.mrb[8].mxu0 %v6947_v40  ;;  %764 = vmatmul.mubr.bf16.gmra.mrb[8].mxu1 %v6947_v40 }
  0xa2   :  { %793 = vmatpush1.bf16.msra.mxu0 %v5489_v47  ;;  %866 = vmatpush1.bf16.msra.mxu1 %v5491_v48  ;;  %v7099_v47 = vld [vmem:[#allocation8 + $0x44] ss:$16 sps:$4 sm:$0xff]   ;;  %v7102_v48 = vld [vmem:[#allocation8 + $0x4c] ss:$16 sps:$4 sm:$0xff]  }
  0xa3   :  { %794 = vmatprep.subr.bf16.mxu0 %v5498_v49  ;;  %867 = vmatprep.subr.bf16.mxu1 %v5500_v51  ;;  %v7107_v49 = vld [vmem:[#allocation8 + $0x40] ss:$16 sps:$4 sm:$0xff]   ;;  %v7113_v51 = vld [vmem:[#allocation8 + $0x64] ss:$16 sps:$4 sm:$0xff]  }
  0xa4   :  { %700 = vmatprep.mubr.bf16.mxu0 %v8787_v0  ;;  %773 = vmatprep.mubr.bf16.mxu1 %v8787_v0 }
  0xa6   :  { %795 = vmatpush1.bf16.msra.mxu0 %v5497_v55  ;;  %868 = vmatpush1.bf16.msra.mxu1 %v5499_v56  ;;  %v7125_v55 = vld [vmem:[#allocation8 + $0x84] ss:$16 sps:$4 sm:$0xff]   ;;  %v7128_v56 = vld [vmem:[#allocation8 + $0x8c] ss:$16 sps:$4 sm:$0xff]  }
  0xa7   :  { %796 = vmatprep.subr.bf16.mxu0 %v5506_v58  ;;  %869 = vmatprep.subr.bf16.mxu1 %v5508_v60  ;;  %v7135_v58 = vld [vmem:[#allocation8 + $0x88] ss:$16 sps:$4 sm:$0xff]   ;;  %v7140_v60 = vld [vmem:[#allocation8 + $0xac] ss:$16 sps:$4 sm:$0xff]  }
  0xa9   :  { %701 = vmatmul.mubr.bf16.gmra.mrb[12].mxu0 %v6956_v57  ;;  %774 = vmatmul.mubr.bf16.gmra.mrb[12].mxu1 %v6956_v57 }
  0xaa   :  { %797 = vmatpush1.bf16.msra.mxu0 %v5505_v1  ;;  %870 = vmatpush1.bf16.msra.mxu1 %v5507_v2  ;;  %v7152_v1 = vld [vmem:[#allocation8 + $0xcc] ss:$16 sps:$4 sm:$0xff]   ;;  %v7155_v2 = vld [vmem:[#allocation8 + $0xc0] ss:$16 sps:$4 sm:$0xff]  }
  0xab   :  { %798 = vmatprep.subr.bf16.mxu0 %v5514_v3  ;;  %871 = vmatprep.subr.bf16.mxu1 %v5516_v4  ;;  %8898 = vst [vmem:[#allocation42_spill] sm:$0xff] %v7152_v1  ;;  %v7159_v3 = vld [vmem:[#allocation8 + $0xc8] ss:$16 sps:$4 sm:$0xff]   ;;  %v7161_v4 = vld [vmem:[#allocation8 + $0xe4] ss:$16 sps:$4 sm:$0xff]  }
  0xac   :  { %816 = vmatprep.mubr.bf16.mxu0 %v8787_v0  ;;  %889 = vmatprep.mubr.bf16.mxu1 %v8787_v0 }
  0xae   :  { %799 = vmatpush1.bf16.msra.mxu0 %v5513_v5  ;;  %872 = vmatpush1.bf16.msra.mxu1 %v5515_v7  ;;  %v7164_v5 = vld [vmem:[#allocation8 + $0xec] ss:$16 sps:$4 sm:$0xff]   ;;  %v7167_v7 = vld [vmem:[#allocation8 + $0xe0] ss:$16 sps:$4 sm:$0xff]  }
  0xaf   :  { %1090 = vmatprep.subr.bf16.mxu0 %v6962_v8  ;;  %1131 = vmatprep.subr.bf16.mxu1 %v6965_v9 }
  0xb1   :  { %817 = vmatmul.mubr.bf16.vlgmr.msra.gmra.mrb[16].mxu0 %v6931_v6  ;;  %890 = vmatmul.mubr.bf16.vlgmr.msra.gmra.mrb[16].mxu1 %v6931_v6  ;;  %v7001_v6 = vld [vmem:[#allocation6 + $0x6c] ss:$16 sps:$4 sm:$0xff]  }
  0xb2   :  { %1091 = vmatpush1.bf16.msra.mxu0 %v6968_v10  ;;  %1132 = vmatpush1.bf16.msra.mxu1 %v6970_v11  ;;  %8877 = vst [vmem:[#allocation21_spill] sm:$0xff] %v7001_v6 }
  0xb3   :  { %1092 = vmatprep.subr.bf16.mxu0 %v6973_v12  ;;  %1133 = vmatprep.subr.bf16.mxu1 %v6976_v13 }
  0xb4   :  { %826 = vmatprep.mubr.bf16.mxu0 %v8787_v0  ;;  %899 = vmatprep.mubr.bf16.mxu1 %v8787_v0 }
  0xb6   :  { %1093 = vmatpush1.bf16.msra.mxu0 %v6979_v14  ;;  %1134 = vmatpush1.bf16.msra.mxu1 %v6981_v15 }
  0xb7   :  { %1094 = vmatprep.subr.bf16.mxu0 %v6983_v16  ;;  %1135 = vmatprep.subr.bf16.mxu1 %v6987_v17 }
  0xb9   :  { %827 = vmatmul.mubr.bf16.gmra.mrb[20].mxu0 %v6938_v23  ;;  %900 = vmatmul.mubr.bf16.gmra.mrb[20].mxu1 %v6938_v23  ;;  %v7029_v23 = vld [vmem:[#allocation6 + $0xac] ss:$16 sps:$4 sm:$0xff]  }
  0xba   :  { %1095 = vmatpush1.bf16.msra.mxu0 %v6993_v18  ;;  %1136 = vmatpush1.bf16.msra.mxu1 %v6996_v19  ;;  %8885 = vst [vmem:[#allocation29_spill] sm:$0xff] %v7029_v23 }
  0xbb   :  { %1096 = vmatprep.subr.bf16.mxu0 %v6998_v20  ;;  %1137 = vmatprep.subr.bf16.mxu1 %v7001_v6 }
  0xbc   :  { %836 = vmatprep.mubr.bf16.mxu0 %v8787_v0  ;;  %909 = vmatprep.mubr.bf16.mxu1 %v8787_v0 }
  0xbe   :  { %1097 = vmatpush1.bf16.msra.mxu0 %v7006_v21  ;;  %1138 = vmatpush1.bf16.msra.mxu1 %v7009_v22 }
  0xbf   :  { %1098 = vmatprep.subr.bf16.mxu0 %v7011_v24  ;;  %1139 = vmatprep.subr.bf16.mxu1 %v7015_v25 }
  0xc1   :  { %837 = vmatmul.mubr.bf16.gmra.mrb[24].mxu0 %v6947_v40  ;;  %910 = vmatmul.mubr.bf16.gmra.mrb[24].mxu1 %v6947_v40  ;;  %v7075_v40 = vld [vmem:[#allocation8 + $0xc] ss:$16 sps:$4 sm:$0xff]  }
  0xc2   :  { %1099 = vmatpush1.bf16.msra.mxu0 %v7021_v26  ;;  %1140 = vmatpush1.bf16.msra.mxu1 %v7024_v27  ;;  %8897 = vst [vmem:[#allocation41_spill] sm:$0xff] %v7075_v40 }
  0xc3   :  { %1100 = vmatprep.subr.bf16.mxu0 %v7026_v28  ;;  %1141 = vmatprep.subr.bf16.mxu1 %v7029_v23 }
  0xc4   :  { %846 = vmatprep.mubr.bf16.mxu0 %v8787_v0  ;;  %919 = vmatprep.mubr.bf16.mxu1 %v8787_v0 }
  0xc6   :  { %1101 = vmatpush1.bf16.msra.mxu0 %v7034_v29  ;;  %1142 = vmatpush1.bf16.msra.mxu1 %v7037_v30 }
  0xc7   :  { %1102 = vmatprep.subr.bf16.mxu0 %v7039_v31  ;;  %1143 = vmatprep.subr.bf16.mxu1 %v7043_v32 }
  0xc9   :  { %847 = vmatmul.mubr.bf16.gmra.mrb[28].mxu0 %v6956_v57  ;;  %920 = vmatmul.mubr.bf16.gmra.mrb[28].mxu1 %v6956_v57  ;;  %v7131_v57 = vld [vmem:[#allocation8 + $0x80] ss:$16 sps:$4 sm:$0xff]  }
  0xca   :  { %1103 = vmatpush1.bf16.msra.mxu0 %v7049_v33  ;;  %1144 = vmatpush1.bf16.msra.mxu1 %v7052_v34 }
  0xcb   :  { %1104 = vmatprep.subr.bf16.mxu0 %v7057_v35  ;;  %1145 = vmatprep.subr.bf16.mxu1 %v7060_v36 }
  0xcc   :  { %1122 = vmatprep.mubr.bf16.mxu0 %v8787_v0  ;;  %1163 = vmatprep.mubr.bf16.mxu1 %v8787_v0 }
  0xce   :  { %1105 = vmatpush1.bf16.msra.mxu0 %v7065_v37  ;;  %1146 = vmatpush1.bf16.msra.mxu1 %v7069_v38 }
  0xcf   :  { %1358 = vmatprep.subr.bf16.mxu0 %v7071_v39  ;;  %1399 = vmatprep.subr.bf16.mxu1 %v7075_v40 }
  0xd1   :  { %1123 = vmatmul.mubr.bf16.vlgmr.msra.gmra.mrb[32].mxu0 %v8787_v0  ;;  %1164 = vmatmul.mubr.bf16.vlgmr.msra.gmra.mrb[32].mxu1 %v8787_v0 }
  0xd2   :  { %1359 = vmatpush1.bf16.msra.mxu0 %v7079_v41  ;;  %1400 = vmatpush1.bf16.msra.mxu1 %v7083_v42 }
  0xd3   :  { %1360 = vmatprep.subr.bf16.mxu0 %v7085_v43  ;;  %1401 = vmatprep.subr.bf16.mxu1 %v7088_v44 }
  0xd4   :  { %1390 = vmatprep.mubr.bf16.mxu0 %v8787_v0  ;;  %1431 = vmatprep.mubr.bf16.mxu1 %v8787_v0  ;;  %v7171_v0 = vld [vmem:[#allocation8 + $0xe8] ss:$16 sps:$4 sm:$0xff]  }
  0xd6   :  { %1361 = vmatpush1.bf16.msra.mxu0 %v7093_v45  ;;  %1402 = vmatpush1.bf16.msra.mxu1 %v7097_v46 }
  0xd7   :  { %1362 = vmatprep.subr.bf16.mxu0 %v7099_v47  ;;  %1403 = vmatprep.subr.bf16.mxu1 %v7102_v48 }
  0xda   :  { %1363 = vmatpush1.bf16.msra.mxu0 %v7107_v49  ;;  %1404 = vmatpush1.bf16.msra.mxu1 %v7111_v50 }
  0xdb   :  { %1364 = vmatprep.subr.bf16.mxu0 %v7113_v51  ;;  %1405 = vmatprep.subr.bf16.mxu1 %v7116_v52 }
  0xde   :  { %1365 = vmatpush1.bf16.msra.mxu0 %v7119_v53  ;;  %1406 = vmatpush1.bf16.msra.mxu1 %v7123_v54 }
  0xdf   :  { %1366 = vmatprep.subr.bf16.mxu0 %v7125_v55  ;;  %1407 = vmatprep.subr.bf16.mxu1 %v7128_v56 }
  0xe2   :  { %1367 = vmatpush1.bf16.msra.mxu0 %v7131_v57  ;;  %1408 = vmatpush1.bf16.msra.mxu1 %v7135_v58 }
  0xe3   :  { %1368 = vmatprep.subr.bf16.mxu0 %v7137_v59  ;;  %1409 = vmatprep.subr.bf16.mxu1 %v7140_v60 }
  0xe6   :  { %1369 = vmatpush1.bf16.msra.mxu0 %v7143_v61  ;;  %1410 = vmatpush1.bf16.msra.mxu1 %v7147_v62 }
  0xe7   :  { %1370 = vmatprep.subr.bf16.mxu0 %v7149_v63  ;;  %1411 = vmatprep.subr.bf16.mxu1 %v7152_v1  ;;  %v8899_v1 = vmov 0  }
  0xea   :  { %1371 = vmatpush1.bf16.msra.mxu0 %v7155_v2  ;;  %1412 = vmatpush1.bf16.msra.mxu1 %v7159_v3 }
  0xeb   :  { %1372 = vmatprep.subr.bf16.mxu0 %v7161_v4  ;;  %1413 = vmatprep.subr.bf16.mxu1 %v7164_v5 }
  0xee   :  { %1373 = vmatpush1.bf16.msra.mxu0 %v7167_v7  ;;  %1414 = vmatpush1.bf16.msra.mxu1 %v7171_v0 }
  0xef   :  { %1469 = vmatprep.subr.bf16.mxu0 %v6962_v8  ;;  %1510 = vmatprep.subr.bf16.mxu1 %v6965_v9  ;;  %v254_v8 = vlaneseq }
  0xf1   :  { %1391 = vmatmul.mubr.bf16.vlgmr.msra.gmra.mrb[36].mxu0 %v8899_v1  ;;  %1432 = vmatmul.mubr.bf16.vlgmr.msra.gmra.mrb[36].mxu1 %v8899_v1  ;;  %v7214_v9 = vshrl.u32 %v254_v8, 7 }
  0xf2   :  { %1470 = vmatpush1.bf16.msra.mxu0 %v6968_v10  ;;  %1511 = vmatpush1.bf16.msra.mxu1 %v6970_v11  ;;  %v7220_v11 = vld [vmem:[%s8779_s2] sm:$0xff] }
  0xf3   :  { %1471 = vmatprep.subr.bf16.mxu0 %v6973_v12  ;;  %1512 = vmatprep.subr.bf16.mxu1 %v6976_v13  ;;  %8900 = vst [vmem:[#allocation43_spill] sm:$0xff] %v7214_v9  ;;  %v8794_v10 = vsub.s32 0, %v7214_v9  ;;  %v8797_v12 = vsub.s32 2, %v7214_v9  ;;  %v8802_v13 = vsub.s32 3, %v7214_v9 }
  0xf4   :  { %1501 = vmatprep.mubr.bf16.mxu0 %v8899_v1  ;;  %1542 = vmatprep.mubr.bf16.mxu1 %v8899_v1 }
  0xf5   :  { %v7235_v8 = vrot.slane %v7220_v11, %v8797_v12 }
  0xf6   :  { %1472 = vmatpush1.bf16.msra.mxu0 %v6979_v14  ;;  %1513 = vmatpush1.bf16.msra.mxu1 %v6981_v15  ;;  %v7228_v15 = vrot.slane %v7220_v11, %v8794_v10  ;;  %v7244_v14 = vrot.slane %v7220_v11, %v8802_v13 }
  0xf7   :  { %1473 = vmatprep.subr.bf16.mxu0 %v6983_v16  ;;  %1514 = vmatprep.subr.bf16.mxu1 %v6987_v17 }
  0xfa   :  { %1474 = vmatpush1.bf16.msra.mxu0 %v6993_v18  ;;  %1515 = vmatpush1.bf16.msra.mxu1 %v6996_v19 }
  0xfb   :  { %1475 = vmatprep.subr.bf16.mxu0 %v6998_v20  ;;  %1516 = vmatprep.subr.bf16.mxu1 %v7001_v6 }
  0xfe   :  { %1476 = vmatpush1.bf16.msra.mxu0 %v7006_v21  ;;  %1517 = vmatpush1.bf16.msra.mxu1 %v7009_v22 }
  0xff   :  { %1477 = vmatprep.subr.bf16.mxu0 %v7011_v24  ;;  %1518 = vmatprep.subr.bf16.mxu1 %v7015_v25 }
 0x102   :  { %1478 = vmatpush1.bf16.msra.mxu0 %v7021_v26  ;;  %1519 = vmatpush1.bf16.msra.mxu1 %v7024_v27 }
 0x103   :  { %1479 = vmatprep.subr.bf16.mxu0 %v7026_v28  ;;  %1520 = vmatprep.subr.bf16.mxu1 %v7029_v23 }
 0x106   :  { %1480 = vmatpush1.bf16.msra.mxu0 %v7034_v29  ;;  %1521 = vmatpush1.bf16.msra.mxu1 %v7037_v30 }
 0x107   :  { %1481 = vmatprep.subr.bf16.mxu0 %v7039_v31  ;;  %1522 = vmatprep.subr.bf16.mxu1 %v7043_v32 }
 0x10a   :  { %1482 = vmatpush1.bf16.msra.mxu0 %v7049_v33  ;;  %1523 = vmatpush1.bf16.msra.mxu1 %v7052_v34 }
 0x10b   :  { %1483 = vmatprep.subr.bf16.mxu0 %v7057_v35  ;;  %1524 = vmatprep.subr.bf16.mxu1 %v7060_v36 }
 0x10e   :  { %1484 = vmatpush1.bf16.msra.mxu0 %v7065_v37  ;;  %1525 = vmatpush1.bf16.msra.mxu1 %v7069_v38  ;;  %v8901_v38 = vsub.s32 1, %v7214_v9 }
 0x10f   :  { %1580 = vmatprep.subr.bf16.mxu0 %v7071_v39  ;;  %1621 = vmatprep.subr.bf16.mxu1 %v7075_v40 }
 0x110   :  { %v7249_v10 = vrot.slane %v7220_v11, %v8901_v38 }
 0x164   :  { %v7230_v16 = vpop.f32.mrb[0].mxu0  ;;  %v7239_v39 = vpop.f32.mrb[0].mxu1 }
 0x165   :  { %v7237_v40 = vpop.f32.mrb[1].mxu0  ;;  %v7251_v36 = vpop.f32.mrb[1].mxu1 }
 0x166   :  { %v676_v37 = vpop.f32.mrb[2].mxu0  ;;  %v749_v34 = vpop.f32.mrb[2].mxu1 }
 0x167   :  { %v7254_v12 = vadd.f32 %v676_v37, %v7228_v15  ;;  %v678_v35 = vpop.f32.mrb[3].mxu0  ;;  %v7260_v32 = vadd.f32 %v749_v34, %v7235_v8  ;;  %v751_v13 = vpop.f32.mrb[3].mxu1 }
 0x168   :  { %v7257_v33 = vadd.f32 %v678_v35, %v7249_v10  ;;  %v7263_v31 = vadd.f32 %v751_v13, %v7244_v14 }
 0x169   :  { %8902 = vst [vmem:[#allocation44_spill] sm:$0xff] %v7254_v12  ;;  %8904 = vst [vmem:[#allocation46_spill] sm:$0xff] %v7260_v32 }
 0x16a   :  { %8903 = vst [vmem:[#allocation45_spill] sm:$0xff] %v7257_v33  ;;  %8905 = vst [vmem:[#allocation47_spill] sm:$0xff] %v7263_v31 }
 0x16c   :  { %v682_v38 = vpop.f32.mrb[4].mxu0  ;;  %v755_v23 = vpop.f32.mrb[4].mxu1 }
 0x16d   :  { %v7266_v30 = vadd.f32 %v682_v38, %v7228_v15  ;;  %v684_v29 = vpop.f32.mrb[5].mxu0  ;;  %v7272_v35 = vadd.f32 %v755_v23, %v7235_v8  ;;  %v757_v33 = vpop.f32.mrb[5].mxu1 }
 0x16e   :  { %v7269_v37 = vadd.f32 %v684_v29, %v7249_v10  ;;  %v686_v12 = vpop.f32.mrb[6].mxu0  ;;  %v7278_v13 = vadd.f32 %v757_v33, %v7244_v14  ;;  %v759_v31 = vpop.f32.mrb[6].mxu1 }
 0x16f   :  { %8906 = vst [vmem:[#allocation48_spill] sm:$0xff] %v7266_v30  ;;  %8908 = vst [vmem:[#allocation50_spill] sm:$0xff] %v7272_v35  ;;  %v7275_v34 = vadd.f32 %v686_v12, %v7228_v15  ;;  %v688_v32 = vpop.f32.mrb[7].mxu0  ;;  %v7284_v30 = vadd.f32 %v759_v31, %v7235_v8  ;;  %v761_v29 = vpop.f32.mrb[7].mxu1 }
 0x170   :  { %8907 = vst [vmem:[#allocation49_spill] sm:$0xff] %v7269_v37  ;;  %8910 = vst [vmem:[#allocation52_spill] sm:$0xff] %v7278_v13  ;;  %v7281_v38 = vadd.f32 %v688_v32, %v7249_v10  ;;  %v7287_v37 = vadd.f32 %v761_v29, %v7244_v14 }
 0x171   :  { %8909 = vst [vmem:[#allocation51_spill] sm:$0xff] %v7275_v34  ;;  %8912 = vst [vmem:[#allocation54_spill] sm:$0xff] %v7284_v30 }
 0x172   :  { %8911 = vst [vmem:[#allocation53_spill] sm:$0xff] %v7281_v38  ;;  %8913 = vst [vmem:[#allocation55_spill] sm:$0xff] %v7287_v37 }
 0x174   :  { %v692_v23 = vpop.f32.mrb[8].mxu0  ;;  %v765_v34 = vpop.f32.mrb[8].mxu1 }
 0x175   :  { %v7290_v35 = vadd.f32 %v692_v23, %v7228_v15  ;;  %v694_v12 = vpop.f32.mrb[9].mxu0  ;;  %v7296_v32 = vadd.f32 %v765_v34, %v7235_v8  ;;  %v767_v38 = vpop.f32.mrb[9].mxu1 }
 0x176   :  { %v7293_v33 = vadd.f32 %v694_v12, %v7249_v10  ;;  %v696_v13 = vpop.f32.mrb[10].mxu0  ;;  %v7302_v29 = vadd.f32 %v767_v38, %v7244_v14  ;;  %v769_v37 = vpop.f32.mrb[10].mxu1 }
 0x177   :  { %8914 = vst [vmem:[#allocation56_spill] sm:$0xff] %v7290_v35  ;;  %8916 = vst [vmem:[#allocation58_spill] sm:$0xff] %v7296_v32  ;;  %v7299_v31 = vadd.f32 %v696_v13, %v7228_v15  ;;  %v698_v30 = vpop.f32.mrb[11].mxu0  ;;  %v7308_v35 = vadd.f32 %v769_v37, %v7235_v8  ;;  %v771_v12 = vpop.f32.mrb[11].mxu1 }
 0x178   :  { %8915 = vst [vmem:[#allocation57_spill] sm:$0xff] %v7293_v33  ;;  %8918 = vst [vmem:[#allocation60_spill] sm:$0xff] %v7302_v29  ;;  %v7305_v23 = vadd.f32 %v698_v30, %v7249_v10  ;;  %v7311_v33 = vadd.f32 %v771_v12, %v7244_v14 }
 0x179   :  { %8917 = vst [vmem:[#allocation59_spill] sm:$0xff] %v7299_v31  ;;  %8920 = vst [vmem:[#allocation62_spill] sm:$0xff] %v7308_v35 }
 0x17a   :  { %8919 = vst [vmem:[#allocation61_spill] sm:$0xff] %v7305_v23  ;;  %8921 = vst [vmem:[#allocation63_spill] sm:$0xff] %v7311_v33 }
 0x17c   :  { %v702_v34 = vpop.f32.mrb[12].mxu0  ;;  %v775_v38 = vpop.f32.mrb[12].mxu1 }
 0x17d   :  { %v7314_v32 = vadd.f32 %v702_v34, %v7228_v15  ;;  %v704_v13 = vpop.f32.mrb[13].mxu0  ;;  %v7322_v37 = vadd.f32 %v775_v38, %v7235_v8  ;;  %v777_v35 = vpop.f32.mrb[13].mxu1 }
 0x17e   :  { %v7318_v29 = vadd.f32 %v704_v13, %v7249_v10  ;;  %v706_v30 = vpop.f32.mrb[14].mxu0  ;;  %v779_v31 = vpop.f32.mrb[14].mxu1 }
 0x17f   :  { %8922 = vst [vmem:[#allocation64_spill] sm:$0xff] %v7314_v32  ;;  %8924 = vst [vmem:[#allocation66_spill] sm:$0xff] %v7322_v37  ;;  %v7326_v33 = vadd.f32 %v706_v30, %v7228_v15  ;;  %v708_v34 = vpop.f32.mrb[15].mxu0  ;;  %v7329_v32 = vadd.f32 %v777_v35, %v7244_v14  ;;  %v7336_v23 = vadd.f32 %v779_v31, %v7235_v8  ;;  %v781_v38 = vpop.f32.mrb[15].mxu1  ;;  %v8929_v37 = vsub.s32 4, %v7214_v9 }
 0x180   :  { %8923 = vst [vmem:[#allocation65_spill] sm:$0xff] %v7318_v29  ;;  %v7333_v29 = vadd.f32 %v708_v34, %v7249_v10  ;;  %v7344_v30 = vadd.f32 %v781_v38, %v7244_v14  ;;  %v8931_v35 = vsub.s32 5, %v7214_v9  ;;  %v8932_v34 = vsub.s32 6, %v7214_v9 }
 0x181   :  { %8925 = vst [vmem:[#allocation67_spill] sm:$0xff] %v7326_v33  ;;  %8926 = vst [vmem:[#allocation68_spill] sm:$0xff] %v7329_v32  ;;  %v7341_v12 = vrot.slane %v7220_v11, %v8929_v37  ;;  %v8933_v31 = vsub.s32 7, %v7214_v9 }
 0x182   :  { %8927 = vst [vmem:[#allocation69_spill] sm:$0xff] %v7333_v29  ;;  %8928 = vst [vmem:[#allocation70_spill] sm:$0xff] %v7336_v23  ;;  %v7349_v33 = vrot.slane %v7220_v11, %v8931_v35  ;;  %v7354_v13 = vrot.slane %v7220_v11, %v8932_v34 }
 0x183   :  { %8930 = vst [vmem:[#allocation71_spill] sm:$0xff] %v7344_v30  ;;  %v7359_v29 = vrot.slane %v7220_v11, %v8933_v31 }
 0x184   :  { %v818_v37 = vpop.f32.mrb[16].mxu0  ;;  %v891_v30 = vpop.f32.mrb[16].mxu1 }
 0x185   :  { %v7362_v23 = vadd.f32 %v818_v37, %v7341_v12  ;;  %v820_v38 = vpop.f32.mrb[17].mxu0  ;;  %v7368_v28 = vadd.f32 %v891_v30, %v7354_v13  ;;  %v893_v34 = vpop.f32.mrb[17].mxu1 }
 0x186   :  { %v7365_v32 = vadd.f32 %v820_v38, %v7349_v33  ;;  %v822_v35 = vpop.f32.mrb[18].mxu0  ;;  %v7374_v11 = vadd.f32 %v893_v34, %v7359_v29  ;;  %v895_v31 = vpop.f32.mrb[18].mxu1 }
 0x187   :  { %8934 = vst [vmem:[#allocation72_spill] sm:$0xff] %v7362_v23  ;;  %8936 = vst [vmem:[#allocation74_spill] sm:$0xff] %v7368_v28  ;;  %v7371_v27 = vadd.f32 %v822_v35, %v7341_v12  ;;  %v824_v9 = vpop.f32.mrb[19].mxu0  ;;  %v7380_v23 = vadd.f32 %v895_v31, %v7354_v13  ;;  %v897_v38 = vpop.f32.mrb[19].mxu1 }
 0x188   :  { %8935 = vst [vmem:[#allocation73_spill] sm:$0xff] %v7365_v32  ;;  %8938 = vst [vmem:[#allocation76_spill] sm:$0xff] %v7374_v11  ;;  %v7377_v37 = vadd.f32 %v824_v9, %v7349_v33  ;;  %v7383_v32 = vadd.f32 %v897_v38, %v7359_v29 }
 0x189   :  { %8937 = vst [vmem:[#allocation75_spill] sm:$0xff] %v7371_v27  ;;  %8940 = vst [vmem:[#allocation78_spill] sm:$0xff] %v7380_v23 }
 0x18a   :  { %8939 = vst [vmem:[#allocation77_spill] sm:$0xff] %v7377_v37  ;;  %8941 = vst [vmem:[#allocation79_spill] sm:$0xff] %v7383_v32 }
 0x18c   :  { %v828_v30 = vpop.f32.mrb[20].mxu0  ;;  %v901_v27 = vpop.f32.mrb[20].mxu1 }
 0x18d   :  { %v7386_v28 = vadd.f32 %v828_v30, %v7341_v12  ;;  %v830_v35 = vpop.f32.mrb[21].mxu0  ;;  %v7392_v9 = vadd.f32 %v901_v27, %v7354_v13  ;;  %v903_v37 = vpop.f32.mrb[21].mxu1 }
 0x18e   :  { %v7389_v34 = vadd.f32 %v830_v35, %v7349_v33  ;;  %v832_v11 = vpop.f32.mrb[22].mxu0  ;;  %v7398_v38 = vadd.f32 %v903_v37, %v7359_v29  ;;  %v905_v32 = vpop.f32.mrb[22].mxu1 }
 0x18f   :  { %8942 = vst [vmem:[#allocation80_spill] sm:$0xff] %v7386_v28  ;;  %8944 = vst [vmem:[#allocation82_spill] sm:$0xff] %v7392_v9  ;;  %v7395_v31 = vadd.f32 %v832_v11, %v7341_v12  ;;  %v834_v23 = vpop.f32.mrb[23].mxu0  ;;  %v7404_v28 = vadd.f32 %v905_v32, %v7354_v13  ;;  %v907_v35 = vpop.f32.mrb[23].mxu1 }
 0x190   :  { %8943 = vst [vmem:[#allocation81_spill] sm:$0xff] %v7389_v34  ;;  %8946 = vst [vmem:[#allocation84_spill] sm:$0xff] %v7398_v38  ;;  %v7401_v30 = vadd.f32 %v834_v23, %v7349_v33  ;;  %v7407_v34 = vadd.f32 %v907_v35, %v7359_v29 }
 0x191   :  { %8945 = vst [vmem:[#allocation83_spill] sm:$0xff] %v7395_v31  ;;  %8948 = vst [vmem:[#allocation86_spill] sm:$0xff] %v7404_v28 }
 0x192   :  { %8947 = vst [vmem:[#allocation85_spill] sm:$0xff] %v7401_v30  ;;  %8949 = vst [vmem:[#allocation87_spill] sm:$0xff] %v7407_v34 }
 0x194   :  { %v838_v27 = vpop.f32.mrb[24].mxu0  ;;  %v911_v31 = vpop.f32.mrb[24].mxu1 }
 0x195   :  { %v7410_v9 = vadd.f32 %v838_v27, %v7341_v12  ;;  %v840_v11 = vpop.f32.mrb[25].mxu0  ;;  %v7416_v23 = vadd.f32 %v911_v31, %v7354_v13  ;;  %v913_v30 = vpop.f32.mrb[25].mxu1 }
 0x196   :  { %v7413_v37 = vadd.f32 %v840_v11, %v7349_v33  ;;  %v842_v38 = vpop.f32.mrb[26].mxu0  ;;  %v7422_v35 = vadd.f32 %v913_v30, %v7359_v29  ;;  %v915_v34 = vpop.f32.mrb[26].mxu1 }
 0x197   :  { %8950 = vst [vmem:[#allocation88_spill] sm:$0xff] %v7410_v9  ;;  %8952 = vst [vmem:[#allocation90_spill] sm:$0xff] %v7416_v23  ;;  %v7419_v32 = vadd.f32 %v842_v38, %v7341_v12  ;;  %v844_v28 = vpop.f32.mrb[27].mxu0  ;;  %v7428_v9 = vadd.f32 %v915_v34, %v7354_v13  ;;  %v917_v11 = vpop.f32.mrb[27].mxu1 }
 0x198   :  { %8951 = vst [vmem:[#allocation89_spill] sm:$0xff] %v7413_v37  ;;  %8954 = vst [vmem:[#allocation92_spill] sm:$0xff] %v7422_v35  ;;  %v7425_v27 = vadd.f32 %v844_v28, %v7349_v33  ;;  %v7431_v37 = vadd.f32 %v917_v11, %v7359_v29 }
 0x199   :  { %8953 = vst [vmem:[#allocation91_spill] sm:$0xff] %v7419_v32  ;;  %8956 = vst [vmem:[#allocation94_spill] sm:$0xff] %v7428_v9 }
 0x19a   :  { %8955 = vst [vmem:[#allocation93_spill] sm:$0xff] %v7425_v27  ;;  %8957 = vst [vmem:[#allocation95_spill] sm:$0xff] %v7431_v37 }
 0x19c   :  { %v848_v31 = vpop.f32.mrb[28].mxu0  ;;  %v921_v32 = vpop.f32.mrb[28].mxu1 }
 0x19d   :  { %v7434_v23 = vadd.f32 %v848_v31, %v7341_v12  ;;  %v850_v38 = vpop.f32.mrb[29].mxu0  ;;  %v7440_v28 = vadd.f32 %v921_v32, %v7354_v13  ;;  %v923_v27 = vpop.f32.mrb[29].mxu1  ;;  %v673_v31 = vadd.f32 %v7230_v16, %v7228_v15  ;;  %v748_v32 = vadd.f32 %v7251_v36, %v7244_v14 }
 0x19e   :  { %v7437_v30 = vadd.f32 %v850_v38, %v7349_v33  ;;  %v852_v35 = vpop.f32.mrb[30].mxu0  ;;  %v7443_v9 = vadd.f32 %v923_v27, %v7359_v29  ;;  %v925_v11 = vpop.f32.mrb[30].mxu1  ;;  %v746_v38 = vadd.f32 %v7239_v39, %v7235_v8 }
 0x19f   :  { %8958 = vst [vmem:[#allocation96_spill] sm:$0xff] %v7434_v23  ;;  %8960 = vst [vmem:[#allocation98_spill] sm:$0xff] %v7440_v28  ;;  %v854_v34 = vpop.f32.mrb[31].mxu0  ;;  %v927_v37 = vpop.f32.mrb[31].mxu1  ;;  %v675_v23 = vadd.f32 %v7237_v40, %v7249_v10 }
 0x1a0   :  { %8959 = vst [vmem:[#allocation97_spill] sm:$0xff] %v7437_v30  ;;  %8961 = vst [vmem:[#allocation99_spill] sm:$0xff] %v7443_v9 }
 0x1a4   :  { %v1124_v30 = vpop.f32.mrb[32].mxu0  ;;  %v1165_v26 = vpop.f32.mrb[32].mxu1 }
 0x1a5   :  { %v1125_v28 = vadd.f32 %v1124_v30, %v673_v31  ;;  %v1126_v25 = vpop.f32.mrb[33].mxu0  ;;  %v1166_v27 = vadd.f32 %v1165_v26, %v746_v38  ;;  %v1167_v24 = vpop.f32.mrb[33].mxu1  ;;  %v928_v38 = vadd.f32 %v927_v37, %v7359_v29 }
 0x1a6   :  { %v1127_v9 = vadd.f32 %v1126_v25, %v675_v23  ;;  %v1128_v22 = vpop.f32.mrb[34].mxu0  ;;  %v1168_v6 = vadd.f32 %v1167_v24, %v748_v32  ;;  %v1169_v16 = vpop.f32.mrb[34].mxu1 }
 0x1a7   :  { %v5549_v21 = vmul.f32 -1.442695, %v1125_v28  ;;  %v1129_v15 = vpop.f32.mrb[35].mxu0  ;;  %v1170_v40 = vpop.f32.mrb[35].mxu1  ;;  %v5551_v39 = vmul.f32 -1.442695, %v1166_v27 }
 0x1a8   :  { %v5550_v20 = vmul.f32 -1.442695, %v1127_v9  ;;  %v853_v9 = vadd.f32 %v852_v35, %v7341_v12 }
 0x1a9   :  { %6056 = vpow2.f32 %v5549_v21  ;;  %v926_v21 = vadd.f32 %v925_v11, %v7354_v13 }
 0x1aa   :  { %6058 = vpow2.f32 %v5550_v20  ;;  %v855_v20 = vadd.f32 %v854_v34, %v7349_v33 }
 0x1ab   :  { %6060 = vpow2.f32 %v5551_v39 }
 0x1ac   :  { %6062 = vtanh.f32 %v1168_v6 }
 0x1b3   :  { %v6057_v10 = vpop.eup %6056 }
 0x1b4   :  { %v1181_v8 = vadd.f32 1.0, %v6057_v10  ;;  %v6059_v36 = vpop.eup %6058 }
 0x1b5   :  { %v1182_v14 = vadd.f32 1.0, %v6059_v36  ;;  %v6061_v25 = vpop.eup %6060 }
 0x1b6   :  { %6064 = vrcp.f32 %v1181_v8  ;;  %v6063_v26 = vpop.eup %6062  ;;  %v1183_v30 = vadd.f32 1.0, %v6061_v25 }
 0x1b7   :  { %6066 = vrcp.f32 %v1182_v14 }
 0x1b8   :  { %6068 = vrcp.f32 %v1183_v30 }
 0x1c0   :  { %v6065_v22 = vpop.eup %6064 }
 0x1c1   :  { %v1192_v23 = vmul.f32 %v6065_v22, %v6063_v26  ;;  %v6067_v24 = vpop.eup %6066 }
 0x1c2   :  { %v1191_v28 = vmul.f32 0.0, %v6067_v24  ;;  %v6069_v29 = vpop.eup %6068 }
 0x1c4   :  { %v1392_v31 = vpop.f32.mrb[36].mxu0  ;;  %v7457_v6 = vadd.f32 %v1192_v23, %v1191_v28  ;;  %v1433_v27 = vpop.f32.mrb[36].mxu1 }
 0x1c5   :  { %v1393_v32 = vadd.f32 %v1392_v31, %v853_v9  ;;  %v1394_v15 = vpop.f32.mrb[37].mxu0  ;;  %v1434_v16 = vadd.f32 %v1433_v27, %v926_v21  ;;  %v1435_v39 = vpop.f32.mrb[37].mxu1 }
 0x1c6   :  { %v1395_v40 = vadd.f32 %v1394_v15, %v855_v20  ;;  %v1396_v10 = vpop.f32.mrb[38].mxu0  ;;  %6070 = vtanh.f32 %v7457_v6  ;;  %v1436_v35 = vadd.f32 %v1435_v39, %v928_v38  ;;  %v1437_v34 = vpop.f32.mrb[38].mxu1  ;;  %v7495_v39 = vld [vmem:[#allocation6 + $0x4] ss:$16 sps:$4 sm:$0xff]  }
 0x1c7   :  { %v5584_v12 = vmul.f32 -1.442695, %v1393_v32  ;;  %v1397_v33 = vpop.f32.mrb[39].mxu0  ;;  %v1438_v11 = vpop.f32.mrb[39].mxu1  ;;  %v5586_v37 = vmul.f32 -1.442695, %v1434_v16 }
 0x1c8   :  { %v5585_v13 = vmul.f32 -1.442695, %v1395_v40  ;;  %v8962_v32 = vld [vmem:[#allocation42_spill] sm:$0xff]  ;;  %v7498_v10 = vld [vmem:[#allocation6 + $0xc] ss:$16 sps:$4 sm:$0xff]  }
 0x1c9   :  { %6072 = vpow2.f32 %v5584_v12  ;;  %v7504_v33 = vld [vmem:[#allocation6 + $0x8] ss:$16 sps:$4 sm:$0xff]   ;;  %v7507_v34 = vld [vmem:[#allocation6 + $0x24] ss:$16 sps:$4 sm:$0xff]   ;;  %v7515_v11 = vld [vmem:[#allocation6 + $0x20] ss:$16 sps:$4 sm:$0xff]  }
 0x1ca   :  { %6074 = vpow2.f32 %v5585_v13  ;;  %v7510_v13 = vld [vmem:[#allocation6 + $0x2c] ss:$16 sps:$4 sm:$0xff]  }
 0x1cb   :  { %6076 = vpow2.f32 %v5586_v37  ;;  %v7521_v37 = vld [vmem:[#allocation6 + $0x44] ss:$16 sps:$4 sm:$0xff]  }
 0x1cc   :  { %6078 = vtanh.f32 %v1436_v35  ;;  %v7501_v35 = vld [vmem:[#allocation6] ss:$16 sps:$4 sm:$0xff]  }
 0x1d0   :  { %v6071_v8 = vpop.eup %6070 }
 0x1d1   :  { %v1195_v36 = vmul.f32 %v6071_v8, %v6069_v29  ;;  %v7518_v29 = vld [vmem:[#allocation6 + $0x28] ss:$16 sps:$4 sm:$0xff]   ;;  %v8963_v8 = vld [vmem:[#allocation20_spill] sm:$0xff] }
 0x1d3   :  { %v6073_v14 = vpop.eup %6072  ;;  %v1196_v26 = vpack.c.bf16 %v1195_v36, %v1195_v36  ;;  %v8964_v36 = vld [vmem:[#allocation21_spill] sm:$0xff] }
 0x1d4   :  { %v1449_v25 = vadd.f32 1.0, %v6073_v14  ;;  %v6075_v22 = vpop.eup %6074  ;;  %v8965_v14 = vld [vmem:[#allocation22_spill] sm:$0xff] }
 0x1d5   :  { %v1450_v23 = vadd.f32 1.0, %v6075_v22  ;;  %1197 = vst [vmem:[#allocation2] sm:$0xf] %v1196_v26  ;;  %1502 = vmatmul.mubr.bf16.vlgmr.msra.gmra.mrb[40].mxu0 %v1196_v26  ;;  %1543 = vmatmul.mubr.bf16.vlgmr.msra.gmra.mrb[40].mxu1 %v1196_v26  ;;  %v6077_v24 = vpop.eup %6076  ;;  %v8967_v26 = vld [vmem:[#allocation24_spill] sm:$0xff]  ;;  %v8968_v22 = vld [vmem:[#allocation25_spill] sm:$0xff] }
 0x1d6   :  { %6080 = vrcp.f32 %v1449_v25  ;;  %1581 = vmatpush1.bf16.msra.mxu0 %v7079_v41  ;;  %1622 = vmatpush1.bf16.msra.mxu1 %v7083_v42  ;;  %v6079_v30 = vpop.eup %6078  ;;  %v1451_v21 = vadd.f32 1.0, %v6077_v24  ;;  %v8966_v25 = vld [vmem:[#allocation23_spill] sm:$0xff] }
 0x1d7   :  { %6082 = vrcp.f32 %v1450_v23  ;;  %1582 = vmatprep.subr.bf16.mxu0 %v7085_v43  ;;  %1623 = vmatprep.subr.bf16.mxu1 %v7088_v44  ;;  %v8969_v23 = vld [vmem:[#allocation26_spill] sm:$0xff]  ;;  %v8970_v24 = vld [vmem:[#allocation27_spill] sm:$0xff] }
 0x1d8   :  { %1612 = vmatprep.mubr.bf16.mxu0 %v8899_v1  ;;  %1653 = vmatprep.mubr.bf16.mxu1 %v8899_v1  ;;  %6084 = vrcp.f32 %v1451_v21  ;;  %v8978_v21 = vld [vmem:[#allocation35_spill] sm:$0xff] }
 0x1da   :  { %1583 = vmatpush1.bf16.msra.mxu0 %v7093_v45  ;;  %1624 = vmatpush1.bf16.msra.mxu1 %v7097_v46 }
 0x1db   :  { %1584 = vmatprep.subr.bf16.mxu0 %v7099_v47  ;;  %1625 = vmatprep.subr.bf16.mxu1 %v7102_v48 }
 0x1de   :  { %1585 = vmatpush1.bf16.msra.mxu0 %v7107_v49  ;;  %1626 = vmatpush1.bf16.msra.mxu1 %v7111_v50 }
 0x1df   :  { %1586 = vmatprep.subr.bf16.mxu0 %v7113_v51  ;;  %1627 = vmatprep.subr.bf16.mxu1 %v7116_v52 }
 0x1e0   :  { %v6081_v9 = vpop.eup %6080 }
 0x1e1   :  { %v1460_v28 = vmul.f32 %v6081_v9, %v6079_v30  ;;  %v6083_v20 = vpop.eup %6082  ;;  %v8974_v30 = vld [vmem:[#allocation31_spill] sm:$0xff]  ;;  %v8975_v9 = vld [vmem:[#allocation32_spill] sm:$0xff] }
 0x1e2   :  { %v1459_v31 = vmul.f32 0.0, %v6083_v20  ;;  %1587 = vmatpush1.bf16.msra.mxu0 %v7119_v53  ;;  %1628 = vmatpush1.bf16.msra.mxu1 %v7123_v54  ;;  %v6085_v27 = vpop.eup %6084  ;;  %v8977_v20 = vld [vmem:[#allocation34_spill] sm:$0xff] }
 0x1e3   :  { %1588 = vmatprep.subr.bf16.mxu0 %v7125_v55  ;;  %1629 = vmatprep.subr.bf16.mxu1 %v7128_v56 }
 0x1e4   :  { %v7478_v38 = vadd.f32 %v1460_v28, %v1459_v31  ;;  %v8976_v28 = vld [vmem:[#allocation33_spill] sm:$0xff]  ;;  %v8979_v31 = vld [vmem:[#allocation36_spill] sm:$0xff] }
 0x1e6   :  { %6086 = vtanh.f32 %v7478_v38  ;;  %1589 = vmatpush1.bf16.msra.mxu0 %v7131_v57  ;;  %1630 = vmatpush1.bf16.msra.mxu1 %v7135_v58 }
 0x1e7   :  { %1590 = vmatprep.subr.bf16.mxu0 %v7137_v59  ;;  %1631 = vmatprep.subr.bf16.mxu1 %v7140_v60 }
 0x1ea   :  { %1591 = vmatpush1.bf16.msra.mxu0 %v7143_v61  ;;  %1632 = vmatpush1.bf16.msra.mxu1 %v7147_v62 }
 0x1eb   :  { %1592 = vmatprep.subr.bf16.mxu0 %v7149_v63  ;;  %1633 = vmatprep.subr.bf16.mxu1 %v8962_v32 }
 0x1ee   :  { %1593 = vmatpush1.bf16.msra.mxu0 %v7155_v2  ;;  %1634 = vmatpush1.bf16.msra.mxu1 %v7159_v3 }
 0x1ef   :  { %1594 = vmatprep.subr.bf16.mxu0 %v7161_v4  ;;  %1635 = vmatprep.subr.bf16.mxu1 %v7164_v5 }
 0x1f0   :  { %v6087_v15 = vpop.eup %6086 }
 0x1f1   :  { %v1463_v16 = vmul.f32 %v6087_v15, %v6085_v27  ;;  %v8980_v27 = vld [vmem:[#allocation37_spill] sm:$0xff]  ;;  %v8981_v15 = vld [vmem:[#allocation38_spill] sm:$0xff] }
 0x1f2   :  { %1595 = vmatpush1.bf16.msra.mxu0 %v7167_v7  ;;  %1636 = vmatpush1.bf16.msra.mxu1 %v7171_v0 }
 0x1f3   :  { %v1464_v40 = vpack.c.bf16 %v1463_v16, %v1463_v16  ;;  %1688 = vmatprep.subr.bf16.mxu0 %v7495_v39  ;;  %1729 = vmatprep.subr.bf16.mxu1 %v7498_v10  ;;  %v8982_v16 = vld [vmem:[#allocation39_spill] sm:$0xff] }
 0x1f5   :  { %v1466_v12 = vrot.slane %v1464_v40, 4  ;;  %1613 = vmatmul.mubr.bf16.vlgmr.msra.gmra.mrb[44].mxu0 %v1464_v40  ;;  %1654 = vmatmul.mubr.bf16.vlgmr.msra.gmra.mrb[44].mxu1 %v1464_v40  ;;  %v8983_v40 = vld [vmem:[#allocation40_spill] sm:$0xff] }
 0x1f6   :  { %1689 = vmatpush1.bf16.msra.mxu0 %v7501_v35  ;;  %1730 = vmatpush1.bf16.msra.mxu1 %v7504_v33 }
 0x1f7   :  { %1468 = vst [vmem:[#allocation2 + $0x38] sm:$0xf0] %v1466_v12  ;;  %1690 = vmatprep.subr.bf16.mxu0 %v7507_v34  ;;  %1731 = vmatprep.subr.bf16.mxu1 %v7510_v13  ;;  %v8984_v12 = vld [vmem:[#allocation41_spill] sm:$0xff] }
 0x1f8   :  { %1720 = vmatprep.mubr.bf16.mxu0 %v8899_v1  ;;  %1761 = vmatprep.mubr.bf16.mxu1 %v8899_v1 }
 0x1fa   :  { %1691 = vmatpush1.bf16.msra.mxu0 %v7515_v11  ;;  %1732 = vmatpush1.bf16.msra.mxu1 %v7518_v29 }
 0x1fb   :  { %1692 = vmatprep.subr.bf16.mxu0 %v7521_v37  ;;  %1733 = vmatprep.subr.bf16.mxu1 %v6987_v17  ;;  %v8971_v17 = vld [vmem:[#allocation28_spill] sm:$0xff] }
 0x1fe   :  { %1693 = vmatpush1.bf16.msra.mxu0 %v6993_v18  ;;  %1734 = vmatpush1.bf16.msra.mxu1 %v6996_v19  ;;  %v8972_v18 = vld [vmem:[#allocation29_spill] sm:$0xff]  ;;  %v8973_v19 = vld [vmem:[#allocation30_spill] sm:$0xff] }
 0x1ff   :  { %1694 = vmatprep.subr.bf16.mxu0 %v8963_v8  ;;  %1735 = vmatprep.subr.bf16.mxu1 %v8964_v36 }
 0x202   :  { %1695 = vmatpush1.bf16.msra.mxu0 %v8965_v14  ;;  %1736 = vmatpush1.bf16.msra.mxu1 %v8966_v25  ;;  %v8985_v14 = vld [vmem:[#allocation44_spill] sm:$0xff] }
 0x203   :  { %1696 = vmatprep.subr.bf16.mxu0 %v8967_v26  ;;  %1737 = vmatprep.subr.bf16.mxu1 %v8968_v22  ;;  %v8986_v26 = vld [vmem:[#allocation46_spill] sm:$0xff] }
 0x206   :  { %1697 = vmatpush1.bf16.msra.mxu0 %v8969_v23  ;;  %1738 = vmatpush1.bf16.msra.mxu1 %v8970_v24 }
 0x207   :  { %1698 = vmatprep.subr.bf16.mxu0 %v8971_v17  ;;  %1739 = vmatprep.subr.bf16.mxu1 %v8972_v18  ;;  %v8987_v17 = vld [vmem:[#allocation45_spill] sm:$0xff] }
 0x20a   :  { %1699 = vmatpush1.bf16.msra.mxu0 %v8973_v19  ;;  %1740 = vmatpush1.bf16.msra.mxu1 %v8974_v30  ;;  %v8988_v19 = vld [vmem:[#allocation47_spill] sm:$0xff] }
 0x20b   :  { %1700 = vmatprep.subr.bf16.mxu0 %v8975_v9  ;;  %1741 = vmatprep.subr.bf16.mxu1 %v8976_v28 }
 0x20e   :  { %1701 = vmatpush1.bf16.msra.mxu0 %v8977_v20  ;;  %1742 = vmatpush1.bf16.msra.mxu1 %v8978_v21 }
 0x20f   :  { %1702 = vmatprep.subr.bf16.mxu0 %v8979_v31  ;;  %1743 = vmatprep.subr.bf16.mxu1 %v8980_v27 }
 0x212   :  { %1703 = vmatpush1.bf16.msra.mxu0 %v8981_v15  ;;  %1744 = vmatpush1.bf16.msra.mxu1 %v8982_v16 }
 0x213   :  { %1796 = vmatprep.subr.bf16.mxu0 %v8983_v40  ;;  %1837 = vmatprep.subr.bf16.mxu1 %v8984_v12 }
 0x2a8   :  { %v1503_v8 = vpop.f32.mrb[40].mxu0  ;;  %v1544_v36 = vpop.f32.mrb[40].mxu1 }
 0x2a9   :  { %v1504_v25 = vadd.f32 %v1503_v8, %v8985_v14  ;;  %v1545_v22 = vadd.f32 %v1544_v36, %v8986_v26  ;;  %v1505_v23 = vpop.f32.mrb[41].mxu0  ;;  %v1546_v24 = vpop.f32.mrb[41].mxu1 }
 0x2aa   :  { %v1506_v18 = vadd.f32 %v1505_v23, %v8987_v17  ;;  %v1547_v30 = vadd.f32 %v1546_v24, %v8988_v19  ;;  %v1507_v9 = vpop.f32.mrb[42].mxu0  ;;  %v1548_v28 = vpop.f32.mrb[42].mxu1 }
 0x2ab   :  { %v5587_v20 = vmul.f32 -1.442695, %v1504_v25  ;;  %v1508_v21 = vpop.f32.mrb[43].mxu0  ;;  %v1549_v31 = vpop.f32.mrb[43].mxu1  ;;  %v5589_v15 = vmul.f32 -1.442695, %v1545_v22 }
 0x2ac   :  { %v5588_v27 = vmul.f32 -1.442695, %v1506_v18  ;;  %v8989_v22 = vld [vmem:[#allocation96_spill] sm:$0xff] }
 0x2ad   :  { %6088 = vpow2.f32 %v5587_v20 }
 0x2ae   :  { %6090 = vpow2.f32 %v5588_v27  ;;  %v8991_v27 = vld [vmem:[#allocation97_spill] sm:$0xff] }
 0x2af   :  { %6092 = vtanh.f32 %v1547_v30  ;;  %v8990_v30 = vld [vmem:[#allocation98_spill] sm:$0xff] }
 0x2b0   :  { %6094 = vpow2.f32 %v5589_v15 }
 0x2b7   :  { %v6089_v16 = vpop.eup %6088 }
 0x2b8   :  { %v1560_v40 = vadd.f32 1.0, %v6089_v16  ;;  %v6091_v12 = vpop.eup %6090  ;;  %v8992_v16 = vld [vmem:[#allocation99_spill] sm:$0xff] }
 0x2b9   :  { %v1561_v8 = vadd.f32 1.0, %v6091_v12  ;;  %v6093_v36 = vpop.eup %6092 }
 0x2ba   :  { %6096 = vrcp.f32 %v1560_v40  ;;  %v6095_v14 = vpop.eup %6094 }
 0x2bb   :  { %6098 = vrcp.f32 %v1561_v8  ;;  %v1562_v25 = vadd.f32 1.0, %v6095_v14 }
 0x2bd   :  { %6100 = vrcp.f32 %v1562_v25 }
 0x2c4   :  { %v6097_v26 = vpop.eup %6096 }
 0x2c5   :  { %v1571_v23 = vmul.f32 %v6097_v26, %v6093_v36  ;;  %v6099_v24 = vpop.eup %6098 }
 0x2c6   :  { %v1570_v17 = vmul.f32 %v6099_v24, %v7457_v6 }
 0x2c8   :  { %v1614_v18 = vpop.f32.mrb[44].mxu0  ;;  %v1655_v19 = vpop.f32.mrb[44].mxu1  ;;  %v7554_v9 = vadd.f32 %v1571_v23, %v1570_v17 }
 0x2c9   :  { %v1615_v28 = vadd.f32 %v1614_v18, %v8989_v22  ;;  %v1656_v20 = vadd.f32 %v1655_v19, %v8990_v30  ;;  %v1616_v21 = vpop.f32.mrb[45].mxu0  ;;  %v1657_v31 = vpop.f32.mrb[45].mxu1 }
 0x2ca   :  { %v1617_v15 = vadd.f32 %v1616_v21, %v8991_v27  ;;  %v1658_v40 = vadd.f32 %v1657_v31, %v8992_v16  ;;  %v1618_v12 = vpop.f32.mrb[46].mxu0  ;;  %v1659_v8 = vpop.f32.mrb[46].mxu1  ;;  %6102 = vtanh.f32 %v7554_v9  ;;  %v7671_v27 = vld [vmem:[#allocation6 + $0xe0] ss:$16 sps:$4 sm:$0xff]   ;;  %v7677_v16 = vld [vmem:[#allocation8 + $0x4] ss:$16 sps:$4 sm:$0xff]  }
 0x2cb   :  { %v5590_v6 = vmul.f32 -1.442695, %v1615_v28  ;;  %v1619_v36 = vpop.f32.mrb[47].mxu0  ;;  %v1660_v14 = vpop.f32.mrb[47].mxu1  ;;  %v5592_v17 = vmul.f32 -1.442695, %v1656_v20 }
 0x2cc   :  { %v5591_v26 = vmul.f32 -1.442695, %v1617_v15  ;;  %v6101_v23 = vpop.eup %6100  ;;  %v7668_v20 = vld [vmem:[#allocation6 + $0xec] ss:$16 sps:$4 sm:$0xff]   ;;  %9005 = vst [vmem:[#allocation31_spill] sm:$0xff] %v7671_v27  ;;  %9007 = vst [vmem:[#allocation33_spill] sm:$0xff] %v7677_v16 }
 0x2cd   :  { %6104 = vpow2.f32 %v5590_v6  ;;  %9004 = vst [vmem:[#allocation30_spill] sm:$0xff] %v7668_v20  ;;  %v7674_v15 = vld [vmem:[#allocation6 + $0xe8] ss:$16 sps:$4 sm:$0xff]   ;;  %v9009_v6 = vld [vmem:[#allocation48_spill] sm:$0xff]  ;;  %v9010_v14 = vld [vmem:[#allocation50_spill] sm:$0xff] }
 0x2ce   :  { %6106 = vpow2.f32 %v5591_v26  ;;  %9006 = vst [vmem:[#allocation32_spill] sm:$0xff] %v7674_v15 }
 0x2cf   :  { %6108 = vtanh.f32 %v1658_v40  ;;  %v7680_v40 = vld [vmem:[#allocation8 + $0xc] ss:$16 sps:$4 sm:$0xff]  }
 0x2d0   :  { %6110 = vpow2.f32 %v5592_v17  ;;  %9008 = vst [vmem:[#allocation34_spill] sm:$0xff] %v7680_v40  ;;  %v9011_v17 = vld [vmem:[#allocation49_spill] sm:$0xff] }
 0x2d4   :  { %v6103_v24 = vpop.eup %6102 }
 0x2d5   :  { %v1574_v18 = vmul.f32 %v6103_v24, %v6101_v23 }
 0x2d7   :  { %v6105_v19 = vpop.eup %6104  ;;  %v1575_v22 = vpack.c.bf16 %v1574_v18, %v1574_v18 }
 0x2d8   :  { %v1671_v25 = vadd.f32 1.0, %v6105_v19  ;;  %v6107_v30 = vpop.eup %6106  ;;  %v9012_v19 = vld [vmem:[#allocation52_spill] sm:$0xff] }
 0x2d9   :  { %v1672_v21 = vadd.f32 1.0, %v6107_v30  ;;  %v1577_v31 = vrot.slane %v1575_v22, 4  ;;  %1721 = vmatmul.mubr.bf16.vlgmr.msra.gmra.mrb[48].mxu0 %v1575_v22  ;;  %1762 = vmatmul.mubr.bf16.vlgmr.msra.gmra.mrb[48].mxu1 %v1575_v22 }
 0x2da   :  { %6112 = vrcp.f32 %v1671_v25  ;;  %1797 = vmatpush1.bf16.msra.mxu0 %v7079_v41  ;;  %1838 = vmatpush1.bf16.msra.mxu1 %v7083_v42  ;;  %v6109_v41 = vpop.eup %6108 }
 0x2db   :  { %6114 = vrcp.f32 %v1672_v21  ;;  %1579 = vst [vmem:[#allocation2] sm:$0xf0] %v1577_v31  ;;  %1798 = vmatprep.subr.bf16.mxu0 %v7085_v43  ;;  %1839 = vmatprep.subr.bf16.mxu1 %v7088_v44  ;;  %v6111_v42 = vpop.eup %6110 }
 0x2dc   :  { %1828 = vmatprep.mubr.bf16.mxu0 %v8899_v1  ;;  %1869 = vmatprep.mubr.bf16.mxu1 %v8899_v1 }
 0x2de   :  { %1799 = vmatpush1.bf16.msra.mxu0 %v7093_v45  ;;  %1840 = vmatpush1.bf16.msra.mxu1 %v7097_v46  ;;  %v1673_v45 = vadd.f32 1.0, %v6111_v42 }
 0x2df   :  { %1800 = vmatprep.subr.bf16.mxu0 %v7099_v47  ;;  %1841 = vmatprep.subr.bf16.mxu1 %v7102_v48 }
 0x2e0   :  { %6116 = vrcp.f32 %v1673_v45 }
 0x2e2   :  { %1801 = vmatpush1.bf16.msra.mxu0 %v7107_v49  ;;  %1842 = vmatpush1.bf16.msra.mxu1 %v7111_v50 }
 0x2e3   :  { %1802 = vmatprep.subr.bf16.mxu0 %v7113_v51  ;;  %1843 = vmatprep.subr.bf16.mxu1 %v7116_v52  ;;  %v7611_v52 = vld [vmem:[#allocation6 + $0x40] ss:$16 sps:$4 sm:$0xff]  }
 0x2e4   :  { %v6113_v43 = vpop.eup %6112 }
 0x2e5   :  { %v1682_v44 = vmul.f32 %v6113_v43, %v6109_v41  ;;  %v6115_v28 = vpop.eup %6114 }
 0x2e6   :  { %v1681_v46 = vmul.f32 %v6115_v28, %v7478_v38  ;;  %1803 = vmatpush1.bf16.msra.mxu0 %v7119_v53  ;;  %1844 = vmatpush1.bf16.msra.mxu1 %v7123_v54  ;;  %v7614_v53 = vld [vmem:[#allocation6 + $0x48] ss:$16 sps:$4 sm:$0xff]   ;;  %v7617_v54 = vld [vmem:[#allocation6 + $0x64] ss:$16 sps:$4 sm:$0xff]  }
 0x2e7   :  { %1804 = vmatprep.subr.bf16.mxu0 %v7125_v55  ;;  %1845 = vmatprep.subr.bf16.mxu1 %v7128_v56  ;;  %v7620_v55 = vld [vmem:[#allocation6 + $0x6c] ss:$16 sps:$4 sm:$0xff]   ;;  %v7623_v56 = vld [vmem:[#allocation6 + $0x60] ss:$16 sps:$4 sm:$0xff]   ;;  %v7662_v38 = vld [vmem:[#allocation6 + $0xc8] ss:$16 sps:$4 sm:$0xff]  }
 0x2e8   :  { %v7580_v47 = vadd.f32 %v1682_v44, %v1681_v46  ;;  %9002 = vst [vmem:[#allocation28_spill] sm:$0xff] %v7662_v38 }
 0x2ea   :  { %6118 = vtanh.f32 %v7580_v47  ;;  %1805 = vmatpush1.bf16.msra.mxu0 %v7131_v57  ;;  %1846 = vmatpush1.bf16.msra.mxu1 %v7135_v58  ;;  %v6117_v48 = vpop.eup %6116  ;;  %v7626_v57 = vld [vmem:[#allocation6 + $0x68] ss:$16 sps:$4 sm:$0xff]   ;;  %v7629_v58 = vld [vmem:[#allocation6 + $0x84] ss:$16 sps:$4 sm:$0xff]  }
 0x2eb   :  { %1806 = vmatprep.subr.bf16.mxu0 %v7137_v59  ;;  %1847 = vmatprep.subr.bf16.mxu1 %v7140_v60  ;;  %v7632_v59 = vld [vmem:[#allocation6 + $0x8c] ss:$16 sps:$4 sm:$0xff]   ;;  %v7635_v60 = vld [vmem:[#allocation6 + $0x80] ss:$16 sps:$4 sm:$0xff]  }
 0x2ec   :  { %8993 = vst [vmem:[#allocation42_spill] sm:$0xff] %v7635_v60 }
 0x2ee   :  { %1807 = vmatpush1.bf16.msra.mxu0 %v7143_v61  ;;  %1848 = vmatpush1.bf16.msra.mxu1 %v7147_v62  ;;  %v7638_v61 = vld [vmem:[#allocation6 + $0x88] ss:$16 sps:$4 sm:$0xff]   ;;  %v7641_v62 = vld [vmem:[#allocation6 + $0xa4] ss:$16 sps:$4 sm:$0xff]  }
 0x2ef   :  { %1808 = vmatprep.subr.bf16.mxu0 %v7149_v63  ;;  %1849 = vmatprep.subr.bf16.mxu1 %v8962_v32  ;;  %8994 = vst [vmem:[#allocation20_spill] sm:$0xff] %v7638_v61  ;;  %8995 = vst [vmem:[#allocation21_spill] sm:$0xff] %v7641_v62  ;;  %v7644_v63 = vld [vmem:[#allocation6 + $0xac] ss:$16 sps:$4 sm:$0xff]   ;;  %v7665_v32 = vld [vmem:[#allocation6 + $0xe4] ss:$16 sps:$4 sm:$0xff]  }
 0x2f0   :  { %8996 = vst [vmem:[#allocation22_spill] sm:$0xff] %v7644_v63  ;;  %9003 = vst [vmem:[#allocation29_spill] sm:$0xff] %v7665_v32 }
 0x2f2   :  { %1809 = vmatpush1.bf16.msra.mxu0 %v7155_v2  ;;  %1850 = vmatpush1.bf16.msra.mxu1 %v7159_v3  ;;  %v7647_v2 = vld [vmem:[#allocation6 + $0xa0] ss:$16 sps:$4 sm:$0xff]   ;;  %v7650_v3 = vld [vmem:[#allocation6 + $0xa8] ss:$16 sps:$4 sm:$0xff]  }
 0x2f3   :  { %1810 = vmatprep.subr.bf16.mxu0 %v7161_v4  ;;  %1851 = vmatprep.subr.bf16.mxu1 %v7164_v5  ;;  %8997 = vst [vmem:[#allocation23_spill] sm:$0xff] %v7647_v2  ;;  %8998 = vst [vmem:[#allocation24_spill] sm:$0xff] %v7650_v3  ;;  %v7653_v4 = vld [vmem:[#allocation6 + $0xc4] ss:$16 sps:$4 sm:$0xff]   ;;  %v7656_v5 = vld [vmem:[#allocation6 + $0xcc] ss:$16 sps:$4 sm:$0xff]  }
 0x2f4   :  { %v6119_v49 = vpop.eup %6118  ;;  %8999 = vst [vmem:[#allocation25_spill] sm:$0xff] %v7653_v4  ;;  %9000 = vst [vmem:[#allocation26_spill] sm:$0xff] %v7656_v5 }
 0x2f5   :  { %v1685_v50 = vmul.f32 %v6119_v49, %v6117_v48 }
 0x2f6   :  { %1811 = vmatpush1.bf16.msra.mxu0 %v7167_v7  ;;  %1852 = vmatpush1.bf16.msra.mxu1 %v7171_v0  ;;  %v7608_v0 = vld [vmem:[#allocation6 + $0x4c] ss:$16 sps:$4 sm:$0xff]   ;;  %v7659_v7 = vld [vmem:[#allocation6 + $0xc0] ss:$16 sps:$4 sm:$0xff]  }
 0x2f7   :  { %v1686_v51 = vpack.c.bf16 %v1685_v50, %v1685_v50  ;;  %1907 = vmatprep.subr.bf16.mxu0 %v7495_v39  ;;  %1948 = vmatprep.subr.bf16.mxu1 %v7498_v10  ;;  %9001 = vst [vmem:[#allocation27_spill] sm:$0xff] %v7659_v7 }
 0x2f9   :  { %1687 = vst [vmem:[#allocation2 + $0x38] sm:$0xf] %v1686_v51  ;;  %1829 = vmatmul.mubr.bf16.vlgmr.msra.gmra.mrb[52].mxu0 %v1686_v51  ;;  %1870 = vmatmul.mubr.bf16.vlgmr.msra.gmra.mrb[52].mxu1 %v1686_v51 }
 0x2fa   :  { %1908 = vmatpush1.bf16.msra.mxu0 %v7501_v35  ;;  %1949 = vmatpush1.bf16.msra.mxu1 %v7504_v33 }
 0x2fb   :  { %1909 = vmatprep.subr.bf16.mxu0 %v7507_v34  ;;  %1950 = vmatprep.subr.bf16.mxu1 %v7510_v13 }
 0x2fc   :  { %1939 = vmatprep.mubr.bf16.mxu0 %v8899_v1  ;;  %1980 = vmatprep.mubr.bf16.mxu1 %v8899_v1 }
 0x2fe   :  { %1910 = vmatpush1.bf16.msra.mxu0 %v7515_v11  ;;  %1951 = vmatpush1.bf16.msra.mxu1 %v7518_v29 }
 0x2ff   :  { %1911 = vmatprep.subr.bf16.mxu0 %v7521_v37  ;;  %1952 = vmatprep.subr.bf16.mxu1 %v7608_v0 }
 0x302   :  { %1912 = vmatpush1.bf16.msra.mxu0 %v7611_v52  ;;  %1953 = vmatpush1.bf16.msra.mxu1 %v7614_v53 }
 0x303   :  { %1913 = vmatprep.subr.bf16.mxu0 %v7617_v54  ;;  %1954 = vmatprep.subr.bf16.mxu1 %v7620_v55 }
 0x306   :  { %1914 = vmatpush1.bf16.msra.mxu0 %v7623_v56  ;;  %1955 = vmatpush1.bf16.msra.mxu1 %v7626_v57 }
 0x307   :  { %1915 = vmatprep.subr.bf16.mxu0 %v7629_v58  ;;  %1956 = vmatprep.subr.bf16.mxu1 %v7632_v59 }
 0x30a   :  { %1916 = vmatpush1.bf16.msra.mxu0 %v7635_v60  ;;  %1957 = vmatpush1.bf16.msra.mxu1 %v7638_v61 }
 0x30b   :  { %1917 = vmatprep.subr.bf16.mxu0 %v7641_v62  ;;  %1958 = vmatprep.subr.bf16.mxu1 %v7644_v63 }
 0x30e   :  { %1918 = vmatpush1.bf16.msra.mxu0 %v7647_v2  ;;  %1959 = vmatpush1.bf16.msra.mxu1 %v7650_v3 }
 0x30f   :  { %1919 = vmatprep.subr.bf16.mxu0 %v7653_v4  ;;  %1960 = vmatprep.subr.bf16.mxu1 %v7656_v5 }
 0x312   :  { %1920 = vmatpush1.bf16.msra.mxu0 %v7659_v7  ;;  %1961 = vmatpush1.bf16.msra.mxu1 %v7662_v38 }
 0x313   :  { %1921 = vmatprep.subr.bf16.mxu0 %v7665_v32  ;;  %1962 = vmatprep.subr.bf16.mxu1 %v7668_v20 }
 0x316   :  { %1922 = vmatpush1.bf16.msra.mxu0 %v7671_v27  ;;  %1963 = vmatpush1.bf16.msra.mxu1 %v7674_v15 }
 0x317   :  { %2018 = vmatprep.subr.bf16.mxu0 %v7677_v16  ;;  %2059 = vmatprep.subr.bf16.mxu1 %v7680_v40 }
 0x3ac   :  { %v1722_v12 = vpop.f32.mrb[48].mxu0  ;;  %v1763_v8 = vpop.f32.mrb[48].mxu1 }
 0x3ad   :  { %v1723_v36 = vadd.f32 %v1722_v12, %v9009_v6  ;;  %v1764_v26 = vadd.f32 %v1763_v8, %v9010_v14  ;;  %v1724_v23 = vpop.f32.mrb[49].mxu0  ;;  %v1765_v24 = vpop.f32.mrb[49].mxu1 }
 0x3ae   :  { %v1725_v18 = vadd.f32 %v1724_v23, %v9011_v17  ;;  %v1766_v25 = vadd.f32 %v1765_v24, %v9012_v19  ;;  %v1726_v22 = vpop.f32.mrb[50].mxu0  ;;  %v1767_v30 = vpop.f32.mrb[50].mxu1  ;;  %v9014_v17 = vld [vmem:[#allocation94_spill] sm:$0xff] }
 0x3af   :  { %v5593_v21 = vmul.f32 -1.442695, %v1723_v36  ;;  %v1727_v31 = vpop.f32.mrb[51].mxu0  ;;  %v1768_v41 = vpop.f32.mrb[51].mxu1  ;;  %v5595_v43 = vmul.f32 -1.442695, %v1764_v26 }
 0x3b0   :  { %v5594_v42 = vmul.f32 -1.442695, %v1725_v18  ;;  %v9013_v26 = vld [vmem:[#allocation91_spill] sm:$0xff]  ;;  %v9015_v22 = vld [vmem:[#allocation93_spill] sm:$0xff] }
 0x3b1   :  { %6120 = vpow2.f32 %v5593_v21  ;;  %v9016_v21 = vld [vmem:[#allocation95_spill] sm:$0xff] }
 0x3b2   :  { %6122 = vpow2.f32 %v5594_v42 }
 0x3b3   :  { %6124 = vtanh.f32 %v1766_v25 }
 0x3b4   :  { %6126 = vpow2.f32 %v5595_v43 }
 0x3bb   :  { %v6121_v44 = vpop.eup %6120 }
 0x3bc   :  { %v1779_v28 = vadd.f32 1.0, %v6121_v44  ;;  %v6123_v45 = vpop.eup %6122 }
 0x3bd   :  { %v1780_v46 = vadd.f32 1.0, %v6123_v45  ;;  %v6125_v48 = vpop.eup %6124 }
 0x3be   :  { %6128 = vrcp.f32 %v1779_v28  ;;  %v6127_v49 = vpop.eup %6126 }
 0x3bf   :  { %6130 = vrcp.f32 %v1780_v46  ;;  %v1781_v8 = vadd.f32 1.0, %v6127_v49 }
 0x3c1   :  { %6132 = vrcp.f32 %v1781_v8 }
 0x3c8   :  { %v6129_v50 = vpop.eup %6128 }
 0x3c9   :  { %v1790_v51 = vmul.f32 %v6129_v50, %v6125_v48  ;;  %v6131_v12 = vpop.eup %6130 }
 0x3ca   :  { %v1789_v6 = vmul.f32 %v6131_v12, %v7554_v9 }
 0x3cb   :  { %v6133_v45 = vpop.eup %6132 }
 0x3cc   :  { %v1830_v36 = vpop.f32.mrb[52].mxu0  ;;  %v1871_v14 = vpop.f32.mrb[52].mxu1  ;;  %v7688_v23 = vadd.f32 %v1790_v51, %v1789_v6 }
 0x3cd   :  { %v1831_v24 = vadd.f32 %v1830_v36, %v9013_v26  ;;  %v1872_v18 = vadd.f32 %v1871_v14, %v9014_v17  ;;  %v1832_v19 = vpop.f32.mrb[53].mxu0  ;;  %v1873_v25 = vpop.f32.mrb[53].mxu1  ;;  %v7695_v36 = vld [vmem:[#allocation8] ss:$16 sps:$4 sm:$0xff]   ;;  %v7698_v14 = vld [vmem:[#allocation8 + $0x8] ss:$16 sps:$4 sm:$0xff]  }
 0x3ce   :  { %v1833_v30 = vadd.f32 %v1832_v19, %v9015_v22  ;;  %v1874_v31 = vadd.f32 %v1873_v25, %v9016_v21  ;;  %v1834_v41 = vpop.f32.mrb[54].mxu0  ;;  %v1875_v42 = vpop.f32.mrb[54].mxu1  ;;  %6134 = vtanh.f32 %v7688_v23  ;;  %v7701_v26 = vld [vmem:[#allocation8 + $0x24] ss:$16 sps:$4 sm:$0xff]   ;;  %v7709_v17 = vld [vmem:[#allocation8 + $0x20] ss:$16 sps:$4 sm:$0xff]  }
 0x3cf   :  { %v5596_v9 = vmul.f32 -1.442695, %v1831_v24  ;;  %v1835_v43 = vpop.f32.mrb[55].mxu0  ;;  %v1876_v44 = vpop.f32.mrb[55].mxu1  ;;  %v5598_v48 = vmul.f32 -1.442695, %v1872_v18 }
 0x3d0   :  { %v5597_v28 = vmul.f32 -1.442695, %v1833_v30  ;;  %v7704_v24 = vld [vmem:[#allocation8 + $0x2c] ss:$16 sps:$4 sm:$0xff]   ;;  %v7712_v18 = vld [vmem:[#allocation8 + $0x28] ss:$16 sps:$4 sm:$0xff]  }
 0x3d1   :  { %6136 = vpow2.f32 %v5596_v9  ;;  %v7715_v19 = vld [vmem:[#allocation8 + $0x44] ss:$16 sps:$4 sm:$0xff]   ;;  %v7718_v25 = vld [vmem:[#allocation8 + $0x4c] ss:$16 sps:$4 sm:$0xff]   ;;  %v7721_v21 = vld [vmem:[#allocation8 + $0x40] ss:$16 sps:$4 sm:$0xff]  }
 0x3d2   :  { %6138 = vpow2.f32 %v5597_v28  ;;  %v7727_v42 = vld [vmem:[#allocation8 + $0x64] ss:$16 sps:$4 sm:$0xff]   ;;  %v7730_v9 = vld [vmem:[#allocation8 + $0x6c] ss:$16 sps:$4 sm:$0xff]  }
 0x3d3   :  { %6140 = vtanh.f32 %v1874_v31  ;;  %v7724_v31 = vld [vmem:[#allocation8 + $0x48] ss:$16 sps:$4 sm:$0xff]  }
 0x3d4   :  { %6142 = vpow2.f32 %v5598_v48  ;;  %v7737_v48 = vld [vmem:[#allocation8 + $0x68] ss:$16 sps:$4 sm:$0xff]  }
 0x3d8   :  { %v6135_v46 = vpop.eup %6134 }
 0x3d9   :  { %v1793_v49 = vmul.f32 %v6135_v46, %v6133_v45  ;;  %v7734_v46 = vld [vmem:[#allocation8 + $0x60] ss:$16 sps:$4 sm:$0xff]  }
 0x3db   :  { %v6137_v50 = vpop.eup %6136  ;;  %v1794_v12 = vpack.c.bf16 %v1793_v49, %v1793_v49  ;;  %v7740_v49 = vld [vmem:[#allocation8 + $0x84] ss:$16 sps:$4 sm:$0xff]  }
 0x3dc   :  { %v1887_v51 = vadd.f32 1.0, %v6137_v50  ;;  %v6139_v8 = vpop.eup %6138  ;;  %v7743_v50 = vld [vmem:[#allocation8 + $0x8c] ss:$16 sps:$4 sm:$0xff]  }
 0x3dd   :  { %v1888_v6 = vadd.f32 1.0, %v6139_v8  ;;  %1795 = vst [vmem:[#allocation2 + $0x10] sm:$0xf] %v1794_v12  ;;  %1940 = vmatmul.mubr.bf16.vlgmr.msra.gmra.mrb[56].mxu0 %v1794_v12  ;;  %1981 = vmatmul.mubr.bf16.vlgmr.msra.gmra.mrb[56].mxu1 %v1794_v12  ;;  %v6141_v22 = vpop.eup %6140  ;;  %v7752_v12 = vld [vmem:[#allocation8 + $0x88] ss:$16 sps:$4 sm:$0xff]  }
 0x3de   :  { %6144 = vrcp.f32 %v1887_v51  ;;  %2019 = vmatpush1.bf16.msra.mxu0 %v7695_v36  ;;  %2060 = vmatpush1.bf16.msra.mxu1 %v7698_v14  ;;  %v6143_v30 = vpop.eup %6142  ;;  %v7755_v8 = vld [vmem:[#allocation8 + $0xa4] ss:$16 sps:$4 sm:$0xff]  }
 0x3df   :  { %6146 = vrcp.f32 %v1888_v6  ;;  %2020 = vmatprep.subr.bf16.mxu0 %v7701_v26  ;;  %2061 = vmatprep.subr.bf16.mxu1 %v7704_v24  ;;  %v1889_v28 = vadd.f32 1.0, %v6143_v30  ;;  %v7758_v6 = vld [vmem:[#allocation8 + $0xac] ss:$16 sps:$4 sm:$0xff]   ;;  %v7764_v30 = vld [vmem:[#allocation8 + $0xa8] ss:$16 sps:$4 sm:$0xff]  }
 0x3e0   :  { %2050 = vmatprep.mubr.bf16.mxu0 %v8899_v1  ;;  %2091 = vmatprep.mubr.bf16.mxu1 %v8899_v1  ;;  %9017 = vst [vmem:[#allocation35_spill] sm:$0xff] %v7758_v6  ;;  %9019 = vst [vmem:[#allocation37_spill] sm:$0xff] %v7764_v30 }
 0x3e1   :  { %6148 = vrcp.f32 %v1889_v28  ;;  %v7776_v28 = vld [vmem:[#allocation8 + $0xc8] ss:$16 sps:$4 sm:$0xff]  }
 0x3e2   :  { %2021 = vmatpush1.bf16.msra.mxu0 %v7709_v17  ;;  %2062 = vmatpush1.bf16.msra.mxu1 %v7712_v18  ;;  %9023 = vst [vmem:[#allocation41_spill] sm:$0xff] %v7776_v28 }
 0x3e3   :  { %2022 = vmatprep.subr.bf16.mxu0 %v7715_v19  ;;  %2063 = vmatprep.subr.bf16.mxu1 %v7718_v25 }
 0x3e6   :  { %2023 = vmatpush1.bf16.msra.mxu0 %v7721_v21  ;;  %2064 = vmatpush1.bf16.msra.mxu1 %v7724_v31 }
 0x3e7   :  { %2024 = vmatprep.subr.bf16.mxu0 %v7727_v42  ;;  %2065 = vmatprep.subr.bf16.mxu1 %v7730_v9 }
 0x3e8   :  { %v6145_v41 = vpop.eup %6144 }
 0x3e9   :  { %v1898_v43 = vmul.f32 %v6145_v41, %v6141_v22  ;;  %v6147_v44 = vpop.eup %6146  ;;  %v7761_v22 = vld [vmem:[#allocation8 + $0xa0] ss:$16 sps:$4 sm:$0xff]   ;;  %v7767_v41 = vld [vmem:[#allocation8 + $0xc4] ss:$16 sps:$4 sm:$0xff]  }
 0x3ea   :  { %v1897_v45 = vmul.f32 %v6147_v44, %v7580_v47  ;;  %2025 = vmatpush1.bf16.msra.mxu0 %v7734_v46  ;;  %2066 = vmatpush1.bf16.msra.mxu1 %v7737_v48  ;;  %v7749_v47 = vld [vmem:[#allocation8 + $0x80] ss:$16 sps:$4 sm:$0xff]   ;;  %9018 = vst [vmem:[#allocation36_spill] sm:$0xff] %v7761_v22  ;;  %9020 = vst [vmem:[#allocation38_spill] sm:$0xff] %v7767_v41 }
 0x3eb   :  { %2026 = vmatprep.subr.bf16.mxu0 %v7740_v49  ;;  %2067 = vmatprep.subr.bf16.mxu1 %v7743_v50  ;;  %v7773_v44 = vld [vmem:[#allocation8 + $0xc0] ss:$16 sps:$4 sm:$0xff]  }
 0x3ec   :  { %v7746_v51 = vadd.f32 %v1898_v43, %v1897_v45  ;;  %v7770_v43 = vld [vmem:[#allocation8 + $0xcc] ss:$16 sps:$4 sm:$0xff]   ;;  %9022 = vst [vmem:[#allocation40_spill] sm:$0xff] %v7773_v44  ;;  %v6149_v45 = vpop.eup %6148 }
 0x3ed   :  { %9021 = vst [vmem:[#allocation39_spill] sm:$0xff] %v7770_v43 }
 0x3ee   :  { %6150 = vtanh.f32 %v7746_v51  ;;  %2027 = vmatpush1.bf16.msra.mxu0 %v7749_v47  ;;  %2068 = vmatpush1.bf16.msra.mxu1 %v7752_v12 }
 0x3ef   :  { %2028 = vmatprep.subr.bf16.mxu0 %v7755_v8  ;;  %2069 = vmatprep.subr.bf16.mxu1 %v7758_v6 }
 0x3f2   :  { %2029 = vmatpush1.bf16.msra.mxu0 %v7761_v22  ;;  %2070 = vmatpush1.bf16.msra.mxu1 %v7764_v30  ;;  %v7779_v22 = vld [vmem:[#allocation8 + $0xe4] ss:$16 sps:$4 sm:$0xff]   ;;  %v7782_v30 = vld [vmem:[#allocation8 + $0xec] ss:$16 sps:$4 sm:$0xff]  }
 0x3f3   :  { %2030 = vmatprep.subr.bf16.mxu0 %v7767_v41  ;;  %2071 = vmatprep.subr.bf16.mxu1 %v7770_v43  ;;  %9024 = vst [vmem:[#allocation44_spill] sm:$0xff] %v7779_v22  ;;  %v7785_v43 = vld [vmem:[#allocation8 + $0xe0] ss:$16 sps:$4 sm:$0xff]  }
 0x3f6   :  { %2031 = vmatpush1.bf16.msra.mxu0 %v7773_v44  ;;  %2072 = vmatpush1.bf16.msra.mxu1 %v7776_v28  ;;  %v7788_v44 = vld [vmem:[#allocation8 + $0xe8] ss:$16 sps:$4 sm:$0xff]  }
 0x3f7   :  { %2032 = vmatprep.subr.bf16.mxu0 %v7779_v22  ;;  %2073 = vmatprep.subr.bf16.mxu1 %v7782_v30 }
 0x3f8   :  { %v6151_v41 = vpop.eup %6150 }
 0x3f9   :  { %v1901_v6 = vmul.f32 %v6151_v41, %v6149_v45  ;;  %v9025_v41 = vld [vmem:[#allocation51_spill] sm:$0xff]  ;;  %v9026_v45 = vld [vmem:[#allocation54_spill] sm:$0xff] }
 0x3fa   :  { %2033 = vmatpush1.bf16.msra.mxu0 %v7785_v43  ;;  %2074 = vmatpush1.bf16.msra.mxu1 %v7788_v44 }
 0x3fb   :  { %v1902_v28 = vpack.c.bf16 %v1901_v6, %v1901_v6  ;;  %2126 = vmatprep.subr.bf16.mxu0 %v7495_v39  ;;  %2167 = vmatprep.subr.bf16.mxu1 %v7498_v10 }
 0x3fd   :  { %v1904_v22 = vrot.slane %v1902_v28, 4  ;;  %2051 = vmatmul.mubr.bf16.vlgmr.msra.gmra.mrb[60].mxu0 %v1902_v28  ;;  %2092 = vmatmul.mubr.bf16.vlgmr.msra.gmra.mrb[60].mxu1 %v1902_v28 }
 0x3fe   :  { %2127 = vmatpush1.bf16.msra.mxu0 %v7501_v35  ;;  %2168 = vmatpush1.bf16.msra.mxu1 %v7504_v33 }
 0x3ff   :  { %1906 = vst [vmem:[#allocation2 + $0x28] sm:$0xf0] %v1904_v22  ;;  %2128 = vmatprep.subr.bf16.mxu0 %v7507_v34  ;;  %2169 = vmatprep.subr.bf16.mxu1 %v7510_v13 }
 0x400   :  { %2158 = vmatprep.mubr.bf16.mxu0 %v8899_v1  ;;  %2199 = vmatprep.mubr.bf16.mxu1 %v8899_v1 }
 0x402   :  { %2129 = vmatpush1.bf16.msra.mxu0 %v7515_v11  ;;  %2170 = vmatpush1.bf16.msra.mxu1 %v7518_v29 }
 0x403   :  { %2130 = vmatprep.subr.bf16.mxu0 %v7521_v37  ;;  %2171 = vmatprep.subr.bf16.mxu1 %v7608_v0 }
 0x406   :  { %2131 = vmatpush1.bf16.msra.mxu0 %v7611_v52  ;;  %2172 = vmatpush1.bf16.msra.mxu1 %v7614_v53 }
 0x407   :  { %2132 = vmatprep.subr.bf16.mxu0 %v7617_v54  ;;  %2173 = vmatprep.subr.bf16.mxu1 %v7620_v55 }
 0x40a   :  { %2133 = vmatpush1.bf16.msra.mxu0 %v7623_v56  ;;  %2174 = vmatpush1.bf16.msra.mxu1 %v7626_v57 }
 0x40b   :  { %2134 = vmatprep.subr.bf16.mxu0 %v7629_v58  ;;  %2175 = vmatprep.subr.bf16.mxu1 %v7632_v59 }
 0x40e   :  { %2135 = vmatpush1.bf16.msra.mxu0 %v7635_v60  ;;  %2176 = vmatpush1.bf16.msra.mxu1 %v7638_v61 }
 0x40f   :  { %2136 = vmatprep.subr.bf16.mxu0 %v7641_v62  ;;  %2177 = vmatprep.subr.bf16.mxu1 %v7644_v63 }
 0x412   :  { %2137 = vmatpush1.bf16.msra.mxu0 %v7647_v2  ;;  %2178 = vmatpush1.bf16.msra.mxu1 %v7650_v3  ;;  %v9028_v3 = vld [vmem:[#allocation55_spill] sm:$0xff] }
 0x413   :  { %2138 = vmatprep.subr.bf16.mxu0 %v7653_v4  ;;  %2179 = vmatprep.subr.bf16.mxu1 %v7656_v5  ;;  %v9027_v4 = vld [vmem:[#allocation53_spill] sm:$0xff] }
 0x416   :  { %2139 = vmatpush1.bf16.msra.mxu0 %v7659_v7  ;;  %2180 = vmatpush1.bf16.msra.mxu1 %v7662_v38 }
 0x417   :  { %2140 = vmatprep.subr.bf16.mxu0 %v7665_v32  ;;  %2181 = vmatprep.subr.bf16.mxu1 %v7668_v20 }
 0x41a   :  { %2141 = vmatpush1.bf16.msra.mxu0 %v7671_v27  ;;  %2182 = vmatpush1.bf16.msra.mxu1 %v7674_v15 }
 0x41b   :  { %2234 = vmatprep.subr.bf16.mxu0 %v7677_v16  ;;  %2275 = vmatprep.subr.bf16.mxu1 %v7680_v40 }
 0x4b0   :  { %v1941_v6 = vpop.f32.mrb[56].mxu0  ;;  %v1982_v22 = vpop.f32.mrb[56].mxu1 }
 0x4b1   :  { %v1942_v28 = vadd.f32 %v1941_v6, %v9025_v41  ;;  %v1983_v7 = vadd.f32 %v1982_v22, %v9026_v45  ;;  %v1943_v5 = vpop.f32.mrb[57].mxu0  ;;  %v1984_v38 = vpop.f32.mrb[57].mxu1  ;;  %v9031_v41 = vld [vmem:[#allocation89_spill] sm:$0xff]  ;;  %v9032_v45 = vld [vmem:[#allocation92_spill] sm:$0xff] }
 0x4b2   :  { %v1944_v32 = vadd.f32 %v1943_v5, %v9027_v4  ;;  %v1985_v20 = vadd.f32 %v1984_v38, %v9028_v3  ;;  %v1945_v2 = vpop.f32.mrb[58].mxu0  ;;  %v1986_v27 = vpop.f32.mrb[58].mxu1 }
 0x4b3   :  { %v5599_v63 = vmul.f32 -1.442695, %v1942_v28  ;;  %v1946_v15 = vpop.f32.mrb[59].mxu0  ;;  %v1987_v62 = vpop.f32.mrb[59].mxu1  ;;  %v5601_v40 = vmul.f32 -1.442695, %v1983_v7 }
 0x4b4   :  { %v5600_v16 = vmul.f32 -1.442695, %v1944_v32  ;;  %v9029_v7 = vld [vmem:[#allocation88_spill] sm:$0xff] }
 0x4b5   :  { %6152 = vpow2.f32 %v5599_v63 }
 0x4b6   :  { %6154 = vpow2.f32 %v5600_v16 }
 0x4b7   :  { %6156 = vtanh.f32 %v1985_v20  ;;  %v9030_v20 = vld [vmem:[#allocation90_spill] sm:$0xff] }
 0x4b8   :  { %6158 = vpow2.f32 %v5601_v40 }
 0x4bf   :  { %v6153_v61 = vpop.eup %6152 }
 0x4c0   :  { %v1998_v60 = vadd.f32 1.0, %v6153_v61  ;;  %v6155_v6 = vpop.eup %6154 }
 0x4c1   :  { %v1999_v22 = vadd.f32 1.0, %v6155_v6  ;;  %v6157_v4 = vpop.eup %6156 }
 0x4c2   :  { %6160 = vrcp.f32 %v1998_v60  ;;  %v6159_v5 = vpop.eup %6158 }
 0x4c3   :  { %6162 = vrcp.f32 %v1999_v22  ;;  %v2000_v27 = vadd.f32 1.0, %v6159_v5 }
 0x4c5   :  { %6164 = vrcp.f32 %v2000_v27 }
 0x4cc   :  { %v6161_v3 = vpop.eup %6160 }
 0x4cd   :  { %v2009_v2 = vmul.f32 %v6161_v3, %v6157_v4  ;;  %v6163_v38 = vpop.eup %6162 }
 0x4ce   :  { %v2008_v62 = vmul.f32 %v6163_v38, %v7688_v23 }
 0x4cf   :  { %v6165_v38 = vpop.eup %6164 }
 0x4d0   :  { %v2052_v32 = vpop.f32.mrb[60].mxu0  ;;  %v2093_v63 = vpop.f32.mrb[60].mxu1  ;;  %v7832_v15 = vadd.f32 %v2009_v2, %v2008_v62 }
 0x4d1   :  { %v2053_v61 = vadd.f32 %v2052_v32, %v9029_v7  ;;  %v2094_v16 = vadd.f32 %v2093_v63, %v9030_v20  ;;  %v2054_v40 = vpop.f32.mrb[61].mxu0  ;;  %v2095_v60 = vpop.f32.mrb[61].mxu1 }
 0x4d2   :  { %v2055_v28 = vadd.f32 %v2054_v40, %v9031_v41  ;;  %v2096_v6 = vadd.f32 %v2095_v60, %v9032_v45  ;;  %v2056_v22 = vpop.f32.mrb[62].mxu0  ;;  %v2097_v4 = vpop.f32.mrb[62].mxu1  ;;  %6166 = vtanh.f32 %v7832_v15 }
 0x4d3   :  { %v5602_v23 = vmul.f32 -1.442695, %v2053_v61  ;;  %v2057_v5 = vpop.f32.mrb[63].mxu0  ;;  %v2098_v3 = vpop.f32.mrb[63].mxu1  ;;  %v5604_v32 = vmul.f32 -1.442695, %v2094_v16 }
 0x4d4   :  { %v5603_v2 = vmul.f32 -1.442695, %v2055_v28  ;;  %v9034_v5 = vld [vmem:[#allocation36_spill] sm:$0xff]  ;;  %v9035_v3 = vld [vmem:[#allocation37_spill] sm:$0xff] }
 0x4d5   :  { %6168 = vpow2.f32 %v5602_v23 }
 0x4d6   :  { %6170 = vpow2.f32 %v5603_v2  ;;  %v9036_v2 = vld [vmem:[#allocation38_spill] sm:$0xff] }
 0x4d7   :  { %6172 = vtanh.f32 %v2096_v6 }
 0x4d8   :  { %6174 = vpow2.f32 %v5604_v32  ;;  %v9039_v32 = vld [vmem:[#allocation41_spill] sm:$0xff] }
 0x4dc   :  { %v6167_v62 = vpop.eup %6166 }
 0x4dd   :  { %v2012_v63 = vmul.f32 %v6167_v62, %v6165_v38  ;;  %v9037_v38 = vld [vmem:[#allocation39_spill] sm:$0xff]  ;;  %v9038_v62 = vld [vmem:[#allocation40_spill] sm:$0xff] }
 0x4df   :  { %v6169_v7 = vpop.eup %6168  ;;  %v2013_v20 = vpack.c.bf16 %v2012_v63, %v2012_v63 }
 0x4e0   :  { %v2109_v27 = vadd.f32 1.0, %v6169_v7  ;;  %v6171_v40 = vpop.eup %6170  ;;  %v9040_v7 = vld [vmem:[#allocation44_spill] sm:$0xff] }
 0x4e1   :  { %v2110_v60 = vadd.f32 1.0, %v6171_v40  ;;  %v2015_v41 = vrot.slane %v2013_v20, 4  ;;  %2159 = vmatmul.mubr.bf16.vlgmr.msra.gmra.mrb[64].mxu0 %v2013_v20  ;;  %2200 = vmatmul.mubr.bf16.vlgmr.msra.gmra.mrb[64].mxu1 %v2013_v20  ;;  %v6173_v61 = vpop.eup %6172 }
 0x4e2   :  { %6176 = vrcp.f32 %v2109_v27  ;;  %2235 = vmatpush1.bf16.msra.mxu0 %v7695_v36  ;;  %2276 = vmatpush1.bf16.msra.mxu1 %v7698_v14  ;;  %v6175_v16 = vpop.eup %6174 }
 0x4e3   :  { %6178 = vrcp.f32 %v2110_v60  ;;  %2017 = vst [vmem:[#allocation2 + $0x10] sm:$0xf0] %v2015_v41  ;;  %2236 = vmatprep.subr.bf16.mxu0 %v7701_v26  ;;  %2277 = vmatprep.subr.bf16.mxu1 %v7704_v24  ;;  %v2111_v22 = vadd.f32 1.0, %v6175_v16  ;;  %v9050_v60 = vld [vmem:[#allocation28_spill] sm:$0xff]  ;;  %v9051_v41 = vld [vmem:[#allocation29_spill] sm:$0xff]  ;;  %v9053_v16 = vld [vmem:[#allocation31_spill] sm:$0xff] }
 0x4e4   :  { %2266 = vmatprep.mubr.bf16.mxu0 %v8899_v1  ;;  %2307 = vmatprep.mubr.bf16.mxu1 %v8899_v1 }
 0x4e5   :  { %6180 = vrcp.f32 %v2111_v22 }
 0x4e6   :  { %2237 = vmatpush1.bf16.msra.mxu0 %v7709_v17  ;;  %2278 = vmatpush1.bf16.msra.mxu1 %v7712_v18 }
 0x4e7   :  { %2238 = vmatprep.subr.bf16.mxu0 %v7715_v19  ;;  %2279 = vmatprep.subr.bf16.mxu1 %v7718_v25 }
 0x4ea   :  { %2239 = vmatpush1.bf16.msra.mxu0 %v7721_v21  ;;  %2280 = vmatpush1.bf16.msra.mxu1 %v7724_v31 }
 0x4eb   :  { %2240 = vmatprep.subr.bf16.mxu0 %v7727_v42  ;;  %2281 = vmatprep.subr.bf16.mxu1 %v7730_v9 }
 0x4ec   :  { %v6177_v28 = vpop.eup %6176 }
 0x4ed   :  { %v2120_v45 = vmul.f32 %v6177_v28, %v6173_v61  ;;  %v6179_v6 = vpop.eup %6178  ;;  %v9052_v61 = vld [vmem:[#allocation30_spill] sm:$0xff]  ;;  %v9054_v28 = vld [vmem:[#allocation32_spill] sm:$0xff] }
 0x4ee   :  { %v2119_v4 = vmul.f32 %v6179_v6, %v7746_v51  ;;  %2241 = vmatpush1.bf16.msra.mxu0 %v7734_v46  ;;  %2282 = vmatpush1.bf16.msra.mxu1 %v7737_v48  ;;  %v9033_v51 = vld [vmem:[#allocation35_spill] sm:$0xff]  ;;  %v9056_v6 = vld [vmem:[#allocation34_spill] sm:$0xff] }
 0x4ef   :  { %2242 = vmatprep.subr.bf16.mxu0 %v7740_v49  ;;  %2283 = vmatprep.subr.bf16.mxu1 %v7743_v50  ;;  %v6181_v63 = vpop.eup %6180 }
 0x4f0   :  { %v7858_v23 = vadd.f32 %v2120_v45, %v2119_v4  ;;  %v9055_v45 = vld [vmem:[#allocation33_spill] sm:$0xff] }
 0x4f2   :  { %6182 = vtanh.f32 %v7858_v23  ;;  %2243 = vmatpush1.bf16.msra.mxu0 %v7749_v47  ;;  %2284 = vmatpush1.bf16.msra.mxu1 %v7752_v12 }
 0x4f3   :  { %2244 = vmatprep.subr.bf16.mxu0 %v7755_v8  ;;  %2285 = vmatprep.subr.bf16.mxu1 %v9033_v51 }
 0x4f6   :  { %2245 = vmatpush1.bf16.msra.mxu0 %v9034_v5  ;;  %2286 = vmatpush1.bf16.msra.mxu1 %v9035_v3 }
 0x4f7   :  { %2246 = vmatprep.subr.bf16.mxu0 %v9036_v2  ;;  %2287 = vmatprep.subr.bf16.mxu1 %v9037_v38 }
 0x4fa   :  { %2247 = vmatpush1.bf16.msra.mxu0 %v9038_v62  ;;  %2288 = vmatpush1.bf16.msra.mxu1 %v9039_v32 }
 0x4fb   :  { %2248 = vmatprep.subr.bf16.mxu0 %v9040_v7  ;;  %2289 = vmatprep.subr.bf16.mxu1 %v7782_v30 }
 0x4fc   :  { %v6183_v27 = vpop.eup %6182 }
 0x4fd   :  { %v2123_v20 = vmul.f32 %v6183_v27, %v6181_v63  ;;  %v9057_v63 = vld [vmem:[#allocation56_spill] sm:$0xff] }
 0x4fe   :  { %2249 = vmatpush1.bf16.msra.mxu0 %v7785_v43  ;;  %2290 = vmatpush1.bf16.msra.mxu1 %v7788_v44 }
 0x4ff   :  { %v2124_v40 = vpack.c.bf16 %v2123_v20, %v2123_v20  ;;  %2345 = vmatprep.subr.bf16.mxu0 %v7495_v39  ;;  %2386 = vmatprep.subr.bf16.mxu1 %v7498_v10  ;;  %v9041_v39 = vld [vmem:[#allocation42_spill] sm:$0xff]  ;;  %v9042_v10 = vld [vmem:[#allocation20_spill] sm:$0xff] }
 0x500   :  { %v9058_v20 = vld [vmem:[#allocation58_spill] sm:$0xff] }
 0x501   :  { %2125 = vst [vmem:[#allocation2 + $0x28] sm:$0xf] %v2124_v40  ;;  %2267 = vmatmul.mubr.bf16.vlgmr.msra.gmra.mrb[68].mxu0 %v2124_v40  ;;  %2308 = vmatmul.mubr.bf16.vlgmr.msra.gmra.mrb[68].mxu1 %v2124_v40 }
 0x502   :  { %2346 = vmatpush1.bf16.msra.mxu0 %v7501_v35  ;;  %2387 = vmatpush1.bf16.msra.mxu1 %v7504_v33  ;;  %v9043_v35 = vld [vmem:[#allocation21_spill] sm:$0xff]  ;;  %v9044_v33 = vld [vmem:[#allocation22_spill] sm:$0xff] }
 0x503   :  { %2347 = vmatprep.subr.bf16.mxu0 %v7507_v34  ;;  %2388 = vmatprep.subr.bf16.mxu1 %v7510_v13  ;;  %v9045_v34 = vld [vmem:[#allocation23_spill] sm:$0xff]  ;;  %v9046_v13 = vld [vmem:[#allocation24_spill] sm:$0xff] }
 0x504   :  { %2377 = vmatprep.mubr.bf16.mxu0 %v8899_v1  ;;  %2418 = vmatprep.mubr.bf16.mxu1 %v8899_v1 }
 0x506   :  { %2348 = vmatpush1.bf16.msra.mxu0 %v7515_v11  ;;  %2389 = vmatpush1.bf16.msra.mxu1 %v7518_v29  ;;  %v9047_v11 = vld [vmem:[#allocation25_spill] sm:$0xff]  ;;  %v9048_v29 = vld [vmem:[#allocation26_spill] sm:$0xff] }
 0x507   :  { %2349 = vmatprep.subr.bf16.mxu0 %v7521_v37  ;;  %2390 = vmatprep.subr.bf16.mxu1 %v7608_v0  ;;  %v9049_v37 = vld [vmem:[#allocation27_spill] sm:$0xff] }
 0x50a   :  { %2350 = vmatpush1.bf16.msra.mxu0 %v7611_v52  ;;  %2391 = vmatpush1.bf16.msra.mxu1 %v7614_v53 }
 0x50b   :  { %2351 = vmatprep.subr.bf16.mxu0 %v7617_v54  ;;  %2392 = vmatprep.subr.bf16.mxu1 %v7620_v55 }
 0x50e   :  { %2352 = vmatpush1.bf16.msra.mxu0 %v7623_v56  ;;  %2393 = vmatpush1.bf16.msra.mxu1 %v7626_v57 }
 0x50f   :  { %2353 = vmatprep.subr.bf16.mxu0 %v7629_v58  ;;  %2394 = vmatprep.subr.bf16.mxu1 %v7632_v59 }
 0x512   :  { %2354 = vmatpush1.bf16.msra.mxu0 %v9041_v39  ;;  %2395 = vmatpush1.bf16.msra.mxu1 %v9042_v10 }
 0x513   :  { %2355 = vmatprep.subr.bf16.mxu0 %v9043_v35  ;;  %2396 = vmatprep.subr.bf16.mxu1 %v9044_v33 }
 0x516   :  { %2356 = vmatpush1.bf16.msra.mxu0 %v9045_v34  ;;  %2397 = vmatpush1.bf16.msra.mxu1 %v9046_v13 }
 0x517   :  { %2357 = vmatprep.subr.bf16.mxu0 %v9047_v11  ;;  %2398 = vmatprep.subr.bf16.mxu1 %v9048_v29  ;;  %v9059_v29 = vld [vmem:[#allocation57_spill] sm:$0xff]  ;;  %v9060_v11 = vld [vmem:[#allocation60_spill] sm:$0xff] }
 0x51a   :  { %2358 = vmatpush1.bf16.msra.mxu0 %v9049_v37  ;;  %2399 = vmatpush1.bf16.msra.mxu1 %v9050_v60 }
 0x51b   :  { %2359 = vmatprep.subr.bf16.mxu0 %v9051_v41  ;;  %2400 = vmatprep.subr.bf16.mxu1 %v9052_v61 }
 0x51e   :  { %2360 = vmatpush1.bf16.msra.mxu0 %v9053_v16  ;;  %2401 = vmatpush1.bf16.msra.mxu1 %v9054_v28 }
 0x51f   :  { %2456 = vmatprep.subr.bf16.mxu0 %v9055_v45  ;;  %2497 = vmatprep.subr.bf16.mxu1 %v9056_v6 }
 0x5b4   :  { %v2160_v22 = vpop.f32.mrb[64].mxu0  ;;  %v2201_v4 = vpop.f32.mrb[64].mxu1 }
 0x5b5   :  { %v2161_v27 = vadd.f32 %v2160_v22, %v9057_v63  ;;  %v2202_v40 = vadd.f32 %v2201_v4, %v9058_v20  ;;  %v2162_v37 = vpop.f32.mrb[65].mxu0  ;;  %v2203_v60 = vpop.f32.mrb[65].mxu1 }
 0x5b6   :  { %v2163_v41 = vadd.f32 %v2162_v37, %v9059_v29  ;;  %v2204_v61 = vadd.f32 %v2203_v60, %v9060_v11  ;;  %v2164_v13 = vpop.f32.mrb[66].mxu0  ;;  %v2205_v16 = vpop.f32.mrb[66].mxu1 }
 0x5b7   :  { %v5605_v34 = vmul.f32 -1.442695, %v2161_v27  ;;  %v2165_v28 = vpop.f32.mrb[67].mxu0  ;;  %v2206_v33 = vpop.f32.mrb[67].mxu1  ;;  %v5607_v6 = vmul.f32 -1.442695, %v2202_v40 }
 0x5b8   :  { %v5606_v45 = vmul.f32 -1.442695, %v2163_v41  ;;  %v9063_v27 = vld [vmem:[#allocation85_spill] sm:$0xff]  ;;  %v9064_v40 = vld [vmem:[#allocation87_spill] sm:$0xff] }
 0x5b9   :  { %6184 = vpow2.f32 %v5605_v34 }
 0x5ba   :  { %6186 = vpow2.f32 %v5606_v45  ;;  %v9061_v45 = vld [vmem:[#allocation83_spill] sm:$0xff] }
 0x5bb   :  { %6188 = vtanh.f32 %v2204_v61  ;;  %v9062_v61 = vld [vmem:[#allocation86_spill] sm:$0xff] }
 0x5bc   :  { %6190 = vpow2.f32 %v5607_v6 }
 0x5c3   :  { %v6185_v35 = vpop.eup %6184 }
 0x5c4   :  { %v2217_v10 = vadd.f32 1.0, %v6185_v35  ;;  %v6187_v22 = vpop.eup %6186 }
 0x5c5   :  { %v2218_v4 = vadd.f32 1.0, %v6187_v22  ;;  %v6189_v29 = vpop.eup %6188 }
 0x5c6   :  { %6192 = vrcp.f32 %v2217_v10  ;;  %v6191_v37 = vpop.eup %6190 }
 0x5c7   :  { %6194 = vrcp.f32 %v2218_v4  ;;  %v2219_v16 = vadd.f32 1.0, %v6191_v37 }
 0x5c9   :  { %6196 = vrcp.f32 %v2219_v16 }
 0x5d0   :  { %v6193_v11 = vpop.eup %6192 }
 0x5d1   :  { %v2228_v13 = vmul.f32 %v6193_v11, %v6189_v29  ;;  %v6195_v60 = vpop.eup %6194 }
 0x5d2   :  { %v2227_v33 = vmul.f32 %v6195_v60, %v7832_v15 }
 0x5d3   :  { %v6197_v60 = vpop.eup %6196 }
 0x5d4   :  { %v2268_v41 = vpop.f32.mrb[68].mxu0  ;;  %v2309_v34 = vpop.f32.mrb[68].mxu1  ;;  %v7916_v28 = vadd.f32 %v2228_v13, %v2227_v33 }
 0x5d5   :  { %v2269_v35 = vadd.f32 %v2268_v41, %v9061_v45  ;;  %v2310_v63 = vadd.f32 %v2309_v34, %v9062_v61  ;;  %v2270_v6 = vpop.f32.mrb[69].mxu0  ;;  %v2311_v10 = vpop.f32.mrb[69].mxu1 }
 0x5d6   :  { %v2271_v20 = vadd.f32 %v2270_v6, %v9063_v27  ;;  %v2312_v22 = vadd.f32 %v2311_v10, %v9064_v40  ;;  %v2272_v4 = vpop.f32.mrb[70].mxu0  ;;  %v2313_v29 = vpop.f32.mrb[70].mxu1  ;;  %6198 = vtanh.f32 %v7916_v28 }
 0x5d7   :  { %v5608_v15 = vmul.f32 -1.442695, %v2269_v35  ;;  %v2273_v37 = vpop.f32.mrb[71].mxu0  ;;  %v2314_v11 = vpop.f32.mrb[71].mxu1  ;;  %v5610_v41 = vmul.f32 -1.442695, %v2310_v63 }
 0x5d8   :  { %v5609_v13 = vmul.f32 -1.442695, %v2271_v20 }
 0x5d9   :  { %6200 = vpow2.f32 %v5608_v15 }
 0x5da   :  { %6202 = vpow2.f32 %v5609_v13  ;;  %v7959_v13 = vld [vmem:[#allocation6 + $0x4] ss:$16 sps:$4 sm:$0xff]  }
 0x5db   :  { %6204 = vtanh.f32 %v2312_v22 }
 0x5dc   :  { %6206 = vpow2.f32 %v5610_v41  ;;  %v7965_v41 = vld [vmem:[#allocation6] ss:$16 sps:$4 sm:$0xff]  }
 0x5e0   :  { %v6199_v33 = vpop.eup %6198 }
 0x5e1   :  { %v2231_v34 = vmul.f32 %v6199_v33, %v6197_v60  ;;  %v7962_v60 = vld [vmem:[#allocation6 + $0xc] ss:$16 sps:$4 sm:$0xff]  }
 0x5e3   :  { %v6201_v45 = vpop.eup %6200  ;;  %v2232_v61 = vpack.c.bf16 %v2231_v34, %v2231_v34  ;;  %v7968_v34 = vld [vmem:[#allocation6 + $0x8] ss:$16 sps:$4 sm:$0xff]  }
 0x5e4   :  { %v2325_v16 = vadd.f32 1.0, %v6201_v45  ;;  %v6203_v6 = vpop.eup %6202  ;;  %v7971_v45 = vld [vmem:[#allocation6 + $0x24] ss:$16 sps:$4 sm:$0xff]  }
 0x5e5   :  { %v2326_v10 = vadd.f32 1.0, %v6203_v6  ;;  %2233 = vst [vmem:[#allocation2 + $0x20] sm:$0xf] %v2232_v61  ;;  %2378 = vmatmul.mubr.bf16.vlgmr.msra.gmra.mrb[72].mxu0 %v2232_v61  ;;  %2419 = vmatmul.mubr.bf16.vlgmr.msra.gmra.mrb[72].mxu1 %v2232_v61  ;;  %v6205_v35 = vpop.eup %6204  ;;  %v7979_v61 = vld [vmem:[#allocation6 + $0x20] ss:$16 sps:$4 sm:$0xff]  }
 0x5e6   :  { %6208 = vrcp.f32 %v2325_v16  ;;  %2457 = vmatpush1.bf16.msra.mxu0 %v7695_v36  ;;  %2498 = vmatpush1.bf16.msra.mxu1 %v7698_v14  ;;  %v6207_v63 = vpop.eup %6206  ;;  %v7974_v16 = vld [vmem:[#allocation6 + $0x2c] ss:$16 sps:$4 sm:$0xff]   ;;  %v7982_v6 = vld [vmem:[#allocation6 + $0x28] ss:$16 sps:$4 sm:$0xff]  }
 0x5e7   :  { %6210 = vrcp.f32 %v2326_v10  ;;  %2458 = vmatprep.subr.bf16.mxu0 %v7701_v26  ;;  %2499 = vmatprep.subr.bf16.mxu1 %v7704_v24  ;;  %v2327_v22 = vadd.f32 1.0, %v6207_v63  ;;  %v7985_v10 = vld [vmem:[#allocation6 + $0x44] ss:$16 sps:$4 sm:$0xff]   ;;  %v9076_v63 = vld [vmem:[#allocation31_spill] sm:$0xff] }
 0x5e8   :  { %2488 = vmatprep.mubr.bf16.mxu0 %v8899_v1  ;;  %2529 = vmatprep.mubr.bf16.mxu1 %v8899_v1 }
 0x5e9   :  { %6212 = vrcp.f32 %v2327_v22 }
 0x5ea   :  { %2459 = vmatpush1.bf16.msra.mxu0 %v7709_v17  ;;  %2500 = vmatpush1.bf16.msra.mxu1 %v7712_v18 }
 0x5eb   :  { %2460 = vmatprep.subr.bf16.mxu0 %v7715_v19  ;;  %2501 = vmatprep.subr.bf16.mxu1 %v7718_v25 }
 0x5ee   :  { %2461 = vmatpush1.bf16.msra.mxu0 %v7721_v21  ;;  %2502 = vmatpush1.bf16.msra.mxu1 %v7724_v31 }
 0x5ef   :  { %2462 = vmatprep.subr.bf16.mxu0 %v7727_v42  ;;  %2503 = vmatprep.subr.bf16.mxu1 %v7730_v9 }
 0x5f0   :  { %v6209_v27 = vpop.eup %6208 }
 0x5f1   :  { %v2336_v20 = vmul.f32 %v6209_v27, %v6205_v35  ;;  %v6211_v40 = vpop.eup %6210  ;;  %v9065_v35 = vld [vmem:[#allocation20_spill] sm:$0xff] }
 0x5f2   :  { %v2335_v4 = vmul.f32 %v6211_v40, %v7858_v23  ;;  %2463 = vmatpush1.bf16.msra.mxu0 %v7734_v46  ;;  %2504 = vmatpush1.bf16.msra.mxu1 %v7737_v48  ;;  %v9077_v27 = vld [vmem:[#allocation32_spill] sm:$0xff]  ;;  %v9079_v40 = vld [vmem:[#allocation34_spill] sm:$0xff] }
 0x5f3   :  { %2464 = vmatprep.subr.bf16.mxu0 %v7740_v49  ;;  %2505 = vmatprep.subr.bf16.mxu1 %v7743_v50  ;;  %v6213_v23 = vpop.eup %6212 }
 0x5f4   :  { %v7942_v29 = vadd.f32 %v2336_v20, %v2335_v4  ;;  %v9078_v20 = vld [vmem:[#allocation33_spill] sm:$0xff] }
 0x5f6   :  { %6214 = vtanh.f32 %v7942_v29  ;;  %2465 = vmatpush1.bf16.msra.mxu0 %v7749_v47  ;;  %2506 = vmatpush1.bf16.msra.mxu1 %v7752_v12 }
 0x5f7   :  { %2466 = vmatprep.subr.bf16.mxu0 %v7755_v8  ;;  %2507 = vmatprep.subr.bf16.mxu1 %v9033_v51 }
 0x5fa   :  { %2467 = vmatpush1.bf16.msra.mxu0 %v9034_v5  ;;  %2508 = vmatpush1.bf16.msra.mxu1 %v9035_v3 }
 0x5fb   :  { %2468 = vmatprep.subr.bf16.mxu0 %v9036_v2  ;;  %2509 = vmatprep.subr.bf16.mxu1 %v9037_v38 }
 0x5fe   :  { %2469 = vmatpush1.bf16.msra.mxu0 %v9038_v62  ;;  %2510 = vmatpush1.bf16.msra.mxu1 %v9039_v32 }
 0x5ff   :  { %2470 = vmatprep.subr.bf16.mxu0 %v9040_v7  ;;  %2511 = vmatprep.subr.bf16.mxu1 %v7782_v30 }
 0x600   :  { %v6215_v15 = vpop.eup %6214 }
 0x601   :  { %v2339_v37 = vmul.f32 %v6215_v15, %v6213_v23  ;;  %v9080_v23 = vld [vmem:[#allocation59_spill] sm:$0xff] }
 0x602   :  { %2471 = vmatpush1.bf16.msra.mxu0 %v7785_v43  ;;  %2512 = vmatpush1.bf16.msra.mxu1 %v7788_v44 }
 0x603   :  { %v2340_v11 = vpack.c.bf16 %v2339_v37, %v2339_v37  ;;  %2564 = vmatprep.subr.bf16.mxu0 %v7959_v13  ;;  %2605 = vmatprep.subr.bf16.mxu1 %v7962_v60  ;;  %v9081_v37 = vld [vmem:[#allocation62_spill] sm:$0xff] }
 0x605   :  { %v2342_v33 = vrot.slane %v2340_v11, 4  ;;  %2489 = vmatmul.mubr.bf16.vlgmr.msra.gmra.mrb[76].mxu0 %v2340_v11  ;;  %2530 = vmatmul.mubr.bf16.vlgmr.msra.gmra.mrb[76].mxu1 %v2340_v11 }
 0x606   :  { %2565 = vmatpush1.bf16.msra.mxu0 %v7965_v41  ;;  %2606 = vmatpush1.bf16.msra.mxu1 %v7968_v34 }
 0x607   :  { %2344 = vst [vmem:[#allocation2 + $0x18] sm:$0xf0] %v2342_v33  ;;  %2566 = vmatprep.subr.bf16.mxu0 %v7971_v45  ;;  %2607 = vmatprep.subr.bf16.mxu1 %v7974_v16 }
 0x608   :  { %2596 = vmatprep.mubr.bf16.mxu0 %v8899_v1  ;;  %2637 = vmatprep.mubr.bf16.mxu1 %v8899_v1 }
 0x60a   :  { %2567 = vmatpush1.bf16.msra.mxu0 %v7979_v61  ;;  %2608 = vmatpush1.bf16.msra.mxu1 %v7982_v6 }
 0x60b   :  { %2568 = vmatprep.subr.bf16.mxu0 %v7985_v10  ;;  %2609 = vmatprep.subr.bf16.mxu1 %v7608_v0  ;;  %v9066_v0 = vld [vmem:[#allocation21_spill] sm:$0xff] }
 0x60e   :  { %2569 = vmatpush1.bf16.msra.mxu0 %v7611_v52  ;;  %2610 = vmatpush1.bf16.msra.mxu1 %v7614_v53  ;;  %v9067_v52 = vld [vmem:[#allocation22_spill] sm:$0xff]  ;;  %v9068_v53 = vld [vmem:[#allocation23_spill] sm:$0xff] }
 0x60f   :  { %2570 = vmatprep.subr.bf16.mxu0 %v7617_v54  ;;  %2611 = vmatprep.subr.bf16.mxu1 %v7620_v55  ;;  %v9069_v54 = vld [vmem:[#allocation24_spill] sm:$0xff]  ;;  %v9070_v55 = vld [vmem:[#allocation25_spill] sm:$0xff] }
 0x612   :  { %2571 = vmatpush1.bf16.msra.mxu0 %v7623_v56  ;;  %2612 = vmatpush1.bf16.msra.mxu1 %v7626_v57  ;;  %v9071_v56 = vld [vmem:[#allocation26_spill] sm:$0xff]  ;;  %v9072_v57 = vld [vmem:[#allocation27_spill] sm:$0xff] }
 0x613   :  { %2572 = vmatprep.subr.bf16.mxu0 %v7629_v58  ;;  %2613 = vmatprep.subr.bf16.mxu1 %v7632_v59  ;;  %v9073_v58 = vld [vmem:[#allocation28_spill] sm:$0xff]  ;;  %v9074_v59 = vld [vmem:[#allocation29_spill] sm:$0xff] }
 0x616   :  { %2573 = vmatpush1.bf16.msra.mxu0 %v9041_v39  ;;  %2614 = vmatpush1.bf16.msra.mxu1 %v9065_v35  ;;  %v9075_v39 = vld [vmem:[#allocation30_spill] sm:$0xff] }
 0x617   :  { %2574 = vmatprep.subr.bf16.mxu0 %v9066_v0  ;;  %2615 = vmatprep.subr.bf16.mxu1 %v9067_v52  ;;  %v9082_v0 = vld [vmem:[#allocation61_spill] sm:$0xff] }
 0x61a   :  { %2575 = vmatpush1.bf16.msra.mxu0 %v9068_v53  ;;  %2616 = vmatpush1.bf16.msra.mxu1 %v9069_v54  ;;  %v9083_v53 = vld [vmem:[#allocation63_spill] sm:$0xff] }
 0x61b   :  { %2576 = vmatprep.subr.bf16.mxu0 %v9070_v55  ;;  %2617 = vmatprep.subr.bf16.mxu1 %v9071_v56 }
 0x61e   :  { %2577 = vmatpush1.bf16.msra.mxu0 %v9072_v57  ;;  %2618 = vmatpush1.bf16.msra.mxu1 %v9073_v58 }
 0x61f   :  { %2578 = vmatprep.subr.bf16.mxu0 %v9074_v59  ;;  %2619 = vmatprep.subr.bf16.mxu1 %v9075_v39 }
 0x622   :  { %2579 = vmatpush1.bf16.msra.mxu0 %v9076_v63  ;;  %2620 = vmatpush1.bf16.msra.mxu1 %v9077_v27 }
 0x623   :  { %2672 = vmatprep.subr.bf16.mxu0 %v9078_v20  ;;  %2713 = vmatprep.subr.bf16.mxu1 %v9079_v40 }
 0x6b8   :  { %v2379_v22 = vpop.f32.mrb[72].mxu0  ;;  %v2420_v4 = vpop.f32.mrb[72].mxu1 }
 0x6b9   :  { %v2380_v15 = vadd.f32 %v2379_v22, %v9080_v23  ;;  %v2421_v11 = vadd.f32 %v2420_v4, %v9081_v37  ;;  %v2381_v33 = vpop.f32.mrb[73].mxu0  ;;  %v2422_v35 = vpop.f32.mrb[73].mxu1 }
 0x6ba   :  { %v2382_v52 = vadd.f32 %v2381_v33, %v9082_v0  ;;  %v2423_v54 = vadd.f32 %v2422_v35, %v9083_v53  ;;  %v2383_v55 = vpop.f32.mrb[74].mxu0  ;;  %v2424_v56 = vpop.f32.mrb[74].mxu1 }
 0x6bb   :  { %v5611_v57 = vmul.f32 -1.442695, %v2380_v15  ;;  %v2384_v58 = vpop.f32.mrb[75].mxu0  ;;  %v2425_v59 = vpop.f32.mrb[75].mxu1  ;;  %v5613_v63 = vmul.f32 -1.442695, %v2421_v11 }
 0x6bc   :  { %v5612_v39 = vmul.f32 -1.442695, %v2382_v52  ;;  %v9084_v11 = vld [vmem:[#allocation80_spill] sm:$0xff] }
 0x6bd   :  { %6216 = vpow2.f32 %v5611_v57 }
 0x6be   :  { %6218 = vpow2.f32 %v5612_v39  ;;  %v9086_v39 = vld [vmem:[#allocation81_spill] sm:$0xff] }
 0x6bf   :  { %6220 = vtanh.f32 %v2423_v54  ;;  %v9085_v54 = vld [vmem:[#allocation82_spill] sm:$0xff] }
 0x6c0   :  { %6222 = vpow2.f32 %v5613_v63 }
 0x6c7   :  { %v6217_v27 = vpop.eup %6216 }
 0x6c8   :  { %v2436_v20 = vadd.f32 1.0, %v6217_v27  ;;  %v6219_v40 = vpop.eup %6218  ;;  %v9087_v27 = vld [vmem:[#allocation84_spill] sm:$0xff] }
 0x6c9   :  { %v2437_v22 = vadd.f32 1.0, %v6219_v40  ;;  %v6221_v4 = vpop.eup %6220 }
 0x6ca   :  { %6224 = vrcp.f32 %v2436_v20  ;;  %v6223_v23 = vpop.eup %6222 }
 0x6cb   :  { %6226 = vrcp.f32 %v2437_v22  ;;  %v2438_v15 = vadd.f32 1.0, %v6223_v23 }
 0x6cd   :  { %6228 = vrcp.f32 %v2438_v15 }
 0x6d4   :  { %v6225_v37 = vpop.eup %6224 }
 0x6d5   :  { %v2447_v33 = vmul.f32 %v6225_v37, %v6221_v4  ;;  %v6227_v35 = vpop.eup %6226 }
 0x6d6   :  { %v2446_v0 = vmul.f32 %v6227_v35, %v7916_v28 }
 0x6d8   :  { %v2490_v52 = vpop.f32.mrb[76].mxu0  ;;  %v2531_v53 = vpop.f32.mrb[76].mxu1  ;;  %v8018_v55 = vadd.f32 %v2447_v33, %v2446_v0 }
 0x6d9   :  { %v2491_v56 = vadd.f32 %v2490_v52, %v9084_v11  ;;  %v2532_v57 = vadd.f32 %v2531_v53, %v9085_v54  ;;  %v2492_v58 = vpop.f32.mrb[77].mxu0  ;;  %v2533_v59 = vpop.f32.mrb[77].mxu1 }
 0x6da   :  { %v2493_v63 = vadd.f32 %v2492_v58, %v9086_v39  ;;  %v2534_v20 = vadd.f32 %v2533_v59, %v9087_v27  ;;  %v2494_v40 = vpop.f32.mrb[78].mxu0  ;;  %v2535_v22 = vpop.f32.mrb[78].mxu1  ;;  %6230 = vtanh.f32 %v8018_v55 }
 0x6db   :  { %v5614_v28 = vmul.f32 -1.442695, %v2491_v56  ;;  %v2495_v4 = vpop.f32.mrb[79].mxu0  ;;  %v2536_v23 = vpop.f32.mrb[79].mxu1  ;;  %v5616_v0 = vmul.f32 -1.442695, %v2532_v57 }
 0x6dc   :  { %v5615_v37 = vmul.f32 -1.442695, %v2493_v63  ;;  %v6229_v33 = vpop.eup %6228  ;;  %v9089_v57 = vld [vmem:[#allocation66_spill] sm:$0xff]  ;;  %v9091_v22 = vld [vmem:[#allocation68_spill] sm:$0xff] }
 0x6dd   :  { %6232 = vpow2.f32 %v5614_v28 }
 0x6de   :  { %6234 = vpow2.f32 %v5615_v37 }
 0x6df   :  { %6236 = vtanh.f32 %v2534_v20  ;;  %v9090_v20 = vld [vmem:[#allocation65_spill] sm:$0xff] }
 0x6e0   :  { %6238 = vpow2.f32 %v5616_v0 }
 0x6e4   :  { %v6231_v35 = vpop.eup %6230 }
 0x6e5   :  { %v2450_v52 = vmul.f32 %v6231_v35, %v6229_v33 }
 0x6e7   :  { %v6233_v53 = vpop.eup %6232  ;;  %v2451_v11 = vpack.c.bf16 %v2450_v52, %v2450_v52 }
 0x6e8   :  { %v2547_v15 = vadd.f32 1.0, %v6233_v53  ;;  %v6235_v54 = vpop.eup %6234 }
 0x6e9   :  { %v2548_v58 = vadd.f32 1.0, %v6235_v54  ;;  %v2453_v59 = vrot.slane %v2451_v11, 4  ;;  %2597 = vmatmul.mubr.bf16.vlgmr.msra.gmra.mrb[80].mxu0 %v2451_v11  ;;  %2638 = vmatmul.mubr.bf16.vlgmr.msra.gmra.mrb[80].mxu1 %v2451_v11 }
 0x6ea   :  { %6240 = vrcp.f32 %v2547_v15  ;;  %2673 = vmatpush1.bf16.msra.mxu0 %v7695_v36  ;;  %2714 = vmatpush1.bf16.msra.mxu1 %v7698_v14  ;;  %v6237_v36 = vpop.eup %6236 }
 0x6eb   :  { %6242 = vrcp.f32 %v2548_v58  ;;  %2455 = vst [vmem:[#allocation2 + $0x20] sm:$0xf0] %v2453_v59  ;;  %2674 = vmatprep.subr.bf16.mxu0 %v7701_v26  ;;  %2715 = vmatprep.subr.bf16.mxu1 %v7704_v24  ;;  %v6239_v14 = vpop.eup %6238 }
 0x6ec   :  { %2704 = vmatprep.mubr.bf16.mxu0 %v8899_v1  ;;  %2745 = vmatprep.mubr.bf16.mxu1 %v8899_v1 }
 0x6ee   :  { %2675 = vmatpush1.bf16.msra.mxu0 %v7709_v17  ;;  %2716 = vmatpush1.bf16.msra.mxu1 %v7712_v18  ;;  %v2549_v17 = vadd.f32 1.0, %v6239_v14 }
 0x6ef   :  { %2676 = vmatprep.subr.bf16.mxu0 %v7715_v19  ;;  %2717 = vmatprep.subr.bf16.mxu1 %v7718_v25 }
 0x6f0   :  { %6244 = vrcp.f32 %v2549_v17 }
 0x6f2   :  { %2677 = vmatpush1.bf16.msra.mxu0 %v7721_v21  ;;  %2718 = vmatpush1.bf16.msra.mxu1 %v7724_v31 }
 0x6f3   :  { %2678 = vmatprep.subr.bf16.mxu0 %v7727_v42  ;;  %2719 = vmatprep.subr.bf16.mxu1 %v7730_v9  ;;  %v6529_v9 = vld [vmem:[#allocation6 + $0x4c] ss:$16 sps:$4 sm:$0xff]  }
 0x6f4   :  { %v6241_v26 = vpop.eup %6240 }
 0x6f5   :  { %v2558_v24 = vmul.f32 %v6241_v26, %v6237_v36  ;;  %v6243_v56 = vpop.eup %6242 }
 0x6f6   :  { %v2557_v18 = vmul.f32 %v6243_v56, %v7942_v29  ;;  %2679 = vmatpush1.bf16.msra.mxu0 %v7734_v46  ;;  %2720 = vmatpush1.bf16.msra.mxu1 %v7737_v48  ;;  %v6530_v46 = vld [vmem:[#allocation6 + $0x40] ss:$16 sps:$4 sm:$0xff]   ;;  %v6531_v48 = vld [vmem:[#allocation6 + $0x48] ss:$16 sps:$4 sm:$0xff]   ;;  %v6548_v29 = vld [vmem:[#allocation6 + $0xe4] ss:$16 sps:$4 sm:$0xff]  }
 0x6f7   :  { %2680 = vmatprep.subr.bf16.mxu0 %v7740_v49  ;;  %2721 = vmatprep.subr.bf16.mxu1 %v7743_v50  ;;  %v6532_v49 = vld [vmem:[#allocation6 + $0x64] ss:$16 sps:$4 sm:$0xff]   ;;  %v6533_v50 = vld [vmem:[#allocation6 + $0x6c] ss:$16 sps:$4 sm:$0xff]  }
 0x6f8   :  { %v8044_v19 = vadd.f32 %v2558_v24, %v2557_v18 }
 0x6fa   :  { %6246 = vtanh.f32 %v8044_v19  ;;  %2681 = vmatpush1.bf16.msra.mxu0 %v7749_v47  ;;  %2722 = vmatpush1.bf16.msra.mxu1 %v7752_v12  ;;  %v6245_v25 = vpop.eup %6244  ;;  %v6534_v47 = vld [vmem:[#allocation6 + $0x60] ss:$16 sps:$4 sm:$0xff]   ;;  %v6535_v12 = vld [vmem:[#allocation6 + $0x68] ss:$16 sps:$4 sm:$0xff]  }
 0x6fb   :  { %2682 = vmatprep.subr.bf16.mxu0 %v7755_v8  ;;  %2723 = vmatprep.subr.bf16.mxu1 %v9033_v51  ;;  %v6536_v8 = vld [vmem:[#allocation6 + $0x84] ss:$16 sps:$4 sm:$0xff]  }
 0x6fc   :  { %v6540_v51 = vld [vmem:[#allocation6 + $0xa4] ss:$16 sps:$4 sm:$0xff]  }
 0x6fe   :  { %2683 = vmatpush1.bf16.msra.mxu0 %v9034_v5  ;;  %2724 = vmatpush1.bf16.msra.mxu1 %v9035_v3  ;;  %v6541_v5 = vld [vmem:[#allocation6 + $0xac] ss:$16 sps:$4 sm:$0xff]   ;;  %v6542_v3 = vld [vmem:[#allocation6 + $0xa0] ss:$16 sps:$4 sm:$0xff]  }
 0x6ff   :  { %2684 = vmatprep.subr.bf16.mxu0 %v9036_v2  ;;  %2725 = vmatprep.subr.bf16.mxu1 %v9037_v38  ;;  %v6543_v2 = vld [vmem:[#allocation6 + $0xa8] ss:$16 sps:$4 sm:$0xff]   ;;  %v6544_v38 = vld [vmem:[#allocation6 + $0xc4] ss:$16 sps:$4 sm:$0xff]  }
 0x702   :  { %2685 = vmatpush1.bf16.msra.mxu0 %v9038_v62  ;;  %2726 = vmatpush1.bf16.msra.mxu1 %v9039_v32  ;;  %v6545_v62 = vld [vmem:[#allocation6 + $0xcc] ss:$16 sps:$4 sm:$0xff]   ;;  %v6546_v32 = vld [vmem:[#allocation6 + $0xc0] ss:$16 sps:$4 sm:$0xff]  }
 0x703   :  { %2686 = vmatprep.subr.bf16.mxu0 %v9040_v7  ;;  %2727 = vmatprep.subr.bf16.mxu1 %v7782_v30  ;;  %v6537_v30 = vld [vmem:[#allocation6 + $0x8c] ss:$16 sps:$4 sm:$0xff]   ;;  %v6547_v7 = vld [vmem:[#allocation6 + $0xc8] ss:$16 sps:$4 sm:$0xff]  }
 0x704   :  { %v6247_v21 = vpop.eup %6246 }
 0x705   :  { %v2561_v31 = vmul.f32 %v6247_v21, %v6245_v25  ;;  %v9092_v21 = vld [vmem:[#allocation75_spill] sm:$0xff] }
 0x706   :  { %2687 = vmatpush1.bf16.msra.mxu0 %v7785_v43  ;;  %2728 = vmatpush1.bf16.msra.mxu1 %v7788_v44  ;;  %v6538_v43 = vld [vmem:[#allocation6 + $0x80] ss:$16 sps:$4 sm:$0xff]   ;;  %v6539_v44 = vld [vmem:[#allocation6 + $0x88] ss:$16 sps:$4 sm:$0xff]  }
 0x707   :  { %v2562_v42 = vpack.c.bf16 %v2561_v31, %v2561_v31  ;;  %2783 = vmatprep.subr.bf16.mxu0 %v7959_v13  ;;  %2824 = vmatprep.subr.bf16.mxu1 %v7962_v60  ;;  %v6549_v13 = vld [vmem:[#allocation6 + $0xec] ss:$16 sps:$4 sm:$0xff]   ;;  %v6550_v60 = vld [vmem:[#allocation6 + $0xe0] ss:$16 sps:$4 sm:$0xff]  }
 0x709   :  { %2563 = vst [vmem:[#allocation2 + $0x18] sm:$0xf] %v2562_v42  ;;  %2705 = vmatmul.mubr.bf16.vlgmr.msra.gmra.mrb[84].mxu0 %v2562_v42  ;;  %2746 = vmatmul.mubr.bf16.vlgmr.msra.gmra.mrb[84].mxu1 %v2562_v42  ;;  %v9093_v42 = vld [vmem:[#allocation78_spill] sm:$0xff] }
 0x70a   :  { %2784 = vmatpush1.bf16.msra.mxu0 %v7965_v41  ;;  %2825 = vmatpush1.bf16.msra.mxu1 %v7968_v34  ;;  %v6551_v41 = vld [vmem:[#allocation6 + $0xe8] ss:$16 sps:$4 sm:$0xff]   ;;  %v6552_v34 = vld [vmem:[#allocation8 + $0x4] ss:$16 sps:$4 sm:$0xff]  }
 0x70b   :  { %2785 = vmatprep.subr.bf16.mxu0 %v7971_v45  ;;  %2826 = vmatprep.subr.bf16.mxu1 %v7974_v16  ;;  %v6553_v45 = vld [vmem:[#allocation8 + $0xc] ss:$16 sps:$4 sm:$0xff]  }
 0x70c   :  { %2815 = vmatprep.mubr.bf16.mxu0 %v8899_v1  ;;  %2856 = vmatprep.mubr.bf16.mxu1 %v8899_v1 }
 0x70e   :  { %2786 = vmatpush1.bf16.msra.mxu0 %v7979_v61  ;;  %2827 = vmatpush1.bf16.msra.mxu1 %v7982_v6  ;;  %v9088_v6 = vld [vmem:[#allocation64_spill] sm:$0xff] }
 0x70f   :  { %2787 = vmatprep.subr.bf16.mxu0 %v7985_v10  ;;  %2828 = vmatprep.subr.bf16.mxu1 %v6529_v9 }
 0x712   :  { %2788 = vmatpush1.bf16.msra.mxu0 %v6530_v46  ;;  %2829 = vmatpush1.bf16.msra.mxu1 %v6531_v48 }
 0x713   :  { %2789 = vmatprep.subr.bf16.mxu0 %v6532_v49  ;;  %2830 = vmatprep.subr.bf16.mxu1 %v6533_v50  ;;  %v9094_v49 = vld [vmem:[#allocation77_spill] sm:$0xff] }
 0x716   :  { %2790 = vmatpush1.bf16.msra.mxu0 %v6534_v47  ;;  %2831 = vmatpush1.bf16.msra.mxu1 %v6535_v12  ;;  %v9095_v47 = vld [vmem:[#allocation79_spill] sm:$0xff] }
 0x717   :  { %2791 = vmatprep.subr.bf16.mxu0 %v6536_v8  ;;  %2832 = vmatprep.subr.bf16.mxu1 %v6537_v30 }
 0x71a   :  { %2792 = vmatpush1.bf16.msra.mxu0 %v6538_v43  ;;  %2833 = vmatpush1.bf16.msra.mxu1 %v6539_v44 }
 0x71b   :  { %2793 = vmatprep.subr.bf16.mxu0 %v6540_v51  ;;  %2834 = vmatprep.subr.bf16.mxu1 %v6541_v5 }
 0x71e   :  { %2794 = vmatpush1.bf16.msra.mxu0 %v6542_v3  ;;  %2835 = vmatpush1.bf16.msra.mxu1 %v6543_v2 }
 0x71f   :  { %2795 = vmatprep.subr.bf16.mxu0 %v6544_v38  ;;  %2836 = vmatprep.subr.bf16.mxu1 %v6545_v62 }
 0x722   :  { %2796 = vmatpush1.bf16.msra.mxu0 %v6546_v32  ;;  %2837 = vmatpush1.bf16.msra.mxu1 %v6547_v7 }
 0x723   :  { %2797 = vmatprep.subr.bf16.mxu0 %v6548_v29  ;;  %2838 = vmatprep.subr.bf16.mxu1 %v6549_v13 }
 0x726   :  { %2798 = vmatpush1.bf16.msra.mxu0 %v6550_v60  ;;  %2839 = vmatpush1.bf16.msra.mxu1 %v6551_v41  ;;  %v6554_v60 = vld [vmem:[#allocation8] ss:$16 sps:$4 sm:$0xff]   ;;  %v6555_v41 = vld [vmem:[#allocation8 + $0x8] ss:$16 sps:$4 sm:$0xff]  }
 0x727   :  { %2894 = vmatprep.subr.bf16.mxu0 %v6552_v34  ;;  %2935 = vmatprep.subr.bf16.mxu1 %v6553_v45  ;;  %v6556_v34 = vld [vmem:[#allocation8 + $0x24] ss:$16 sps:$4 sm:$0xff]   ;;  %v6557_v45 = vld [vmem:[#allocation8 + $0x2c] ss:$16 sps:$4 sm:$0xff]  }
 0x7bc   :  { %v2598_v16 = vpop.f32.mrb[80].mxu0  ;;  %v2639_v61 = vpop.f32.mrb[80].mxu1 }
 0x7bd   :  { %v2599_v10 = vadd.f32 %v2598_v16, %v9088_v6  ;;  %v2640_v39 = vadd.f32 %v2639_v61, %v9089_v57  ;;  %v2600_v63 = vpop.f32.mrb[81].mxu0  ;;  %v2641_v27 = vpop.f32.mrb[81].mxu1  ;;  %v6558_v16 = vld [vmem:[#allocation8 + $0x20] ss:$16 sps:$4 sm:$0xff]   ;;  %v6559_v61 = vld [vmem:[#allocation8 + $0x28] ss:$16 sps:$4 sm:$0xff]  }
 0x7be   :  { %v2601_v40 = vadd.f32 %v2600_v63, %v9090_v20  ;;  %v2642_v28 = vadd.f32 %v2641_v27, %v9091_v22  ;;  %v2602_v4 = vpop.f32.mrb[82].mxu0  ;;  %v2643_v23 = vpop.f32.mrb[82].mxu1  ;;  %v6560_v6 = vld [vmem:[#allocation8 + $0x44] ss:$16 sps:$4 sm:$0xff]   ;;  %v6562_v63 = vld [vmem:[#allocation8 + $0x40] ss:$16 sps:$4 sm:$0xff]  }
 0x7bf   :  { %v5617_v37 = vmul.f32 -1.442695, %v2599_v10  ;;  %v2603_v33 = vpop.f32.mrb[83].mxu0  ;;  %v2644_v35 = vpop.f32.mrb[83].mxu1  ;;  %v5619_v52 = vmul.f32 -1.442695, %v2640_v39 }
 0x7c0   :  { %v5618_v0 = vmul.f32 -1.442695, %v2601_v40  ;;  %v6561_v10 = vld [vmem:[#allocation8 + $0x4c] ss:$16 sps:$4 sm:$0xff]   ;;  %v6563_v27 = vld [vmem:[#allocation8 + $0x48] ss:$16 sps:$4 sm:$0xff]  }
 0x7c1   :  { %6248 = vpow2.f32 %v5617_v37  ;;  %v6564_v40 = vld [vmem:[#allocation8 + $0x64] ss:$16 sps:$4 sm:$0xff]   ;;  %v6565_v22 = vld [vmem:[#allocation8 + $0x6c] ss:$16 sps:$4 sm:$0xff]   ;;  %v6566_v33 = vld [vmem:[#allocation8 + $0x60] ss:$16 sps:$4 sm:$0xff]  }
 0x7c2   :  { %6250 = vpow2.f32 %v5618_v0  ;;  %v6567_v35 = vld [vmem:[#allocation8 + $0x68] ss:$16 sps:$4 sm:$0xff]   ;;  %v6568_v0 = vld [vmem:[#allocation8 + $0x84] ss:$16 sps:$4 sm:$0xff]  }
 0x7c3   :  { %6252 = vtanh.f32 %v2642_v28 }
 0x7c4   :  { %6254 = vpow2.f32 %v5619_v52  ;;  %v6569_v52 = vld [vmem:[#allocation8 + $0x8c] ss:$16 sps:$4 sm:$0xff]  }
 0x7cb   :  { %v6249_v53 = vpop.eup %6248 }
 0x7cc   :  { %v2655_v15 = vadd.f32 1.0, %v6249_v53  ;;  %v6251_v11 = vpop.eup %6250 }
 0x7cd   :  { %v2656_v54 = vadd.f32 1.0, %v6251_v11  ;;  %v6253_v58 = vpop.eup %6252  ;;  %v6571_v11 = vld [vmem:[#allocation8 + $0x88] ss:$16 sps:$4 sm:$0xff]  }
 0x7ce   :  { %6256 = vrcp.f32 %v2655_v15  ;;  %v6255_v59 = vpop.eup %6254  ;;  %v6570_v15 = vld [vmem:[#allocation8 + $0x80] ss:$16 sps:$4 sm:$0xff]  }
 0x7cf   :  { %6258 = vrcp.f32 %v2656_v54  ;;  %v2657_v24 = vadd.f32 1.0, %v6255_v59  ;;  %v6572_v54 = vld [vmem:[#allocation8 + $0xa4] ss:$16 sps:$4 sm:$0xff]   ;;  %v6575_v59 = vld [vmem:[#allocation8 + $0xa8] ss:$16 sps:$4 sm:$0xff]  }
 0x7d1   :  { %6260 = vrcp.f32 %v2657_v24  ;;  %v6579_v24 = vld [vmem:[#allocation8 + $0xc8] ss:$16 sps:$4 sm:$0xff]  }
 0x7d8   :  { %v6257_v36 = vpop.eup %6256 }
 0x7d9   :  { %v2666_v14 = vmul.f32 %v6257_v36, %v6253_v58  ;;  %v6259_v26 = vpop.eup %6258  ;;  %v6574_v58 = vld [vmem:[#allocation8 + $0xa0] ss:$16 sps:$4 sm:$0xff]   ;;  %v6576_v36 = vld [vmem:[#allocation8 + $0xc4] ss:$16 sps:$4 sm:$0xff]  }
 0x7da   :  { %v2665_v56 = vmul.f32 %v6259_v26, %v8018_v55  ;;  %v6578_v26 = vld [vmem:[#allocation8 + $0xc0] ss:$16 sps:$4 sm:$0xff]  }
 0x7db   :  { %v6261_v5 = vpop.eup %6260 }
 0x7dc   :  { %v2706_v17 = vpop.f32.mrb[84].mxu0  ;;  %v2747_v18 = vpop.f32.mrb[84].mxu1  ;;  %v8077_v25 = vadd.f32 %v2666_v14, %v2665_v56  ;;  %v6577_v14 = vld [vmem:[#allocation8 + $0xcc] ss:$16 sps:$4 sm:$0xff]  }
 0x7dd   :  { %v2707_v31 = vadd.f32 %v2706_v17, %v9092_v21  ;;  %v2748_v9 = vadd.f32 %v2747_v18, %v9093_v42  ;;  %v2708_v46 = vpop.f32.mrb[85].mxu0  ;;  %v2749_v48 = vpop.f32.mrb[85].mxu1  ;;  %v6580_v17 = vld [vmem:[#allocation8 + $0xe4] ss:$16 sps:$4 sm:$0xff]   ;;  %v6581_v18 = vld [vmem:[#allocation8 + $0xec] ss:$16 sps:$4 sm:$0xff]  }
 0x7de   :  { %v2709_v50 = vadd.f32 %v2708_v46, %v9094_v49  ;;  %v2750_v12 = vadd.f32 %v2749_v48, %v9095_v47  ;;  %v2710_v8 = vpop.f32.mrb[86].mxu0  ;;  %v2751_v30 = vpop.f32.mrb[86].mxu1  ;;  %6262 = vtanh.f32 %v8077_v25  ;;  %v6582_v42 = vld [vmem:[#allocation8 + $0xe0] ss:$16 sps:$4 sm:$0xff]   ;;  %v3011_v47 = vld [vmem:[#allocation9 + $0x8] sm:$0xff] }
 0x7df   :  { %v5620_v55 = vmul.f32 -1.442695, %v2707_v31  ;;  %v2711_v43 = vpop.f32.mrb[87].mxu0  ;;  %v2752_v44 = vpop.f32.mrb[87].mxu1  ;;  %v5622_v2 = vmul.f32 -1.442695, %v2748_v9 }
 0x7e0   :  { %v5621_v51 = vmul.f32 -1.442695, %v2709_v50  ;;  %v6583_v9 = vld [vmem:[#allocation8 + $0xe8] ss:$16 sps:$4 sm:$0xff]   ;;  %v3010_v49 = vld [vmem:[#allocation9] sm:$0xff] }
 0x7e1   :  { %6264 = vpow2.f32 %v5620_v55  ;;  %v3014_v50 = vld [vmem:[#allocation9 + $0x20] sm:$0xff]  ;;  %v3015_v8 = vld [vmem:[#allocation9 + $0x28] sm:$0xff] }
 0x7e2   :  { %6266 = vpow2.f32 %v5621_v51  ;;  %v5629_v30 = vcombine.low %v3010_v49, %v3014_v50  ;;  %v5631_v55 = vcombine.low %v3011_v47, %v3015_v8  ;;  %v5632_v43 = vcombine.high %v3011_v47, %v3015_v8  ;;  %v3018_v44 = vld [vmem:[#allocation9 + $0x40] sm:$0xff] }
 0x7e3   :  { %6268 = vtanh.f32 %v2750_v12  ;;  %v5630_v12 = vcombine.high %v3010_v49, %v3014_v50  ;;  %v3022_v51 = vld [vmem:[#allocation9 + $0x60] sm:$0xff] }
 0x7e4   :  { %6270 = vpow2.f32 %v5622_v2  ;;  %v3023_v2 = vld [vmem:[#allocation9 + $0x68] sm:$0xff]  ;;  %v3078_v8 = vld [vmem:[#allocation9 + $0x220] sm:$0xff] }
 0x7e8   :  { %v6263_v3 = vpop.eup %6262 }
 0x7e9   :  { %v2669_v38 = vmul.f32 %v6263_v3, %v6261_v5  ;;  %v3019_v5 = vld [vmem:[#allocation9 + $0x48] sm:$0xff]  ;;  %v5638_v3 = vcombine.high %v3018_v44, %v3022_v51 }
 0x7eb   :  { %v6265_v62 = vpop.eup %6264  ;;  %v2670_v7 = vpack.c.bf16 %v2669_v38, %v2669_v38  ;;  %v5637_v38 = vcombine.low %v3018_v44, %v3022_v51 }
 0x7ec   :  { %v2763_v32 = vadd.f32 1.0, %v6265_v62  ;;  %v6267_v29 = vpop.eup %6266  ;;  %v5639_v62 = vcombine.low %v3019_v5, %v3023_v2 }
 0x7ed   :  { %v2764_v13 = vadd.f32 1.0, %v6267_v29  ;;  %2671 = vst [vmem:[#allocation2 + $0x30] sm:$0xf] %v2670_v7  ;;  %2816 = vmatmul.mubr.bf16.vlgmr.msra.gmra.mrb[88].mxu0 %v2670_v7  ;;  %2857 = vmatmul.mubr.bf16.vlgmr.msra.gmra.mrb[88].mxu1 %v2670_v7  ;;  %v6269_v57 = vpop.eup %6268  ;;  %v3026_v7 = vld [vmem:[#allocation9 + $0x80] sm:$0xff] }
 0x7ee   :  { %6272 = vrcp.f32 %v2763_v32  ;;  %2895 = vmatpush1.bf16.msra.mxu0 %v6554_v60  ;;  %2936 = vmatpush1.bf16.msra.mxu1 %v6555_v41  ;;  %v6271_v39 = vpop.eup %6270  ;;  %v5640_v32 = vcombine.high %v3019_v5, %v3023_v2  ;;  %v3030_v29 = vld [vmem:[#allocation9 + $0xa0] sm:$0xff]  ;;  %v3031_v41 = vld [vmem:[#allocation9 + $0xa8] sm:$0xff] }
 0x7ef   :  { %6274 = vrcp.f32 %v2764_v13  ;;  %2896 = vmatprep.subr.bf16.mxu0 %v6556_v34  ;;  %2937 = vmatprep.subr.bf16.mxu1 %v6557_v45  ;;  %v2765_v23 = vadd.f32 1.0, %v6271_v39  ;;  %v3027_v13 = vld [vmem:[#allocation9 + $0x88] sm:$0xff]  ;;  %v5646_v60 = vcombine.high %v3026_v7, %v3030_v29  ;;  %v5645_v34 = vcombine.low %v3026_v7, %v3030_v29  ;;  %v3086_v2 = vld [vmem:[#allocation9 + $0x260] sm:$0xff] }
 0x7f0   :  { %2926 = vmatprep.mubr.bf16.mxu0 %v8899_v1  ;;  %2967 = vmatprep.mubr.bf16.mxu1 %v8899_v1  ;;  %v5647_v45 = vcombine.low %v3027_v13, %v3031_v41  ;;  %v3039_v39 = vld [vmem:[#allocation9 + $0xe8] sm:$0xff] }
 0x7f1   :  { %6276 = vrcp.f32 %v2765_v23  ;;  %v3047_v23 = vld [vmem:[#allocation9 + $0x128] sm:$0xff] }
 0x7f2   :  { %2897 = vmatpush1.bf16.msra.mxu0 %v6558_v16  ;;  %2938 = vmatpush1.bf16.msra.mxu1 %v6559_v61  ;;  %v5648_v16 = vcombine.high %v3027_v13, %v3031_v41  ;;  %v3034_v61 = vld [vmem:[#allocation9 + $0xc0] sm:$0xff] }
 0x7f3   :  { %2898 = vmatprep.subr.bf16.mxu0 %v6560_v6  ;;  %2939 = vmatprep.subr.bf16.mxu1 %v6561_v10  ;;  %v3038_v6 = vld [vmem:[#allocation9 + $0xe0] sm:$0xff]  ;;  %v3035_v10 = vld [vmem:[#allocation9 + $0xc8] sm:$0xff] }
 0x7f4   :  { %v3094_v41 = vld [vmem:[#allocation9 + $0x2a0] sm:$0xff] }
 0x7f6   :  { %2899 = vmatpush1.bf16.msra.mxu0 %v6562_v63  ;;  %2940 = vmatpush1.bf16.msra.mxu1 %v6563_v27  ;;  %v5653_v63 = vcombine.low %v3034_v61, %v3038_v6  ;;  %v5655_v27 = vcombine.low %v3035_v10, %v3039_v39 }
 0x7f7   :  { %2900 = vmatprep.subr.bf16.mxu0 %v6564_v40  ;;  %2941 = vmatprep.subr.bf16.mxu1 %v6565_v22  ;;  %v3042_v40 = vld [vmem:[#allocation9 + $0x100] sm:$0xff] }
 0x7f8   :  { %v6273_v20 = vpop.eup %6272  ;;  %v3046_v22 = vld [vmem:[#allocation9 + $0x120] sm:$0xff] }
 0x7f9   :  { %v2774_v28 = vmul.f32 %v6273_v20, %v6269_v57  ;;  %v6275_v4 = vpop.eup %6274  ;;  %v5654_v57 = vcombine.high %v3034_v61, %v3038_v6  ;;  %v5656_v20 = vcombine.high %v3035_v10, %v3039_v39  ;;  %v3102_v39 = vld [vmem:[#allocation9 + $0x2e0] sm:$0xff] }
 0x7fa   :  { %v2773_v37 = vmul.f32 %v6275_v4, %v8044_v19  ;;  %2901 = vmatpush1.bf16.msra.mxu0 %v6566_v33  ;;  %2942 = vmatpush1.bf16.msra.mxu1 %v6567_v35  ;;  %v6573_v19 = vld [vmem:[#allocation8 + $0xac] ss:$16 sps:$4 sm:$0xff]   ;;  %v5662_v4 = vcombine.high %v3042_v40, %v3046_v22 }
 0x7fb   :  { %2902 = vmatprep.subr.bf16.mxu0 %v6568_v0  ;;  %2943 = vmatprep.subr.bf16.mxu1 %v6569_v52  ;;  %v6277_v56 = vpop.eup %6276  ;;  %v3050_v0 = vld [vmem:[#allocation9 + $0x140] sm:$0xff] }
 0x7fc   :  { %v8087_v53 = vadd.f32 %v2774_v28, %v2773_v37  ;;  %v3043_v28 = vld [vmem:[#allocation9 + $0x108] sm:$0xff]  ;;  %v5661_v37 = vcombine.low %v3042_v40, %v3046_v22  ;;  %v3054_v52 = vld [vmem:[#allocation9 + $0x160] sm:$0xff] }
 0x7fd   :  { %v5663_v33 = vcombine.low %v3043_v28, %v3047_v23  ;;  %v5664_v35 = vcombine.high %v3043_v28, %v3047_v23  ;;  %v3110_v23 = vld [vmem:[#allocation9 + $0x320] sm:$0xff] }
 0x7fe   :  { %6278 = vtanh.f32 %v8087_v53  ;;  %2903 = vmatpush1.bf16.msra.mxu0 %v6570_v15  ;;  %2944 = vmatpush1.bf16.msra.mxu1 %v6571_v11  ;;  %v3051_v15 = vld [vmem:[#allocation9 + $0x148] sm:$0xff]  ;;  %v5670_v11 = vcombine.high %v3050_v0, %v3054_v52 }
 0x7ff   :  { %2904 = vmatprep.subr.bf16.mxu0 %v6572_v54  ;;  %2945 = vmatprep.subr.bf16.mxu1 %v6573_v19  ;;  %v3055_v54 = vld [vmem:[#allocation9 + $0x168] sm:$0xff]  ;;  %v5669_v19 = vcombine.low %v3050_v0, %v3054_v52 }
 0x802   :  { %2905 = vmatpush1.bf16.msra.mxu0 %v6574_v58  ;;  %2946 = vmatpush1.bf16.msra.mxu1 %v6575_v59  ;;  %v5671_v58 = vcombine.low %v3051_v15, %v3055_v54  ;;  %v5672_v59 = vcombine.high %v3051_v15, %v3055_v54  ;;  %v3118_v54 = vld [vmem:[#allocation9 + $0x360] sm:$0xff] }
 0x803   :  { %2906 = vmatprep.subr.bf16.mxu0 %v6576_v36  ;;  %2947 = vmatprep.subr.bf16.mxu1 %v6577_v14  ;;  %v3058_v36 = vld [vmem:[#allocation9 + $0x180] sm:$0xff] }
 0x804   :  { %v3062_v14 = vld [vmem:[#allocation9 + $0x1a0] sm:$0xff] }
 0x806   :  { %2907 = vmatpush1.bf16.msra.mxu0 %v6578_v26  ;;  %2948 = vmatpush1.bf16.msra.mxu1 %v6579_v24  ;;  %v3059_v26 = vld [vmem:[#allocation9 + $0x188] sm:$0xff]  ;;  %v5678_v24 = vcombine.high %v3058_v36, %v3062_v14 }
 0x807   :  { %2908 = vmatprep.subr.bf16.mxu0 %v6580_v17  ;;  %2949 = vmatprep.subr.bf16.mxu1 %v6581_v18  ;;  %v5677_v17 = vcombine.low %v3058_v36, %v3062_v14 }
 0x808   :  { %v6279_v21 = vpop.eup %6278 }
 0x809   :  { %v2777_v31 = vmul.f32 %v6279_v21, %v6277_v56  ;;  %v3063_v56 = vld [vmem:[#allocation9 + $0x1a8] sm:$0xff] }
 0x80a   :  { %2909 = vmatpush1.bf16.msra.mxu0 %v6582_v42  ;;  %2950 = vmatpush1.bf16.msra.mxu1 %v6583_v9  ;;  %v5679_v18 = vcombine.low %v3059_v26, %v3063_v56  ;;  %v5680_v21 = vcombine.high %v3059_v26, %v3063_v56  ;;  %v3070_v42 = vld [vmem:[#allocation9 + $0x1e0] sm:$0xff]  ;;  %v3067_v9 = vld [vmem:[#allocation9 + $0x1c8] sm:$0xff] }
 0x80b   :  { %v2778_v46 = vpack.c.bf16 %v2777_v31, %v2777_v31  ;;  %3884 = vmatprep.subr.bf16.mxu0 %v5630_v12  ;;  %3957 = vmatprep.subr.bf16.mxu1 %v5632_v43  ;;  %v3066_v31 = vld [vmem:[#allocation9 + $0x1c0] sm:$0xff]  ;;  %v3079_v43 = vld [vmem:[#allocation9 + $0x228] sm:$0xff] }
 0x80c   :  { %v5685_v49 = vcombine.low %v3066_v31, %v3070_v42  ;;  %v3074_v12 = vld [vmem:[#allocation9 + $0x200] sm:$0xff] }
 0x80d   :  { %v2780_v48 = vrot.slane %v2778_v46, 4  ;;  %2927 = vmatmul.mubr.bf16.vlgmr.msra.gmra.mrb[92].mxu0 %v2778_v46  ;;  %2968 = vmatmul.mubr.bf16.vlgmr.msra.gmra.mrb[92].mxu1 %v2778_v46  ;;  %v5686_v46 = vcombine.high %v3066_v31, %v3070_v42  ;;  %v5693_v44 = vcombine.low %v3074_v12, %v3078_v8  ;;  %v3126_v56 = vld [vmem:[#allocation9 + $0x3a0] sm:$0xff] }
 0x80e   :  { %3885 = vmatpush1.bf16.msra.mxu0 %v5629_v30  ;;  %3958 = vmatpush1.bf16.msra.mxu1 %v5631_v55  ;;  %v3075_v30 = vld [vmem:[#allocation9 + $0x208] sm:$0xff]  ;;  %v5694_v55 = vcombine.high %v3074_v12, %v3078_v8 }
 0x80f   :  { %2782 = vst [vmem:[#allocation2 + $0x8] sm:$0xf0] %v2780_v48  ;;  %3886 = vmatprep.subr.bf16.mxu0 %v5638_v3  ;;  %3959 = vmatprep.subr.bf16.mxu1 %v5640_v32  ;;  %v3071_v48 = vld [vmem:[#allocation9 + $0x1e8] sm:$0xff]  ;;  %v5695_v51 = vcombine.low %v3075_v30, %v3079_v43  ;;  %v5696_v5 = vcombine.high %v3075_v30, %v3079_v43  ;;  %v3082_v3 = vld [vmem:[#allocation9 + $0x240] sm:$0xff]  ;;  %v8092_v43 = vld [vmem:[#allocation9 + $0x30] sm:$0xff] }
 0x810   :  { %v5687_v50 = vcombine.low %v3067_v9, %v3071_v48  ;;  %v5688_v47 = vcombine.high %v3067_v9, %v3071_v48  ;;  %v3087_v32 = vld [vmem:[#allocation9 + $0x268] sm:$0xff]  ;;  %v5701_v7 = vcombine.low %v3082_v3, %v3086_v2  ;;  %v3134_v48 = vld [vmem:[#allocation9 + $0x3e0] sm:$0xff] }
 0x811   :  { %v3135_v12 = vld [vmem:[#allocation9 + $0x3e8] sm:$0xff] }
 0x812   :  { %3887 = vmatpush1.bf16.msra.mxu0 %v5637_v38  ;;  %3960 = vmatpush1.bf16.msra.mxu1 %v5639_v62  ;;  %v3083_v38 = vld [vmem:[#allocation9 + $0x248] sm:$0xff]  ;;  %v5702_v62 = vcombine.high %v3082_v3, %v3086_v2 }
 0x813   :  { %3888 = vmatprep.subr.bf16.mxu0 %v5646_v60  ;;  %3961 = vmatprep.subr.bf16.mxu1 %v5648_v16  ;;  %v5703_v29 = vcombine.low %v3083_v38, %v3087_v32  ;;  %v5704_v13 = vcombine.high %v3083_v38, %v3087_v32  ;;  %v3090_v60 = vld [vmem:[#allocation9 + $0x280] sm:$0xff]  ;;  %v3095_v16 = vld [vmem:[#allocation9 + $0x2a8] sm:$0xff] }
 0x814   :  { %v5709_v61 = vcombine.low %v3090_v60, %v3094_v41 }
 0x816   :  { %3889 = vmatpush1.bf16.msra.mxu0 %v5645_v34  ;;  %3962 = vmatpush1.bf16.msra.mxu1 %v5647_v45  ;;  %v3091_v34 = vld [vmem:[#allocation9 + $0x288] sm:$0xff]  ;;  %v5710_v45 = vcombine.high %v3090_v60, %v3094_v41 }
 0x817   :  { %3890 = vmatprep.subr.bf16.mxu0 %v5654_v57  ;;  %3963 = vmatprep.subr.bf16.mxu1 %v5656_v20  ;;  %v5711_v6 = vcombine.low %v3091_v34, %v3095_v16  ;;  %v5712_v10 = vcombine.high %v3091_v34, %v3095_v16  ;;  %v3098_v57 = vld [vmem:[#allocation9 + $0x2c0] sm:$0xff]  ;;  %v3103_v20 = vld [vmem:[#allocation9 + $0x2e8] sm:$0xff] }
 0x818   :  { %v5717_v40 = vcombine.low %v3098_v57, %v3102_v39 }
 0x81a   :  { %3891 = vmatpush1.bf16.msra.mxu0 %v5653_v63  ;;  %3964 = vmatpush1.bf16.msra.mxu1 %v5655_v27  ;;  %v3099_v63 = vld [vmem:[#allocation9 + $0x2c8] sm:$0xff]  ;;  %v5718_v27 = vcombine.high %v3098_v57, %v3102_v39 }
 0x81b   :  { %3892 = vmatprep.subr.bf16.mxu0 %v5662_v4  ;;  %3965 = vmatprep.subr.bf16.mxu1 %v5664_v35  ;;  %v5719_v22 = vcombine.low %v3099_v63, %v3103_v20  ;;  %v5720_v28 = vcombine.high %v3099_v63, %v3103_v20  ;;  %v3106_v4 = vld [vmem:[#allocation9 + $0x300] sm:$0xff]  ;;  %v3111_v35 = vld [vmem:[#allocation9 + $0x328] sm:$0xff] }
 0x81c   :  { %v5725_v0 = vcombine.low %v3106_v4, %v3110_v23 }
 0x81e   :  { %3893 = vmatpush1.bf16.msra.mxu0 %v5661_v37  ;;  %3966 = vmatpush1.bf16.msra.mxu1 %v5663_v33  ;;  %v3107_v37 = vld [vmem:[#allocation9 + $0x308] sm:$0xff]  ;;  %v5726_v33 = vcombine.high %v3106_v4, %v3110_v23 }
 0x81f   :  { %3894 = vmatprep.subr.bf16.mxu0 %v5670_v11  ;;  %3967 = vmatprep.subr.bf16.mxu1 %v5672_v59  ;;  %v5727_v52 = vcombine.low %v3107_v37, %v3111_v35  ;;  %v5728_v15 = vcombine.high %v3107_v37, %v3111_v35  ;;  %v3114_v11 = vld [vmem:[#allocation9 + $0x340] sm:$0xff]  ;;  %v3119_v59 = vld [vmem:[#allocation9 + $0x368] sm:$0xff] }
 0x820   :  { %v5733_v36 = vcombine.low %v3114_v11, %v3118_v54 }
 0x822   :  { %3895 = vmatpush1.bf16.msra.mxu0 %v5669_v19  ;;  %3968 = vmatpush1.bf16.msra.mxu1 %v5671_v58  ;;  %v3115_v19 = vld [vmem:[#allocation9 + $0x348] sm:$0xff]  ;;  %v5734_v58 = vcombine.high %v3114_v11, %v3118_v54 }
 0x823   :  { %3896 = vmatprep.subr.bf16.mxu0 %v5678_v24  ;;  %3969 = vmatprep.subr.bf16.mxu1 %v5680_v21  ;;  %v5735_v14 = vcombine.low %v3115_v19, %v3119_v59  ;;  %v5736_v26 = vcombine.high %v3115_v19, %v3119_v59  ;;  %v3122_v24 = vld [vmem:[#allocation9 + $0x380] sm:$0xff]  ;;  %v3127_v21 = vld [vmem:[#allocation9 + $0x3a8] sm:$0xff]  ;;  %v9100_v59 = vld [vmem:[#allocation72_spill] sm:$0xff] }
 0x824   :  { %v5741_v31 = vcombine.low %v3122_v24, %v3126_v56 }
 0x826   :  { %3897 = vmatpush1.bf16.msra.mxu0 %v5677_v17  ;;  %3970 = vmatpush1.bf16.msra.mxu1 %v5679_v18  ;;  %v3123_v17 = vld [vmem:[#allocation9 + $0x388] sm:$0xff]  ;;  %v5742_v18 = vcombine.high %v3122_v24, %v3126_v56 }
 0x827   :  { %3898 = vmatprep.subr.bf16.mxu0 %v5686_v46  ;;  %3971 = vmatprep.subr.bf16.mxu1 %v5688_v47  ;;  %v5743_v42 = vcombine.low %v3123_v17, %v3127_v21  ;;  %v5744_v9 = vcombine.high %v3123_v17, %v3127_v21  ;;  %v3130_v46 = vld [vmem:[#allocation9 + $0x3c0] sm:$0xff]  ;;  %v9102_v17 = vld [vmem:[#allocation73_spill] sm:$0xff]  ;;  %v9103_v21 = vld [vmem:[#allocation76_spill] sm:$0xff] }
 0x828   :  { %v5750_v47 = vcombine.high %v3130_v46, %v3134_v48 }
 0x82a   :  { %3899 = vmatpush1.bf16.msra.mxu0 %v5685_v49  ;;  %3972 = vmatpush1.bf16.msra.mxu1 %v5687_v50  ;;  %v3131_v49 = vld [vmem:[#allocation9 + $0x3c8] sm:$0xff]  ;;  %v5749_v50 = vcombine.low %v3130_v46, %v3134_v48 }
 0x82b   :  { %3900 = vmatprep.subr.bf16.mxu0 %v5694_v55  ;;  %3973 = vmatprep.subr.bf16.mxu1 %v5696_v5  ;;  %v5751_v8 = vcombine.low %v3131_v49, %v3135_v12  ;;  %v5752_v30 = vcombine.high %v3131_v49, %v3135_v12  ;;  %v8090_v55 = vld [vmem:[#allocation9 + $0x10] sm:$0xff]  ;;  %v8098_v5 = vld [vmem:[#allocation9 + $0x38] sm:$0xff] }
 0x82c   :  { %v5633_v3 = vcombine.low %v8090_v55, %v8092_v43 }
 0x82e   :  { %3901 = vmatpush1.bf16.msra.mxu0 %v5693_v44  ;;  %3974 = vmatpush1.bf16.msra.mxu1 %v5695_v51  ;;  %v8094_v44 = vld [vmem:[#allocation9 + $0x18] sm:$0xff]  ;;  %v5634_v51 = vcombine.high %v8090_v55, %v8092_v43 }
 0x82f   :  { %3902 = vmatprep.subr.bf16.mxu0 %v5702_v62  ;;  %3975 = vmatprep.subr.bf16.mxu1 %v5704_v13  ;;  %v5635_v2 = vcombine.low %v8094_v44, %v8098_v5  ;;  %v5636_v38 = vcombine.high %v8094_v44, %v8098_v5  ;;  %v9097_v13 = vld [vmem:[#allocation70_spill] sm:$0xff]  ;;  %v3037_v55 = vld [vmem:[#allocation9 + $0xd8] sm:$0xff] }
 0x830   :  { %v3041_v43 = vld [vmem:[#allocation9 + $0xf8] sm:$0xff] }
 0x832   :  { %3903 = vmatpush1.bf16.msra.mxu0 %v5701_v7  ;;  %3976 = vmatpush1.bf16.msra.mxu1 %v5703_v29  ;;  %v9096_v7 = vld [vmem:[#allocation67_spill] sm:$0xff] }
 0x833   :  { %3904 = vmatprep.subr.bf16.mxu0 %v5710_v45  ;;  %3977 = vmatprep.subr.bf16.mxu1 %v5712_v10  ;;  %v9098_v45 = vld [vmem:[#allocation69_spill] sm:$0xff] }
 0x836   :  { %3905 = vmatpush1.bf16.msra.mxu0 %v5709_v61  ;;  %3978 = vmatpush1.bf16.msra.mxu1 %v5711_v6  ;;  %v9099_v61 = vld [vmem:[#allocation71_spill] sm:$0xff] }
 0x837   :  { %3906 = vmatprep.subr.bf16.mxu0 %v5718_v27  ;;  %3979 = vmatprep.subr.bf16.mxu1 %v5720_v28 }
 0x83a   :  { %3907 = vmatpush1.bf16.msra.mxu0 %v5717_v40  ;;  %3980 = vmatpush1.bf16.msra.mxu1 %v5719_v22 }
 0x83b   :  { %3908 = vmatprep.subr.bf16.mxu0 %v5726_v33  ;;  %3981 = vmatprep.subr.bf16.mxu1 %v5728_v15 }
 0x83e   :  { %3909 = vmatpush1.bf16.msra.mxu0 %v5725_v0  ;;  %3982 = vmatpush1.bf16.msra.mxu1 %v5727_v52 }
 0x83f   :  { %3910 = vmatprep.subr.bf16.mxu0 %v5734_v58  ;;  %3983 = vmatprep.subr.bf16.mxu1 %v5736_v26 }
 0x842   :  { %3911 = vmatpush1.bf16.msra.mxu0 %v5733_v36  ;;  %3984 = vmatpush1.bf16.msra.mxu1 %v5735_v14  ;;  %v9101_v14 = vld [vmem:[#allocation74_spill] sm:$0xff] }
 0x843   :  { %3912 = vmatprep.subr.bf16.mxu0 %v5742_v18  ;;  %3985 = vmatprep.subr.bf16.mxu1 %v5744_v9 }
 0x846   :  { %3913 = vmatpush1.bf16.msra.mxu0 %v5741_v31  ;;  %3986 = vmatpush1.bf16.msra.mxu1 %v5743_v42 }
 0x847   :  { %3914 = vmatprep.subr.bf16.mxu0 %v5750_v47  ;;  %3987 = vmatprep.subr.bf16.mxu1 %v5752_v30 }
 0x84a   :  { %3915 = vmatpush1.bf16.msra.mxu0 %v5749_v50  ;;  %3988 = vmatpush1.bf16.msra.mxu1 %v5751_v8 }
 0x84b   :  { %4030 = vmatprep.subr.bf16.mxu0 %v5634_v51  ;;  %4089 = vmatprep.subr.bf16.mxu1 %v5636_v38 }
 0x8c0   :  { %v2817_v62 = vpop.f32.mrb[88].mxu0  ;;  %v2858_v32 = vpop.f32.mrb[88].mxu1 }
 0x8c1   :  { %v2818_v29 = vadd.f32 %v2817_v62, %v9096_v7  ;;  %v2859_v60 = vadd.f32 %v2858_v32, %v9097_v13  ;;  %v2819_v41 = vpop.f32.mrb[89].mxu0  ;;  %v2860_v34 = vpop.f32.mrb[89].mxu1 }
 0x8c2   :  { %v2820_v16 = vadd.f32 %v2819_v41, %v9098_v45  ;;  %v2861_v6 = vadd.f32 %v2860_v34, %v9099_v61  ;;  %v2821_v10 = vpop.f32.mrb[90].mxu0  ;;  %v2862_v57 = vpop.f32.mrb[90].mxu1 }
 0x8c3   :  { %v5623_v39 = vmul.f32 -1.442695, %v2818_v29  ;;  %v2822_v63 = vpop.f32.mrb[91].mxu0  ;;  %v2863_v27 = vpop.f32.mrb[91].mxu1  ;;  %v5625_v40 = vmul.f32 -1.442695, %v2859_v60 }
 0x8c4   :  { %v5624_v20 = vmul.f32 -1.442695, %v2820_v16  ;;  %v3020_v63 = vld [vmem:[#allocation9 + $0x50] sm:$0xff] }
 0x8c5   :  { %6280 = vpow2.f32 %v5623_v39  ;;  %v3024_v27 = vld [vmem:[#allocation9 + $0x70] sm:$0xff] }
 0x8c6   :  { %6282 = vpow2.f32 %v5624_v20  ;;  %v3021_v20 = vld [vmem:[#allocation9 + $0x58] sm:$0xff] }
 0x8c7   :  { %6284 = vtanh.f32 %v2861_v6 }
 0x8c8   :  { %6286 = vpow2.f32 %v5625_v40  ;;  %v3025_v40 = vld [vmem:[#allocation9 + $0x78] sm:$0xff] }
 0x8cf   :  { %v6281_v22 = vpop.eup %6280 }
 0x8d0   :  { %v2874_v28 = vadd.f32 1.0, %v6281_v22  ;;  %v6283_v4 = vpop.eup %6282 }
 0x8d1   :  { %v2875_v23 = vadd.f32 1.0, %v6283_v4  ;;  %v6285_v37 = vpop.eup %6284  ;;  %v3028_v4 = vld [vmem:[#allocation9 + $0x90] sm:$0xff] }
 0x8d2   :  { %6288 = vrcp.f32 %v2874_v28  ;;  %v6287_v33 = vpop.eup %6286  ;;  %v8118_v28 = vld [vmem:[#allocation2] sm:$0xff] }
 0x8d3   :  { %6290 = vrcp.f32 %v2875_v23  ;;  %v2876_v15 = vadd.f32 1.0, %v6287_v33  ;;  %v5644_v23 = vcombine.high %v3021_v20, %v3025_v40  ;;  %v3029_v33 = vld [vmem:[#allocation9 + $0x98] sm:$0xff] }
 0x8d5   :  { %6292 = vrcp.f32 %v2876_v15  ;;  %v5643_v15 = vcombine.low %v3021_v20, %v3025_v40  ;;  %v3081_v20 = vld [vmem:[#allocation9 + $0x238] sm:$0xff] }
 0x8dc   :  { %v6289_v35 = vpop.eup %6288 }
 0x8dd   :  { %v2885_v0 = vmul.f32 %v6289_v35, %v6285_v37  ;;  %v6291_v52 = vpop.eup %6290  ;;  %v3032_v37 = vld [vmem:[#allocation9 + $0xb0] sm:$0xff]  ;;  %v3033_v35 = vld [vmem:[#allocation9 + $0xb8] sm:$0xff] }
 0x8de   :  { %v2884_v11 = vmul.f32 %v6291_v52, %v8077_v25  ;;  %v5641_v52 = vcombine.low %v3020_v63, %v3024_v27  ;;  %v5649_v44 = vcombine.low %v3028_v4, %v3032_v37  ;;  %v5651_v5 = vcombine.low %v3029_v33, %v3033_v35 }
 0x8df   :  { %v6293_v50 = vpop.eup %6292 }
 0x8e0   :  { %v2928_v54 = vpop.f32.mrb[92].mxu0  ;;  %v2969_v19 = vpop.f32.mrb[92].mxu1  ;;  %v2886_v58 = vadd.f32 %v2885_v0, %v2884_v11  ;;  %v8130_v0 = vld [vmem:[#allocation2 + $0x18] sm:$0xff]  ;;  %v5650_v11 = vcombine.high %v3028_v4, %v3032_v37  ;;  %v3084_v37 = vld [vmem:[#allocation9 + $0x250] sm:$0xff] }
 0x8e1   :  { %v2929_v36 = vadd.f32 %v2928_v54, %v9100_v59  ;;  %v2970_v26 = vadd.f32 %v2969_v19, %v9101_v14  ;;  %v2930_v24 = vpop.f32.mrb[93].mxu0  ;;  %v2971_v56 = vpop.f32.mrb[93].mxu1  ;;  %v5652_v54 = vcombine.high %v3029_v33, %v3033_v35  ;;  %v3036_v19 = vld [vmem:[#allocation9 + $0xd0] sm:$0xff]  ;;  %v3085_v35 = vld [vmem:[#allocation9 + $0x258] sm:$0xff] }
 0x8e2   :  { %v2931_v18 = vadd.f32 %v2930_v24, %v9102_v17  ;;  %v2972_v31 = vadd.f32 %v2971_v56, %v9103_v21  ;;  %v2932_v42 = vpop.f32.mrb[94].mxu0  ;;  %v2973_v9 = vpop.f32.mrb[94].mxu1  ;;  %6294 = vtanh.f32 %v2886_v58  ;;  %v3040_v58 = vld [vmem:[#allocation9 + $0xf0] sm:$0xff]  ;;  %v3049_v24 = vld [vmem:[#allocation9 + $0x138] sm:$0xff]  ;;  %v8138_v56 = vld [vmem:[#allocation2 + $0x28] sm:$0xff] }
 0x8e3   :  { %v5626_v46 = vmul.f32 -1.442695, %v2929_v36  ;;  %v2933_v48 = vpop.f32.mrb[95].mxu0  ;;  %v2974_v25 = vpop.f32.mrb[95].mxu1  ;;  %v5628_v12 = vmul.f32 -1.442695, %v2970_v26  ;;  %v5658_v59 = vcombine.high %v3036_v19, %v3040_v58  ;;  %v5660_v36 = vcombine.high %v3037_v55, %v3041_v43 }
 0x8e4   :  { %v5627_v49 = vmul.f32 -1.442695, %v2931_v18  ;;  %v3048_v14 = vld [vmem:[#allocation9 + $0x130] sm:$0xff]  ;;  %v3045_v26 = vld [vmem:[#allocation9 + $0x118] sm:$0xff]  ;;  %v5657_v17 = vcombine.low %v3036_v19, %v3040_v58  ;;  %v5659_v18 = vcombine.low %v3037_v55, %v3041_v43 }
 0x8e5   :  { %6296 = vpow2.f32 %v5626_v46  ;;  %v3052_v42 = vld [vmem:[#allocation9 + $0x150] sm:$0xff]  ;;  %v3053_v46 = vld [vmem:[#allocation9 + $0x158] sm:$0xff] }
 0x8e6   :  { %6298 = vpow2.f32 %v5627_v49  ;;  %v3056_v9 = vld [vmem:[#allocation9 + $0x170] sm:$0xff]  ;;  %v3057_v48 = vld [vmem:[#allocation9 + $0x178] sm:$0xff]  ;;  %v5667_v49 = vcombine.low %v3045_v26, %v3049_v24 }
 0x8e7   :  { %6300 = vtanh.f32 %v2972_v31  ;;  %v5668_v31 = vcombine.high %v3045_v26, %v3049_v24  ;;  %v3088_v33 = vld [vmem:[#allocation9 + $0x270] sm:$0xff]  ;;  %v3093_v43 = vld [vmem:[#allocation9 + $0x298] sm:$0xff] }
 0x8e8   :  { %6302 = vpow2.f32 %v5628_v12  ;;  %v5674_v12 = vcombine.high %v3052_v42, %v3056_v9  ;;  %v3092_v58 = vld [vmem:[#allocation9 + $0x290] sm:$0xff]  ;;  %v3101_v26 = vld [vmem:[#allocation9 + $0x2d8] sm:$0xff] }
 0x8e9   :  { %v3096_v55 = vld [vmem:[#allocation9 + $0x2b0] sm:$0xff]  ;;  %v3105_v24 = vld [vmem:[#allocation9 + $0x2f8] sm:$0xff] }
 0x8ec   :  { %v6295_v47 = vpop.eup %6294 }
 0x8ed   :  { %v2888_v8 = vmul.f32 %v6295_v47, %v6293_v50  ;;  %v8142_v50 = vld [vmem:[#allocation2 + $0x20] sm:$0xff]  ;;  %v3060_v47 = vld [vmem:[#allocation9 + $0x190] sm:$0xff] }
 0x8ef   :  { %v6297_v30 = vpop.eup %6296  ;;  %v2889_v51 = vpack.c.bf16 %v2888_v8, %v2888_v8  ;;  %v5676_v8 = vcombine.high %v3053_v46, %v3057_v48 }
 0x8f0   :  { %v2985_v38 = vadd.f32 1.0, %v6297_v30  ;;  %v6299_v62 = vpop.eup %6298  ;;  %v3064_v30 = vld [vmem:[#allocation9 + $0x1b0] sm:$0xff] }
 0x8f1   :  { %v2891_v32 = vrot.slane %v2889_v51, 4  ;;  %v2986_v7 = vadd.f32 1.0, %v6299_v62  ;;  %v6301_v29 = vpop.eup %6300  ;;  %v3061_v51 = vld [vmem:[#allocation9 + $0x198] sm:$0xff] }
 0x8f2   :  { %6304 = vrcp.f32 %v2985_v38  ;;  %v6303_v13 = vpop.eup %6302  ;;  %v3065_v38 = vld [vmem:[#allocation9 + $0x1b8] sm:$0xff] }
 0x8f3   :  { %2893 = vst [vmem:[#allocation2 + $0x30] sm:$0xf0] %v2891_v32  ;;  %6306 = vrcp.f32 %v2986_v7  ;;  %v2987_v45 = vadd.f32 1.0, %v6303_v13  ;;  %v8146_v62 = vld [vmem:[#allocation2 + $0x38] sm:$0xff]  ;;  %v5673_v32 = vcombine.low %v3052_v42, %v3056_v9  ;;  %v5675_v7 = vcombine.low %v3053_v46, %v3057_v48  ;;  %v3108_v42 = vld [vmem:[#allocation9 + $0x310] sm:$0xff] }
 0x8f4   :  { %v5684_v13 = vcombine.high %v3061_v51, %v3065_v38  ;;  %v3112_v9 = vld [vmem:[#allocation9 + $0x330] sm:$0xff]  ;;  %v3109_v46 = vld [vmem:[#allocation9 + $0x318] sm:$0xff] }
 0x8f5   :  { %6308 = vrcp.f32 %v2987_v45  ;;  %v3073_v45 = vld [vmem:[#allocation9 + $0x1f8] sm:$0xff] }
 0x8f6   :  { %v3113_v48 = vld [vmem:[#allocation9 + $0x338] sm:$0xff] }
 0x8fc   :  { %v6305_v60 = vpop.eup %6304 }
 0x8fd   :  { %v2996_v41 = vmul.f32 %v6305_v60, %v6301_v29  ;;  %v6307_v34 = vpop.eup %6306  ;;  %v5682_v29 = vcombine.high %v3060_v47, %v3064_v30  ;;  %v3068_v60 = vld [vmem:[#allocation9 + $0x1d0] sm:$0xff] }
 0x8fe   :  { %v2995_v16 = vmul.f32 %v6307_v34, %v8087_v53  ;;  %v5642_v53 = vcombine.high %v3020_v63, %v3024_v27  ;;  %v3069_v34 = vld [vmem:[#allocation9 + $0x1d8] sm:$0xff] }
 0x8ff   :  { %v6309_v6 = vpop.eup %6308  ;;  %v5692_v63 = vcombine.high %v3069_v34, %v3073_v45  ;;  %v3077_v27 = vld [vmem:[#allocation9 + $0x218] sm:$0xff]  ;;  %v5691_v4 = vcombine.low %v3069_v34, %v3073_v45 }
 0x900   :  { %v2997_v61 = vadd.f32 %v2996_v41, %v2995_v16  ;;  %v3072_v41 = vld [vmem:[#allocation9 + $0x1f0] sm:$0xff]  ;;  %v5681_v16 = vcombine.low %v3060_v47, %v3064_v30  ;;  %v5730_v47 = vcombine.high %v3108_v42, %v3112_v9  ;;  %v3125_v34 = vld [vmem:[#allocation9 + $0x398] sm:$0xff] }
 0x901   :  { %v5689_v40 = vcombine.low %v3068_v60, %v3072_v41  ;;  %v3120_v30 = vld [vmem:[#allocation9 + $0x370] sm:$0xff]  ;;  %v3129_v45 = vld [vmem:[#allocation9 + $0x3b8] sm:$0xff] }
 0x902   :  { %6310 = vtanh.f32 %v2997_v61  ;;  %v5683_v61 = vcombine.low %v3061_v51, %v3065_v38  ;;  %v3117_v51 = vld [vmem:[#allocation9 + $0x358] sm:$0xff] }
 0x903   :  { %v3121_v38 = vld [vmem:[#allocation9 + $0x378] sm:$0xff] }
 0x90c   :  { %v6311_v10 = vpop.eup %6310 }
 0x90d   :  { %v2999_v57 = vmul.f32 %v6311_v10, %v6309_v6  ;;  %v3076_v6 = vld [vmem:[#allocation9 + $0x210] sm:$0xff] }
 0x90e   :  { %v3080_v10 = vld [vmem:[#allocation9 + $0x230] sm:$0xff] }
 0x90f   :  { %v3000_v39 = vpack.c.bf16 %v2999_v57, %v2999_v57  ;;  %v8150_v57 = vld [vmem:[#allocation2 + $0x30] sm:$0xff] }
 0x911   :  { %3001 = vst [vmem:[#allocation2 + $0x8] sm:$0xf] %v3000_v39  ;;  %v5690_v39 = vcombine.high %v3068_v60, %v3072_v41  ;;  %v3124_v60 = vld [vmem:[#allocation9 + $0x390] sm:$0xff] }
 0x912   :  { %v3128_v41 = vld [vmem:[#allocation9 + $0x3b0] sm:$0xff] }
 0x918   :  { %v8116_v22 = vld [vmem:[#allocation2 + $0x8] sm:$0xff] }
 0x919   :  { %3916 = vmatprep.mubr.bf16.mxu0 %v8116_v22  ;;  %3989 = vmatprep.mubr.bf16.mxu1 %v8116_v22 }
 0x91a   :  { %3917 = vmatmul.mubr.bf16.vlgmr.msra.gmra.mrb[96].mxu0 %v8118_v28  ;;  %3990 = vmatmul.mubr.bf16.vlgmr.msra.gmra.mrb[96].mxu1 %v8118_v28 }
 0x91b   :  { %4031 = vmatpush1.bf16.msra.mxu0 %v5633_v3  ;;  %4090 = vmatpush1.bf16.msra.mxu1 %v5635_v2  ;;  %v8134_v3 = vld [vmem:[#allocation2 + $0x10] sm:$0xff] }
 0x91c   :  { %3926 = vmatprep.mubr.bf16.mxu0 %v8130_v0  ;;  %3999 = vmatprep.mubr.bf16.mxu1 %v8130_v0  ;;  %v3044_v2 = vld [vmem:[#allocation9 + $0x110] sm:$0xff] }
 0x91d   :  { %4032 = vmatprep.subr.bf16.mxu0 %v5642_v53  ;;  %4091 = vmatprep.subr.bf16.mxu1 %v5644_v23  ;;  %v5666_v21 = vcombine.high %v3044_v2, %v3048_v14  ;;  %v5665_v25 = vcombine.low %v3044_v2, %v3048_v14  ;;  %v5698_v53 = vcombine.high %v3076_v6, %v3080_v10  ;;  %v3104_v14 = vld [vmem:[#allocation9 + $0x2f0] sm:$0xff] }
 0x91e   :  { %v5700_v23 = vcombine.high %v3077_v27, %v3081_v20  ;;  %v5714_v2 = vcombine.high %v3092_v58, %v3096_v55 }
 0x91f   :  { %4033 = vmatpush1.bf16.msra.mxu0 %v5641_v52  ;;  %4092 = vmatpush1.bf16.msra.mxu1 %v5643_v15  ;;  %v3089_v52 = vld [vmem:[#allocation9 + $0x278] sm:$0xff]  ;;  %v5697_v15 = vcombine.low %v3076_v6, %v3080_v10  ;;  %v5746_v6 = vcombine.high %v3124_v60, %v3128_v41  ;;  %v5748_v10 = vcombine.high %v3125_v34, %v3129_v45 }
 0x920   :  { %4034 = vmatprep.subr.bf16.mxu0 %v5650_v11  ;;  %4093 = vmatprep.subr.bf16.mxu1 %v5652_v54  ;;  %v5699_v11 = vcombine.low %v3077_v27, %v3081_v20  ;;  %v5706_v54 = vcombine.high %v3084_v37, %v3088_v33  ;;  %v5708_v19 = vcombine.high %v3085_v35, %v3089_v52  ;;  %v3133_v27 = vld [vmem:[#allocation9 + $0x3d8] sm:$0xff] }
 0x921   :  { %v3137_v20 = vld [vmem:[#allocation9 + $0x3f8] sm:$0xff] }
 0x922   :  { %3927 = vmatmul.mubr.bf16.gmra.mrb[100].mxu0 %v8134_v3  ;;  %4000 = vmatmul.mubr.bf16.gmra.mrb[100].mxu1 %v8134_v3 }
 0x923   :  { %4035 = vmatpush1.bf16.msra.mxu0 %v5649_v44  ;;  %4094 = vmatpush1.bf16.msra.mxu1 %v5651_v5  ;;  %v5705_v44 = vcombine.low %v3084_v37, %v3088_v33  ;;  %v5707_v5 = vcombine.low %v3085_v35, %v3089_v52  ;;  %v5755_v33 = vcombine.low %v3133_v27, %v3137_v20  ;;  %v5962_v35 = vld [vmem:[#allocation12 + $0x4] ss:$16 sps:$4 sm:$0xff]   ;;  %v5965_v52 = vld [vmem:[#allocation12 + $0xc] ss:$16 sps:$4 sm:$0xff]  }
 0x924   :  { %3936 = vmatprep.mubr.bf16.mxu0 %v8138_v56  ;;  %4009 = vmatprep.mubr.bf16.mxu1 %v8138_v56 }
 0x925   :  { %4036 = vmatprep.subr.bf16.mxu0 %v5658_v59  ;;  %4095 = vmatprep.subr.bf16.mxu1 %v5660_v36  ;;  %v3100_v36 = vld [vmem:[#allocation9 + $0x2d0] sm:$0xff] }
 0x927   :  { %4037 = vmatpush1.bf16.msra.mxu0 %v5657_v17  ;;  %4096 = vmatpush1.bf16.msra.mxu1 %v5659_v18  ;;  %v5713_v17 = vcombine.low %v3092_v58, %v3096_v55  ;;  %v5966_v58 = vld [vmem:[#allocation12 + $0x20] ss:$16 sps:$4 sm:$0xff]   ;;  %v5969_v55 = vld [vmem:[#allocation12 + $0x28] ss:$16 sps:$4 sm:$0xff]  }
 0x928   :  { %4038 = vmatprep.subr.bf16.mxu0 %v5666_v21  ;;  %4097 = vmatprep.subr.bf16.mxu1 %v5668_v31  ;;  %v5722_v21 = vcombine.high %v3100_v36, %v3104_v14  ;;  %v5724_v31 = vcombine.high %v3101_v26, %v3105_v24 }
 0x92a   :  { %3937 = vmatmul.mubr.bf16.gmra.mrb[104].mxu0 %v8142_v50  ;;  %4010 = vmatmul.mubr.bf16.gmra.mrb[104].mxu1 %v8142_v50 }
 0x92b   :  { %4039 = vmatpush1.bf16.msra.mxu0 %v5665_v25  ;;  %4098 = vmatpush1.bf16.msra.mxu1 %v5667_v49  ;;  %v5721_v25 = vcombine.low %v3100_v36, %v3104_v14  ;;  %v5723_v49 = vcombine.low %v3101_v26, %v3105_v24  ;;  %v5986_v36 = vld [vmem:[#allocation12 + $0x84] ss:$16 sps:$4 sm:$0xff]   ;;  %v5989_v14 = vld [vmem:[#allocation12 + $0x8c] ss:$16 sps:$4 sm:$0xff]   ;;  %v5984_v26 = vld [vmem:[#allocation12 + $0x80] ss:$16 sps:$4 sm:$0xff]  }
 0x92c   :  { %3946 = vmatprep.mubr.bf16.mxu0 %v8146_v62  ;;  %4019 = vmatprep.mubr.bf16.mxu1 %v8146_v62  ;;  %v5987_v24 = vld [vmem:[#allocation12 + $0x88] ss:$16 sps:$4 sm:$0xff]  }
 0x92d   :  { %4040 = vmatprep.subr.bf16.mxu0 %v5674_v12  ;;  %4099 = vmatprep.subr.bf16.mxu1 %v5676_v8  ;;  %v5732_v12 = vcombine.high %v3109_v46, %v3113_v48  ;;  %v3116_v8 = vld [vmem:[#allocation9 + $0x350] sm:$0xff] }
 0x92f   :  { %4041 = vmatpush1.bf16.msra.mxu0 %v5673_v32  ;;  %4100 = vmatpush1.bf16.msra.mxu1 %v5675_v7  ;;  %v5729_v32 = vcombine.low %v3108_v42, %v3112_v9  ;;  %v5731_v7 = vcombine.low %v3109_v46, %v3113_v48  ;;  %v5996_v42 = vld [vmem:[#allocation12 + $0xc0] ss:$16 sps:$4 sm:$0xff]   ;;  %v5999_v9 = vld [vmem:[#allocation12 + $0xc8] ss:$16 sps:$4 sm:$0xff]   ;;  %v6004_v46 = vld [vmem:[#allocation12 + $0xe4] ss:$16 sps:$4 sm:$0xff]  }
 0x930   :  { %4042 = vmatprep.subr.bf16.mxu0 %v5682_v29  ;;  %4101 = vmatprep.subr.bf16.mxu1 %v5684_v13  ;;  %v5738_v29 = vcombine.high %v3116_v8, %v3120_v30  ;;  %v5740_v13 = vcombine.high %v3117_v51, %v3121_v38  ;;  %v6005_v48 = vld [vmem:[#allocation12 + $0xe8] ss:$16 sps:$4 sm:$0xff]  }
 0x932   :  { %3947 = vmatmul.mubr.bf16.gmra.mrb[108].mxu0 %v8150_v57  ;;  %4020 = vmatmul.mubr.bf16.gmra.mrb[108].mxu1 %v8150_v57 }
 0x933   :  { %4043 = vmatpush1.bf16.msra.mxu0 %v5681_v16  ;;  %4102 = vmatpush1.bf16.msra.mxu1 %v5683_v61  ;;  %v5737_v16 = vcombine.low %v3116_v8, %v3120_v30  ;;  %v5739_v61 = vcombine.low %v3117_v51, %v3121_v38  ;;  %v8184_v8 = vld [vmem:[#allocation11 + $0x2c] ss:$16 sps:$4 sm:$0xff]   ;;  %v8190_v30 = vld [vmem:[#allocation11 + $0x20] ss:$16 sps:$4 sm:$0xff]   ;;  %v8192_v51 = vld [vmem:[#allocation11 + $0x28] ss:$16 sps:$4 sm:$0xff]  }
 0x934   :  { %4062 = vmatprep.mubr.bf16.mxu0 %v8116_v22  ;;  %4121 = vmatprep.mubr.bf16.mxu1 %v8116_v22  ;;  %v3097_v22 = vld [vmem:[#allocation9 + $0x2b8] sm:$0xff]  ;;  %v8196_v38 = vld [vmem:[#allocation11 + $0x44] ss:$16 sps:$4 sm:$0xff]  }
 0x935   :  { %4044 = vmatprep.subr.bf16.mxu0 %v5690_v39  ;;  %4103 = vmatprep.subr.bf16.mxu1 %v5692_v63  ;;  %v5716_v59 = vcombine.high %v3093_v43, %v3097_v22  ;;  %v5715_v18 = vcombine.low %v3093_v43, %v3097_v22  ;;  %v3132_v39 = vld [vmem:[#allocation9 + $0x3d0] sm:$0xff]  ;;  %v5977_v22 = vld [vmem:[#allocation12 + $0x4c] ss:$16 sps:$4 sm:$0xff]  }
 0x936   :  { %v3136_v63 = vld [vmem:[#allocation9 + $0x3f0] sm:$0xff] }
 0x937   :  { %4045 = vmatpush1.bf16.msra.mxu0 %v5689_v40  ;;  %4104 = vmatpush1.bf16.msra.mxu1 %v5691_v4  ;;  %v5745_v40 = vcombine.low %v3124_v60, %v3128_v41  ;;  %v5747_v4 = vcombine.low %v3125_v34, %v3129_v45  ;;  %v5753_v37 = vcombine.low %v3132_v39, %v3136_v63  ;;  %v5974_v43 = vld [vmem:[#allocation12 + $0x44] ss:$16 sps:$4 sm:$0xff]   ;;  %v8212_v60 = vld [vmem:[#allocation11 + $0x6c] ss:$16 sps:$4 sm:$0xff]   ;;  %v8216_v41 = vld [vmem:[#allocation11 + $0x60] ss:$16 sps:$4 sm:$0xff]  }
 0x938   :  { %4046 = vmatprep.subr.bf16.mxu0 %v5698_v53  ;;  %4105 = vmatprep.subr.bf16.mxu1 %v5700_v23  ;;  %v5754_v53 = vcombine.high %v3132_v39, %v3136_v63  ;;  %v5756_v23 = vcombine.high %v3133_v27, %v3137_v20  ;;  %v8218_v34 = vld [vmem:[#allocation11 + $0x68] ss:$16 sps:$4 sm:$0xff]   ;;  %v8222_v45 = vld [vmem:[#allocation11 + $0x84] ss:$16 sps:$4 sm:$0xff]   ;;  %v8236_v39 = vld [vmem:[#allocation11 + $0xac] ss:$16 sps:$4 sm:$0xff]  }
 0x939   :  { %v8240_v63 = vld [vmem:[#allocation11 + $0xa0] ss:$16 sps:$4 sm:$0xff]   ;;  %v8242_v27 = vld [vmem:[#allocation11 + $0xa8] ss:$16 sps:$4 sm:$0xff]   ;;  %v8246_v20 = vld [vmem:[#allocation11 + $0xc4] ss:$16 sps:$4 sm:$0xff]  }
 0x93b   :  { %4047 = vmatpush1.bf16.msra.mxu0 %v5697_v15  ;;  %4106 = vmatpush1.bf16.msra.mxu1 %v5699_v11  ;;  %v5960_v15 = vld [vmem:[#allocation12] ss:$16 sps:$4 sm:$0xff]   ;;  %v5963_v11 = vld [vmem:[#allocation12 + $0x8] ss:$16 sps:$4 sm:$0xff]  }
 0x93c   :  { %4048 = vmatprep.subr.bf16.mxu0 %v5706_v54  ;;  %4107 = vmatprep.subr.bf16.mxu1 %v5708_v19  ;;  %v5968_v54 = vld [vmem:[#allocation12 + $0x24] ss:$16 sps:$4 sm:$0xff]   ;;  %v5971_v19 = vld [vmem:[#allocation12 + $0x2c] ss:$16 sps:$4 sm:$0xff]  }
 0x93f   :  { %4049 = vmatpush1.bf16.msra.mxu0 %v5705_v44  ;;  %4108 = vmatpush1.bf16.msra.mxu1 %v5707_v5  ;;  %v5972_v44 = vld [vmem:[#allocation12 + $0x40] ss:$16 sps:$4 sm:$0xff]   ;;  %v5975_v5 = vld [vmem:[#allocation12 + $0x48] ss:$16 sps:$4 sm:$0xff]  }
 0x940   :  { %4050 = vmatprep.subr.bf16.mxu0 %v5714_v2  ;;  %4109 = vmatprep.subr.bf16.mxu1 %v5716_v59  ;;  %v5980_v2 = vld [vmem:[#allocation12 + $0x64] ss:$16 sps:$4 sm:$0xff]   ;;  %v5981_v59 = vld [vmem:[#allocation12 + $0x68] ss:$16 sps:$4 sm:$0xff]  }
 0x943   :  { %4051 = vmatpush1.bf16.msra.mxu0 %v5713_v17  ;;  %4110 = vmatpush1.bf16.msra.mxu1 %v5715_v18  ;;  %v5992_v17 = vld [vmem:[#allocation12 + $0xa4] ss:$16 sps:$4 sm:$0xff]   ;;  %v5993_v18 = vld [vmem:[#allocation12 + $0xa8] ss:$16 sps:$4 sm:$0xff]  }
 0x944   :  { %4052 = vmatprep.subr.bf16.mxu0 %v5722_v21  ;;  %4111 = vmatprep.subr.bf16.mxu1 %v5724_v31  ;;  %v5998_v21 = vld [vmem:[#allocation12 + $0xc4] ss:$16 sps:$4 sm:$0xff]   ;;  %v6001_v31 = vld [vmem:[#allocation12 + $0xcc] ss:$16 sps:$4 sm:$0xff]  }
 0x947   :  { %4053 = vmatpush1.bf16.msra.mxu0 %v5721_v25  ;;  %4112 = vmatpush1.bf16.msra.mxu1 %v5723_v49  ;;  %v8172_v25 = vld [vmem:[#allocation11 + $0x4] ss:$16 sps:$4 sm:$0xff]   ;;  %v8174_v49 = vld [vmem:[#allocation11 + $0xc] ss:$16 sps:$4 sm:$0xff]  }
 0x948   :  { %4054 = vmatprep.subr.bf16.mxu0 %v5730_v47  ;;  %4113 = vmatprep.subr.bf16.mxu1 %v5732_v12  ;;  %9104 = vst [vmem:[#allocation46_spill] sm:$0xff] %v8172_v25  ;;  %9105 = vst [vmem:[#allocation45_spill] sm:$0xff] %v8174_v49  ;;  %v8176_v47 = vld [vmem:[#allocation11] ss:$16 sps:$4 sm:$0xff]   ;;  %v8178_v12 = vld [vmem:[#allocation11 + $0x8] ss:$16 sps:$4 sm:$0xff]  }
 0x94b   :  { %4055 = vmatpush1.bf16.msra.mxu0 %v5729_v32  ;;  %4114 = vmatpush1.bf16.msra.mxu1 %v5731_v7  ;;  %v8198_v32 = vld [vmem:[#allocation11 + $0x4c] ss:$16 sps:$4 sm:$0xff]   ;;  %v8204_v7 = vld [vmem:[#allocation11 + $0x40] ss:$16 sps:$4 sm:$0xff]  }
 0x94c   :  { %4056 = vmatprep.subr.bf16.mxu0 %v5738_v29  ;;  %4115 = vmatprep.subr.bf16.mxu1 %v5740_v13  ;;  %v8206_v29 = vld [vmem:[#allocation11 + $0x48] ss:$16 sps:$4 sm:$0xff]   ;;  %v8210_v13 = vld [vmem:[#allocation11 + $0x64] ss:$16 sps:$4 sm:$0xff]  }
 0x94f   :  { %4057 = vmatpush1.bf16.msra.mxu0 %v5737_v16  ;;  %4116 = vmatpush1.bf16.msra.mxu1 %v5739_v61  ;;  %v8224_v16 = vld [vmem:[#allocation11 + $0x8c] ss:$16 sps:$4 sm:$0xff]   ;;  %v8228_v61 = vld [vmem:[#allocation11 + $0x80] ss:$16 sps:$4 sm:$0xff]  }
 0x950   :  { %4058 = vmatprep.subr.bf16.mxu0 %v5746_v6  ;;  %4117 = vmatprep.subr.bf16.mxu1 %v5748_v10  ;;  %v8230_v6 = vld [vmem:[#allocation11 + $0x88] ss:$16 sps:$4 sm:$0xff]   ;;  %v8234_v10 = vld [vmem:[#allocation11 + $0xa4] ss:$16 sps:$4 sm:$0xff]  }
 0x953   :  { %4059 = vmatpush1.bf16.msra.mxu0 %v5745_v40  ;;  %4118 = vmatpush1.bf16.msra.mxu1 %v5747_v4  ;;  %v8248_v40 = vld [vmem:[#allocation11 + $0xcc] ss:$16 sps:$4 sm:$0xff]   ;;  %v8252_v4 = vld [vmem:[#allocation11 + $0xc0] ss:$16 sps:$4 sm:$0xff]  }
 0x954   :  { %4060 = vmatprep.subr.bf16.mxu0 %v5754_v53  ;;  %4119 = vmatprep.subr.bf16.mxu1 %v5756_v23  ;;  %v8254_v53 = vld [vmem:[#allocation11 + $0xc8] ss:$16 sps:$4 sm:$0xff]   ;;  %v8258_v23 = vld [vmem:[#allocation11 + $0xe4] ss:$16 sps:$4 sm:$0xff]  }
 0x957   :  { %4061 = vmatpush1.bf16.msra.mxu0 %v5753_v37  ;;  %4120 = vmatpush1.bf16.msra.mxu1 %v5755_v33  ;;  %v8260_v37 = vld [vmem:[#allocation11 + $0xec] ss:$16 sps:$4 sm:$0xff]   ;;  %v8264_v33 = vld [vmem:[#allocation11 + $0xe0] ss:$16 sps:$4 sm:$0xff]  }
 0x958   :  { %4308 = vmatprep.subr.bf16.mxu0 %v5962_v35  ;;  %4349 = vmatprep.subr.bf16.mxu1 %v5965_v52  ;;  %9106 = vst [vmem:[#allocation47_spill] sm:$0xff] %v8260_v37  ;;  %9107 = vst [vmem:[#allocation96_spill] sm:$0xff] %v8264_v33  ;;  %v8266_v35 = vld [vmem:[#allocation11 + $0xe8] ss:$16 sps:$4 sm:$0xff]   ;;  %v8313_v52 = vld [vmem:[%s8783_s6] sm:$0xff]  ;;  %s6791_s6 = smov [#allocation14]  }
 0x959   :  { %9108 = vst [vmem:[#allocation98_spill] sm:$0xff] %v8266_v35  ;;  %s5437_s28 = sshll.u32 %s6791_s6, 4  ;;  %s5438_s28 = int_to_ptr.vmem [resolvable:$true] %s5437_s28 }
 0x95a   :  { %4063 = vmatmul.mubr.bf16.vlgmr.msra.gmra.mrb[112].mxu0 %v8118_v28  ;;  %4122 = vmatmul.mubr.bf16.vlgmr.msra.gmra.mrb[112].mxu1 %v8118_v28  ;;  %v5983_v28 = vld [vmem:[#allocation12 + $0x6c] ss:$16 sps:$4 sm:$0xff]   ;;  %s6748_s5 = scalar_lea.vmem %s5438_s28, 256  ;;  %p6753_p7 = scmp.lt.s32.totalorder %s5438_s28, %s5438_s28 }
 0x95b   :  { %4068 = vmatprep.mubr.bf16.mxu0 %v8130_v0  ;;  %4127 = vmatprep.mubr.bf16.mxu1 %v8130_v0  ;;  %v5978_v0 = vld [vmem:[#allocation12 + $0x60] ss:$16 sps:$4 sm:$0xff]   ;;  %p6749_p6 = scmp.ne.s32.totalorder %s5438_s28, %s6748_s5  ;;  %p6754_p8 = scmp.lt.s32.totalorder %s6748_s5, %s6748_s5 }
 0x95c   :  { %4309 = vmatpush1.bf16.msra.mxu0 %v5960_v15  ;;  %4350 = vmatpush1.bf16.msra.mxu1 %v5963_v11 }
 0x95d   :  { %4310 = vmatprep.subr.bf16.mxu0 %v5968_v54  ;;  %4351 = vmatprep.subr.bf16.mxu1 %v5971_v19  ;;  %v9109_v54 = vld [vmem:[#allocation43_spill] sm:$0xff]  ;;  %p6755_p9 = por %p6754_p8, %p6753_p7 }
 0x95e   :  { %v9110_v19 = vsub.s32 0, %v9109_v54 }
 0x95f   :  { %p6756_p10 = pnand %p6755_p9, %p6749_p6 }
 0x960   :  { %4311 = vmatpush1.bf16.msra.mxu0 %v5966_v58  ;;  %4352 = vmatpush1.bf16.msra.mxu1 %v5969_v55  ;;  %v8322_v58 = vrot.slane %v8313_v52, %v9110_v19  ;;  %v9111_v55 = vsub.s32 2, %v9109_v54 }
 0x961   :  { %4312 = vmatprep.subr.bf16.mxu0 %v5974_v43  ;;  %4353 = vmatprep.subr.bf16.mxu1 %v5977_v22 }
 0x962   :  { %4069 = vmatmul.mubr.bf16.gmra.mrb[116].mxu0 %v8134_v3  ;;  %4128 = vmatmul.mubr.bf16.gmra.mrb[116].mxu1 %v8134_v3  ;;  %v5995_v3 = vld [vmem:[#allocation12 + $0xac] ss:$16 sps:$4 sm:$0xff]   ;;  %v8327_v43 = vrot.slane %v8313_v52, %v9111_v55 }
 0x963   :  { %4074 = vmatprep.mubr.bf16.mxu0 %v8138_v56  ;;  %4133 = vmatprep.mubr.bf16.mxu1 %v8138_v56  ;;  %v5990_v56 = vld [vmem:[#allocation12 + $0xa0] ss:$16 sps:$4 sm:$0xff]  }
 0x964   :  { %4313 = vmatpush1.bf16.msra.mxu0 %v5972_v44  ;;  %4354 = vmatpush1.bf16.msra.mxu1 %v5975_v5  ;;  %v9112_v5 = vsub.s32 1, %v9109_v54 }
 0x965   :  { %4314 = vmatprep.subr.bf16.mxu0 %v5980_v2  ;;  %4355 = vmatprep.subr.bf16.mxu1 %v5983_v28  ;;  %v9113_v28 = vsub.s32 3, %v9109_v54 }
 0x966   :  { %v8336_v2 = vrot.slane %v8313_v52, %v9112_v5 }
 0x968   :  { %4315 = vmatpush1.bf16.msra.mxu0 %v5978_v0  ;;  %4356 = vmatpush1.bf16.msra.mxu1 %v5981_v59  ;;  %v8341_v0 = vrot.slane %v8313_v52, %v9113_v28 }
 0x969   :  { %4316 = vmatprep.subr.bf16.mxu0 %v5986_v36  ;;  %4357 = vmatprep.subr.bf16.mxu1 %v5989_v14 }
 0x96a   :  { %4075 = vmatmul.mubr.bf16.gmra.mrb[120].mxu0 %v8142_v50  ;;  %4134 = vmatmul.mubr.bf16.gmra.mrb[120].mxu1 %v8142_v50  ;;  %v6007_v50 = vld [vmem:[#allocation12 + $0xec] ss:$16 sps:$4 sm:$0xff]  }
 0x96b   :  { %4080 = vmatprep.mubr.bf16.mxu0 %v8146_v62  ;;  %4139 = vmatprep.mubr.bf16.mxu1 %v8146_v62  ;;  %v6002_v62 = vld [vmem:[#allocation12 + $0xe0] ss:$16 sps:$4 sm:$0xff]  }
 0x96c   :  { %4317 = vmatpush1.bf16.msra.mxu0 %v5984_v26  ;;  %4358 = vmatpush1.bf16.msra.mxu1 %v5987_v24 }
 0x96d   :  { %4318 = vmatprep.subr.bf16.mxu0 %v5992_v17  ;;  %4359 = vmatprep.subr.bf16.mxu1 %v5995_v3 }
 0x970   :  { %4319 = vmatpush1.bf16.msra.mxu0 %v5990_v56  ;;  %4360 = vmatpush1.bf16.msra.mxu1 %v5993_v18 }
 0x971   :  { %4320 = vmatprep.subr.bf16.mxu0 %v5998_v21  ;;  %4361 = vmatprep.subr.bf16.mxu1 %v6001_v31 }
 0x972   :  { %4081 = vmatmul.mubr.bf16.gmra.mrb[124].mxu0 %v8150_v57  ;;  %4140 = vmatmul.mubr.bf16.gmra.mrb[124].mxu1 %v8150_v57  ;;  %v8182_v57 = vld [vmem:[#allocation11 + $0x24] ss:$16 sps:$4 sm:$0xff]  }
 0x973   :  { %4340 = vmatprep.mubr.bf16.mxu0 %v8899_v1  ;;  %4381 = vmatprep.mubr.bf16.mxu1 %v8899_v1 }
 0x974   :  { %4321 = vmatpush1.bf16.msra.mxu0 %v5996_v42  ;;  %4362 = vmatpush1.bf16.msra.mxu1 %v5999_v9 }
 0x975   :  { %4322 = vmatprep.subr.bf16.mxu0 %v6004_v46  ;;  %4363 = vmatprep.subr.bf16.mxu1 %v6007_v50 }
 0x978   :  { %4323 = vmatpush1.bf16.msra.mxu0 %v6002_v62  ;;  %4364 = vmatpush1.bf16.msra.mxu1 %v6005_v48 }
 0x979   :  { %4574 = vmatprep.subr.bf16.mxu0 %v8172_v25  ;;  %4615 = vmatprep.subr.bf16.mxu1 %v8174_v49 }
 0x97b   :  { %4341 = vmatmul.mubr.bf16.vlgmr.msra.gmra.mrb[128].mxu0 %v8899_v1  ;;  %4382 = vmatmul.mubr.bf16.vlgmr.msra.gmra.mrb[128].mxu1 %v8899_v1 }
 0x97c   :  { %4575 = vmatpush1.bf16.msra.mxu0 %v8176_v47  ;;  %4616 = vmatpush1.bf16.msra.mxu1 %v8178_v12 }
 0x97d   :  { %4576 = vmatprep.subr.bf16.mxu0 %v8182_v57  ;;  %4617 = vmatprep.subr.bf16.mxu1 %v8184_v8 }
 0x97e   :  { %4606 = vmatprep.mubr.bf16.mxu0 %v8899_v1  ;;  %4647 = vmatprep.mubr.bf16.mxu1 %v8899_v1 }
 0x980   :  { %4577 = vmatpush1.bf16.msra.mxu0 %v8190_v30  ;;  %4618 = vmatpush1.bf16.msra.mxu1 %v8192_v51 }
 0x981   :  { %4578 = vmatprep.subr.bf16.mxu0 %v8196_v38  ;;  %4619 = vmatprep.subr.bf16.mxu1 %v8198_v32 }
 0x984   :  { %4579 = vmatpush1.bf16.msra.mxu0 %v8204_v7  ;;  %4620 = vmatpush1.bf16.msra.mxu1 %v8206_v29 }
 0x985   :  { %4580 = vmatprep.subr.bf16.mxu0 %v8210_v13  ;;  %4621 = vmatprep.subr.bf16.mxu1 %v8212_v60 }
 0x988   :  { %4581 = vmatpush1.bf16.msra.mxu0 %v8216_v41  ;;  %4622 = vmatpush1.bf16.msra.mxu1 %v8218_v34 }
 0x989   :  { %4582 = vmatprep.subr.bf16.mxu0 %v8222_v45  ;;  %4623 = vmatprep.subr.bf16.mxu1 %v8224_v16 }
 0x98c   :  { %4583 = vmatpush1.bf16.msra.mxu0 %v8228_v61  ;;  %4624 = vmatpush1.bf16.msra.mxu1 %v8230_v6 }
 0x98d   :  { %4584 = vmatprep.subr.bf16.mxu0 %v8234_v10  ;;  %4625 = vmatprep.subr.bf16.mxu1 %v8236_v39 }
 0x990   :  { %4585 = vmatpush1.bf16.msra.mxu0 %v8240_v63  ;;  %4626 = vmatpush1.bf16.msra.mxu1 %v8242_v27 }
 0x991   :  { %4586 = vmatprep.subr.bf16.mxu0 %v8246_v20  ;;  %4627 = vmatprep.subr.bf16.mxu1 %v8248_v40 }
 0x994   :  { %4587 = vmatpush1.bf16.msra.mxu0 %v8252_v4  ;;  %4628 = vmatpush1.bf16.msra.mxu1 %v8254_v53 }
 0x995   :  { %4588 = vmatprep.subr.bf16.mxu0 %v8258_v23  ;;  %4629 = vmatprep.subr.bf16.mxu1 %v8260_v37 }
 0x998   :  { %4589 = vmatpush1.bf16.msra.mxu0 %v8264_v33  ;;  %4630 = vmatpush1.bf16.msra.mxu1 %v8266_v35 }
 0x999   :  { %4681 = vmatprep.subr.bf16.mxu0 %v8172_v25  ;;  %4722 = vmatprep.subr.bf16.mxu1 %v8174_v49 }
 0x99b   :  { %4607 = vmatmul.mubr.bf16.vlgmr.msra.gmra.mrb[132].mxu0 %v8899_v1  ;;  %4648 = vmatmul.mubr.bf16.vlgmr.msra.gmra.mrb[132].mxu1 %v8899_v1 }
 0x99c   :  { %4682 = vmatpush1.bf16.msra.mxu0 %v8176_v47  ;;  %4723 = vmatpush1.bf16.msra.mxu1 %v8178_v12 }
 0x99d   :  { %4683 = vmatprep.subr.bf16.mxu0 %v8182_v57  ;;  %4724 = vmatprep.subr.bf16.mxu1 %v8184_v8 }
 0x99e   :  { %4713 = vmatprep.mubr.bf16.mxu0 %v8899_v1  ;;  %4754 = vmatprep.mubr.bf16.mxu1 %v8899_v1 }
 0x9a0   :  { %4684 = vmatpush1.bf16.msra.mxu0 %v8190_v30  ;;  %4725 = vmatpush1.bf16.msra.mxu1 %v8192_v51 }
 0x9a1   :  { %4685 = vmatprep.subr.bf16.mxu0 %v8196_v38  ;;  %4726 = vmatprep.subr.bf16.mxu1 %v8198_v32 }
 0x9a4   :  { %4686 = vmatpush1.bf16.msra.mxu0 %v8204_v7  ;;  %4727 = vmatpush1.bf16.msra.mxu1 %v8206_v29 }
 0x9a5   :  { %4687 = vmatprep.subr.bf16.mxu0 %v8210_v13  ;;  %4728 = vmatprep.subr.bf16.mxu1 %v8212_v60 }
 0x9a8   :  { %4688 = vmatpush1.bf16.msra.mxu0 %v8216_v41  ;;  %4729 = vmatpush1.bf16.msra.mxu1 %v8218_v34 }
 0x9a9   :  { %4689 = vmatprep.subr.bf16.mxu0 %v8222_v45  ;;  %4730 = vmatprep.subr.bf16.mxu1 %v8224_v16 }
 0x9ac   :  { %4690 = vmatpush1.bf16.msra.mxu0 %v8228_v61  ;;  %4731 = vmatpush1.bf16.msra.mxu1 %v8230_v6 }
 0x9ad   :  { %4691 = vmatprep.subr.bf16.mxu0 %v8234_v10  ;;  %4732 = vmatprep.subr.bf16.mxu1 %v8236_v39 }
 0x9b0   :  { %4692 = vmatpush1.bf16.msra.mxu0 %v8240_v63  ;;  %4733 = vmatpush1.bf16.msra.mxu1 %v8242_v27 }
 0x9b1   :  { %4693 = vmatprep.subr.bf16.mxu0 %v8246_v20  ;;  %4734 = vmatprep.subr.bf16.mxu1 %v8248_v40 }
 0x9b4   :  { %4694 = vmatpush1.bf16.msra.mxu0 %v8252_v4  ;;  %4735 = vmatpush1.bf16.msra.mxu1 %v8254_v53 }
 0x9b5   :  { %4695 = vmatprep.subr.bf16.mxu0 %v8258_v23  ;;  %4736 = vmatprep.subr.bf16.mxu1 %v8260_v37 }
 0x9b8   :  { %4696 = vmatpush1.bf16.msra.mxu0 %v8264_v33  ;;  %4737 = vmatpush1.bf16.msra.mxu1 %v8266_v35 }
 0x9b9   :  { %4788 = vmatprep.subr.bf16.mxu0 %v8172_v25  ;;  %4829 = vmatprep.subr.bf16.mxu1 %v8174_v49 }
 0x9ed   :  { %v8315_v15 = vpop.f32.mrb[96].mxu0  ;;  %v8317_v11 = vpop.f32.mrb[96].mxu1 }
 0x9ee   :  { %v8329_v22 = vpop.f32.mrb[97].mxu0  ;;  %v8331_v44 = vpop.f32.mrb[97].mxu1 }
 0x9ef   :  { %v3922_v59 = vpop.f32.mrb[98].mxu0  ;;  %v3995_v36 = vpop.f32.mrb[98].mxu1 }
 0x9f0   :  { %v8344_v14 = vadd.f32 %v3922_v59, %v8322_v58  ;;  %v8347_v26 = vadd.f32 %v3995_v36, %v8327_v43  ;;  %v3924_v24 = vpop.f32.mrb[99].mxu0  ;;  %v3997_v17 = vpop.f32.mrb[99].mxu1 }
 0x9f1   :  { %v8350_v3 = vadd.f32 %v3924_v24, %v8336_v2  ;;  %v8353_v56 = vadd.f32 %v3997_v17, %v8341_v0 }
 0x9f2   :  { %9114 = vst [vmem:[#allocation97_spill] sm:$0xff] %v8344_v14  ;;  %9115 = vst [vmem:[#allocation99_spill] sm:$0xff] %v8347_v26 }
 0x9f3   :  { %9116 = vst [vmem:[#allocation48_spill] sm:$0xff] %v8350_v3  ;;  %9117 = vst [vmem:[#allocation50_spill] sm:$0xff] %v8353_v56 }
 0x9f5   :  { %v3928_v18 = vpop.f32.mrb[100].mxu0  ;;  %v4001_v21 = vpop.f32.mrb[100].mxu1 }
 0x9f6   :  { %v8356_v31 = vadd.f32 %v3928_v18, %v8322_v58  ;;  %v8359_v42 = vadd.f32 %v4001_v21, %v8327_v43  ;;  %v3930_v9 = vpop.f32.mrb[101].mxu0  ;;  %v4003_v46 = vpop.f32.mrb[101].mxu1 }
 0x9f7   :  { %v8362_v50 = vadd.f32 %v3930_v9, %v8336_v2  ;;  %v8365_v62 = vadd.f32 %v4003_v46, %v8341_v0  ;;  %v3932_v48 = vpop.f32.mrb[102].mxu0  ;;  %v4005_v19 = vpop.f32.mrb[102].mxu1 }
 0x9f8   :  { %9118 = vst [vmem:[#allocation49_spill] sm:$0xff] %v8356_v31  ;;  %9119 = vst [vmem:[#allocation52_spill] sm:$0xff] %v8359_v42  ;;  %v8368_v55 = vadd.f32 %v3932_v48, %v8322_v58  ;;  %v8371_v5 = vadd.f32 %v4005_v19, %v8327_v43  ;;  %v3934_v28 = vpop.f32.mrb[103].mxu0  ;;  %v4007_v59 = vpop.f32.mrb[103].mxu1 }
 0x9f9   :  { %9120 = vst [vmem:[#allocation91_spill] sm:$0xff] %v8362_v50  ;;  %9121 = vst [vmem:[#allocation94_spill] sm:$0xff] %v8365_v62  ;;  %v8374_v36 = vadd.f32 %v3934_v28, %v8336_v2  ;;  %v8377_v24 = vadd.f32 %v4007_v59, %v8341_v0 }
 0x9fa   :  { %9122 = vst [vmem:[#allocation93_spill] sm:$0xff] %v8368_v55  ;;  %9123 = vst [vmem:[#allocation95_spill] sm:$0xff] %v8371_v5 }
 0x9fb   :  { %9124 = vst [vmem:[#allocation51_spill] sm:$0xff] %v8374_v36  ;;  %9125 = vst [vmem:[#allocation54_spill] sm:$0xff] %v8377_v24 }
 0x9fd   :  { %v3938_v17 = vpop.f32.mrb[104].mxu0  ;;  %v4011_v18 = vpop.f32.mrb[104].mxu1 }
 0x9fe   :  { %v8380_v21 = vadd.f32 %v3938_v17, %v8322_v58  ;;  %v8383_v9 = vadd.f32 %v4011_v18, %v8327_v43  ;;  %v3940_v46 = vpop.f32.mrb[105].mxu0  ;;  %v4013_v48 = vpop.f32.mrb[105].mxu1 }
 0x9ff   :  { %v8386_v19 = vadd.f32 %v3940_v46, %v8336_v2  ;;  %v8389_v5 = vadd.f32 %v4013_v48, %v8341_v0  ;;  %v3942_v28 = vpop.f32.mrb[106].mxu0  ;;  %v4015_v36 = vpop.f32.mrb[106].mxu1 }
 0xa00   :  { %9126 = vst [vmem:[#allocation53_spill] sm:$0xff] %v8380_v21  ;;  %9127 = vst [vmem:[#allocation55_spill] sm:$0xff] %v8383_v9  ;;  %v8392_v59 = vadd.f32 %v3942_v28, %v8322_v58  ;;  %v8395_v24 = vadd.f32 %v4015_v36, %v8327_v43  ;;  %v3944_v17 = vpop.f32.mrb[107].mxu0  ;;  %v4017_v21 = vpop.f32.mrb[107].mxu1 }
 0xa01   :  { %9128 = vst [vmem:[#allocation88_spill] sm:$0xff] %v8386_v19  ;;  %9129 = vst [vmem:[#allocation90_spill] sm:$0xff] %v8389_v5  ;;  %v8398_v18 = vadd.f32 %v3944_v17, %v8336_v2  ;;  %v8401_v9 = vadd.f32 %v4017_v21, %v8341_v0 }
 0xa02   :  { %9130 = vst [vmem:[#allocation89_spill] sm:$0xff] %v8392_v59  ;;  %9131 = vst [vmem:[#allocation92_spill] sm:$0xff] %v8395_v24 }
 0xa03   :  { %9132 = vst [vmem:[#allocation35_spill] sm:$0xff] %v8398_v18  ;;  %9133 = vst [vmem:[#allocation36_spill] sm:$0xff] %v8401_v9 }
 0xa05   :  { %v3948_v46 = vpop.f32.mrb[108].mxu0  ;;  %v4021_v19 = vpop.f32.mrb[108].mxu1 }
 0xa06   :  { %v8404_v48 = vadd.f32 %v3948_v46, %v8322_v58  ;;  %v8407_v5 = vadd.f32 %v4021_v19, %v8327_v43  ;;  %v3950_v28 = vpop.f32.mrb[109].mxu0  ;;  %v4023_v59 = vpop.f32.mrb[109].mxu1 }
 0xa07   :  { %v8410_v36 = vadd.f32 %v3950_v28, %v8336_v2  ;;  %v8413_v24 = vadd.f32 %v4023_v59, %v8341_v0  ;;  %v3952_v17 = vpop.f32.mrb[110].mxu0  ;;  %v4025_v18 = vpop.f32.mrb[110].mxu1 }
 0xa08   :  { %9134 = vst [vmem:[#allocation37_spill] sm:$0xff] %v8404_v48  ;;  %9135 = vst [vmem:[#allocation38_spill] sm:$0xff] %v8407_v5  ;;  %v8416_v21 = vadd.f32 %v3952_v17, %v8322_v58  ;;  %v8419_v9 = vadd.f32 %v4025_v18, %v8327_v43  ;;  %v3954_v46 = vpop.f32.mrb[111].mxu0  ;;  %v4027_v48 = vpop.f32.mrb[111].mxu1 }
 0xa09   :  { %9136 = vst [vmem:[#allocation39_spill] sm:$0xff] %v8410_v36  ;;  %9137 = vst [vmem:[#allocation40_spill] sm:$0xff] %v8413_v24  ;;  %v8422_v19 = vadd.f32 %v3954_v46, %v8336_v2  ;;  %v8425_v5 = vadd.f32 %v4027_v48, %v8341_v0 }
 0xa0a   :  { %9138 = vst [vmem:[#allocation41_spill] sm:$0xff] %v8416_v21  ;;  %9139 = vst [vmem:[#allocation44_spill] sm:$0xff] %v8419_v9 }
 0xa0b   :  { %9140 = vst [vmem:[#allocation42_spill] sm:$0xff] %v8422_v19  ;;  %9141 = vst [vmem:[#allocation56_spill] sm:$0xff] %v8425_v5 }
 0xa2d   :  { %v4064_v28 = vpop.f32.mrb[112].mxu0  ;;  %v4123_v36 = vpop.f32.mrb[112].mxu1 }
 0xa2e   :  { %v4065_v59 = vpop.f32.mrb[113].mxu0  ;;  %v4124_v24 = vpop.f32.mrb[113].mxu1 }
 0xa2f   :  { %v4066_v55 = vpop.f32.mrb[114].mxu0  ;;  %v4125_v62 = vpop.f32.mrb[114].mxu1 }
 0xa30   :  { %v4067_v50 = vpop.f32.mrb[115].mxu0  ;;  %v4126_v17 = vpop.f32.mrb[115].mxu1 }
 0xa35   :  { %v4070_v21 = vpop.f32.mrb[116].mxu0  ;;  %v4129_v42 = vpop.f32.mrb[116].mxu1 }
 0xa36   :  { %v4071_v18 = vpop.f32.mrb[117].mxu0  ;;  %v4130_v9 = vpop.f32.mrb[117].mxu1 }
 0xa37   :  { %v4072_v31 = vpop.f32.mrb[118].mxu0  ;;  %v4131_v56 = vpop.f32.mrb[118].mxu1 }
 0xa38   :  { %v4073_v3 = vpop.f32.mrb[119].mxu0  ;;  %v4132_v46 = vpop.f32.mrb[119].mxu1  ;;  %v9142_v56 = vsub.s32 4, %v9109_v54 }
 0xa39   :  { %v9145_v46 = vsub.s32 7, %v9109_v54 }
 0xa3a   :  { %v3223_v3 = vrot.slane %v8313_v52, %v9142_v56 }
 0xa3d   :  { %v4076_v19 = vpop.f32.mrb[120].mxu0  ;;  %v4135_v26 = vpop.f32.mrb[120].mxu1 }
 0xa3e   :  { %v4077_v48 = vpop.f32.mrb[121].mxu0  ;;  %v4136_v5 = vpop.f32.mrb[121].mxu1  ;;  %v9143_v26 = vsub.s32 6, %v9109_v54 }
 0xa3f   :  { %v4078_v28 = vpop.f32.mrb[122].mxu0  ;;  %v4137_v36 = vpop.f32.mrb[122].mxu1  ;;  %v9144_v5 = vsub.s32 5, %v9109_v54  ;;  %v3235_v48 = vrot.slane %v8313_v52, %v9145_v46  ;;  %v3921_v46 = vadd.f32 %v8329_v22, %v8336_v2 }
 0xa40   :  { %v4079_v59 = vpop.f32.mrb[123].mxu0  ;;  %v4138_v24 = vpop.f32.mrb[123].mxu1  ;;  %v3231_v31 = vrot.slane %v8313_v52, %v9143_v26 }
 0xa41   :  { %v3227_v19 = vrot.slane %v8313_v52, %v9144_v5 }
 0xa45   :  { %v4082_v55 = vpop.f32.mrb[124].mxu0  ;;  %v4141_v62 = vpop.f32.mrb[124].mxu1 }
 0xa46   :  { %v4083_v50 = vpop.f32.mrb[125].mxu0  ;;  %v4142_v17 = vpop.f32.mrb[125].mxu1 }
 0xa47   :  { %v4084_v21 = vpop.f32.mrb[126].mxu0  ;;  %v4143_v42 = vpop.f32.mrb[126].mxu1 }
 0xa48   :  { %v4086_v18 = vpop.f32.mrb[127].mxu0  ;;  %v4145_v9 = vpop.f32.mrb[127].mxu1  ;;  %v4085_v28 = vadd.f32 %v4084_v21, %v3223_v3  ;;  %v4144_v36 = vadd.f32 %v4143_v42, %v3231_v31 }
 0xa49   :  { %v4087_v59 = vadd.f32 %v4086_v18, %v3227_v19  ;;  %v4146_v24 = vadd.f32 %v4145_v9, %v3235_v48  ;;  %v3994_v48 = vadd.f32 %v8331_v44, %v8341_v0 }
 0xa4e   :  { %v4342_v55 = vpop.f32.mrb[128].mxu0  ;;  %v4383_v62 = vpop.f32.mrb[128].mxu1 }
 0xa4f   :  { %v4343_v50 = vadd.f32 %v4342_v55, %v4085_v28  ;;  %v4384_v17 = vadd.f32 %v4383_v62, %v4144_v36  ;;  %v4344_v56 = vpop.f32.mrb[129].mxu0  ;;  %v4385_v14 = vpop.f32.mrb[129].mxu1 }
 0xa50   :  { %v4345_v49 = vadd.f32 %v4344_v56, %v4087_v59  ;;  %v4386_v26 = vadd.f32 %v4385_v14, %v4146_v24  ;;  %v4346_v25 = vpop.f32.mrb[130].mxu0  ;;  %v4387_v35 = vpop.f32.mrb[130].mxu1 }
 0xa51   :  { %v5789_v33 = vmul.f32 -1.442695, %v4343_v50  ;;  %v4347_v5 = vpop.f32.mrb[131].mxu0  ;;  %v4388_v37 = vpop.f32.mrb[131].mxu1  ;;  %v5791_v52 = vmul.f32 -1.442695, %v4384_v17 }
 0xa52   :  { %v5790_v54 = vmul.f32 -1.442695, %v4345_v49  ;;  %v3919_v49 = vadd.f32 %v8315_v15, %v8322_v58  ;;  %v3992_v37 = vadd.f32 %v8317_v11, %v8327_v43 }
 0xa53   :  { %6312 = vpow2.f32 %v5789_v33 }
 0xa54   :  { %6314 = vpow2.f32 %v5790_v54 }
 0xa55   :  { %6316 = vtanh.f32 %v4386_v26 }
 0xa56   :  { %6318 = vpow2.f32 %v5791_v52 }
 0xa5d   :  { %v6313_v21 = vpop.eup %6312 }
 0xa5e   :  { %v4399_v42 = vadd.f32 1.0, %v6313_v21  ;;  %v6315_v18 = vpop.eup %6314 }
 0xa5f   :  { %v4400_v9 = vadd.f32 1.0, %v6315_v18  ;;  %v6317_v3 = vpop.eup %6316 }
 0xa60   :  { %6320 = vrcp.f32 %v4399_v42  ;;  %v6319_v31 = vpop.eup %6318 }
 0xa61   :  { %6322 = vrcp.f32 %v4400_v9  ;;  %v4401_v19 = vadd.f32 1.0, %v6319_v31 }
 0xa63   :  { %6324 = vrcp.f32 %v4401_v19 }
 0xa6a   :  { %v6321_v14 = vpop.eup %6320 }
 0xa6b   :  { %v4410_v25 = vmul.f32 %v6321_v14, %v6317_v3  ;;  %v6323_v35 = vpop.eup %6322 }
 0xa6c   :  { %v4409_v33 = vmul.f32 0.0, %v6323_v35 }
 0xa6d   :  { %v6325_v44 = vpop.eup %6324 }
 0xa6e   :  { %v4608_v28 = vpop.f32.mrb[132].mxu0  ;;  %v4649_v36 = vpop.f32.mrb[132].mxu1  ;;  %v4411_v59 = vadd.f32 %v4410_v25, %v4409_v33 }
 0xa6f   :  { %v4609_v24 = vadd.f32 %v4608_v28, %v3919_v49  ;;  %v4650_v55 = vadd.f32 %v4649_v36, %v3992_v37  ;;  %v4610_v62 = vpop.f32.mrb[133].mxu0  ;;  %v4651_v50 = vpop.f32.mrb[133].mxu1  ;;  %v9147_v28 = vld [vmem:[#allocation96_spill] sm:$0xff]  ;;  %v9148_v36 = vld [vmem:[#allocation98_spill] sm:$0xff] }
 0xa70   :  { %v4611_v17 = vadd.f32 %v4610_v62, %v3921_v46  ;;  %v4652_v15 = vadd.f32 %v4651_v50, %v3994_v48  ;;  %v4612_v58 = vpop.f32.mrb[134].mxu0  ;;  %v4653_v56 = vpop.f32.mrb[134].mxu1  ;;  %6326 = vtanh.f32 %v4411_v59  ;;  %v9146_v48 = vld [vmem:[#allocation47_spill] sm:$0xff]  ;;  %v9149_v59 = vld [vmem:[#allocation46_spill] sm:$0xff]  ;;  %v9151_v50 = vld [vmem:[#allocation97_spill] sm:$0xff] }
 0xa71   :  { %v5824_v11 = vmul.f32 -1.442695, %v4609_v24  ;;  %v4613_v43 = vpop.f32.mrb[135].mxu0  ;;  %v4654_v26 = vpop.f32.mrb[135].mxu1  ;;  %v5826_v0 = vmul.f32 -1.442695, %v4650_v55 }
 0xa72   :  { %v5825_v22 = vmul.f32 -1.442695, %v4611_v17  ;;  %v9150_v24 = vld [vmem:[#allocation45_spill] sm:$0xff]  ;;  %v9153_v43 = vld [vmem:[#allocation48_spill] sm:$0xff] }
 0xa73   :  { %6328 = vpow2.f32 %v5824_v11 }
 0xa74   :  { %6330 = vpow2.f32 %v5825_v22  ;;  %v9154_v22 = vld [vmem:[#allocation50_spill] sm:$0xff] }
 0xa75   :  { %6332 = vtanh.f32 %v4652_v15  ;;  %v9152_v15 = vld [vmem:[#allocation99_spill] sm:$0xff] }
 0xa76   :  { %6334 = vpow2.f32 %v5826_v0 }
 0xa7a   :  { %v6327_v2 = vpop.eup %6326 }
 0xa7b   :  { %v4413_v5 = vmul.f32 %v6327_v2, %v6325_v44 }
 0xa7d   :  { %v6329_v54 = vpop.eup %6328  ;;  %5430 = vst [vmem:[#allocation14 + $0x8] sm:$0xff] %v4413_v5 }
 0xa7e   :  { %v4665_v52 = vadd.f32 1.0, %v6329_v54  ;;  %v6331_v21 = vpop.eup %6330 }
 0xa7f   :  { %v4666_v42 = vadd.f32 1.0, %v6331_v21  ;;  %v6333_v18 = vpop.eup %6332 }
 0xa80   :  { %6336 = vrcp.f32 %v4665_v52  ;;  %v6335_v9 = vpop.eup %6334 }
 0xa81   :  { %6338 = vrcp.f32 %v4666_v42  ;;  %v4667_v25 = vadd.f32 1.0, %v6335_v9 }
 0xa83   :  { %6340 = vrcp.f32 %v4667_v25 }
 0xa8a   :  { %v6337_v3 = vpop.eup %6336 }
 0xa8b   :  { %v4676_v31 = vmul.f32 %v6337_v3, %v6333_v18  ;;  %v6339_v14 = vpop.eup %6338 }
 0xa8c   :  { %v4675_v35 = vmul.f32 0.0, %v6339_v14 }
 0xa8d   :  { %v6341_v49 = vpop.eup %6340 }
 0xa8e   :  { %v8447_v19 = vadd.f32 %v4676_v31, %v4675_v35 }
 0xa90   :  { %6342 = vtanh.f32 %v8447_v19 }
 0xa9a   :  { %v6343_v37 = vpop.eup %6342 }
 0xa9b   :  { %v4679_v33 = vmul.f32 %v6343_v37, %v6341_v49 }
 0xa9d   :  { %v4680_v46 = vpack.c.bf16 %v4679_v33, %v4679_v33 }
 0xa9f   :  { %4714 = vmatmul.mubr.bf16.vlgmr.msra.gmra.mrb[136].mxu0 %v4680_v46  ;;  %4755 = vmatmul.mubr.bf16.vlgmr.msra.gmra.mrb[136].mxu1 %v4680_v46 }
 0xaa0   :  { %4789 = vmatpush1.bf16.msra.mxu0 %v8176_v47  ;;  %4830 = vmatpush1.bf16.msra.mxu1 %v8178_v12 }
 0xaa1   :  { %4790 = vmatprep.subr.bf16.mxu0 %v8182_v57  ;;  %4831 = vmatprep.subr.bf16.mxu1 %v8184_v8 }
 0xaa2   :  { %4820 = vmatprep.mubr.bf16.mxu0 %v8899_v1  ;;  %4861 = vmatprep.mubr.bf16.mxu1 %v8899_v1 }
 0xaa4   :  { %4791 = vmatpush1.bf16.msra.mxu0 %v8190_v30  ;;  %4832 = vmatpush1.bf16.msra.mxu1 %v8192_v51 }
 0xaa5   :  { %4792 = vmatprep.subr.bf16.mxu0 %v8196_v38  ;;  %4833 = vmatprep.subr.bf16.mxu1 %v8198_v32 }
 0xaa8   :  { %4793 = vmatpush1.bf16.msra.mxu0 %v8204_v7  ;;  %4834 = vmatpush1.bf16.msra.mxu1 %v8206_v29 }
 0xaa9   :  { %4794 = vmatprep.subr.bf16.mxu0 %v8210_v13  ;;  %4835 = vmatprep.subr.bf16.mxu1 %v8212_v60 }
 0xaac   :  { %4795 = vmatpush1.bf16.msra.mxu0 %v8216_v41  ;;  %4836 = vmatpush1.bf16.msra.mxu1 %v8218_v34 }
 0xaad   :  { %4796 = vmatprep.subr.bf16.mxu0 %v8222_v45  ;;  %4837 = vmatprep.subr.bf16.mxu1 %v8224_v16 }
 0xab0   :  { %4797 = vmatpush1.bf16.msra.mxu0 %v8228_v61  ;;  %4838 = vmatpush1.bf16.msra.mxu1 %v8230_v6 }
 0xab1   :  { %4798 = vmatprep.subr.bf16.mxu0 %v8234_v10  ;;  %4839 = vmatprep.subr.bf16.mxu1 %v8236_v39 }
 0xab4   :  { %4799 = vmatpush1.bf16.msra.mxu0 %v8240_v63  ;;  %4840 = vmatpush1.bf16.msra.mxu1 %v8242_v27 }
 0xab5   :  { %4800 = vmatprep.subr.bf16.mxu0 %v8246_v20  ;;  %4841 = vmatprep.subr.bf16.mxu1 %v8248_v40 }
 0xab8   :  { %4801 = vmatpush1.bf16.msra.mxu0 %v8252_v4  ;;  %4842 = vmatpush1.bf16.msra.mxu1 %v8254_v53 }
 0xab9   :  { %4802 = vmatprep.subr.bf16.mxu0 %v8258_v23  ;;  %4843 = vmatprep.subr.bf16.mxu1 %v9146_v48 }
 0xabc   :  { %4803 = vmatpush1.bf16.msra.mxu0 %v9147_v28  ;;  %4844 = vmatpush1.bf16.msra.mxu1 %v9148_v36 }
 0xabd   :  { %4895 = vmatprep.subr.bf16.mxu0 %v9149_v59  ;;  %4936 = vmatprep.subr.bf16.mxu1 %v9150_v24 }
 0xb72   :  { %v4715_v55 = vpop.f32.mrb[136].mxu0  ;;  %v4756_v62 = vpop.f32.mrb[136].mxu1 }
 0xb73   :  { %v4716_v17 = vadd.f32 %v4715_v55, %v9151_v50  ;;  %v4757_v58 = vadd.f32 %v4756_v62, %v9152_v15  ;;  %v4717_v56 = vpop.f32.mrb[137].mxu0  ;;  %v4758_v11 = vpop.f32.mrb[137].mxu1 }
 0xb74   :  { %v4718_v26 = vadd.f32 %v4717_v56, %v9153_v43  ;;  %v4759_v44 = vadd.f32 %v4758_v11, %v9154_v22  ;;  %v4719_v2 = vpop.f32.mrb[138].mxu0  ;;  %v4760_v0 = vpop.f32.mrb[138].mxu1  ;;  %v9155_v56 = vld [vmem:[#allocation49_spill] sm:$0xff]  ;;  %v9156_v43 = vld [vmem:[#allocation52_spill] sm:$0xff] }
 0xb75   :  { %v5827_v5 = vmul.f32 -1.442695, %v4716_v17  ;;  %v4720_v54 = vpop.f32.mrb[139].mxu0  ;;  %v4761_v52 = vpop.f32.mrb[139].mxu1  ;;  %v5829_v42 = vmul.f32 -1.442695, %v4757_v58 }
 0xb76   :  { %v5828_v21 = vmul.f32 -1.442695, %v4718_v26  ;;  %v9157_v2 = vld [vmem:[#allocation91_spill] sm:$0xff] }
 0xb77   :  { %6344 = vpow2.f32 %v5827_v5  ;;  %v9158_v5 = vld [vmem:[#allocation94_spill] sm:$0xff] }
 0xb78   :  { %6346 = vpow2.f32 %v5828_v21 }
 0xb79   :  { %6348 = vtanh.f32 %v4759_v44 }
 0xb7a   :  { %6350 = vpow2.f32 %v5829_v42 }
 0xb81   :  { %v6345_v18 = vpop.eup %6344 }
 0xb82   :  { %v4772_v9 = vadd.f32 1.0, %v6345_v18  ;;  %v6347_v3 = vpop.eup %6346 }
 0xb83   :  { %v4773_v31 = vadd.f32 1.0, %v6347_v3  ;;  %v6349_v14 = vpop.eup %6348 }
 0xb84   :  { %6352 = vrcp.f32 %v4772_v9  ;;  %v6351_v25 = vpop.eup %6350 }
 0xb85   :  { %6354 = vrcp.f32 %v4773_v31  ;;  %v4774_v33 = vadd.f32 1.0, %v6351_v25 }
 0xb87   :  { %6356 = vrcp.f32 %v4774_v33 }
 0xb8e   :  { %v6353_v35 = vpop.eup %6352 }
 0xb8f   :  { %v4783_v49 = vmul.f32 %v6353_v35, %v6349_v14  ;;  %v6355_v37 = vpop.eup %6354 }
 0xb90   :  { %v4782_v46 = vmul.f32 %v6355_v37, %v8447_v19 }
 0xb91   :  { %v6357_v62 = vpop.eup %6356 }
 0xb92   :  { %v8489_v55 = vadd.f32 %v4783_v49, %v4782_v46 }
 0xb94   :  { %6358 = vtanh.f32 %v8489_v55 }
 0xb9e   :  { %v6359_v50 = vpop.eup %6358 }
 0xb9f   :  { %v4786_v17 = vmul.f32 %v6359_v50, %v6357_v62 }
 0xba1   :  { %v4787_v15 = vpack.c.bf16 %v4786_v17, %v4786_v17 }
 0xba3   :  { %4821 = vmatmul.mubr.bf16.vlgmr.msra.gmra.mrb[140].mxu0 %v4787_v15  ;;  %4862 = vmatmul.mubr.bf16.vlgmr.msra.gmra.mrb[140].mxu1 %v4787_v15 }
 0xba4   :  { %4896 = vmatpush1.bf16.msra.mxu0 %v8176_v47  ;;  %4937 = vmatpush1.bf16.msra.mxu1 %v8178_v12 }
 0xba5   :  { %4897 = vmatprep.subr.bf16.mxu0 %v8182_v57  ;;  %4938 = vmatprep.subr.bf16.mxu1 %v8184_v8 }
 0xba6   :  { %4927 = vmatprep.mubr.bf16.mxu0 %v8899_v1  ;;  %4968 = vmatprep.mubr.bf16.mxu1 %v8899_v1 }
 0xba8   :  { %4898 = vmatpush1.bf16.msra.mxu0 %v8190_v30  ;;  %4939 = vmatpush1.bf16.msra.mxu1 %v8192_v51 }
 0xba9   :  { %4899 = vmatprep.subr.bf16.mxu0 %v8196_v38  ;;  %4940 = vmatprep.subr.bf16.mxu1 %v8198_v32 }
 0xbac   :  { %4900 = vmatpush1.bf16.msra.mxu0 %v8204_v7  ;;  %4941 = vmatpush1.bf16.msra.mxu1 %v8206_v29 }
 0xbad   :  { %4901 = vmatprep.subr.bf16.mxu0 %v8210_v13  ;;  %4942 = vmatprep.subr.bf16.mxu1 %v8212_v60 }
 0xbb0   :  { %4902 = vmatpush1.bf16.msra.mxu0 %v8216_v41  ;;  %4943 = vmatpush1.bf16.msra.mxu1 %v8218_v34 }
 0xbb1   :  { %4903 = vmatprep.subr.bf16.mxu0 %v8222_v45  ;;  %4944 = vmatprep.subr.bf16.mxu1 %v8224_v16 }
 0xbb4   :  { %4904 = vmatpush1.bf16.msra.mxu0 %v8228_v61  ;;  %4945 = vmatpush1.bf16.msra.mxu1 %v8230_v6 }
 0xbb5   :  { %4905 = vmatprep.subr.bf16.mxu0 %v8234_v10  ;;  %4946 = vmatprep.subr.bf16.mxu1 %v8236_v39 }
 0xbb8   :  { %4906 = vmatpush1.bf16.msra.mxu0 %v8240_v63  ;;  %4947 = vmatpush1.bf16.msra.mxu1 %v8242_v27 }
 0xbb9   :  { %4907 = vmatprep.subr.bf16.mxu0 %v8246_v20  ;;  %4948 = vmatprep.subr.bf16.mxu1 %v8248_v40 }
 0xbbc   :  { %4908 = vmatpush1.bf16.msra.mxu0 %v8252_v4  ;;  %4949 = vmatpush1.bf16.msra.mxu1 %v8254_v53 }
 0xbbd   :  { %4909 = vmatprep.subr.bf16.mxu0 %v8258_v23  ;;  %4950 = vmatprep.subr.bf16.mxu1 %v9146_v48 }
 0xbc0   :  { %4910 = vmatpush1.bf16.msra.mxu0 %v9147_v28  ;;  %4951 = vmatpush1.bf16.msra.mxu1 %v9148_v36 }
 0xbc1   :  { %5002 = vmatprep.subr.bf16.mxu0 %v9149_v59  ;;  %5043 = vmatprep.subr.bf16.mxu1 %v9150_v24 }
 0xc76   :  { %v4822_v19 = vpop.f32.mrb[140].mxu0  ;;  %v4863_v58 = vpop.f32.mrb[140].mxu1 }
 0xc77   :  { %v4823_v11 = vadd.f32 %v4822_v19, %v9155_v56  ;;  %v4864_v26 = vadd.f32 %v4863_v58, %v9156_v43  ;;  %v4824_v22 = vpop.f32.mrb[141].mxu0  ;;  %v4865_v44 = vpop.f32.mrb[141].mxu1 }
 0xc78   :  { %v4825_v0 = vadd.f32 %v4824_v22, %v9157_v2  ;;  %v4866_v54 = vadd.f32 %v4865_v44, %v9158_v5  ;;  %v4826_v52 = vpop.f32.mrb[142].mxu0  ;;  %v4867_v21 = vpop.f32.mrb[142].mxu1  ;;  %v9162_v22 = vld [vmem:[#allocation54_spill] sm:$0xff] }
 0xc79   :  { %v5830_v42 = vmul.f32 -1.442695, %v4823_v11  ;;  %v4827_v18 = vpop.f32.mrb[143].mxu0  ;;  %v4868_v9 = vpop.f32.mrb[143].mxu1  ;;  %v5832_v31 = vmul.f32 -1.442695, %v4864_v26 }
 0xc7a   :  { %v5831_v3 = vmul.f32 -1.442695, %v4825_v0 }
 0xc7b   :  { %6360 = vpow2.f32 %v5830_v42 }
 0xc7c   :  { %6362 = vpow2.f32 %v5831_v3 }
 0xc7d   :  { %6364 = vtanh.f32 %v4866_v54 }
 0xc7e   :  { %6366 = vpow2.f32 %v5832_v31 }
 0xc85   :  { %v6361_v14 = vpop.eup %6360 }
 0xc86   :  { %v4879_v25 = vadd.f32 1.0, %v6361_v14  ;;  %v6363_v35 = vpop.eup %6362 }
 0xc87   :  { %v4880_v49 = vadd.f32 1.0, %v6363_v35  ;;  %v6365_v37 = vpop.eup %6364 }
 0xc88   :  { %6368 = vrcp.f32 %v4879_v25  ;;  %v6367_v33 = vpop.eup %6366 }
 0xc89   :  { %6370 = vrcp.f32 %v4880_v49  ;;  %v4881_v17 = vadd.f32 1.0, %v6367_v33 }
 0xc8b   :  { %6372 = vrcp.f32 %v4881_v17 }
 0xc92   :  { %v6369_v46 = vpop.eup %6368 }
 0xc93   :  { %v4890_v62 = vmul.f32 %v6369_v46, %v6365_v37  ;;  %v6371_v50 = vpop.eup %6370 }
 0xc94   :  { %v4889_v15 = vmul.f32 %v6371_v50, %v8489_v55  ;;  %v9161_v55 = vld [vmem:[#allocation51_spill] sm:$0xff] }
 0xc95   :  { %v6373_v58 = vpop.eup %6372 }
 0xc96   :  { %v8531_v19 = vadd.f32 %v4890_v62, %v4889_v15  ;;  %v8576_v15 = vld [vmem:[#allocation11] ss:$16 sps:$4 sm:$0xff]  }
 0xc98   :  { %6374 = vtanh.f32 %v8531_v19 }
 0xca2   :  { %v6375_v56 = vpop.eup %6374 }
 0xca3   :  { %v4893_v11 = vmul.f32 %v6375_v56, %v6373_v58  ;;  %v8579_v58 = vld [vmem:[#allocation11 + $0x8] ss:$16 sps:$4 sm:$0xff]   ;;  %v8585_v56 = vld [vmem:[#allocation11 + $0x2c] ss:$16 sps:$4 sm:$0xff]  }
 0xca5   :  { %v4894_v43 = vpack.c.bf16 %v4893_v11, %v4893_v11  ;;  %v8590_v11 = vld [vmem:[#allocation11 + $0x20] ss:$16 sps:$4 sm:$0xff]  }
 0xca7   :  { %4928 = vmatmul.mubr.bf16.vlgmr.msra.gmra.mrb[144].mxu0 %v4894_v43  ;;  %4969 = vmatmul.mubr.bf16.vlgmr.msra.gmra.mrb[144].mxu1 %v4894_v43  ;;  %v8593_v43 = vld [vmem:[#allocation11 + $0x28] ss:$16 sps:$4 sm:$0xff]  }
 0xca8   :  { %5003 = vmatpush1.bf16.msra.mxu0 %v8176_v47  ;;  %5044 = vmatpush1.bf16.msra.mxu1 %v8178_v12 }
 0xca9   :  { %5004 = vmatprep.subr.bf16.mxu0 %v8182_v57  ;;  %5045 = vmatprep.subr.bf16.mxu1 %v8184_v8  ;;  %v9159_v57 = vld [vmem:[#allocation93_spill] sm:$0xff] }
 0xcaa   :  { %5034 = vmatprep.mubr.bf16.mxu0 %v8899_v1  ;;  %5075 = vmatprep.mubr.bf16.mxu1 %v8899_v1 }
 0xcac   :  { %5005 = vmatpush1.bf16.msra.mxu0 %v8190_v30  ;;  %5046 = vmatpush1.bf16.msra.mxu1 %v8192_v51  ;;  %v9160_v30 = vld [vmem:[#allocation95_spill] sm:$0xff] }
 0xcad   :  { %5006 = vmatprep.subr.bf16.mxu0 %v8196_v38  ;;  %5047 = vmatprep.subr.bf16.mxu1 %v8198_v32 }
 0xcb0   :  { %5007 = vmatpush1.bf16.msra.mxu0 %v8204_v7  ;;  %5048 = vmatpush1.bf16.msra.mxu1 %v8206_v29 }
 0xcb1   :  { %5008 = vmatprep.subr.bf16.mxu0 %v8210_v13  ;;  %5049 = vmatprep.subr.bf16.mxu1 %v8212_v60 }
 0xcb4   :  { %5009 = vmatpush1.bf16.msra.mxu0 %v8216_v41  ;;  %5050 = vmatpush1.bf16.msra.mxu1 %v8218_v34 }
 0xcb5   :  { %5010 = vmatprep.subr.bf16.mxu0 %v8222_v45  ;;  %5051 = vmatprep.subr.bf16.mxu1 %v8224_v16 }
 0xcb8   :  { %5011 = vmatpush1.bf16.msra.mxu0 %v8228_v61  ;;  %5052 = vmatpush1.bf16.msra.mxu1 %v8230_v6 }
 0xcb9   :  { %5012 = vmatprep.subr.bf16.mxu0 %v8234_v10  ;;  %5053 = vmatprep.subr.bf16.mxu1 %v8236_v39 }
 0xcbc   :  { %5013 = vmatpush1.bf16.msra.mxu0 %v8240_v63  ;;  %5054 = vmatpush1.bf16.msra.mxu1 %v8242_v27 }
 0xcbd   :  { %5014 = vmatprep.subr.bf16.mxu0 %v8246_v20  ;;  %5055 = vmatprep.subr.bf16.mxu1 %v8248_v40 }
 0xcc0   :  { %5015 = vmatpush1.bf16.msra.mxu0 %v8252_v4  ;;  %5056 = vmatpush1.bf16.msra.mxu1 %v8254_v53 }
 0xcc1   :  { %5016 = vmatprep.subr.bf16.mxu0 %v8258_v23  ;;  %5057 = vmatprep.subr.bf16.mxu1 %v9146_v48 }
 0xcc4   :  { %5017 = vmatpush1.bf16.msra.mxu0 %v9147_v28  ;;  %5058 = vmatpush1.bf16.msra.mxu1 %v9148_v36 }
 0xcc5   :  { %5109 = vmatprep.subr.bf16.mxu0 %v9149_v59  ;;  %5150 = vmatprep.subr.bf16.mxu1 %v9150_v24 }
 0xd7a   :  { %v4929_v47 = vpop.f32.mrb[144].mxu0  ;;  %v4970_v12 = vpop.f32.mrb[144].mxu1 }
 0xd7b   :  { %v4930_v8 = vadd.f32 %v4929_v47, %v9159_v57  ;;  %v4971_v51 = vadd.f32 %v4970_v12, %v9160_v30  ;;  %v4931_v38 = vpop.f32.mrb[145].mxu0  ;;  %v4972_v32 = vpop.f32.mrb[145].mxu1  ;;  %v8596_v47 = vld [vmem:[#allocation11 + $0x44] ss:$16 sps:$4 sm:$0xff]   ;;  %v8599_v12 = vld [vmem:[#allocation11 + $0x4c] ss:$16 sps:$4 sm:$0xff]  }
 0xd7c   :  { %v4932_v26 = vadd.f32 %v4931_v38, %v9161_v55  ;;  %v4973_v44 = vadd.f32 %v4972_v32, %v9162_v22  ;;  %v4933_v2 = vpop.f32.mrb[146].mxu0  ;;  %v4974_v0 = vpop.f32.mrb[146].mxu1 }
 0xd7d   :  { %v5833_v5 = vmul.f32 -1.442695, %v4930_v8  ;;  %v4934_v54 = vpop.f32.mrb[147].mxu0  ;;  %v4975_v52 = vpop.f32.mrb[147].mxu1  ;;  %v5835_v24 = vmul.f32 -1.442695, %v4971_v51 }
 0xd7e   :  { %v5834_v59 = vmul.f32 -1.442695, %v4932_v26 }
 0xd7f   :  { %6376 = vpow2.f32 %v5833_v5 }
 0xd80   :  { %6378 = vpow2.f32 %v5834_v59  ;;  %v8648_v59 = vld [vmem:[#allocation11 + $0x40] ss:$16 sps:$4 sm:$0xff]  }
 0xd81   :  { %6380 = vtanh.f32 %v4973_v44 }
 0xd82   :  { %6382 = vpow2.f32 %v5835_v24  ;;  %v8651_v24 = vld [vmem:[#allocation11 + $0x48] ss:$16 sps:$4 sm:$0xff]  }
 0xd89   :  { %v6377_v21 = vpop.eup %6376 }
 0xd8a   :  { %v4986_v42 = vadd.f32 1.0, %v6377_v21  ;;  %v6379_v18 = vpop.eup %6378  ;;  %v8654_v21 = vld [vmem:[#allocation11 + $0x64] ss:$16 sps:$4 sm:$0xff]  }
 0xd8b   :  { %v4987_v9 = vadd.f32 1.0, %v6379_v18  ;;  %v6381_v3 = vpop.eup %6380  ;;  %v8660_v18 = vld [vmem:[#allocation11 + $0x60] ss:$16 sps:$4 sm:$0xff]  }
 0xd8c   :  { %6384 = vrcp.f32 %v4986_v42  ;;  %v6383_v31 = vpop.eup %6382  ;;  %v8657_v42 = vld [vmem:[#allocation11 + $0x6c] ss:$16 sps:$4 sm:$0xff]  }
 0xd8d   :  { %6386 = vrcp.f32 %v4987_v9  ;;  %v4988_v49 = vadd.f32 1.0, %v6383_v31  ;;  %v8663_v9 = vld [vmem:[#allocation11 + $0x68] ss:$16 sps:$4 sm:$0xff]   ;;  %v8669_v31 = vld [vmem:[#allocation11 + $0x8c] ss:$16 sps:$4 sm:$0xff]  }
 0xd8f   :  { %6388 = vrcp.f32 %v4988_v49  ;;  %v8681_v49 = vld [vmem:[#allocation11 + $0xac] ss:$16 sps:$4 sm:$0xff]  }
 0xd96   :  { %v6385_v14 = vpop.eup %6384 }
 0xd97   :  { %v4997_v25 = vmul.f32 %v6385_v14, %v6381_v3  ;;  %v6387_v35 = vpop.eup %6386  ;;  %v8666_v3 = vld [vmem:[#allocation11 + $0x84] ss:$16 sps:$4 sm:$0xff]   ;;  %v8672_v14 = vld [vmem:[#allocation11 + $0x80] ss:$16 sps:$4 sm:$0xff]  }
 0xd98   :  { %v4996_v37 = vmul.f32 %v6387_v35, %v8531_v19  ;;  %v8582_v19 = vld [vmem:[#allocation11 + $0x24] ss:$16 sps:$4 sm:$0xff]  }
 0xd99   :  { %v6389_v46 = vpop.eup %6388  ;;  %v8678_v35 = vld [vmem:[#allocation11 + $0xa4] ss:$16 sps:$4 sm:$0xff]  }
 0xd9a   :  { %v8573_v33 = vadd.f32 %v4997_v25, %v4996_v37  ;;  %v8675_v25 = vld [vmem:[#allocation11 + $0x88] ss:$16 sps:$4 sm:$0xff]   ;;  %v8684_v37 = vld [vmem:[#allocation11 + $0xa0] ss:$16 sps:$4 sm:$0xff]  }
 0xd9c   :  { %6390 = vtanh.f32 %v8573_v33 }
 0xda6   :  { %v6391_v62 = vpop.eup %6390 }
 0xda7   :  { %v5000_v50 = vmul.f32 %v6391_v62, %v6389_v46  ;;  %v8690_v46 = vld [vmem:[#allocation11 + $0xc4] ss:$16 sps:$4 sm:$0xff]   ;;  %v8693_v62 = vld [vmem:[#allocation11 + $0xcc] ss:$16 sps:$4 sm:$0xff]  }
 0xda9   :  { %v5001_v17 = vpack.c.bf16 %v5000_v50, %v5000_v50  ;;  %v8696_v50 = vld [vmem:[#allocation11 + $0xc0] ss:$16 sps:$4 sm:$0xff]  }
 0xdab   :  { %5035 = vmatmul.mubr.bf16.vlgmr.msra.gmra.mrb[148].mxu0 %v5001_v17  ;;  %5076 = vmatmul.mubr.bf16.vlgmr.msra.gmra.mrb[148].mxu1 %v5001_v17  ;;  %v8699_v17 = vld [vmem:[#allocation11 + $0xc8] ss:$16 sps:$4 sm:$0xff]  }
 0xdac   :  { %5110 = vmatpush1.bf16.msra.mxu0 %v8576_v15  ;;  %5151 = vmatpush1.bf16.msra.mxu1 %v8579_v58 }
 0xdad   :  { %5111 = vmatprep.subr.bf16.mxu0 %v8582_v19  ;;  %5152 = vmatprep.subr.bf16.mxu1 %v8585_v56 }
 0xdae   :  { %5141 = vmatprep.mubr.bf16.mxu0 %v8899_v1  ;;  %5182 = vmatprep.mubr.bf16.mxu1 %v8899_v1 }
 0xdb0   :  { %5112 = vmatpush1.bf16.msra.mxu0 %v8590_v11  ;;  %5153 = vmatpush1.bf16.msra.mxu1 %v8593_v43 }
 0xdb1   :  { %5113 = vmatprep.subr.bf16.mxu0 %v8596_v47  ;;  %5154 = vmatprep.subr.bf16.mxu1 %v8599_v12 }
 0xdb4   :  { %5114 = vmatpush1.bf16.msra.mxu0 %v8204_v7  ;;  %5155 = vmatpush1.bf16.msra.mxu1 %v8206_v29  ;;  %v8624_v7 = vld [vmem:[#allocation11 + $0x4] ss:$16 sps:$4 sm:$0xff]   ;;  %v8627_v29 = vld [vmem:[#allocation11 + $0xc] ss:$16 sps:$4 sm:$0xff]  }
 0xdb5   :  { %5115 = vmatprep.subr.bf16.mxu0 %v8210_v13  ;;  %5156 = vmatprep.subr.bf16.mxu1 %v8212_v60 }
 0xdb8   :  { %5116 = vmatpush1.bf16.msra.mxu0 %v8216_v41  ;;  %5157 = vmatpush1.bf16.msra.mxu1 %v8218_v34  ;;  %v9163_v41 = vld [vmem:[#allocation53_spill] sm:$0xff] }
 0xdb9   :  { %5117 = vmatprep.subr.bf16.mxu0 %v8222_v45  ;;  %5158 = vmatprep.subr.bf16.mxu1 %v8224_v16  ;;  %v9164_v45 = vld [vmem:[#allocation55_spill] sm:$0xff] }
 0xdbc   :  { %5118 = vmatpush1.bf16.msra.mxu0 %v8228_v61  ;;  %5159 = vmatpush1.bf16.msra.mxu1 %v8230_v6 }
 0xdbd   :  { %5119 = vmatprep.subr.bf16.mxu0 %v8234_v10  ;;  %5160 = vmatprep.subr.bf16.mxu1 %v8236_v39  ;;  %v9165_v10 = vld [vmem:[#allocation88_spill] sm:$0xff] }
 0xdc0   :  { %5120 = vmatpush1.bf16.msra.mxu0 %v8240_v63  ;;  %5161 = vmatpush1.bf16.msra.mxu1 %v8242_v27  ;;  %v9166_v63 = vld [vmem:[#allocation90_spill] sm:$0xff] }
 0xdc1   :  { %5121 = vmatprep.subr.bf16.mxu0 %v8246_v20  ;;  %5162 = vmatprep.subr.bf16.mxu1 %v8248_v40 }
 0xdc4   :  { %5122 = vmatpush1.bf16.msra.mxu0 %v8252_v4  ;;  %5163 = vmatpush1.bf16.msra.mxu1 %v8254_v53 }
 0xdc5   :  { %5123 = vmatprep.subr.bf16.mxu0 %v8258_v23  ;;  %5164 = vmatprep.subr.bf16.mxu1 %v9146_v48 }
 0xdc8   :  { %5124 = vmatpush1.bf16.msra.mxu0 %v9147_v28  ;;  %5165 = vmatpush1.bf16.msra.mxu1 %v9148_v36 }
 0xdc9   :  { %5216 = vmatprep.subr.bf16.mxu0 %v8624_v7  ;;  %5257 = vmatprep.subr.bf16.mxu1 %v8627_v29 }
 0xe7e   :  { %v5036_v13 = vpop.f32.mrb[148].mxu0  ;;  %v5077_v60 = vpop.f32.mrb[148].mxu1 }
 0xe7f   :  { %v5037_v34 = vadd.f32 %v5036_v13, %v9163_v41  ;;  %v5078_v16 = vadd.f32 %v5077_v60, %v9164_v45  ;;  %v5038_v61 = vpop.f32.mrb[149].mxu0  ;;  %v5079_v6 = vpop.f32.mrb[149].mxu1  ;;  %v8702_v13 = vld [vmem:[#allocation11 + $0xe4] ss:$16 sps:$4 sm:$0xff]   ;;  %v8705_v60 = vld [vmem:[#allocation11 + $0xec] ss:$16 sps:$4 sm:$0xff]  }
 0xe80   :  { %v5039_v39 = vadd.f32 %v5038_v61, %v9165_v10  ;;  %v5080_v27 = vadd.f32 %v5079_v6, %v9166_v63  ;;  %v5040_v20 = vpop.f32.mrb[150].mxu0  ;;  %v5081_v40 = vpop.f32.mrb[150].mxu1  ;;  %v8708_v41 = vld [vmem:[#allocation11 + $0xe0] ss:$16 sps:$4 sm:$0xff]   ;;  %v9167_v61 = vld [vmem:[#allocation89_spill] sm:$0xff] }
 0xe81   :  { %v5836_v4 = vmul.f32 -1.442695, %v5037_v34  ;;  %v5041_v53 = vpop.f32.mrb[151].mxu0  ;;  %v5082_v23 = vpop.f32.mrb[151].mxu1  ;;  %v5838_v28 = vmul.f32 -1.442695, %v5078_v16 }
 0xe82   :  { %v5837_v48 = vmul.f32 -1.442695, %v5039_v39  ;;  %v8711_v34 = vld [vmem:[#allocation11 + $0xe8] ss:$16 sps:$4 sm:$0xff]   ;;  %v9168_v10 = vld [vmem:[#allocation92_spill] sm:$0xff] }
 0xe83   :  { %6392 = vpow2.f32 %v5836_v4  ;;  %v9169_v20 = vld [vmem:[#allocation35_spill] sm:$0xff]  ;;  %v9170_v4 = vld [vmem:[#allocation36_spill] sm:$0xff] }
 0xe84   :  { %6394 = vpow2.f32 %v5837_v48 }
 0xe85   :  { %6396 = vtanh.f32 %v5080_v27 }
 0xe86   :  { %6398 = vpow2.f32 %v5838_v28 }
 0xe8d   :  { %v6393_v36 = vpop.eup %6392 }
 0xe8e   :  { %v5093_v57 = vadd.f32 1.0, %v6393_v36  ;;  %v6395_v8 = vpop.eup %6394 }
 0xe8f   :  { %v5094_v30 = vadd.f32 1.0, %v6395_v8  ;;  %v6397_v51 = vpop.eup %6396 }
 0xe90   :  { %6400 = vrcp.f32 %v5093_v57  ;;  %v6399_v38 = vpop.eup %6398 }
 0xe91   :  { %6402 = vrcp.f32 %v5094_v30  ;;  %v5095_v22 = vadd.f32 1.0, %v6399_v38 }
 0xe93   :  { %6404 = vrcp.f32 %v5095_v22 }
 0xe9a   :  { %v6401_v32 = vpop.eup %6400 }
 0xe9b   :  { %v5104_v55 = vmul.f32 %v6401_v32, %v6397_v51  ;;  %v6403_v26 = vpop.eup %6402 }
 0xe9c   :  { %v5103_v44 = vmul.f32 %v6403_v26, %v8573_v33  ;;  %v8687_v33 = vld [vmem:[#allocation11 + $0xa8] ss:$16 sps:$4 sm:$0xff]  }
 0xe9d   :  { %v6405_v0 = vpop.eup %6404 }
 0xe9e   :  { %v8635_v2 = vadd.f32 %v5104_v55, %v5103_v44 }
 0xea0   :  { %6406 = vtanh.f32 %v8635_v2 }
 0xeaa   :  { %v6407_v5 = vpop.eup %6406 }
 0xeab   :  { %v5107_v54 = vmul.f32 %v6407_v5, %v6405_v0 }
 0xead   :  { %v5108_v52 = vpack.c.bf16 %v5107_v54, %v5107_v54 }
 0xeaf   :  { %5142 = vmatmul.mubr.bf16.vlgmr.msra.gmra.mrb[152].mxu0 %v5108_v52  ;;  %5183 = vmatmul.mubr.bf16.vlgmr.msra.gmra.mrb[152].mxu1 %v5108_v52 }
 0xeb0   :  { %5217 = vmatpush1.bf16.msra.mxu0 %v8576_v15  ;;  %5258 = vmatpush1.bf16.msra.mxu1 %v8579_v58 }
 0xeb1   :  { %5218 = vmatprep.subr.bf16.mxu0 %v8582_v19  ;;  %5259 = vmatprep.subr.bf16.mxu1 %v8585_v56 }
 0xeb2   :  { %5248 = vmatprep.mubr.bf16.mxu0 %v8899_v1  ;;  %5289 = vmatprep.mubr.bf16.mxu1 %v8899_v1 }
 0xeb4   :  { %5219 = vmatpush1.bf16.msra.mxu0 %v8590_v11  ;;  %5260 = vmatpush1.bf16.msra.mxu1 %v8593_v43 }
 0xeb5   :  { %5220 = vmatprep.subr.bf16.mxu0 %v8596_v47  ;;  %5261 = vmatprep.subr.bf16.mxu1 %v8599_v12 }
 0xeb8   :  { %5221 = vmatpush1.bf16.msra.mxu0 %v8648_v59  ;;  %5262 = vmatpush1.bf16.msra.mxu1 %v8651_v24 }
 0xeb9   :  { %5222 = vmatprep.subr.bf16.mxu0 %v8654_v21  ;;  %5263 = vmatprep.subr.bf16.mxu1 %v8657_v42 }
 0xebc   :  { %5223 = vmatpush1.bf16.msra.mxu0 %v8660_v18  ;;  %5264 = vmatpush1.bf16.msra.mxu1 %v8663_v9 }
 0xebd   :  { %5224 = vmatprep.subr.bf16.mxu0 %v8666_v3  ;;  %5265 = vmatprep.subr.bf16.mxu1 %v8669_v31 }
 0xec0   :  { %5225 = vmatpush1.bf16.msra.mxu0 %v8672_v14  ;;  %5266 = vmatpush1.bf16.msra.mxu1 %v8675_v25 }
 0xec1   :  { %5226 = vmatprep.subr.bf16.mxu0 %v8678_v35  ;;  %5267 = vmatprep.subr.bf16.mxu1 %v8681_v49 }
 0xec4   :  { %5227 = vmatpush1.bf16.msra.mxu0 %v8684_v37  ;;  %5268 = vmatpush1.bf16.msra.mxu1 %v8687_v33 }
 0xec5   :  { %5228 = vmatprep.subr.bf16.mxu0 %v8690_v46  ;;  %5269 = vmatprep.subr.bf16.mxu1 %v8693_v62 }
 0xec8   :  { %5229 = vmatpush1.bf16.msra.mxu0 %v8696_v50  ;;  %5270 = vmatpush1.bf16.msra.mxu1 %v8699_v17 }
 0xec9   :  { %5230 = vmatprep.subr.bf16.mxu0 %v8702_v13  ;;  %5271 = vmatprep.subr.bf16.mxu1 %v8705_v60 }
 0xecc   :  { %5231 = vmatpush1.bf16.msra.mxu0 %v8708_v41  ;;  %5272 = vmatpush1.bf16.msra.mxu1 %v8711_v34 }
 0xecd   :  { %5323 = vmatprep.subr.bf16.mxu0 %v8624_v7  ;;  %5364 = vmatprep.subr.bf16.mxu1 %v8627_v29 }
 0xf82   :  { %v5143_v45 = vpop.f32.mrb[152].mxu0  ;;  %v5184_v16 = vpop.f32.mrb[152].mxu1 }
 0xf83   :  { %v5144_v6 = vadd.f32 %v5143_v45, %v9167_v61  ;;  %v5185_v39 = vadd.f32 %v5184_v16, %v9168_v10  ;;  %v5145_v63 = vpop.f32.mrb[153].mxu0  ;;  %v5186_v27 = vpop.f32.mrb[153].mxu1 }
 0xf84   :  { %v5146_v40 = vadd.f32 %v5145_v63, %v9169_v20  ;;  %v5187_v53 = vadd.f32 %v5186_v27, %v9170_v4  ;;  %v5147_v23 = vpop.f32.mrb[154].mxu0  ;;  %v5188_v48 = vpop.f32.mrb[154].mxu1  ;;  %v9175_v20 = vld [vmem:[#allocation41_spill] sm:$0xff]  ;;  %v9176_v4 = vld [vmem:[#allocation44_spill] sm:$0xff] }
 0xf85   :  { %v5839_v28 = vmul.f32 -1.442695, %v5144_v6  ;;  %v5148_v36 = vpop.f32.mrb[155].mxu0  ;;  %v5189_v57 = vpop.f32.mrb[155].mxu1  ;;  %v5841_v29 = vmul.f32 -1.442695, %v5185_v39 }
 0xf86   :  { %v5840_v7 = vmul.f32 -1.442695, %v5146_v40  ;;  %v9178_v57 = vld [vmem:[#allocation56_spill] sm:$0xff] }
 0xf87   :  { %6408 = vpow2.f32 %v5839_v28  ;;  %v9177_v28 = vld [vmem:[#allocation42_spill] sm:$0xff] }
 0xf88   :  { %6410 = vpow2.f32 %v5840_v7 }
 0xf89   :  { %6412 = vtanh.f32 %v5187_v53 }
 0xf8a   :  { %6414 = vpow2.f32 %v5841_v29 }
 0xf91   :  { %v6409_v8 = vpop.eup %6408 }
 0xf92   :  { %v5200_v30 = vadd.f32 1.0, %v6409_v8  ;;  %v6411_v51 = vpop.eup %6410 }
 0xf93   :  { %v5201_v38 = vadd.f32 1.0, %v6411_v51  ;;  %v6413_v32 = vpop.eup %6412 }
 0xf94   :  { %6416 = vrcp.f32 %v5200_v30  ;;  %v6415_v55 = vpop.eup %6414 }
 0xf95   :  { %6418 = vrcp.f32 %v5201_v38  ;;  %v5202_v0 = vadd.f32 1.0, %v6415_v55 }
 0xf97   :  { %6420 = vrcp.f32 %v5202_v0 }
 0xf9e   :  { %v6417_v26 = vpop.eup %6416 }
 0xf9f   :  { %v5211_v22 = vmul.f32 %v6417_v26, %v6413_v32  ;;  %v6419_v44 = vpop.eup %6418 }
 0xfa0   :  { %v5210_v5 = vmul.f32 %v6419_v44, %v8635_v2 }
 0xfa1   :  { %v6421_v52 = vpop.eup %6420 }
 0xfa2   :  { %v8721_v54 = vadd.f32 %v5211_v22, %v5210_v5 }
 0xfa4   :  { %6422 = vtanh.f32 %v8721_v54 }
 0xfae   :  { %v6423_v45 = vpop.eup %6422 }
 0xfaf   :  { %v5214_v16 = vmul.f32 %v6423_v45, %v6421_v52 }
 0xfb1   :  { %v5215_v61 = vpack.c.bf16 %v5214_v16, %v5214_v16 }
 0xfb3   :  { %5249 = vmatmul.mubr.bf16.vlgmr.msra.gmra.mrb[156].mxu0 %v5215_v61  ;;  %5290 = vmatmul.mubr.bf16.vlgmr.msra.gmra.mrb[156].mxu1 %v5215_v61 }
 0xfb4   :  { %5324 = vmatpush1.bf16.msra.mxu0 %v8576_v15  ;;  %5365 = vmatpush1.bf16.msra.mxu1 %v8579_v58  ;;  %v9171_v58 = vld [vmem:[#allocation37_spill] sm:$0xff] }
 0xfb5   :  { %5325 = vmatprep.subr.bf16.mxu0 %v8582_v19  ;;  %5366 = vmatprep.subr.bf16.mxu1 %v8585_v56  ;;  %v9172_v56 = vld [vmem:[#allocation38_spill] sm:$0xff] }
 0xfb6   :  { %5355 = vmatprep.mubr.bf16.mxu0 %v8899_v1  ;;  %5396 = vmatprep.mubr.bf16.mxu1 %v8899_v1 }
 0xfb8   :  { %5326 = vmatpush1.bf16.msra.mxu0 %v8590_v11  ;;  %5367 = vmatpush1.bf16.msra.mxu1 %v8593_v43 }
 0xfb9   :  { %5327 = vmatprep.subr.bf16.mxu0 %v8596_v47  ;;  %5368 = vmatprep.subr.bf16.mxu1 %v8599_v12  ;;  %v9173_v12 = vld [vmem:[#allocation39_spill] sm:$0xff] }
 0xfbc   :  { %5328 = vmatpush1.bf16.msra.mxu0 %v8648_v59  ;;  %5369 = vmatpush1.bf16.msra.mxu1 %v8651_v24  ;;  %v9174_v59 = vld [vmem:[#allocation40_spill] sm:$0xff] }
 0xfbd   :  { %5329 = vmatprep.subr.bf16.mxu0 %v8654_v21  ;;  %5370 = vmatprep.subr.bf16.mxu1 %v8657_v42 }
 0xfc0   :  { %5330 = vmatpush1.bf16.msra.mxu0 %v8660_v18  ;;  %5371 = vmatpush1.bf16.msra.mxu1 %v8663_v9 }
 0xfc1   :  { %5331 = vmatprep.subr.bf16.mxu0 %v8666_v3  ;;  %5372 = vmatprep.subr.bf16.mxu1 %v8669_v31 }
 0xfc4   :  { %5332 = vmatpush1.bf16.msra.mxu0 %v8672_v14  ;;  %5373 = vmatpush1.bf16.msra.mxu1 %v8675_v25 }
 0xfc5   :  { %5333 = vmatprep.subr.bf16.mxu0 %v8678_v35  ;;  %5374 = vmatprep.subr.bf16.mxu1 %v8681_v49 }
 0xfc8   :  { %5334 = vmatpush1.bf16.msra.mxu0 %v8684_v37  ;;  %5375 = vmatpush1.bf16.msra.mxu1 %v8687_v33 }
 0xfc9   :  { %5335 = vmatprep.subr.bf16.mxu0 %v8690_v46  ;;  %5376 = vmatprep.subr.bf16.mxu1 %v8693_v62 }
 0xfcc   :  { %5336 = vmatpush1.bf16.msra.mxu0 %v8696_v50  ;;  %5377 = vmatpush1.bf16.msra.mxu1 %v8699_v17 }
 0xfcd   :  { %5337 = vmatprep.subr.bf16.mxu0 %v8702_v13  ;;  %5378 = vmatprep.subr.bf16.mxu1 %v8705_v60 }
 0xfd0   :  { %5338 = vmatpush1.bf16.msra.mxu0 %v8708_v41  ;;  %5379 = vmatpush1.bf16.msra.mxu1 %v8711_v34 }
0x1086   :  { %v5250_v1 = vpop.f32.mrb[156].mxu0  ;;  %v5291_v15 = vpop.f32.mrb[156].mxu1 }
0x1087   :  { %v5251_v19 = vadd.f32 %v5250_v1, %v9171_v58  ;;  %v5292_v11 = vadd.f32 %v5291_v15, %v9172_v56  ;;  %v5252_v43 = vpop.f32.mrb[157].mxu0  ;;  %v5293_v47 = vpop.f32.mrb[157].mxu1 }
0x1088   :  { %v5253_v2 = vadd.f32 %v5252_v43, %v9173_v12  ;;  %v5294_v24 = vadd.f32 %v5293_v47, %v9174_v59  ;;  %v5254_v21 = vpop.f32.mrb[158].mxu0  ;;  %v5295_v42 = vpop.f32.mrb[158].mxu1 }
0x1089   :  { %v5842_v18 = vmul.f32 -1.442695, %v5251_v19  ;;  %v5255_v9 = vpop.f32.mrb[159].mxu0  ;;  %v5296_v3 = vpop.f32.mrb[159].mxu1  ;;  %v5844_v14 = vmul.f32 -1.442695, %v5292_v11 }
0x108a   :  { %v5843_v31 = vmul.f32 -1.442695, %v5253_v2 }
0x108b   :  { %6424 = vpow2.f32 %v5842_v18 }
0x108c   :  { %6426 = vpow2.f32 %v5843_v31 }
0x108d   :  { %6428 = vtanh.f32 %v5294_v24 }
0x108e   :  { %6430 = vpow2.f32 %v5844_v14 }
0x1095   :  { %v6425_v25 = vpop.eup %6424 }
0x1096   :  { %v5307_v35 = vadd.f32 1.0, %v6425_v25  ;;  %v6427_v49 = vpop.eup %6426 }
0x1097   :  { %v5308_v37 = vadd.f32 1.0, %v6427_v49  ;;  %v6429_v33 = vpop.eup %6428 }
0x1098   :  { %6432 = vrcp.f32 %v5307_v35  ;;  %v6431_v46 = vpop.eup %6430 }
0x1099   :  { %6434 = vrcp.f32 %v5308_v37  ;;  %v5309_v13 = vadd.f32 1.0, %v6431_v46 }
0x109b   :  { %6436 = vrcp.f32 %v5309_v13 }
0x10a2   :  { %v6433_v62 = vpop.eup %6432 }
0x10a3   :  { %v5318_v50 = vmul.f32 %v6433_v62, %v6429_v33  ;;  %v6435_v17 = vpop.eup %6434 }
0x10a4   :  { %v5317_v60 = vmul.f32 %v6435_v17, %v8721_v54 }
0x10a5   :  { %v6437_v34 = vpop.eup %6436 }
0x10a6   :  { %v5319_v41 = vadd.f32 %v5318_v50, %v5317_v60 }
0x10a8   :  { %6438 = vtanh.f32 %v5319_v41 }
0x10b2   :  { %v6439_v6 = vpop.eup %6438 }
0x10b3   :  { %v5321_v10 = vmul.f32 %v6439_v6, %v6437_v34 }
0x10b5   :  { %v5322_v39 = vpack.c.bf16 %v5321_v10, %v5321_v10 }
0x10b7   :  { %5356 = vmatmul.mubr.bf16.vlgmr.msra.gmra.mrb[160].mxu0 %v5322_v39  ;;  %5397 = vmatmul.mubr.bf16.vlgmr.msra.gmra.mrb[160].mxu1 %v5322_v39 }
0x118a   :  { %v5357_v63 = vpop.f32.mrb[160].mxu0  ;;  %v5398_v27 = vpop.f32.mrb[160].mxu1 }
0x118b   :  { %v5358_v40 = vadd.f32 %v5357_v63, %v9175_v20  ;;  %v5399_v53 = vadd.f32 %v5398_v27, %v9176_v4  ;;  %v5359_v23 = vpop.f32.mrb[161].mxu0  ;;  %v5400_v48 = vpop.f32.mrb[161].mxu1 }
0x118c   :  { %v5360_v36 = vadd.f32 %v5359_v23, %v9177_v28  ;;  %v5401_v7 = vadd.f32 %v5400_v48, %v9178_v57  ;;  %v5361_v29 = vpop.f32.mrb[162].mxu0  ;;  %v5402_v8 = vpop.f32.mrb[162].mxu1 }
0x118d   :  { %v5845_v30 = vmul.f32 -1.442695, %v5358_v40  ;;  %v5362_v51 = vpop.f32.mrb[163].mxu0  ;;  %v5403_v38 = vpop.f32.mrb[163].mxu1  ;;  %v5847_v55 = vmul.f32 -1.442695, %v5399_v53 }
0x118e   :  { %v5846_v32 = vmul.f32 -1.442695, %v5360_v36 }
0x118f   :  { %6440 = vpow2.f32 %v5845_v30 }
0x1190   :  { %6442 = vpow2.f32 %v5846_v32 }
0x1191   :  { %6444 = vtanh.f32 %v5401_v7 }
0x1192   :  { %6446 = vpow2.f32 %v5847_v55 }
0x1199   :  { %v6441_v26 = vpop.eup %6440 }
0x119a   :  { %v5414_v22 = vadd.f32 1.0, %v6441_v26  ;;  %v6443_v44 = vpop.eup %6442 }
0x119b   :  { %v5415_v0 = vadd.f32 1.0, %v6443_v44  ;;  %v6445_v5 = vpop.eup %6444 }
0x119c   :  { %6448 = vrcp.f32 %v5414_v22  ;;  %v6447_v54 = vpop.eup %6446 }
0x119d   :  { %6450 = vrcp.f32 %v5415_v0  ;;  %v5416_v61 = vadd.f32 1.0, %v6447_v54 }
0x119f   :  { %6452 = vrcp.f32 %v5416_v61 }
0x11a6   :  { %v6449_v52 = vpop.eup %6448 }
0x11a7   :  { %v5425_v45 = vmul.f32 %v6449_v52, %v6445_v5  ;;  %v6451_v16 = vpop.eup %6450 }
0x11a8   :  { %v5424_v1 = vmul.f32 %v6451_v16, %v5319_v41 }
0x11a9   :  { %v6453_v58 = vpop.eup %6452 }
0x11aa   :  { %v5426_v15 = vadd.f32 %v5425_v45, %v5424_v1 }
0x11ac   :  { %6454 = vtanh.f32 %v5426_v15 }
0x11b6   :  { %v6455_v19 = vpop.eup %6454 }
0x11b7   :  { %v5428_v56 = vmul.f32 %v6455_v19, %v6453_v58 }
0x11b9   :  { %5429 = vst [vmem:[#allocation14] sm:$0xff] %v5428_v56 }
0x11ba   :  { %6759 = shalt.err (!%p6756_p10)
}
0x11bb   :  { %s6760_s29 = scalar_lea.hbm %s8786_s9, 256 }
0x11bc   :  { %p6761_p11 = scmp.ne.s32.totalorder %s8786_s9, %s6760_s29  ;;  %p6764_p12 = scmp.lt.u32.totalorder %s6760_s29, %s8786_s9 }
0x11be   :  { %p6766_p13 = pnand %p6764_p12, %p6761_p11 }
0x11c0   :  { %6769 = shalt.err (!%p6766_p13)
}
0x11c1   :  { %5440 = dma.vmem_to_hbm [thread:$0]  %s5438_s28, 256, %s8786_s9, [#allocation5]  }
0x11c2   :  { %6778 = dma.done.wait [#allocation5], 256  }
0x11c3   :  { %6779 = vsyncadd [#allocation5], 4294967040 }
0x11c4   :  { %5444 = vsyncpa [#allocation4], 1 }
0x11c5   :  { %5445 = vsyncpa [#allocation7], 1 }
0x11c6   :  { %5446 = vsyncpa [#allocation10], 1 }
0x11c7   :  { %5447 = vsyncpa [#allocation13], 1 }
0x11c8   :  { %5448 = vsyncpa [#allocation5], 1 }

</bundles_post_ra>
